<compile_context>
chip_gen: v7x
topology: tpu7x:2x2x1
jax: 0.10.0
libtpu: 0.0.40
codegen_flags: <defaults>
</compile_context>

<pallas_src>
import functools
import inspect

import jax
import jax.numpy as jnp
import numpy as np
from jax import lax
from jax.experimental import pallas as pl
from jax.experimental.pallas import tpu as pltpu

_EPS = 1e-5  # PyTorch InstanceNorm2d default eps

# Per-chunk f32 accumulator budget (bytes).  Keeps the 9-tap accumulation for
# one row chunk inside the vreg file (64 x 4 KiB) instead of bouncing VMEM.
_ACC_BYTES_TARGET = 64 * 1024


# ------------------------------ Pallas kernel ------------------------------- #

def _fused_resnet_block_kernel(x_ref, w1_ref, w2_ref, o_ref, acc_ref, h1p_ref,
                               *, H, W, C, rows_per_chunk, compute_dtype):
    """out = x + IN(conv2(pad(relu(IN(conv1(pad(x)))))))  for one batch elem.

    x_ref  : [(H+2)*(W+2)+2, C] f32  reflection-padded x, flattened rows of
             width W+2, one zero dummy row before and after.
    w*_ref : [9, C, C]               conv weights, tap-major (ky*3+kx, Cin, Cout).
    o_ref  : [H*(W+2), C]  f32       output in the same "wide row" layout
                                     (wrap columns are junk, stripped by caller).
    acc_ref: [H*(W+2), C]  f32       conv-output staging (1 store + 1 load / stage).
    h1p_ref: [(H+2)*(W+2)+2, C]      reflection-padded h1 (compute dtype).
    """
    Wp = W + 2
    HWp = H * Wp
    inv_n = 1.0 / float(H * W)
    cdt = compute_dtype

    # Row chunks cover whole image rows, so the wrap-column masks and the +-2
    # reflection shifts never cross a chunk boundary.
    chunks = [(r0, min(rows_per_chunk, H - r0))
              for r0 in range(0, H, rows_per_chunk)]

    # Per-chunk-size masks over the flat [rows*Wp, 1] layout (traced once).
    _mask_cache = {}

    def masks(rows):
        if rows not in _mask_cache:
            col = lax.broadcasted_iota(jnp.int32, (rows * Wp, 1), 0) % Wp
            _mask_cache[rows] = (
                jnp.logical_and(col >= 1, col <= W),  # valid (non-wrap) cols
                col == 0,                             # left reflection column
                col == Wp - 1,                        # right reflection column
            )
        return _mask_cache[rows]

    def conv3x3_with_stats(src_ref, w_ref):
        """Per chunk: 9 shifted-slice matmuls into a value accumulator, one
        store; per-channel sum / sum-of-squares of valid positions fused in.
        Returns (mean, rstd), each [1, C] f32."""
        s = jnp.zeros((1, C), jnp.float32)
        ss = jnp.zeros((1, C), jnp.float32)
        for r0, rows in chunks:
            base, csz = r0 * Wp, rows * Wp
            acc = None
            for k in range(9):
                ky, kx = divmod(k, 3)
                off = ky * Wp + kx                          # static tap offset
                lhs = src_ref[pl.ds(base + off, csz), :].astype(cdt)
                contrib = jnp.dot(lhs, w_ref[k],
                                  preferred_element_type=jnp.float32)
                acc = contrib if acc is None else acc + contrib
            acc_ref[pl.ds(base, csz), :] = acc              # single store/chunk
            valid, _, _ = masks(rows)
            am = jnp.where(valid, acc, 0.0)
            s = s + jnp.sum(am, axis=0, keepdims=True)
            ss = ss + jnp.sum(am * am, axis=0, keepdims=True)
        mean = s * inv_n
        # TODO(synk): E[x^2]-E[x]^2 in f32 can lose precision for very large
        # H*W; switch to a shifted/compensated accumulation if spatial grows.
        var = jnp.maximum(ss * inv_n - mean * mean, 0.0)    # biased (torch)
        rstd = lax.rsqrt(var + _EPS)
        return mean, rstd

    # ---- stage 1: conv3x3 -> InstanceNorm -> ReLU -> padded-h1 scratch ---- #
    mean1, rstd1 = conv3x3_with_stats(x_ref, w1_ref)
    zp2 = jnp.zeros((2, C), jnp.float32)
    for r0, rows in chunks:
        base, csz = r0 * Wp, rows * Wp
        y = jnp.maximum((acc_ref[pl.ds(base, csz), :] - mean1) * rstd1, 0.0)
        # Reflection column fix (chunk-local): wide col 0 <- wide col 2,
        # wide col Wp-1 <- wide col Wp-3, i.e. flat-row shifts of +2 / -2.
        _, c0, cL = masks(rows)
        y_p2 = jnp.concatenate([y[2:], zp2], axis=0)        # row r -> y[r+2]
        y_m2 = jnp.concatenate([zp2, y[:-2]], axis=0)       # row r -> y[r-2]
        yf = jnp.where(c0, y_p2, jnp.where(cL, y_m2, y))
        h1p_ref[pl.ds(1 + Wp + base, csz), :] = yf.astype(h1p_ref.dtype)

    # Reflection pad rows + dummy rows of the h1 slab (tiny copies).
    zrow = jnp.zeros((1, C), h1p_ref.dtype)
    h1p_ref[pl.ds(0, 1), :] = zrow                                # lead dummy
    h1p_ref[pl.ds(1 + (H + 2) * Wp, 1), :] = zrow                 # trail dummy
    top = h1p_ref[pl.ds(1 + 2 * Wp, Wp), :]                       # image row 1
    h1p_ref[pl.ds(1, Wp), :] = top                                # pad row 0
    bot = h1p_ref[pl.ds(1 + (H - 1) * Wp, Wp), :]                 # image row H-2
    h1p_ref[pl.ds(1 + (H + 1) * Wp, Wp), :] = bot                 # pad row H+1

    # ---- stage 2: conv3x3 -> InstanceNorm -> residual add ----------------- #
    mean2, rstd2 = conv3x3_with_stats(h1p_ref, w2_ref)
    for r0, rows in chunks:
        base, csz = r0 * Wp, rows * Wp
        y2 = (acc_ref[pl.ds(base, csz), :] - mean2) * rstd2
        x_res = x_ref[pl.ds(Wp + 1 + base, csz), :]         # exact f32 residual
        o_ref[pl.ds(base, csz), :] = x_res + y2


# -------------------------------- wrapper ----------------------------------- #

def _has_pipeline_mode():
    try:
        return hasattr(pl, "Buffered") and (
            "pipeline_mode" in inspect.signature(pl.BlockSpec).parameters)
    except (TypeError, ValueError):
        return False


_HAS_PIPELINE_MODE = _has_pipeline_mode()


def _weight_spec(C):
    # Constant index_map -> the block is resident across the grid; single
    # buffering saves VMEM (double buffering buys nothing here).
    kwargs = {"pipeline_mode": pl.Buffered(1)} if _HAS_PIPELINE_MODE else {}
    return pl.BlockSpec((9, C, C), lambda b: (0, 0, 0), **kwargs)


def _vmem_limit_bytes():
    # Leave headroom below the physical per-core VMEM (64 MiB on v7x,
    # 128 MiB on v5e/v6e) for compiler scratch and double buffers.
    try:
        cap = int(pltpu.get_tpu_info().vmem_capacity_bytes)
        return min(int(cap * 0.8), 100 * 1024 * 1024)
    except Exception:  # pragma: no cover - conservative fallback
        return 48 * 1024 * 1024


def _resnet_block_impl(x_nchw, w1, w2, *, compute_dtype):
    B, C, H, W = x_nchw.shape
    Hp, Wp = H + 2, W + 2
    HWp = H * Wp
    Np2 = Hp * Wp + 2          # padded slab rows + lead/trail dummy rows

    # Layout glue (cheap, ~1.1x the activation bytes, no 9x im2col).  The slab
    # stays f32 so the in-kernel residual add is exact; matmul operands are
    # cast to compute_dtype inside the kernel.
    x = jnp.transpose(x_nchw, (0, 2, 3, 1))                        # NHWC
    xp = jnp.pad(x, ((0, 0), (1, 1), (1, 1), (0, 0)), mode="reflect")
    xpf = jnp.pad(xp.reshape(B, Hp * Wp, C), ((0, 0), (1, 1), (0, 0)))
    xpf = xpf.astype(jnp.float32)

    w1m = w1.reshape(9, C, C).astype(compute_dtype)   # HWIO -> [tap, Cin, Cout]
    w2m = w2.reshape(9, C, C).astype(compute_dtype)

    # Whole image rows per chunk, sized so the per-chunk f32 accumulator of the
    # 9-tap matmul reduction stays vreg-resident.
    rows_per_chunk = max(1, min(H, _ACC_BYTES_TARGET // (4 * C * Wp)))

    kernel = functools.partial(
        _fused_resnet_block_kernel, H=H, W=W, C=C,
        rows_per_chunk=rows_per_chunk, compute_dtype=compute_dtype)

    out = pl.pallas_call(
        kernel,
        out_shape=jax.ShapeDtypeStruct((B, HWp, C), jnp.float32),
        grid=(B,),
        in_specs=[
            pl.BlockSpec((None, Np2, C), lambda b: (b, 0, 0)),  # padded x (f32)
            _weight_spec(C),                                    # w1 (resident)
            _weight_spec(C),                                    # w2 (resident)
        ],
        out_specs=pl.BlockSpec((None, HWp, C), lambda b: (b, 0, 0)),
        scratch_shapes=[
            pltpu.VMEM((HWp, C), jnp.float32),      # conv output staging
            pltpu.VMEM((Np2, C), compute_dtype),    # reflection-padded h1
        ],
        compiler_params=pltpu.CompilerParams(
            # TODO(synk): for B == 1 on v7x add a second parallel axis (e.g.
            # output-channel halves) so both TensorCores are used.
            dimension_semantics=("parallel",),      # megacore over batch
            vmem_limit_bytes=_vmem_limit_bytes(),
        ),
    )(xpf, w1m, w2m)

    # Strip the wrap columns; XLA fuses this slice into the layout transpose.
    out = out.reshape(B, H, Wp, C)[:, :, 1:W + 1, :]
    return jnp.transpose(out, (0, 3, 1, 2))                        # NCHW


@functools.partial(jax.jit, static_argnames=("compute_dtype",))
def resnet_block(x_nchw, w1, b1, w2, b2, *, compute_dtype=jnp.bfloat16):
    """out = x + conv_block(x).

    x_nchw: [B, C, H, W] float32 (PyTorch layout)
    w1, w2: [3, 3, C, C] (HWIO; torch weight[o,i,ky,kx] == w[ky,kx,i,o])
    b1, b2: [C]  — accepted for interface parity but unused: a per-channel
            bias is exactly cancelled by InstanceNorm(affine=False).
    """
    del b1, b2
    return _resnet_block_impl(x_nchw, w1, w2, compute_dtype=compute_dtype)


# --------------------------- pure-JAX reference ------------------------------ #

def _ref_forward(x_nchw, w1, b1, w2, b2):
    x = jnp.transpose(x_nchw, (0, 2, 3, 1))

    def conv(t, w, b):
        tp = jnp.pad(t, ((0, 0), (1, 1), (1, 1), (0, 0)), mode="reflect")
        y = lax.conv_general_dilated(
            tp, w, (1, 1), "VALID",
            dimension_numbers=("NHWC", "HWIO", "NHWC"))
        return y + b

    def inorm(y):
        mean = jnp.mean(y, axis=(1, 2), keepdims=True)
        var = jnp.mean((y - mean) ** 2, axis=(1, 2), keepdims=True)
        return (y - mean) * lax.rsqrt(var + _EPS)

    h = jnp.maximum(inorm(conv(x, w1, b1)), 0.0)
    out = x + inorm(conv(h, w2, b2))
    return jnp.transpose(out, (0, 3, 1, 2))


# ----------------------------------- main ------------------------------------ #

if __name__ == "__main__":
    B, C, H, W = 2, 4, 16, 16
    key = jax.random.PRNGKey(0)
    kx, k1, kb1, k2, kb2 = jax.random.split(key, 5)

    x = jax.random.normal(kx, (B, C, H, W), jnp.float32)
    w1 = jax.random.normal(k1, (3, 3, C, C), jnp.float32) * 0.1
    b1 = jax.random.normal(kb1, (C,), jnp.float32) * 0.1
    w2 = jax.random.normal(k2, (3, 3, C, C), jnp.float32) * 0.1
    b2 = jax.random.normal(kb2, (C,), jnp.float32) * 0.1

    ref = _ref_forward(x, w1, b1, w2, b2)

    # f32 compute path: tight check of conv/pad/norm/residual logic.
    out_f32 = jax.block_until_ready(
        resnet_block(x, w1, b1, w2, b2, compute_dtype=jnp.float32))
    np.testing.assert_allclose(np.asarray(out_f32), np.asarray(ref),
                               rtol=1e-3, atol=1e-3)

    # bf16 matmul path (default, MXU-friendly): residual is exact f32 now, so
    # the remaining error is bf16 rounding of the conv operands only.
    out_bf16 = jax.block_until_ready(resnet_block(x, w1, b1, w2, b2))
    np.testing.assert_allclose(np.asarray(out_bf16), np.asarray(ref),
                               rtol=3e-2, atol=3e-2)

    print("KERNEL_OK")
</pallas_src>

<mosaic_0001>
module attributes {stable_mosaic.version = 11 : i64} {
  func.func @_fused_resnet_block_kernel(%arg0: i32, %arg1: memref<1x326x4xf32, #tpu.memory_space<vmem>>, %arg2: memref<9x4x4xf32, #tpu.memory_space<vmem>>, %arg3: memref<9x4x4xf32, #tpu.memory_space<vmem>>, %arg4: memref<1x288x4xf32, #tpu.memory_space<vmem>>, %arg5: memref<288x4xf32, #tpu.memory_space<vmem>>, %arg6: memref<326x4xf32, #tpu.memory_space<vmem>>) attributes {dimension_semantics = [#tpu.dimension_semantics<parallel>], iteration_bounds = array<i64: 2>, scalar_prefetch = 0 : i64, scratch_operands = 2 : i64, tpu.core_type = #tpu.core_type<tc>, window_params = [{transform_indices = @transform_0, window_bounds = array<i64: 1, 326, 4>}, {pipeline_mode = #tpu.pipeline_mode<synchronous>, transform_indices = @transform_1, window_bounds = array<i64: 9, 4, 4>}, {pipeline_mode = #tpu.pipeline_mode<synchronous>, transform_indices = @transform_2, window_bounds = array<i64: 9, 4, 4>}, {transform_indices = @transform_3, window_bounds = array<i64: 1, 288, 4>}]} {
    %cst = arith.constant 0.000000e+00 : f32
    %0 = vector.broadcast %cst : f32 to vector<1x4xf32>
    %cst_0 = arith.constant 0.000000e+00 : f32
    %1 = vector.broadcast %cst_0 : f32 to vector<1x4xf32>
    %c0 = arith.constant 0 : index
    %c0_1 = arith.constant 0 : index
    %c0_2 = arith.constant 0 : index
    %2 = vector.load %arg1[%c0, %c0_1, %c0_2] : memref<1x326x4xf32, #tpu.memory_space<vmem>>, vector<1x288x4xf32>
    %3 = vector.shape_cast %2 : vector<1x288x4xf32> to vector<288x4xf32>
    %c0_3 = arith.constant 0 : index
    %c0_4 = arith.constant 0 : index
    %c0_5 = arith.constant 0 : index
    %4 = vector.load %arg2[%c0_3, %c0_4, %c0_5] : memref<9x4x4xf32, #tpu.memory_space<vmem>>, vector<1x4x4xf32>
    %5 = vector.shape_cast %4 : vector<1x4x4xf32> to vector<4x4xf32>
    %cst_6 = arith.constant dense<0.000000e+00> : vector<288x4xf32>
    %6 = tpu.matmul %3, %5, %cst_6 {dimension_numbers = #tpu.dot_dimension_numbers<[1], [0], [0], [1], [0, 0, 1, 1], [], []>} : vector<288x4xf32>, vector<4x4xf32>, vector<288x4xf32> -> vector<288x4xf32>
    %c0_7 = arith.constant 0 : index
    %c1 = arith.constant 1 : index
    %c0_8 = arith.constant 0 : index
    %7 = vector.load %arg1[%c0_7, %c1, %c0_8] : memref<1x326x4xf32, #tpu.memory_space<vmem>>, vector<1x288x4xf32>
    %8 = vector.shape_cast %7 : vector<1x288x4xf32> to vector<288x4xf32>
    %c1_9 = arith.constant 1 : index
    %c0_10 = arith.constant 0 : index
    %c0_11 = arith.constant 0 : index
    %9 = vector.load %arg2[%c1_9, %c0_10, %c0_11] : memref<9x4x4xf32, #tpu.memory_space<vmem>>, vector<1x4x4xf32>
    %10 = vector.shape_cast %9 : vector<1x4x4xf32> to vector<4x4xf32>
    %cst_12 = arith.constant dense<0.000000e+00> : vector<288x4xf32>
    %11 = tpu.matmul %8, %10, %cst_12 {dimension_numbers = #tpu.dot_dimension_numbers<[1], [0], [0], [1], [0, 0, 1, 1], [], []>} : vector<288x4xf32>, vector<4x4xf32>, vector<288x4xf32> -> vector<288x4xf32>
    %12 = arith.addf %6, %11 : vector<288x4xf32>
    %c0_13 = arith.constant 0 : index
    %c2 = arith.constant 2 : index
    %c0_14 = arith.constant 0 : index
    %13 = vector.load %arg1[%c0_13, %c2, %c0_14] : memref<1x326x4xf32, #tpu.memory_space<vmem>>, vector<1x288x4xf32>
    %14 = vector.shape_cast %13 : vector<1x288x4xf32> to vector<288x4xf32>
    %c2_15 = arith.constant 2 : index
    %c0_16 = arith.constant 0 : index
    %c0_17 = arith.constant 0 : index
    %15 = vector.load %arg2[%c2_15, %c0_16, %c0_17] : memref<9x4x4xf32, #tpu.memory_space<vmem>>, vector<1x4x4xf32>
    %16 = vector.shape_cast %15 : vector<1x4x4xf32> to vector<4x4xf32>
    %cst_18 = arith.constant dense<0.000000e+00> : vector<288x4xf32>
    %17 = tpu.matmul %14, %16, %cst_18 {dimension_numbers = #tpu.dot_dimension_numbers<[1], [0], [0], [1], [0, 0, 1, 1], [], []>} : vector<288x4xf32>, vector<4x4xf32>, vector<288x4xf32> -> vector<288x4xf32>
    %18 = arith.addf %12, %17 : vector<288x4xf32>
    %c0_19 = arith.constant 0 : index
    %c18 = arith.constant 18 : index
    %c0_20 = arith.constant 0 : index
    %19 = vector.load %arg1[%c0_19, %c18, %c0_20] : memref<1x326x4xf32, #tpu.memory_space<vmem>>, vector<1x288x4xf32>
    %20 = vector.shape_cast %19 : vector<1x288x4xf32> to vector<288x4xf32>
    %c3 = arith.constant 3 : index
    %c0_21 = arith.constant 0 : index
    %c0_22 = arith.constant 0 : index
    %21 = vector.load %arg2[%c3, %c0_21, %c0_22] : memref<9x4x4xf32, #tpu.memory_space<vmem>>, vector<1x4x4xf32>
    %22 = vector.shape_cast %21 : vector<1x4x4xf32> to vector<4x4xf32>
    %cst_23 = arith.constant dense<0.000000e+00> : vector<288x4xf32>
    %23 = tpu.matmul %20, %22, %cst_23 {dimension_numbers = #tpu.dot_dimension_numbers<[1], [0], [0], [1], [0, 0, 1, 1], [], []>} : vector<288x4xf32>, vector<4x4xf32>, vector<288x4xf32> -> vector<288x4xf32>
    %24 = arith.addf %18, %23 : vector<288x4xf32>
    %c0_24 = arith.constant 0 : index
    %c19 = arith.constant 19 : index
    %c0_25 = arith.constant 0 : index
    %25 = vector.load %arg1[%c0_24, %c19, %c0_25] : memref<1x326x4xf32, #tpu.memory_space<vmem>>, vector<1x288x4xf32>
    %26 = vector.shape_cast %25 : vector<1x288x4xf32> to vector<288x4xf32>
    %c4 = arith.constant 4 : index
    %c0_26 = arith.constant 0 : index
    %c0_27 = arith.constant 0 : index
    %27 = vector.load %arg2[%c4, %c0_26, %c0_27] : memref<9x4x4xf32, #tpu.memory_space<vmem>>, vector<1x4x4xf32>
    %28 = vector.shape_cast %27 : vector<1x4x4xf32> to vector<4x4xf32>
    %cst_28 = arith.constant dense<0.000000e+00> : vector<288x4xf32>
    %29 = tpu.matmul %26, %28, %cst_28 {dimension_numbers = #tpu.dot_dimension_numbers<[1], [0], [0], [1], [0, 0, 1, 1], [], []>} : vector<288x4xf32>, vector<4x4xf32>, vector<288x4xf32> -> vector<288x4xf32>
    %30 = arith.addf %24, %29 : vector<288x4xf32>
    %c0_29 = arith.constant 0 : index
    %c20 = arith.constant 20 : index
    %c0_30 = arith.constant 0 : index
    %31 = vector.load %arg1[%c0_29, %c20, %c0_30] : memref<1x326x4xf32, #tpu.memory_space<vmem>>, vector<1x288x4xf32>
    %32 = vector.shape_cast %31 : vector<1x288x4xf32> to vector<288x4xf32>
    %c5 = arith.constant 5 : index
    %c0_31 = arith.constant 0 : index
    %c0_32 = arith.constant 0 : index
    %33 = vector.load %arg2[%c5, %c0_31, %c0_32] : memref<9x4x4xf32, #tpu.memory_space<vmem>>, vector<1x4x4xf32>
    %34 = vector.shape_cast %33 : vector<1x4x4xf32> to vector<4x4xf32>
    %cst_33 = arith.constant dense<0.000000e+00> : vector<288x4xf32>
    %35 = tpu.matmul %32, %34, %cst_33 {dimension_numbers = #tpu.dot_dimension_numbers<[1], [0], [0], [1], [0, 0, 1, 1], [], []>} : vector<288x4xf32>, vector<4x4xf32>, vector<288x4xf32> -> vector<288x4xf32>
    %36 = arith.addf %30, %35 : vector<288x4xf32>
    %c0_34 = arith.constant 0 : index
    %c36 = arith.constant 36 : index
    %c0_35 = arith.constant 0 : index
    %37 = vector.load %arg1[%c0_34, %c36, %c0_35] : memref<1x326x4xf32, #tpu.memory_space<vmem>>, vector<1x288x4xf32>
    %38 = vector.shape_cast %37 : vector<1x288x4xf32> to vector<288x4xf32>
    %c6 = arith.constant 6 : index
    %c0_36 = arith.constant 0 : index
    %c0_37 = arith.constant 0 : index
    %39 = vector.load %arg2[%c6, %c0_36, %c0_37] : memref<9x4x4xf32, #tpu.memory_space<vmem>>, vector<1x4x4xf32>
    %40 = vector.shape_cast %39 : vector<1x4x4xf32> to vector<4x4xf32>
    %cst_38 = arith.constant dense<0.000000e+00> : vector<288x4xf32>
    %41 = tpu.matmul %38, %40, %cst_38 {dimension_numbers = #tpu.dot_dimension_numbers<[1], [0], [0], [1], [0, 0, 1, 1], [], []>} : vector<288x4xf32>, vector<4x4xf32>, vector<288x4xf32> -> vector<288x4xf32>
    %42 = arith.addf %36, %41 : vector<288x4xf32>
    %c0_39 = arith.constant 0 : index
    %c37 = arith.constant 37 : index
    %c0_40 = arith.constant 0 : index
    %43 = vector.load %arg1[%c0_39, %c37, %c0_40] : memref<1x326x4xf32, #tpu.memory_space<vmem>>, vector<1x288x4xf32>
    %44 = vector.shape_cast %43 : vector<1x288x4xf32> to vector<288x4xf32>
    %c7 = arith.constant 7 : index
    %c0_41 = arith.constant 0 : index
    %c0_42 = arith.constant 0 : index
    %45 = vector.load %arg2[%c7, %c0_41, %c0_42] : memref<9x4x4xf32, #tpu.memory_space<vmem>>, vector<1x4x4xf32>
    %46 = vector.shape_cast %45 : vector<1x4x4xf32> to vector<4x4xf32>
    %cst_43 = arith.constant dense<0.000000e+00> : vector<288x4xf32>
    %47 = tpu.matmul %44, %46, %cst_43 {dimension_numbers = #tpu.dot_dimension_numbers<[1], [0], [0], [1], [0, 0, 1, 1], [], []>} : vector<288x4xf32>, vector<4x4xf32>, vector<288x4xf32> -> vector<288x4xf32>
    %48 = arith.addf %42, %47 : vector<288x4xf32>
    %c0_44 = arith.constant 0 : index
    %c38 = arith.constant 38 : index
    %c0_45 = arith.constant 0 : index
    %49 = vector.load %arg1[%c0_44, %c38, %c0_45] : memref<1x326x4xf32, #tpu.memory_space<vmem>>, vector<1x288x4xf32>
    %50 = vector.shape_cast %49 : vector<1x288x4xf32> to vector<288x4xf32>
    %c8 = arith.constant 8 : index
    %c0_46 = arith.constant 0 : index
    %c0_47 = arith.constant 0 : index
    %51 = vector.load %arg2[%c8, %c0_46, %c0_47] : memref<9x4x4xf32, #tpu.memory_space<vmem>>, vector<1x4x4xf32>
    %52 = vector.shape_cast %51 : vector<1x4x4xf32> to vector<4x4xf32>
    %cst_48 = arith.constant dense<0.000000e+00> : vector<288x4xf32>
    %53 = tpu.matmul %50, %52, %cst_48 {dimension_numbers = #tpu.dot_dimension_numbers<[1], [0], [0], [1], [0, 0, 1, 1], [], []>} : vector<288x4xf32>, vector<4x4xf32>, vector<288x4xf32> -> vector<288x4xf32>
    %54 = arith.addf %48, %53 : vector<288x4xf32>
    %c0_49 = arith.constant 0 : index
    %c0_50 = arith.constant 0 : index
    %55 = vector.load %arg5[%c0_49, %c0_50] : memref<288x4xf32, #tpu.memory_space<vmem>>, vector<288x4xf32>
    tpu.vector_store %arg5[%c0_49, %c0_50], %54 {strides = array<i32>} : memref<288x4xf32, #tpu.memory_space<vmem>>, vector<288x4xf32>,
    %56 = tpu.iota {dimensions = array<i32: 0>} : vector<288x1xi32>
    %c18_i32 = arith.constant 18 : i32
    %c0_i32 = arith.constant 0 : i32
    %57 = arith.cmpi eq, %c18_i32, %c0_i32 : i32
    %c1_i32 = arith.constant 1 : i32
    %58 = arith.select %57, %c1_i32, %c18_i32 : i32
    %59 = vector.broadcast %58 : i32 to vector<288x1xi32>
    %60 = arith.remsi %56, %59 : vector<288x1xi32>
    %c0_i32_51 = arith.constant 0 : i32
    %61 = vector.broadcast %c0_i32_51 : i32 to vector<288x1xi32>
    %62 = arith.cmpi ne, %60, %61 : vector<288x1xi32>
    %c0_i32_52 = arith.constant 0 : i32
    %63 = vector.broadcast %c0_i32_52 : i32 to vector<288x1xi32>
    %64 = arith.cmpi slt, %60, %63 : vector<288x1xi32>
    %c0_i32_53 = arith.constant 0 : i32
    %65 = arith.cmpi slt, %58, %c0_i32_53 : i32
    %66 = vector.broadcast %65 : i1 to vector<288x1xi1>
    %67 = vector.broadcast %66 : vector<288x1xi1> to vector<288x1xi1>
    %68 = arith.xori %64, %67 : vector<288x1xi1>
    %69 = arith.andi %68, %62 : vector<288x1xi1>
    %70 = vector.broadcast %58 : i32 to vector<288x1xi32>
    %71 = arith.addi %60, %70 : vector<288x1xi32>
    %72 = arith.select %69, %71, %60 : vector<288x1xi1>, vector<288x1xi32>
    %c1_i32_54 = arith.constant 1 : i32
    %73 = vector.broadcast %c1_i32_54 : i32 to vector<288x1xi32>
    %74 = arith.cmpi sge, %72, %73 : vector<288x1xi32>
    %c16_i32 = arith.constant 16 : i32
    %75 = vector.broadcast %c16_i32 : i32 to vector<288x1xi32>
    %76 = arith.cmpi sle, %72, %75 : vector<288x1xi32>
    %77 = arith.andi %74, %76 : vector<288x1xi1>
    %c0_i32_55 = arith.constant 0 : i32
    %78 = vector.broadcast %c0_i32_55 : i32 to vector<288x1xi32>
    %79 = arith.cmpi eq, %72, %78 : vector<288x1xi32>
    %c17_i32 = arith.constant 17 : i32
    %80 = vector.broadcast %c17_i32 : i32 to vector<288x1xi32>
    %81 = arith.cmpi eq, %72, %80 : vector<288x1xi32>
    %cst_56 = arith.constant 0.000000e+00 : f32
    %82 = vector.shape_cast %77 : vector<288x1xi1> to vector<288x1xi1>
    %83 = vector.broadcast %82 : vector<288x1xi1> to vector<288x4xi1>
    %84 = vector.broadcast %cst_56 : f32 to vector<288x4xf32>
    %85 = arith.select %83, %54, %84 : vector<288x4xi1>, vector<288x4xf32>
    %cst_57 = arith.constant dense<0.000000e+00> : vector<4xf32>
    %86 = vector.multi_reduction <add>, %85, %cst_57 [0] : vector<288x4xf32> to vector<4xf32>
    %87 = vector.shape_cast %86 : vector<4xf32> to vector<1x4xf32>
    %88 = arith.addf %0, %87 : vector<1x4xf32>
    %89 = arith.mulf %85, %85 : vector<288x4xf32>
    %cst_58 = arith.constant dense<0.000000e+00> : vector<4xf32>
    %90 = vector.multi_reduction <add>, %89, %cst_58 [0] : vector<288x4xf32> to vector<4xf32>
    %91 = vector.shape_cast %90 : vector<4xf32> to vector<1x4xf32>
    %92 = arith.addf %1, %91 : vector<1x4xf32>
    %cst_59 = arith.constant 3.906250e-03 : f32
    %93 = vector.broadcast %cst_59 : f32 to vector<1x4xf32>
    %94 = arith.mulf %88, %93 : vector<1x4xf32>
    %cst_60 = arith.constant 3.906250e-03 : f32
    %95 = vector.broadcast %cst_60 : f32 to vector<1x4xf32>
    %96 = arith.mulf %92, %95 : vector<1x4xf32>
    %97 = arith.mulf %94, %94 : vector<1x4xf32>
    %98 = arith.subf %96, %97 : vector<1x4xf32>
    %cst_61 = arith.constant 0.000000e+00 : f32
    %99 = vector.broadcast %cst_61 : f32 to vector<1x4xf32>
    %100 = arith.maximumf %98, %99 : vector<1x4xf32>
    %cst_62 = arith.constant 9.99999974E-6 : f32
    %101 = vector.broadcast %cst_62 : f32 to vector<1x4xf32>
    %102 = arith.addf %100, %101 : vector<1x4xf32>
    %103 = math.rsqrt %102 : vector<1x4xf32>
    %cst_63 = arith.constant 0.000000e+00 : f32
    %104 = vector.broadcast %cst_63 : f32 to vector<2x4xf32>
    %c0_64 = arith.constant 0 : index
    %c0_65 = arith.constant 0 : index
    %105 = vector.load %arg5[%c0_64, %c0_65] : memref<288x4xf32, #tpu.memory_space<vmem>>, vector<288x4xf32>
    %106 = vector.broadcast %94 : vector<1x4xf32> to vector<288x4xf32>
    %107 = arith.subf %105, %106 : vector<288x4xf32>
    %108 = vector.broadcast %103 : vector<1x4xf32> to vector<288x4xf32>
    %109 = arith.mulf %107, %108 : vector<288x4xf32>
    %cst_66 = arith.constant 0.000000e+00 : f32
    %110 = vector.broadcast %cst_66 : f32 to vector<288x4xf32>
    %111 = arith.maximumf %109, %110 : vector<288x4xf32>
    %112 = vector.extract_strided_slice %111 {offsets = [2, 0], sizes = [286, 4], strides = [1, 1]} : vector<288x4xf32> to vector<286x4xf32>
    %113 = tpu.concatenate %112, %104 in 0 : vector<286x4xf32>, vector<2x4xf32> -> vector<288x4xf32>
    %114 = vector.extract_strided_slice %111 {offsets = [0, 0], sizes = [286, 4], strides = [1, 1]} : vector<288x4xf32> to vector<286x4xf32>
    %115 = tpu.concatenate %104, %114 in 0 : vector<2x4xf32>, vector<286x4xf32> -> vector<288x4xf32>
    %116 = vector.shape_cast %81 : vector<288x1xi1> to vector<288x1xi1>
    %117 = vector.broadcast %116 : vector<288x1xi1> to vector<288x4xi1>
    %118 = arith.select %117, %115, %111 : vector<288x4xi1>, vector<288x4xf32>
    %119 = vector.shape_cast %79 : vector<288x1xi1> to vector<288x1xi1>
    %120 = vector.broadcast %119 : vector<288x1xi1> to vector<288x4xi1>
    %121 = arith.select %120, %113, %118 : vector<288x4xi1>, vector<288x4xf32>
    %c19_67 = arith.constant 19 : index
    %c0_68 = arith.constant 0 : index
    %122 = vector.load %arg6[%c19_67, %c0_68] : memref<326x4xf32, #tpu.memory_space<vmem>>, vector<288x4xf32>
    tpu.vector_store %arg6[%c19_67, %c0_68], %121 {strides = array<i32>} : memref<326x4xf32, #tpu.memory_space<vmem>>, vector<288x4xf32>,
    %cst_69 = arith.constant 0.000000e+00 : f32
    %123 = vector.broadcast %cst_69 : f32 to vector<1x4xf32>
    %c0_70 = arith.constant 0 : index
    %c0_71 = arith.constant 0 : index
    %124 = vector.load %arg6[%c0_70, %c0_71] : memref<326x4xf32, #tpu.memory_space<vmem>>, vector<1x4xf32>
    tpu.vector_store %arg6[%c0_70, %c0_71], %123 {strides = array<i32>} : memref<326x4xf32, #tpu.memory_space<vmem>>, vector<1x4xf32>,
    %c325 = arith.constant 325 : index
    %c0_72 = arith.constant 0 : index
    %125 = vector.load %arg6[%c325, %c0_72] : memref<326x4xf32, #tpu.memory_space<vmem>>, vector<1x4xf32>
    tpu.vector_store %arg6[%c325, %c0_72], %123 {strides = array<i32>} : memref<326x4xf32, #tpu.memory_space<vmem>>, vector<1x4xf32>,
    %c37_73 = arith.constant 37 : index
    %c0_74 = arith.constant 0 : index
    %126 = vector.load %arg6[%c37_73, %c0_74] : memref<326x4xf32, #tpu.memory_space<vmem>>, vector<18x4xf32>
    %c1_75 = arith.constant 1 : index
    %c0_76 = arith.constant 0 : index
    %127 = vector.load %arg6[%c1_75, %c0_76] : memref<326x4xf32, #tpu.memory_space<vmem>>, vector<18x4xf32>
    tpu.vector_store %arg6[%c1_75, %c0_76], %126 {strides = array<i32>} : memref<326x4xf32, #tpu.memory_space<vmem>>, vector<18x4xf32>,
    %c271 = arith.constant 271 : index
    %c0_77 = arith.constant 0 : index
    %128 = vector.load %arg6[%c271, %c0_77] : memref<326x4xf32, #tpu.memory_space<vmem>>, vector<18x4xf32>
    %c307 = arith.constant 307 : index
    %c0_78 = arith.constant 0 : index
    %129 = vector.load %arg6[%c307, %c0_78] : memref<326x4xf32, #tpu.memory_space<vmem>>, vector<18x4xf32>
    tpu.vector_store %arg6[%c307, %c0_78], %128 {strides = array<i32>} : memref<326x4xf32, #tpu.memory_space<vmem>>, vector<18x4xf32>,
    %cst_79 = arith.constant 0.000000e+00 : f32
    %130 = vector.broadcast %cst_79 : f32 to vector<1x4xf32>
    %cst_80 = arith.constant 0.000000e+00 : f32
    %131 = vector.broadcast %cst_80 : f32 to vector<1x4xf32>
    %c0_81 = arith.constant 0 : index
    %c0_82 = arith.constant 0 : index
    %132 = vector.load %arg6[%c0_81, %c0_82] : memref<326x4xf32, #tpu.memory_space<vmem>>, vector<288x4xf32>
    %c0_83 = arith.constant 0 : index
    %c0_84 = arith.constant 0 : index
    %c0_85 = arith.constant 0 : index
    %133 = vector.load %arg3[%c0_83, %c0_84, %c0_85] : memref<9x4x4xf32, #tpu.memory_space<vmem>>, vector<1x4x4xf32>
    %134 = vector.shape_cast %133 : vector<1x4x4xf32> to vector<4x4xf32>
    %cst_86 = arith.constant dense<0.000000e+00> : vector<288x4xf32>
    %135 = tpu.matmul %132, %134, %cst_86 {dimension_numbers = #tpu.dot_dimension_numbers<[1], [0], [0], [1], [0, 0, 1, 1], [], []>} : vector<288x4xf32>, vector<4x4xf32>, vector<288x4xf32> -> vector<288x4xf32>
    %c1_87 = arith.constant 1 : index
    %c0_88 = arith.constant 0 : index
    %136 = vector.load %arg6[%c1_87, %c0_88] : memref<326x4xf32, #tpu.memory_space<vmem>>, vector<288x4xf32>
    %c1_89 = arith.constant 1 : index
    %c0_90 = arith.constant 0 : index
    %c0_91 = arith.constant 0 : index
    %137 = vector.load %arg3[%c1_89, %c0_90, %c0_91] : memref<9x4x4xf32, #tpu.memory_space<vmem>>, vector<1x4x4xf32>
    %138 = vector.shape_cast %137 : vector<1x4x4xf32> to vector<4x4xf32>
    %cst_92 = arith.constant dense<0.000000e+00> : vector<288x4xf32>
    %139 = tpu.matmul %136, %138, %cst_92 {dimension_numbers = #tpu.dot_dimension_numbers<[1], [0], [0], [1], [0, 0, 1, 1], [], []>} : vector<288x4xf32>, vector<4x4xf32>, vector<288x4xf32> -> vector<288x4xf32>
    %140 = arith.addf %135, %139 : vector<288x4xf32>
    %c2_93 = arith.constant 2 : index
    %c0_94 = arith.constant 0 : index
    %141 = vector.load %arg6[%c2_93, %c0_94] : memref<326x4xf32, #tpu.memory_space<vmem>>, vector<288x4xf32>
    %c2_95 = arith.constant 2 : index
    %c0_96 = arith.constant 0 : index
    %c0_97 = arith.constant 0 : index
    %142 = vector.load %arg3[%c2_95, %c0_96, %c0_97] : memref<9x4x4xf32, #tpu.memory_space<vmem>>, vector<1x4x4xf32>
    %143 = vector.shape_cast %142 : vector<1x4x4xf32> to vector<4x4xf32>
    %cst_98 = arith.constant dense<0.000000e+00> : vector<288x4xf32>
    %144 = tpu.matmul %141, %143, %cst_98 {dimension_numbers = #tpu.dot_dimension_numbers<[1], [0], [0], [1], [0, 0, 1, 1], [], []>} : vector<288x4xf32>, vector<4x4xf32>, vector<288x4xf32> -> vector<288x4xf32>
    %145 = arith.addf %140, %144 : vector<288x4xf32>
    %c18_99 = arith.constant 18 : index
    %c0_100 = arith.constant 0 : index
    %146 = vector.load %arg6[%c18_99, %c0_100] : memref<326x4xf32, #tpu.memory_space<vmem>>, vector<288x4xf32>
    %c3_101 = arith.constant 3 : index
    %c0_102 = arith.constant 0 : index
    %c0_103 = arith.constant 0 : index
    %147 = vector.load %arg3[%c3_101, %c0_102, %c0_103] : memref<9x4x4xf32, #tpu.memory_space<vmem>>, vector<1x4x4xf32>
    %148 = vector.shape_cast %147 : vector<1x4x4xf32> to vector<4x4xf32>
    %cst_104 = arith.constant dense<0.000000e+00> : vector<288x4xf32>
    %149 = tpu.matmul %146, %148, %cst_104 {dimension_numbers = #tpu.dot_dimension_numbers<[1], [0], [0], [1], [0, 0, 1, 1], [], []>} : vector<288x4xf32>, vector<4x4xf32>, vector<288x4xf32> -> vector<288x4xf32>
    %150 = arith.addf %145, %149 : vector<288x4xf32>
    %c19_105 = arith.constant 19 : index
    %c0_106 = arith.constant 0 : index
    %151 = vector.load %arg6[%c19_105, %c0_106] : memref<326x4xf32, #tpu.memory_space<vmem>>, vector<288x4xf32>
    %c4_107 = arith.constant 4 : index
    %c0_108 = arith.constant 0 : index
    %c0_109 = arith.constant 0 : index
    %152 = vector.load %arg3[%c4_107, %c0_108, %c0_109] : memref<9x4x4xf32, #tpu.memory_space<vmem>>, vector<1x4x4xf32>
    %153 = vector.shape_cast %152 : vector<1x4x4xf32> to vector<4x4xf32>
    %cst_110 = arith.constant dense<0.000000e+00> : vector<288x4xf32>
    %154 = tpu.matmul %151, %153, %cst_110 {dimension_numbers = #tpu.dot_dimension_numbers<[1], [0], [0], [1], [0, 0, 1, 1], [], []>} : vector<288x4xf32>, vector<4x4xf32>, vector<288x4xf32> -> vector<288x4xf32>
    %155 = arith.addf %150, %154 : vector<288x4xf32>
    %c20_111 = arith.constant 20 : index
    %c0_112 = arith.constant 0 : index
    %156 = vector.load %arg6[%c20_111, %c0_112] : memref<326x4xf32, #tpu.memory_space<vmem>>, vector<288x4xf32>
    %c5_113 = arith.constant 5 : index
    %c0_114 = arith.constant 0 : index
    %c0_115 = arith.constant 0 : index
    %157 = vector.load %arg3[%c5_113, %c0_114, %c0_115] : memref<9x4x4xf32, #tpu.memory_space<vmem>>, vector<1x4x4xf32>
    %158 = vector.shape_cast %157 : vector<1x4x4xf32> to vector<4x4xf32>
    %cst_116 = arith.constant dense<0.000000e+00> : vector<288x4xf32>
    %159 = tpu.matmul %156, %158, %cst_116 {dimension_numbers = #tpu.dot_dimension_numbers<[1], [0], [0], [1], [0, 0, 1, 1], [], []>} : vector<288x4xf32>, vector<4x4xf32>, vector<288x4xf32> -> vector<288x4xf32>
    %160 = arith.addf %155, %159 : vector<288x4xf32>
    %c36_117 = arith.constant 36 : index
    %c0_118 = arith.constant 0 : index
    %161 = vector.load %arg6[%c36_117, %c0_118] : memref<326x4xf32, #tpu.memory_space<vmem>>, vector<288x4xf32>
    %c6_119 = arith.constant 6 : index
    %c0_120 = arith.constant 0 : index
    %c0_121 = arith.constant 0 : index
    %162 = vector.load %arg3[%c6_119, %c0_120, %c0_121] : memref<9x4x4xf32, #tpu.memory_space<vmem>>, vector<1x4x4xf32>
    %163 = vector.shape_cast %162 : vector<1x4x4xf32> to vector<4x4xf32>
    %cst_122 = arith.constant dense<0.000000e+00> : vector<288x4xf32>
    %164 = tpu.matmul %161, %163, %cst_122 {dimension_numbers = #tpu.dot_dimension_numbers<[1], [0], [0], [1], [0, 0, 1, 1], [], []>} : vector<288x4xf32>, vector<4x4xf32>, vector<288x4xf32> -> vector<288x4xf32>
    %165 = arith.addf %160, %164 : vector<288x4xf32>
    %c37_123 = arith.constant 37 : index
    %c0_124 = arith.constant 0 : index
    %166 = vector.load %arg6[%c37_123, %c0_124] : memref<326x4xf32, #tpu.memory_space<vmem>>, vector<288x4xf32>
    %c7_125 = arith.constant 7 : index
    %c0_126 = arith.constant 0 : index
    %c0_127 = arith.constant 0 : index
    %167 = vector.load %arg3[%c7_125, %c0_126, %c0_127] : memref<9x4x4xf32, #tpu.memory_space<vmem>>, vector<1x4x4xf32>
    %168 = vector.shape_cast %167 : vector<1x4x4xf32> to vector<4x4xf32>
    %cst_128 = arith.constant dense<0.000000e+00> : vector<288x4xf32>
    %169 = tpu.matmul %166, %168, %cst_128 {dimension_numbers = #tpu.dot_dimension_numbers<[1], [0], [0], [1], [0, 0, 1, 1], [], []>} : vector<288x4xf32>, vector<4x4xf32>, vector<288x4xf32> -> vector<288x4xf32>
    %170 = arith.addf %165, %169 : vector<288x4xf32>
    %c38_129 = arith.constant 38 : index
    %c0_130 = arith.constant 0 : index
    %171 = vector.load %arg6[%c38_129, %c0_130] : memref<326x4xf32, #tpu.memory_space<vmem>>, vector<288x4xf32>
    %c8_131 = arith.constant 8 : index
    %c0_132 = arith.constant 0 : index
    %c0_133 = arith.constant 0 : index
    %172 = vector.load %arg3[%c8_131, %c0_132, %c0_133] : memref<9x4x4xf32, #tpu.memory_space<vmem>>, vector<1x4x4xf32>
    %173 = vector.shape_cast %172 : vector<1x4x4xf32> to vector<4x4xf32>
    %cst_134 = arith.constant dense<0.000000e+00> : vector<288x4xf32>
    %174 = tpu.matmul %171, %173, %cst_134 {dimension_numbers = #tpu.dot_dimension_numbers<[1], [0], [0], [1], [0, 0, 1, 1], [], []>} : vector<288x4xf32>, vector<4x4xf32>, vector<288x4xf32> -> vector<288x4xf32>
    %175 = arith.addf %170, %174 : vector<288x4xf32>
    %c0_135 = arith.constant 0 : index
    %c0_136 = arith.constant 0 : index
    %176 = vector.load %arg5[%c0_135, %c0_136] : memref<288x4xf32, #tpu.memory_space<vmem>>, vector<288x4xf32>
    tpu.vector_store %arg5[%c0_135, %c0_136], %175 {strides = array<i32>} : memref<288x4xf32, #tpu.memory_space<vmem>>, vector<288x4xf32>,
    %cst_137 = arith.constant 0.000000e+00 : f32
    %177 = vector.shape_cast %77 : vector<288x1xi1> to vector<288x1xi1>
    %178 = vector.broadcast %177 : vector<288x1xi1> to vector<288x4xi1>
    %179 = vector.broadcast %cst_137 : f32 to vector<288x4xf32>
    %180 = arith.select %178, %175, %179 : vector<288x4xi1>, vector<288x4xf32>
    %cst_138 = arith.constant dense<0.000000e+00> : vector<4xf32>
    %181 = vector.multi_reduction <add>, %180, %cst_138 [0] : vector<288x4xf32> to vector<4xf32>
    %182 = vector.shape_cast %181 : vector<4xf32> to vector<1x4xf32>
    %183 = arith.addf %130, %182 : vector<1x4xf32>
    %184 = arith.mulf %180, %180 : vector<288x4xf32>
    %cst_139 = arith.constant dense<0.000000e+00> : vector<4xf32>
    %185 = vector.multi_reduction <add>, %184, %cst_139 [0] : vector<288x4xf32> to vector<4xf32>
    %186 = vector.shape_cast %185 : vector<4xf32> to vector<1x4xf32>
    %187 = arith.addf %131, %186 : vector<1x4xf32>
    %cst_140 = arith.constant 3.906250e-03 : f32
    %188 = vector.broadcast %cst_140 : f32 to vector<1x4xf32>
    %189 = arith.mulf %183, %188 : vector<1x4xf32>
    %cst_141 = arith.constant 3.906250e-03 : f32
    %190 = vector.broadcast %cst_141 : f32 to vector<1x4xf32>
    %191 = arith.mulf %187, %190 : vector<1x4xf32>
    %192 = arith.mulf %189, %189 : vector<1x4xf32>
    %193 = arith.subf %191, %192 : vector<1x4xf32>
    %cst_142 = arith.constant 0.000000e+00 : f32
    %194 = vector.broadcast %cst_142 : f32 to vector<1x4xf32>
    %195 = arith.maximumf %193, %194 : vector<1x4xf32>
    %cst_143 = arith.constant 9.99999974E-6 : f32
    %196 = vector.broadcast %cst_143 : f32 to vector<1x4xf32>
    %197 = arith.addf %195, %196 : vector<1x4xf32>
    %198 = math.rsqrt %197 : vector<1x4xf32>
    %c0_144 = arith.constant 0 : index
    %c0_145 = arith.constant 0 : index
    %199 = vector.load %arg5[%c0_144, %c0_145] : memref<288x4xf32, #tpu.memory_space<vmem>>, vector<288x4xf32>
    %200 = vector.broadcast %189 : vector<1x4xf32> to vector<288x4xf32>
    %201 = arith.subf %199, %200 : vector<288x4xf32>
    %202 = vector.broadcast %198 : vector<1x4xf32> to vector<288x4xf32>
    %203 = arith.mulf %201, %202 : vector<288x4xf32>
    %c0_146 = arith.constant 0 : index
    %c19_147 = arith.constant 19 : index
    %c0_148 = arith.constant 0 : index
    %204 = vector.load %arg1[%c0_146, %c19_147, %c0_148] : memref<1x326x4xf32, #tpu.memory_space<vmem>>, vector<1x288x4xf32>
    %205 = vector.shape_cast %204 : vector<1x288x4xf32> to vector<288x4xf32>
    %206 = arith.addf %205, %203 : vector<288x4xf32>
    %c0_149 = arith.constant 0 : index
    %c0_150 = arith.constant 0 : index
    %c0_151 = arith.constant 0 : index
    %207 = vector.load %arg4[%c0_149, %c0_150, %c0_151] : memref<1x288x4xf32, #tpu.memory_space<vmem>>, vector<1x288x4xf32>
    %208 = vector.shape_cast %207 : vector<1x288x4xf32> to vector<288x4xf32>
    %209 = vector.shape_cast %206 : vector<288x4xf32> to vector<1x288x4xf32>
    tpu.vector_store %arg4[%c0_149, %c0_150, %c0_151], %209 {strides = array<i32>} : memref<1x288x4xf32, #tpu.memory_space<vmem>>, vector<1x288x4xf32>,
    return
  }
  func.func @transform_0(%arg0: i32) -> (i32, i32, i32) {
    %c0_i32 = arith.constant 0 : i32
    %c0_i32_0 = arith.constant 0 : i32
    %c0_i32_1 = arith.constant 0 : i32
    return %arg0, %c0_i32, %c0_i32_0 : i32, i32, i32
  }
  func.func @transform_1(%arg0: i32) -> (i32, i32, i32) {
    %c0_i32 = arith.constant 0 : i32
    %c0_i32_0 = arith.constant 0 : i32
    %c0_i32_1 = arith.constant 0 : i32
    %c0_i32_2 = arith.constant 0 : i32
    return %c0_i32, %c0_i32_0, %c0_i32_1 : i32, i32, i32
  }
  func.func @transform_2(%arg0: i32) -> (i32, i32, i32) {
    %c0_i32 = arith.constant 0 : i32
    %c0_i32_0 = arith.constant 0 : i32
    %c0_i32_1 = arith.constant 0 : i32
    %c0_i32_2 = arith.constant 0 : i32
    return %c0_i32, %c0_i32_0, %c0_i32_1 : i32, i32, i32
  }
  func.func @transform_3(%arg0: i32) -> (i32, i32, i32) {
    %c0_i32 = arith.constant 0 : i32
    %c0_i32_0 = arith.constant 0 : i32
    %c0_i32_1 = arith.constant 0 : i32
    return %arg0, %c0_i32, %c0_i32_0 : i32, i32, i32
  }
}

</mosaic_0001>

<bundles_post_ra>
// kernel: resnet_block.1
= control target key start
LH: loop header
LB: loop body
LE: loop exit
PB: predicated region body
PF: predicated region fallthrough
CT: control target
= control target key end

     0   :  { %s13169_s12 = smov 0   ;;  %s17252_s0 = inlined_call_operand.vmem [shape: f32[2,326,4], index: 0, kind: input, shape index: {}]   ;;  %s17253_s1 = inlined_call_operand.vmem [shape: f32[9,4,4], index: 1, kind: input, shape index: {}]   ;;  %s17254_s2 = inlined_call_operand.vmem [shape: f32[9,4,4], index: 2, kind: input, shape index: {}]   ;;  %s17255_s3 = inlined_call_operand.vmem [shape: f32[2,288,4], index: 3, kind: output, shape index: {}]  }
   0x1 LB: > { %s10111_s13 = sadd.s32 4294967295, %s13146_s12   ;;  %p10115_p0 = scmp.ge.s32.totalorder %s13146_s12, 1  ;;  %s13146_s12 = sphi %s13169_s12, %s13_s12  }
   0x2   : > { %p137_p1 = scmp.lt.s32.totalorder %s13146_s12, 3 }
   0x4   : > { %p138_p2 = pnand %p10115_p0, %p137_p1 }
   0x6   : > { %141 = sbr.rel (%p138_p2) target bundleno = 2109 (0x83d), region = 32 }
   0xd   : > { %v10118_v0 = vld [vmem:[%s17253_s1 + $0x4] sm:$0xf]  ;;  %vm17256_vm0 = vcmask 1043456   ;;  %p161_p3 = scmp.lt.s32.totalorder %s10111_s13, 1  ;;  %v207_v1 = vld [vmem:[%s17253_s1] sm:$0xf] }
   0xe   : > { %11468 = vmatprep.subr.msk.mxu0 %vm17256_vm0, %v10118_v0  ;;  %vm17257_vm1 = vcmask 31744   ;;  %v13201_v5 = vld [vmem:[%s17253_s1 + $0x8] sm:$0xf]  ;;  %v13281_v42 = vld [vmem:[%s17253_s1 + $0xc] sm:$0xf] }
   0xf   : > { %11469 = vmatpush3.msk.msra.mxu0 %vm17256_vm0, %v10118_v0  ;;  %s18713_s13 = smov (!%p161_p3, %s10111_s13), 1 }
  0x10   : > { %11524 = vmatprep.subr.msk.mxu0 %vm17256_vm0, %v207_v1  ;;  %s13052_s18 = smul.u32 328, %s18713_s13 }
  0x11   : > { %s13053_s5 = smul.u32 288, %s18713_s13 }
  0x12   : > { %s13192_s21 = scalar_lea.vmem %s17252_s0, %s13052_s18 }
  0x13   : > { %v208_v2 = vld [vmem:[%s13192_s21 + $0x1] sm:$0xff]  ;;  %v209_v3 = vld [vmem:[%s13192_s21 + $0x9] sm:$0xff]  ;;  %v210_v4 = vld [vmem:[%s13192_s21 + $0x11] sm:$0xff]  ;;  %s17118_s8 = scalar_lea.vmem %s17255_s3, %s13053_s5 }
  0x14   : > { %11470 = vmatprep.mubr.msk.f32.mxu0 %vm17257_vm1, %v208_v2  ;;  %v211_v6 = vld [vmem:[%s13192_s21 + $0x19] sm:$0xff]  ;;  %v212_v7 = vld [vmem:[%s13192_s21 + $0x21] sm:$0xff]  ;;  %v213_v8 = vld [vmem:[%s13192_s21 + $0x29] sm:$0xff] }
  0x15   : > { %11471 = vmatmul.mubr.msk.f32.vlgmr.msra.gmra.mrb[0].mxu0 %vm17257_vm1, %v209_v3  ;;  %v214_v9 = vld [vmem:[%s13192_s21 + $0x31] sm:$0xff]  ;;  %v215_v10 = vld [vmem:[%s13192_s21 + $0x39] sm:$0xff]  ;;  %v216_v11 = vld [vmem:[%s13192_s21 + $0x41] sm:$0xff] }
  0x16   : > { %11525 = vmatpush3.msk.msra.mxu0 %vm17256_vm0, %v207_v1  ;;  %11473 = vmatprep.mubr.msk.f32.mxu0 %vm17257_vm1, %v210_v4  ;;  %v217_v12 = vld [vmem:[%s13192_s21 + $0x49] sm:$0xff]  ;;  %v218_v13 = vld [vmem:[%s13192_s21 + $0x51] sm:$0xff]  ;;  %v219_v14 = vld [vmem:[%s13192_s21 + $0x59] sm:$0xff] }
  0x17   : > { %11580 = vmatprep.subr.msk.mxu0 %vm17256_vm0, %v13201_v5  ;;  %v220_v15 = vld [vmem:[%s13192_s21 + $0x61] sm:$0xff]  ;;  %v221_v16 = vld [vmem:[%s13192_s21 + $0x69] sm:$0xff]  ;;  %v222_v17 = vld [vmem:[%s13192_s21 + $0x71] sm:$0xff] }
  0x18   : > { %v223_v18 = vld [vmem:[%s13192_s21 + $0x79] sm:$0xff]  ;;  %v224_v19 = vld [vmem:[%s13192_s21 + $0x81] sm:$0xff]  ;;  %v225_v20 = vld [vmem:[%s13192_s21 + $0x89] sm:$0xff] }
  0x19   : > { %11474 = vmatmul.mubr.msk.f32.gmra.mrb[2].mxu0 %vm17257_vm1, %v211_v6  ;;  %v226_v21 = vld [vmem:[%s13192_s21 + $0x91] sm:$0xff]  ;;  %v227_v22 = vld [vmem:[%s13192_s21 + $0x99] sm:$0xff]  ;;  %v228_v23 = vld [vmem:[%s13192_s21 + $0xa1] sm:$0xff] }
  0x1a   : > { %11476 = vmatprep.mubr.msk.f32.mxu0 %vm17257_vm1, %v212_v7  ;;  %v229_v24 = vld [vmem:[%s13192_s21 + $0xa9] sm:$0xff]  ;;  %v230_v25 = vld [vmem:[%s13192_s21 + $0xb1] sm:$0xff]  ;;  %v231_v26 = vld [vmem:[%s13192_s21 + $0xb9] sm:$0xff] }
  0x1b   : > { %v232_v27 = vld [vmem:[%s13192_s21 + $0xc1] sm:$0xff]  ;;  %v233_v28 = vld [vmem:[%s13192_s21 + $0xc9] sm:$0xff]  ;;  %v234_v29 = vld [vmem:[%s13192_s21 + $0xd1] sm:$0xff] }
  0x1c   : > { %v235_v30 = vld [vmem:[%s13192_s21 + $0xd9] sm:$0xff]  ;;  %v236_v31 = vld [vmem:[%s13192_s21 + $0xe1] sm:$0xff]  ;;  %v237_v32 = vld [vmem:[%s13192_s21 + $0xe9] sm:$0xff] }
  0x1d   : > { %11477 = vmatmul.mubr.msk.f32.gmra.mrb[4].mxu0 %vm17257_vm1, %v213_v8  ;;  %v238_v33 = vld [vmem:[%s13192_s21 + $0xf1] sm:$0xff]  ;;  %v239_v34 = vld [vmem:[%s13192_s21 + $0xf9] sm:$0xff]  ;;  %v240_v35 = vld [vmem:[%s13192_s21 + $0x101] sm:$0xff] }
  0x1e   : > { %11479 = vmatprep.mubr.msk.f32.mxu0 %vm17257_vm1, %v214_v9  ;;  %v241_v36 = vld [vmem:[%s13192_s21 + $0x109] sm:$0xff]  ;;  %v242_v37 = vld [vmem:[%s13192_s21 + $0x111] sm:$0xff]  ;;  %v243_v38 = vld [vmem:[%s13192_s21 + $0x119] sm:$0xff] }
  0x1f   : > { %v171_v39 = vld [vmem:[%s13192_s21] sm:$0xff]  ;;  %v172_v40 = vld [vmem:[%s13192_s21 + $0x8] sm:$0xff]  ;;  %v173_v41 = vld [vmem:[%s13192_s21 + $0x10] sm:$0xff] }
  0x20   : > { %v174_v43 = vld [vmem:[%s13192_s21 + $0x18] sm:$0xff]  ;;  %v175_v44 = vld [vmem:[%s13192_s21 + $0x20] sm:$0xff]  ;;  %v176_v45 = vld [vmem:[%s13192_s21 + $0x28] sm:$0xff] }
  0x21   : > { %11480 = vmatmul.mubr.msk.f32.gmra.mrb[6].mxu0 %vm17257_vm1, %v215_v10  ;;  %v177_v46 = vld [vmem:[%s13192_s21 + $0x30] sm:$0xff]  ;;  %v178_v47 = vld [vmem:[%s13192_s21 + $0x38] sm:$0xff]  ;;  %v179_v48 = vld [vmem:[%s13192_s21 + $0x40] sm:$0xff] }
  0x22   : > { %11482 = vmatprep.mubr.msk.f32.mxu0 %vm17257_vm1, %v216_v11  ;;  %v180_v49 = vld [vmem:[%s13192_s21 + $0x48] sm:$0xff]  ;;  %v181_v50 = vld [vmem:[%s13192_s21 + $0x50] sm:$0xff]  ;;  %v182_v51 = vld [vmem:[%s13192_s21 + $0x58] sm:$0xff] }
  0x23   : > { %v183_v52 = vld [vmem:[%s13192_s21 + $0x60] sm:$0xff]  ;;  %v184_v53 = vld [vmem:[%s13192_s21 + $0x68] sm:$0xff]  ;;  %v185_v54 = vld [vmem:[%s13192_s21 + $0x70] sm:$0xff] }
  0x24   : > { %v186_v55 = vld [vmem:[%s13192_s21 + $0x78] sm:$0xff]  ;;  %v187_v56 = vld [vmem:[%s13192_s21 + $0x80] sm:$0xff]  ;;  %v188_v57 = vld [vmem:[%s13192_s21 + $0x88] sm:$0xff] }
  0x25   : > { %11483 = vmatmul.mubr.msk.f32.gmra.mrb[8].mxu0 %vm17257_vm1, %v217_v12  ;;  %v189_v58 = vld [vmem:[%s13192_s21 + $0x90] sm:$0xff]  ;;  %v190_v59 = vld [vmem:[%s13192_s21 + $0x98] sm:$0xff]  ;;  %v191_v60 = vld [vmem:[%s13192_s21 + $0xa0] sm:$0xff] }
  0x26   : > { %11485 = vmatprep.mubr.msk.f32.mxu0 %vm17257_vm1, %v218_v13  ;;  %v192_v61 = vld [vmem:[%s13192_s21 + $0xa8] sm:$0xff]  ;;  %v193_v62 = vld [vmem:[%s13192_s21 + $0xb0] sm:$0xff]  ;;  %v194_v63 = vld [vmem:[%s13192_s21 + $0xb8] sm:$0xff] }
  0x27   : > { %v195_v0 = vld [vmem:[%s13192_s21 + $0xc0] sm:$0xff]  ;;  %v196_v1 = vld [vmem:[%s13192_s21 + $0xc8] sm:$0xff]  ;;  %v197_v2 = vld [vmem:[%s13192_s21 + $0xd0] sm:$0xff] }
  0x28   : > { %v198_v3 = vld [vmem:[%s13192_s21 + $0xd8] sm:$0xff]  ;;  %v199_v4 = vld [vmem:[%s13192_s21 + $0xe0] sm:$0xff]  ;;  %v201_v6 = vld [vmem:[%s13192_s21 + $0xf0] sm:$0xff] }
  0x29   : > { %11486 = vmatmul.mubr.msk.f32.gmra.mrb[10].mxu0 %vm17257_vm1, %v219_v14  ;;  %v202_v7 = vld [vmem:[%s13192_s21 + $0xf8] sm:$0xff]  ;;  %v203_v8 = vld [vmem:[%s13192_s21 + $0x100] sm:$0xff]  ;;  %v204_v9 = vld [vmem:[%s13192_s21 + $0x108] sm:$0xff] }
  0x2a   : > { %11488 = vmatprep.mubr.msk.f32.mxu0 %vm17257_vm1, %v220_v15  ;;  %v205_v10 = vld [vmem:[%s13192_s21 + $0x110] sm:$0xff]  ;;  %v206_v11 = vld [vmem:[%s13192_s21 + $0x118] sm:$0xff]  ;;  %v960_v12 = vld [vmem:[%s13192_s21 + $0x2] sm:$0xff] }
  0x2b   : > { %v961_v13 = vld [vmem:[%s13192_s21 + $0xa] sm:$0xff]  ;;  %v13359_v14 = vld [vmem:[%s13192_s21 + $0x12] sm:$0xff] }
  0x2c   : > { %v13364_v15 = vld [vmem:[%s17253_s1 + $0x10] sm:$0xf] }
  0x2d   : > { %11489 = vmatmul.mubr.msk.f32.gmra.mrb[12].mxu0 %vm17257_vm1, %v221_v16  ;;  %v13372_v16 = vld [vmem:[%s13192_s21 + $0x1a] sm:$0xff] }
  0x2e   : > { %11491 = vmatprep.mubr.msk.f32.mxu0 %vm17257_vm1, %v222_v17  ;;  %v13375_v17 = vld [vmem:[%s13192_s21 + $0x22] sm:$0xff] }
  0x31   : > { %11492 = vmatmul.mubr.msk.f32.gmra.mrb[14].mxu0 %vm17257_vm1, %v223_v18  ;;  %v13384_v18 = vld [vmem:[%s13192_s21 + $0x2a] sm:$0xff] }
  0x32   : > { %11494 = vmatprep.mubr.msk.f32.mxu0 %vm17257_vm1, %v224_v19  ;;  %v13387_v19 = vld [vmem:[%s13192_s21 + $0x32] sm:$0xff] }
  0x35   : > { %11495 = vmatmul.mubr.msk.f32.gmra.mrb[16].mxu0 %vm17257_vm1, %v225_v20  ;;  %v13394_v20 = vld [vmem:[%s13192_s21 + $0x3a] sm:$0xff] }
  0x36   : > { %11497 = vmatprep.mubr.msk.f32.mxu0 %vm17257_vm1, %v226_v21  ;;  %v13397_v21 = vld [vmem:[%s13192_s21 + $0x42] sm:$0xff] }
  0x39   : > { %11498 = vmatmul.mubr.msk.f32.gmra.mrb[18].mxu0 %vm17257_vm1, %v227_v22  ;;  %v13404_v22 = vld [vmem:[%s13192_s21 + $0x4a] sm:$0xff] }
  0x3a   : > { %11500 = vmatprep.mubr.msk.f32.mxu0 %vm17257_vm1, %v228_v23  ;;  %v13407_v23 = vld [vmem:[%s13192_s21 + $0x52] sm:$0xff] }
  0x3d   : > { %11501 = vmatmul.mubr.msk.f32.gmra.mrb[20].mxu0 %vm17257_vm1, %v229_v24  ;;  %v971_v24 = vld [vmem:[%s13192_s21 + $0x5a] sm:$0xff] }
  0x3e   : > { %11503 = vmatprep.mubr.msk.f32.mxu0 %vm17257_vm1, %v230_v25  ;;  %v972_v25 = vld [vmem:[%s13192_s21 + $0x62] sm:$0xff] }
  0x41   : > { %11504 = vmatmul.mubr.msk.f32.gmra.mrb[22].mxu0 %vm17257_vm1, %v231_v26  ;;  %v973_v26 = vld [vmem:[%s13192_s21 + $0x6a] sm:$0xff] }
  0x42   : > { %11506 = vmatprep.mubr.msk.f32.mxu0 %vm17257_vm1, %v232_v27  ;;  %v974_v27 = vld [vmem:[%s13192_s21 + $0x72] sm:$0xff] }
  0x45   : > { %11507 = vmatmul.mubr.msk.f32.gmra.mrb[24].mxu0 %vm17257_vm1, %v233_v28  ;;  %v975_v28 = vld [vmem:[%s13192_s21 + $0x7a] sm:$0xff] }
  0x46   : > { %11509 = vmatprep.mubr.msk.f32.mxu0 %vm17257_vm1, %v234_v29  ;;  %v976_v29 = vld [vmem:[%s13192_s21 + $0x82] sm:$0xff] }
  0x49   : > { %11510 = vmatmul.mubr.msk.f32.gmra.mrb[26].mxu0 %vm17257_vm1, %v235_v30  ;;  %v977_v30 = vld [vmem:[%s13192_s21 + $0x8a] sm:$0xff] }
  0x4a   : > { %11512 = vmatprep.mubr.msk.f32.mxu0 %vm17257_vm1, %v236_v31  ;;  %v978_v31 = vld [vmem:[%s13192_s21 + $0x92] sm:$0xff] }
  0x4d   : > { %11513 = vmatmul.mubr.msk.f32.gmra.mrb[28].mxu0 %vm17257_vm1, %v237_v32  ;;  %v979_v32 = vld [vmem:[%s13192_s21 + $0x9a] sm:$0xff] }
  0x4e   : > { %11515 = vmatprep.mubr.msk.f32.mxu0 %vm17257_vm1, %v238_v33  ;;  %v980_v33 = vld [vmem:[%s13192_s21 + $0xa2] sm:$0xff] }
  0x51   : > { %11516 = vmatmul.mubr.msk.f32.gmra.mrb[30].mxu0 %vm17257_vm1, %v239_v34  ;;  %v981_v34 = vld [vmem:[%s13192_s21 + $0xaa] sm:$0xff] }
  0x52   : > { %11518 = vmatprep.mubr.msk.f32.mxu0 %vm17257_vm1, %v240_v35  ;;  %v982_v35 = vld [vmem:[%s13192_s21 + $0xb2] sm:$0xff] }
  0x55   : > { %11519 = vmatmul.mubr.msk.f32.gmra.mrb[32].mxu0 %vm17257_vm1, %v241_v36  ;;  %v983_v36 = vld [vmem:[%s13192_s21 + $0xba] sm:$0xff] }
  0x56   : > { %11521 = vmatprep.mubr.msk.f32.mxu0 %vm17257_vm1, %v242_v37  ;;  %v984_v37 = vld [vmem:[%s13192_s21 + $0xc2] sm:$0xff] }
  0x59   : > { %11522 = vmatmul.mubr.msk.f32.gmra.mrb[34].mxu0 %vm17257_vm1, %v243_v38  ;;  %v985_v38 = vld [vmem:[%s13192_s21 + $0xca] sm:$0xff] }
  0x5a   : > { %11526 = vmatprep.mubr.msk.f32.mxu0 %vm17257_vm1, %v171_v39  ;;  %v986_v39 = vld [vmem:[%s13192_s21 + $0xd2] sm:$0xff] }
  0x5d   : > { %11527 = vmatmul.mubr.msk.f32.vlgmr.msra.gmra.mrb[0].mxu0 %vm17257_vm1, %v172_v40  ;;  %v987_v40 = vld [vmem:[%s13192_s21 + $0xda] sm:$0xff] }
  0x5e   : > { %11581 = vmatpush3.msk.msra.mxu0 %vm17256_vm0, %v13201_v5  ;;  %11529 = vmatprep.mubr.msk.f32.mxu0 %vm17257_vm1, %v173_v41  ;;  %v200_v5 = vld [vmem:[%s13192_s21 + $0xe8] sm:$0xff] }
  0x5f   : > { %11636 = vmatprep.subr.msk.mxu0 %vm17256_vm0, %v13281_v42  ;;  %v988_v41 = vld [vmem:[%s13192_s21 + $0xe2] sm:$0xff] }
  0x61   : > { %11530 = vmatmul.mubr.msk.f32.gmra.mrb[2].mxu0 %vm17257_vm1, %v174_v43  ;;  %v990_v43 = vld [vmem:[%s13192_s21 + $0xf2] sm:$0xff] }
  0x62   : > { %11532 = vmatprep.mubr.msk.f32.mxu0 %vm17257_vm1, %v175_v44  ;;  %v991_v44 = vld [vmem:[%s13192_s21 + $0xfa] sm:$0xff] }
  0x65   : > { %11533 = vmatmul.mubr.msk.f32.gmra.mrb[4].mxu0 %vm17257_vm1, %v176_v45  ;;  %v992_v45 = vld [vmem:[%s13192_s21 + $0x102] sm:$0xff] }
  0x66   : > { %11535 = vmatprep.mubr.msk.f32.mxu0 %vm17257_vm1, %v177_v46  ;;  %v993_v46 = vld [vmem:[%s13192_s21 + $0x10a] sm:$0xff] }
  0x69   : > { %11536 = vmatmul.mubr.msk.f32.gmra.mrb[6].mxu0 %vm17257_vm1, %v178_v47  ;;  %v994_v47 = vld [vmem:[%s13192_s21 + $0x112] sm:$0xff] }
  0x6a   : > { %11538 = vmatprep.mubr.msk.f32.mxu0 %vm17257_vm1, %v179_v48  ;;  %v995_v48 = vld [vmem:[%s13192_s21 + $0x11a] sm:$0xff] }
  0x6d   : > { %11539 = vmatmul.mubr.msk.f32.gmra.mrb[8].mxu0 %vm17257_vm1, %v180_v49  ;;  %v10307_v49 = vld [vmem:[%s17253_s1 + $0x14] sm:$0xf] }
  0x6e   : > { %11541 = vmatprep.mubr.msk.f32.mxu0 %vm17257_vm1, %v181_v50  ;;  %v1424_v50 = vld [vmem:[%s13192_s21 + $0x122] sm:$0xff] }
  0x71   : > { %11542 = vmatmul.mubr.msk.f32.gmra.mrb[10].mxu0 %vm17257_vm1, %v182_v51  ;;  %v1425_v51 = vld [vmem:[%s13192_s21 + $0x12a] sm:$0xff] }
  0x72   : > { %11544 = vmatprep.mubr.msk.f32.mxu0 %vm17257_vm1, %v183_v52  ;;  %v1820_v52 = vld [vmem:[%s13192_s21 + $0x13] sm:$0xff] }
  0x75   : > { %11545 = vmatmul.mubr.msk.f32.gmra.mrb[12].mxu0 %vm17257_vm1, %v184_v53  ;;  %v1821_v53 = vld [vmem:[%s13192_s21 + $0x1b] sm:$0xff] }
  0x76   : > { %11547 = vmatprep.mubr.msk.f32.mxu0 %vm17257_vm1, %v185_v54  ;;  %v1822_v54 = vld [vmem:[%s13192_s21 + $0x23] sm:$0xff] }
  0x79   : > { %11548 = vmatmul.mubr.msk.f32.gmra.mrb[14].mxu0 %vm17257_vm1, %v186_v55  ;;  %v13523_v55 = vld [vmem:[%s17253_s1 + $0x18] sm:$0xf] }
  0x7a   : > { %11550 = vmatprep.mubr.msk.f32.mxu0 %vm17257_vm1, %v187_v56  ;;  %v1823_v56 = vld [vmem:[%s13192_s21 + $0x2b] sm:$0xff] }
  0x7d   : > { %11551 = vmatmul.mubr.msk.f32.gmra.mrb[16].mxu0 %vm17257_vm1, %v188_v57  ;;  %v1824_v57 = vld [vmem:[%s13192_s21 + $0x33] sm:$0xff] }
  0x7e   : > { %11553 = vmatprep.mubr.msk.f32.mxu0 %vm17257_vm1, %v189_v58  ;;  %v1825_v58 = vld [vmem:[%s13192_s21 + $0x3b] sm:$0xff] }
  0x81   : > { %11554 = vmatmul.mubr.msk.f32.gmra.mrb[18].mxu0 %vm17257_vm1, %v190_v59  ;;  %v1826_v59 = vld [vmem:[%s13192_s21 + $0x43] sm:$0xff] }
  0x82   : > { %11556 = vmatprep.mubr.msk.f32.mxu0 %vm17257_vm1, %v191_v60  ;;  %v1827_v60 = vld [vmem:[%s13192_s21 + $0x4b] sm:$0xff] }
  0x85   : > { %11557 = vmatmul.mubr.msk.f32.gmra.mrb[20].mxu0 %vm17257_vm1, %v192_v61  ;;  %v1828_v61 = vld [vmem:[%s13192_s21 + $0x53] sm:$0xff] }
  0x86   : > { %11559 = vmatprep.mubr.msk.f32.mxu0 %vm17257_vm1, %v193_v62  ;;  %v1829_v62 = vld [vmem:[%s13192_s21 + $0x5b] sm:$0xff] }
  0x89   : > { %11560 = vmatmul.mubr.msk.f32.gmra.mrb[22].mxu0 %vm17257_vm1, %v194_v63  ;;  %v1830_v63 = vld [vmem:[%s13192_s21 + $0x63] sm:$0xff] }
  0x8a   : > { %11562 = vmatprep.mubr.msk.f32.mxu0 %vm17257_vm1, %v195_v0  ;;  %v1831_v0 = vld [vmem:[%s13192_s21 + $0x6b] sm:$0xff] }
  0x8d   : > { %11563 = vmatmul.mubr.msk.f32.gmra.mrb[24].mxu0 %vm17257_vm1, %v196_v1  ;;  %v1832_v1 = vld [vmem:[%s13192_s21 + $0x73] sm:$0xff] }
  0x8e   : > { %11565 = vmatprep.mubr.msk.f32.mxu0 %vm17257_vm1, %v197_v2  ;;  %v1833_v2 = vld [vmem:[%s13192_s21 + $0x7b] sm:$0xff] }
  0x91   : > { %11566 = vmatmul.mubr.msk.f32.gmra.mrb[26].mxu0 %vm17257_vm1, %v198_v3  ;;  %v1834_v3 = vld [vmem:[%s13192_s21 + $0x83] sm:$0xff] }
  0x92   : > { %11568 = vmatprep.mubr.msk.f32.mxu0 %vm17257_vm1, %v199_v4  ;;  %v1835_v4 = vld [vmem:[%s13192_s21 + $0x8b] sm:$0xff] }
  0x95   : > { %11569 = vmatmul.mubr.msk.f32.gmra.mrb[28].mxu0 %vm17257_vm1, %v200_v5  ;;  %v1836_v5 = vld [vmem:[%s13192_s21 + $0x93] sm:$0xff] }
  0x96   : > { %11571 = vmatprep.mubr.msk.f32.mxu0 %vm17257_vm1, %v201_v6  ;;  %v1837_v6 = vld [vmem:[%s13192_s21 + $0x9b] sm:$0xff] }
  0x99   : > { %11572 = vmatmul.mubr.msk.f32.gmra.mrb[30].mxu0 %vm17257_vm1, %v202_v7  ;;  %v1838_v7 = vld [vmem:[%s13192_s21 + $0xa3] sm:$0xff] }
  0x9a   : > { %11574 = vmatprep.mubr.msk.f32.mxu0 %vm17257_vm1, %v203_v8  ;;  %v1839_v8 = vld [vmem:[%s13192_s21 + $0xab] sm:$0xff] }
  0x9d   : > { %11575 = vmatmul.mubr.msk.f32.gmra.mrb[32].mxu0 %vm17257_vm1, %v204_v9  ;;  %v1840_v9 = vld [vmem:[%s13192_s21 + $0xb3] sm:$0xff] }
  0x9e   : > { %11577 = vmatprep.mubr.msk.f32.mxu0 %vm17257_vm1, %v205_v10  ;;  %v1841_v10 = vld [vmem:[%s13192_s21 + $0xbb] sm:$0xff] }
  0xa1   : > { %11578 = vmatmul.mubr.msk.f32.gmra.mrb[34].mxu0 %vm17257_vm1, %v206_v11  ;;  %v1842_v11 = vld [vmem:[%s13192_s21 + $0xc3] sm:$0xff] }
  0xa2   : > { %11582 = vmatprep.mubr.msk.f32.mxu0 %vm17257_vm1, %v960_v12  ;;  %v1843_v12 = vld [vmem:[%s13192_s21 + $0xcb] sm:$0xff] }
  0xa5   : > { %11583 = vmatmul.mubr.msk.f32.vlgmr.msra.gmra.mrb[0].mxu0 %vm17257_vm1, %v961_v13  ;;  %v1844_v13 = vld [vmem:[%s13192_s21 + $0xd3] sm:$0xff] }
  0xa6   : > { %11637 = vmatpush3.msk.msra.mxu0 %vm17256_vm0, %v13281_v42  ;;  %11585 = vmatprep.mubr.msk.f32.mxu0 %vm17257_vm1, %v13359_v14  ;;  %v989_v42 = vld [vmem:[%s13192_s21 + $0xea] sm:$0xff] }
  0xa7   : > { %11692 = vmatprep.subr.msk.mxu0 %vm17256_vm0, %v13364_v15 }
  0xa9   : > { %11586 = vmatmul.mubr.msk.f32.gmra.mrb[2].mxu0 %vm17257_vm1, %v13372_v16 }
  0xaa   : > { %11588 = vmatprep.mubr.msk.f32.mxu0 %vm17257_vm1, %v13375_v17 }
  0xad   : > { %11589 = vmatmul.mubr.msk.f32.gmra.mrb[4].mxu0 %vm17257_vm1, %v13384_v18 }
  0xae   : > { %11591 = vmatprep.mubr.msk.f32.mxu0 %vm17257_vm1, %v13387_v19 }
  0xb1   : > { %11592 = vmatmul.mubr.msk.f32.gmra.mrb[6].mxu0 %vm17257_vm1, %v13394_v20 }
  0xb2   : > { %11594 = vmatprep.mubr.msk.f32.mxu0 %vm17257_vm1, %v13397_v21 }
  0xb5   : > { %11595 = vmatmul.mubr.msk.f32.gmra.mrb[8].mxu0 %vm17257_vm1, %v13404_v22 }
  0xb6   : > { %11597 = vmatprep.mubr.msk.f32.mxu0 %vm17257_vm1, %v13407_v23 }
  0xb9   : > { %11598 = vmatmul.mubr.msk.f32.gmra.mrb[10].mxu0 %vm17257_vm1, %v971_v24 }
  0xba   : > { %11600 = vmatprep.mubr.msk.f32.mxu0 %vm17257_vm1, %v972_v25 }
  0xbd   : > { %11601 = vmatmul.mubr.msk.f32.gmra.mrb[12].mxu0 %vm17257_vm1, %v973_v26 }
  0xbe   : > { %11603 = vmatprep.mubr.msk.f32.mxu0 %vm17257_vm1, %v974_v27 }
  0xc1   : > { %11604 = vmatmul.mubr.msk.f32.gmra.mrb[14].mxu0 %vm17257_vm1, %v975_v28 }
  0xc2   : > { %11606 = vmatprep.mubr.msk.f32.mxu0 %vm17257_vm1, %v976_v29 }
  0xc5   : > { %11607 = vmatmul.mubr.msk.f32.gmra.mrb[16].mxu0 %vm17257_vm1, %v977_v30 }
  0xc6   : > { %11609 = vmatprep.mubr.msk.f32.mxu0 %vm17257_vm1, %v978_v31 }
  0xc9   : > { %11610 = vmatmul.mubr.msk.f32.gmra.mrb[18].mxu0 %vm17257_vm1, %v979_v32 }
  0xca   : > { %11612 = vmatprep.mubr.msk.f32.mxu0 %vm17257_vm1, %v980_v33 }
  0xcd   : > { %11613 = vmatmul.mubr.msk.f32.gmra.mrb[20].mxu0 %vm17257_vm1, %v981_v34 }
  0xce   : > { %11615 = vmatprep.mubr.msk.f32.mxu0 %vm17257_vm1, %v982_v35 }
  0xd1   : > { %11616 = vmatmul.mubr.msk.f32.gmra.mrb[22].mxu0 %vm17257_vm1, %v983_v36 }
  0xd2   : > { %11618 = vmatprep.mubr.msk.f32.mxu0 %vm17257_vm1, %v984_v37 }
  0xd5   : > { %11619 = vmatmul.mubr.msk.f32.gmra.mrb[24].mxu0 %vm17257_vm1, %v985_v38 }
  0xd6   : > { %11621 = vmatprep.mubr.msk.f32.mxu0 %vm17257_vm1, %v986_v39 }
  0xd9   : > { %11622 = vmatmul.mubr.msk.f32.gmra.mrb[26].mxu0 %vm17257_vm1, %v987_v40 }
  0xda   : > { %11624 = vmatprep.mubr.msk.f32.mxu0 %vm17257_vm1, %v988_v41 }
  0xdd   : > { %11625 = vmatmul.mubr.msk.f32.gmra.mrb[28].mxu0 %vm17257_vm1, %v989_v42 }
  0xde   : > { %11627 = vmatprep.mubr.msk.f32.mxu0 %vm17257_vm1, %v990_v43 }
  0xe1   : > { %11628 = vmatmul.mubr.msk.f32.gmra.mrb[30].mxu0 %vm17257_vm1, %v991_v44 }
  0xe2   : > { %11630 = vmatprep.mubr.msk.f32.mxu0 %vm17257_vm1, %v992_v45 }
  0xe5   : > { %11631 = vmatmul.mubr.msk.f32.gmra.mrb[32].mxu0 %vm17257_vm1, %v993_v46 }
  0xe6   : > { %11633 = vmatprep.mubr.msk.f32.mxu0 %vm17257_vm1, %v994_v47 }
  0xe9   : > { %11634 = vmatmul.mubr.msk.f32.gmra.mrb[34].mxu0 %vm17257_vm1, %v995_v48 }
  0xea   : > { %11638 = vmatprep.mubr.msk.f32.mxu0 %vm17257_vm1, %v13359_v14  ;;  %v1845_v14 = vld [vmem:[%s13192_s21 + $0xdb] sm:$0xff] }
  0xed   : > { %11639 = vmatmul.mubr.msk.f32.vlgmr.msra.gmra.mrb[0].mxu0 %vm17257_vm1, %v13372_v16  ;;  %v1847_v16 = vld [vmem:[%s13192_s21 + $0xeb] sm:$0xff] }
  0xee   : > { %11693 = vmatpush3.msk.msra.mxu0 %vm17256_vm0, %v13364_v15  ;;  %11641 = vmatprep.mubr.msk.f32.mxu0 %vm17257_vm1, %v13375_v17  ;;  %v1846_v15 = vld [vmem:[%s13192_s21 + $0xe3] sm:$0xff]  ;;  %v1848_v17 = vld [vmem:[%s13192_s21 + $0xf3] sm:$0xff] }
  0xef   : > { %11748 = vmatprep.subr.msk.mxu0 %vm17256_vm0, %v10307_v49 }
  0xf1   : > { %11642 = vmatmul.mubr.msk.f32.gmra.mrb[2].mxu0 %vm17257_vm1, %v13384_v18  ;;  %v1849_v18 = vld [vmem:[%s13192_s21 + $0xfb] sm:$0xff] }
  0xf2   : > { %11644 = vmatprep.mubr.msk.f32.mxu0 %vm17257_vm1, %v13387_v19  ;;  %v1850_v19 = vld [vmem:[%s13192_s21 + $0x103] sm:$0xff] }
  0xf5   : > { %11645 = vmatmul.mubr.msk.f32.gmra.mrb[4].mxu0 %vm17257_vm1, %v13394_v20  ;;  %v1851_v20 = vld [vmem:[%s13192_s21 + $0x10b] sm:$0xff] }
  0xf6   : > { %11647 = vmatprep.mubr.msk.f32.mxu0 %vm17257_vm1, %v13397_v21  ;;  %v1852_v21 = vld [vmem:[%s13192_s21 + $0x113] sm:$0xff] }
  0xf9   : > { %11648 = vmatmul.mubr.msk.f32.gmra.mrb[6].mxu0 %vm17257_vm1, %v13404_v22  ;;  %v1853_v22 = vld [vmem:[%s13192_s21 + $0x11b] sm:$0xff] }
  0xfa   : > { %11650 = vmatprep.mubr.msk.f32.mxu0 %vm17257_vm1, %v13407_v23  ;;  %v1854_v23 = vld [vmem:[%s13192_s21 + $0x123] sm:$0xff] }
  0xfd   : > { %11651 = vmatmul.mubr.msk.f32.gmra.mrb[8].mxu0 %vm17257_vm1, %v971_v24  ;;  %v1855_v24 = vld [vmem:[%s13192_s21 + $0x12b] sm:$0xff] }
  0xfe   : > { %11653 = vmatprep.mubr.msk.f32.mxu0 %vm17257_vm1, %v972_v25  ;;  %v2250_v25 = vld [vmem:[%s13192_s21 + $0x14] sm:$0xff] }
 0x101   : > { %11654 = vmatmul.mubr.msk.f32.gmra.mrb[10].mxu0 %vm17257_vm1, %v973_v26  ;;  %v2251_v26 = vld [vmem:[%s13192_s21 + $0x1c] sm:$0xff] }
 0x102   : > { %11656 = vmatprep.mubr.msk.f32.mxu0 %vm17257_vm1, %v974_v27  ;;  %v13600_v27 = vld [vmem:[%s13192_s21 + $0x24] sm:$0xff] }
 0x105   : > { %11657 = vmatmul.mubr.msk.f32.gmra.mrb[12].mxu0 %vm17257_vm1, %v975_v28  ;;  %v13605_v28 = vld [vmem:[%s17253_s1 + $0x1c] sm:$0xf] }
 0x106   : > { %11659 = vmatprep.mubr.msk.f32.mxu0 %vm17257_vm1, %v976_v29  ;;  %v13613_v29 = vld [vmem:[%s13192_s21 + $0x2c] sm:$0xff] }
 0x109   : > { %11660 = vmatmul.mubr.msk.f32.gmra.mrb[14].mxu0 %vm17257_vm1, %v977_v30  ;;  %v13616_v30 = vld [vmem:[%s13192_s21 + $0x34] sm:$0xff] }
 0x10a   : > { %11662 = vmatprep.mubr.msk.f32.mxu0 %vm17257_vm1, %v978_v31  ;;  %v13625_v31 = vld [vmem:[%s13192_s21 + $0x3c] sm:$0xff] }
 0x10d   : > { %11663 = vmatmul.mubr.msk.f32.gmra.mrb[16].mxu0 %vm17257_vm1, %v979_v32  ;;  %v13628_v32 = vld [vmem:[%s13192_s21 + $0x44] sm:$0xff] }
 0x10e   : > { %11665 = vmatprep.mubr.msk.f32.mxu0 %vm17257_vm1, %v980_v33  ;;  %v13635_v33 = vld [vmem:[%s13192_s21 + $0x4c] sm:$0xff] }
 0x111   : > { %11666 = vmatmul.mubr.msk.f32.gmra.mrb[18].mxu0 %vm17257_vm1, %v981_v34  ;;  %v13638_v34 = vld [vmem:[%s13192_s21 + $0x54] sm:$0xff] }
 0x112   : > { %11668 = vmatprep.mubr.msk.f32.mxu0 %vm17257_vm1, %v982_v35  ;;  %v13645_v35 = vld [vmem:[%s13192_s21 + $0x5c] sm:$0xff] }
 0x115   : > { %11669 = vmatmul.mubr.msk.f32.gmra.mrb[20].mxu0 %vm17257_vm1, %v983_v36  ;;  %v13648_v36 = vld [vmem:[%s13192_s21 + $0x64] sm:$0xff] }
 0x116   : > { %11671 = vmatprep.mubr.msk.f32.mxu0 %vm17257_vm1, %v984_v37  ;;  %v2261_v37 = vld [vmem:[%s13192_s21 + $0x6c] sm:$0xff] }
 0x119   : > { %11672 = vmatmul.mubr.msk.f32.gmra.mrb[22].mxu0 %vm17257_vm1, %v985_v38  ;;  %v2262_v38 = vld [vmem:[%s13192_s21 + $0x74] sm:$0xff] }
 0x11a   : > { %11674 = vmatprep.mubr.msk.f32.mxu0 %vm17257_vm1, %v986_v39  ;;  %v2263_v39 = vld [vmem:[%s13192_s21 + $0x7c] sm:$0xff] }
 0x11d   : > { %11675 = vmatmul.mubr.msk.f32.gmra.mrb[24].mxu0 %vm17257_vm1, %v987_v40  ;;  %v2264_v40 = vld [vmem:[%s13192_s21 + $0x84] sm:$0xff] }
 0x11e   : > { %11677 = vmatprep.mubr.msk.f32.mxu0 %vm17257_vm1, %v988_v41  ;;  %v2265_v41 = vld [vmem:[%s13192_s21 + $0x8c] sm:$0xff] }
 0x121   : > { %11678 = vmatmul.mubr.msk.f32.gmra.mrb[26].mxu0 %vm17257_vm1, %v989_v42  ;;  %v2266_v42 = vld [vmem:[%s13192_s21 + $0x94] sm:$0xff] }
 0x122   : > { %11680 = vmatprep.mubr.msk.f32.mxu0 %vm17257_vm1, %v990_v43  ;;  %v2267_v43 = vld [vmem:[%s13192_s21 + $0x9c] sm:$0xff] }
 0x125   : > { %11681 = vmatmul.mubr.msk.f32.gmra.mrb[28].mxu0 %vm17257_vm1, %v991_v44  ;;  %v2268_v44 = vld [vmem:[%s13192_s21 + $0xa4] sm:$0xff] }
 0x126   : > { %11683 = vmatprep.mubr.msk.f32.mxu0 %vm17257_vm1, %v992_v45  ;;  %v2269_v45 = vld [vmem:[%s13192_s21 + $0xac] sm:$0xff] }
 0x129   : > { %11684 = vmatmul.mubr.msk.f32.gmra.mrb[30].mxu0 %vm17257_vm1, %v993_v46  ;;  %v2270_v46 = vld [vmem:[%s13192_s21 + $0xb4] sm:$0xff] }
 0x12a   : > { %11686 = vmatprep.mubr.msk.f32.mxu0 %vm17257_vm1, %v994_v47  ;;  %v2271_v47 = vld [vmem:[%s13192_s21 + $0xbc] sm:$0xff] }
 0x12d   : > { %11687 = vmatmul.mubr.msk.f32.gmra.mrb[32].mxu0 %vm17257_vm1, %v995_v48  ;;  %v2272_v48 = vld [vmem:[%s13192_s21 + $0xc4] sm:$0xff] }
 0x12e   : > { %11689 = vmatprep.mubr.msk.f32.mxu0 %vm17257_vm1, %v1424_v50  ;;  %v2274_v50 = vld [vmem:[%s13192_s21 + $0xd4] sm:$0xff] }
 0x131   : > { %11690 = vmatmul.mubr.msk.f32.gmra.mrb[34].mxu0 %vm17257_vm1, %v1425_v51  ;;  %v2275_v51 = vld [vmem:[%s13192_s21 + $0xdc] sm:$0xff] }
 0x132   : > { %11694 = vmatprep.mubr.msk.f32.mxu0 %vm17257_vm1, %v1820_v52  ;;  %v2276_v52 = vld [vmem:[%s13192_s21 + $0xe4] sm:$0xff] }
 0x135   : > { %11695 = vmatmul.mubr.msk.f32.vlgmr.msra.gmra.mrb[0].mxu0 %vm17257_vm1, %v1821_v53  ;;  %v2277_v53 = vld [vmem:[%s13192_s21 + $0xec] sm:$0xff] }
 0x136   : > { %11749 = vmatpush3.msk.msra.mxu0 %vm17256_vm0, %v10307_v49  ;;  %11697 = vmatprep.mubr.msk.f32.mxu0 %vm17257_vm1, %v1822_v54  ;;  %v2273_v49 = vld [vmem:[%s13192_s21 + $0xcc] sm:$0xff]  ;;  %v2278_v54 = vld [vmem:[%s13192_s21 + $0xf4] sm:$0xff] }
 0x137   : > { %11804 = vmatprep.subr.msk.mxu0 %vm17256_vm0, %v13523_v55 }
 0x139   : > { %11698 = vmatmul.mubr.msk.f32.gmra.mrb[2].mxu0 %vm17257_vm1, %v1823_v56  ;;  %v2280_v56 = vld [vmem:[%s13192_s21 + $0x104] sm:$0xff] }
 0x13a   : > { %11700 = vmatprep.mubr.msk.f32.mxu0 %vm17257_vm1, %v1824_v57  ;;  %v2281_v57 = vld [vmem:[%s13192_s21 + $0x10c] sm:$0xff] }
 0x13d   : > { %11701 = vmatmul.mubr.msk.f32.gmra.mrb[4].mxu0 %vm17257_vm1, %v1825_v58  ;;  %v2282_v58 = vld [vmem:[%s13192_s21 + $0x114] sm:$0xff] }
 0x13e   : > { %11703 = vmatprep.mubr.msk.f32.mxu0 %vm17257_vm1, %v1826_v59  ;;  %v2283_v59 = vld [vmem:[%s13192_s21 + $0x11c] sm:$0xff] }
 0x141   : > { %11704 = vmatmul.mubr.msk.f32.gmra.mrb[6].mxu0 %vm17257_vm1, %v1827_v60  ;;  %v2284_v60 = vld [vmem:[%s13192_s21 + $0x124] sm:$0xff] }
 0x142   : > { %11706 = vmatprep.mubr.msk.f32.mxu0 %vm17257_vm1, %v1828_v61  ;;  %v2285_v61 = vld [vmem:[%s13192_s21 + $0x12c] sm:$0xff] }
 0x145   : > { %11707 = vmatmul.mubr.msk.f32.gmra.mrb[8].mxu0 %vm17257_vm1, %v1829_v62  ;;  %v10421_v62 = vld [vmem:[%s17253_s1 + $0x20] sm:$0xf] }
 0x146   : > { %11709 = vmatprep.mubr.msk.f32.mxu0 %vm17257_vm1, %v1830_v63  ;;  %v2714_v63 = vld [vmem:[%s13192_s21 + $0x134] sm:$0xff] }
 0x149   : > { %11710 = vmatmul.mubr.msk.f32.gmra.mrb[10].mxu0 %vm17257_vm1, %v1831_v0  ;;  %v2715_v0 = vld [vmem:[%s13192_s21 + $0x13c] sm:$0xff] }
 0x14a   : > { %11712 = vmatprep.mubr.msk.f32.mxu0 %vm17257_vm1, %v1832_v1  ;;  %v3110_v1 = vld [vmem:[%s13192_s21 + $0x25] sm:$0xff] }
 0x14d   : > { %11713 = vmatmul.mubr.msk.f32.gmra.mrb[12].mxu0 %vm17257_vm1, %v1833_v2  ;;  %v3111_v2 = vld [vmem:[%s13192_s21 + $0x2d] sm:$0xff] }
 0x14e   : > { %11715 = vmatprep.mubr.msk.f32.mxu0 %vm17257_vm1, %v1834_v3  ;;  %v3112_v3 = vld [vmem:[%s13192_s21 + $0x35] sm:$0xff] }
 0x151   : > { %11716 = vmatmul.mubr.msk.f32.gmra.mrb[14].mxu0 %vm17257_vm1, %v1835_v4  ;;  %v3113_v4 = vld [vmem:[%s13192_s21 + $0x3d] sm:$0xff] }
 0x152   : > { %11718 = vmatprep.mubr.msk.f32.mxu0 %vm17257_vm1, %v1836_v5  ;;  %v3114_v5 = vld [vmem:[%s13192_s21 + $0x45] sm:$0xff] }
 0x155   : > { %11719 = vmatmul.mubr.msk.f32.gmra.mrb[16].mxu0 %vm17257_vm1, %v1837_v6  ;;  %v3115_v6 = vld [vmem:[%s13192_s21 + $0x4d] sm:$0xff] }
 0x156   : > { %11721 = vmatprep.mubr.msk.f32.mxu0 %vm17257_vm1, %v1838_v7  ;;  %v3116_v7 = vld [vmem:[%s13192_s21 + $0x55] sm:$0xff] }
 0x159   : > { %11722 = vmatmul.mubr.msk.f32.gmra.mrb[18].mxu0 %vm17257_vm1, %v1839_v8  ;;  %v3117_v8 = vld [vmem:[%s13192_s21 + $0x5d] sm:$0xff] }
 0x15a   : > { %11724 = vmatprep.mubr.msk.f32.mxu0 %vm17257_vm1, %v1840_v9  ;;  %v3118_v9 = vld [vmem:[%s13192_s21 + $0x65] sm:$0xff] }
 0x15d   : > { %11725 = vmatmul.mubr.msk.f32.gmra.mrb[20].mxu0 %vm17257_vm1, %v1841_v10  ;;  %v3119_v10 = vld [vmem:[%s13192_s21 + $0x6d] sm:$0xff] }
 0x15e   : > { %11727 = vmatprep.mubr.msk.f32.mxu0 %vm17257_vm1, %v1842_v11  ;;  %v3120_v11 = vld [vmem:[%s13192_s21 + $0x75] sm:$0xff] }
 0x161   : > { %11728 = vmatmul.mubr.msk.f32.gmra.mrb[22].mxu0 %vm17257_vm1, %v1843_v12  ;;  %v3121_v12 = vld [vmem:[%s13192_s21 + $0x7d] sm:$0xff] }
 0x162   : > { %11730 = vmatprep.mubr.msk.f32.mxu0 %vm17257_vm1, %v1844_v13  ;;  %v3122_v13 = vld [vmem:[%s13192_s21 + $0x85] sm:$0xff] }
 0x165   : > { %11731 = vmatmul.mubr.msk.f32.gmra.mrb[24].mxu0 %vm17257_vm1, %v1845_v14  ;;  %v3123_v14 = vld [vmem:[%s13192_s21 + $0x8d] sm:$0xff] }
 0x166   : > { %11733 = vmatprep.mubr.msk.f32.mxu0 %vm17257_vm1, %v1846_v15  ;;  %v3124_v15 = vld [vmem:[%s13192_s21 + $0x95] sm:$0xff] }
 0x169   : > { %11734 = vmatmul.mubr.msk.f32.gmra.mrb[26].mxu0 %vm17257_vm1, %v1847_v16  ;;  %v3125_v16 = vld [vmem:[%s13192_s21 + $0x9d] sm:$0xff] }
 0x16a   : > { %11736 = vmatprep.mubr.msk.f32.mxu0 %vm17257_vm1, %v1848_v17  ;;  %v3126_v17 = vld [vmem:[%s13192_s21 + $0xa5] sm:$0xff] }
 0x16d   : > { %11737 = vmatmul.mubr.msk.f32.gmra.mrb[28].mxu0 %vm17257_vm1, %v1849_v18  ;;  %v3127_v18 = vld [vmem:[%s13192_s21 + $0xad] sm:$0xff] }
 0x16e   : > { %11739 = vmatprep.mubr.msk.f32.mxu0 %vm17257_vm1, %v1850_v19  ;;  %v3128_v19 = vld [vmem:[%s13192_s21 + $0xb5] sm:$0xff] }
 0x171   : > { %11740 = vmatmul.mubr.msk.f32.gmra.mrb[30].mxu0 %vm17257_vm1, %v1851_v20  ;;  %v3129_v20 = vld [vmem:[%s13192_s21 + $0xbd] sm:$0xff] }
 0x172   : > { %11742 = vmatprep.mubr.msk.f32.mxu0 %vm17257_vm1, %v1852_v21  ;;  %v3130_v21 = vld [vmem:[%s13192_s21 + $0xc5] sm:$0xff] }
 0x175   : > { %11743 = vmatmul.mubr.msk.f32.gmra.mrb[32].mxu0 %vm17257_vm1, %v1853_v22  ;;  %v3131_v22 = vld [vmem:[%s13192_s21 + $0xcd] sm:$0xff] }
 0x176   : > { %11745 = vmatprep.mubr.msk.f32.mxu0 %vm17257_vm1, %v1854_v23  ;;  %v3132_v23 = vld [vmem:[%s13192_s21 + $0xd5] sm:$0xff] }
 0x179   : > { %11746 = vmatmul.mubr.msk.f32.gmra.mrb[34].mxu0 %vm17257_vm1, %v1855_v24  ;;  %v3133_v24 = vld [vmem:[%s13192_s21 + $0xdd] sm:$0xff] }
 0x17a   : > { %11750 = vmatprep.mubr.msk.f32.mxu0 %vm17257_vm1, %v2250_v25  ;;  %v3134_v25 = vld [vmem:[%s13192_s21 + $0xe5] sm:$0xff] }
 0x17d   : > { %11751 = vmatmul.mubr.msk.f32.vlgmr.msra.gmra.mrb[0].mxu0 %vm17257_vm1, %v2251_v26  ;;  %v3135_v26 = vld [vmem:[%s13192_s21 + $0xed] sm:$0xff] }
 0x17e   : > { %11805 = vmatpush3.msk.msra.mxu0 %vm17256_vm0, %v13523_v55  ;;  %11753 = vmatprep.mubr.msk.f32.mxu0 %vm17257_vm1, %v13600_v27  ;;  %v2279_v55 = vld [vmem:[%s13192_s21 + $0xfc] sm:$0xff] }
 0x17f   : > { %11860 = vmatprep.subr.msk.mxu0 %vm17256_vm0, %v13605_v28 }
 0x181   : > { %11754 = vmatmul.mubr.msk.f32.gmra.mrb[2].mxu0 %vm17257_vm1, %v13613_v29 }
 0x182   : > { %11756 = vmatprep.mubr.msk.f32.mxu0 %vm17257_vm1, %v13616_v30 }
 0x185   : > { %11757 = vmatmul.mubr.msk.f32.gmra.mrb[4].mxu0 %vm17257_vm1, %v13625_v31 }
 0x186   : > { %11759 = vmatprep.mubr.msk.f32.mxu0 %vm17257_vm1, %v13628_v32 }
 0x189   : > { %11760 = vmatmul.mubr.msk.f32.gmra.mrb[6].mxu0 %vm17257_vm1, %v13635_v33 }
 0x18a   : > { %11762 = vmatprep.mubr.msk.f32.mxu0 %vm17257_vm1, %v13638_v34 }
 0x18d   : > { %11763 = vmatmul.mubr.msk.f32.gmra.mrb[8].mxu0 %vm17257_vm1, %v13645_v35 }
 0x18e   : > { %11765 = vmatprep.mubr.msk.f32.mxu0 %vm17257_vm1, %v13648_v36 }
 0x191   : > { %11766 = vmatmul.mubr.msk.f32.gmra.mrb[10].mxu0 %vm17257_vm1, %v2261_v37 }
 0x192   : > { %11768 = vmatprep.mubr.msk.f32.mxu0 %vm17257_vm1, %v2262_v38 }
 0x195   : > { %11769 = vmatmul.mubr.msk.f32.gmra.mrb[12].mxu0 %vm17257_vm1, %v2263_v39 }
 0x196   : > { %11771 = vmatprep.mubr.msk.f32.mxu0 %vm17257_vm1, %v2264_v40 }
 0x199   : > { %11772 = vmatmul.mubr.msk.f32.gmra.mrb[14].mxu0 %vm17257_vm1, %v2265_v41 }
 0x19a   : > { %11774 = vmatprep.mubr.msk.f32.mxu0 %vm17257_vm1, %v2266_v42 }
 0x19d   : > { %11775 = vmatmul.mubr.msk.f32.gmra.mrb[16].mxu0 %vm17257_vm1, %v2267_v43 }
 0x19e   : > { %11777 = vmatprep.mubr.msk.f32.mxu0 %vm17257_vm1, %v2268_v44 }
 0x1a1   : > { %11778 = vmatmul.mubr.msk.f32.gmra.mrb[18].mxu0 %vm17257_vm1, %v2269_v45 }
 0x1a2   : > { %11780 = vmatprep.mubr.msk.f32.mxu0 %vm17257_vm1, %v2270_v46 }
 0x1a5   : > { %11781 = vmatmul.mubr.msk.f32.gmra.mrb[20].mxu0 %vm17257_vm1, %v2271_v47 }
 0x1a6   : > { %11783 = vmatprep.mubr.msk.f32.mxu0 %vm17257_vm1, %v2272_v48 }
 0x1a9   : > { %11784 = vmatmul.mubr.msk.f32.gmra.mrb[22].mxu0 %vm17257_vm1, %v2273_v49 }
 0x1aa   : > { %11786 = vmatprep.mubr.msk.f32.mxu0 %vm17257_vm1, %v2274_v50 }
 0x1ad   : > { %11787 = vmatmul.mubr.msk.f32.gmra.mrb[24].mxu0 %vm17257_vm1, %v2275_v51 }
 0x1ae   : > { %11789 = vmatprep.mubr.msk.f32.mxu0 %vm17257_vm1, %v2276_v52 }
 0x1b1   : > { %11790 = vmatmul.mubr.msk.f32.gmra.mrb[26].mxu0 %vm17257_vm1, %v2277_v53 }
 0x1b2   : > { %11792 = vmatprep.mubr.msk.f32.mxu0 %vm17257_vm1, %v2278_v54 }
 0x1b5   : > { %11793 = vmatmul.mubr.msk.f32.gmra.mrb[28].mxu0 %vm17257_vm1, %v2279_v55 }
 0x1b6   : > { %11795 = vmatprep.mubr.msk.f32.mxu0 %vm17257_vm1, %v2280_v56 }
 0x1b9   : > { %11796 = vmatmul.mubr.msk.f32.gmra.mrb[30].mxu0 %vm17257_vm1, %v2281_v57 }
 0x1ba   : > { %11798 = vmatprep.mubr.msk.f32.mxu0 %vm17257_vm1, %v2282_v58 }
 0x1bd   : > { %11799 = vmatmul.mubr.msk.f32.gmra.mrb[32].mxu0 %vm17257_vm1, %v2283_v59 }
 0x1be   : > { %11801 = vmatprep.mubr.msk.f32.mxu0 %vm17257_vm1, %v2284_v60 }
 0x1c1   : > { %11802 = vmatmul.mubr.msk.f32.gmra.mrb[34].mxu0 %vm17257_vm1, %v2285_v61 }
 0x1c2   : > { %11806 = vmatprep.mubr.msk.f32.mxu0 %vm17257_vm1, %v13600_v27  ;;  %v3136_v27 = vld [vmem:[%s13192_s21 + $0xf5] sm:$0xff] }
 0x1c5   : > { %11807 = vmatmul.mubr.msk.f32.vlgmr.msra.gmra.mrb[0].mxu0 %vm17257_vm1, %v13613_v29  ;;  %v3138_v29 = vld [vmem:[%s13192_s21 + $0x105] sm:$0xff] }
 0x1c6   : > { %11861 = vmatpush3.msk.msra.mxu0 %vm17256_vm0, %v13605_v28  ;;  %11809 = vmatprep.mubr.msk.f32.mxu0 %vm17257_vm1, %v13616_v30  ;;  %v3137_v28 = vld [vmem:[%s13192_s21 + $0xfd] sm:$0xff]  ;;  %v3139_v30 = vld [vmem:[%s13192_s21 + $0x10d] sm:$0xff] }
 0x1c7   : > { %11916 = vmatprep.subr.msk.mxu0 %vm17256_vm0, %v10421_v62 }
 0x1c9   : > { %11810 = vmatmul.mubr.msk.f32.gmra.mrb[2].mxu0 %vm17257_vm1, %v13625_v31  ;;  %v3140_v31 = vld [vmem:[%s13192_s21 + $0x115] sm:$0xff] }
 0x1ca   : > { %11812 = vmatprep.mubr.msk.f32.mxu0 %vm17257_vm1, %v13628_v32  ;;  %v3141_v32 = vld [vmem:[%s13192_s21 + $0x11d] sm:$0xff] }
 0x1cd   : > { %11813 = vmatmul.mubr.msk.f32.gmra.mrb[4].mxu0 %vm17257_vm1, %v13635_v33  ;;  %v3142_v33 = vld [vmem:[%s13192_s21 + $0x125] sm:$0xff] }
 0x1ce   : > { %11815 = vmatprep.mubr.msk.f32.mxu0 %vm17257_vm1, %v13638_v34  ;;  %v3143_v34 = vld [vmem:[%s13192_s21 + $0x12d] sm:$0xff] }
 0x1d1   : > { %11816 = vmatmul.mubr.msk.f32.gmra.mrb[6].mxu0 %vm17257_vm1, %v13645_v35  ;;  %v3144_v35 = vld [vmem:[%s13192_s21 + $0x135] sm:$0xff] }
 0x1d2   : > { %11818 = vmatprep.mubr.msk.f32.mxu0 %vm17257_vm1, %v13648_v36  ;;  %v3145_v36 = vld [vmem:[%s13192_s21 + $0x13d] sm:$0xff] }
 0x1d5   : > { %11819 = vmatmul.mubr.msk.f32.gmra.mrb[8].mxu0 %vm17257_vm1, %v2261_v37  ;;  %v3540_v37 = vld [vmem:[%s13192_s21 + $0x26] sm:$0xff] }
 0x1d6   : > { %11821 = vmatprep.mubr.msk.f32.mxu0 %vm17257_vm1, %v2262_v38  ;;  %v3541_v38 = vld [vmem:[%s13192_s21 + $0x2e] sm:$0xff] }
 0x1d9   : > { %11822 = vmatmul.mubr.msk.f32.gmra.mrb[10].mxu0 %vm17257_vm1, %v2263_v39  ;;  %v3542_v39 = vld [vmem:[%s13192_s21 + $0x36] sm:$0xff] }
 0x1da   : > { %11824 = vmatprep.mubr.msk.f32.mxu0 %vm17257_vm1, %v2264_v40  ;;  %v3543_v40 = vld [vmem:[%s13192_s21 + $0x3e] sm:$0xff] }
 0x1dd   : > { %11825 = vmatmul.mubr.msk.f32.gmra.mrb[12].mxu0 %vm17257_vm1, %v2265_v41  ;;  %v3544_v41 = vld [vmem:[%s13192_s21 + $0x46] sm:$0xff] }
 0x1de   : > { %11827 = vmatprep.mubr.msk.f32.mxu0 %vm17257_vm1, %v2266_v42  ;;  %v3545_v42 = vld [vmem:[%s13192_s21 + $0x4e] sm:$0xff] }
 0x1e1   : > { %11828 = vmatmul.mubr.msk.f32.gmra.mrb[14].mxu0 %vm17257_vm1, %v2267_v43  ;;  %v3546_v43 = vld [vmem:[%s13192_s21 + $0x56] sm:$0xff] }
 0x1e2   : > { %11830 = vmatprep.mubr.msk.f32.mxu0 %vm17257_vm1, %v2268_v44  ;;  %v3547_v44 = vld [vmem:[%s13192_s21 + $0x5e] sm:$0xff] }
 0x1e5   : > { %11831 = vmatmul.mubr.msk.f32.gmra.mrb[16].mxu0 %vm17257_vm1, %v2269_v45  ;;  %v3548_v45 = vld [vmem:[%s13192_s21 + $0x66] sm:$0xff] }
 0x1e6   : > { %11833 = vmatprep.mubr.msk.f32.mxu0 %vm17257_vm1, %v2270_v46  ;;  %v3549_v46 = vld [vmem:[%s13192_s21 + $0x6e] sm:$0xff] }
 0x1e9   : > { %11834 = vmatmul.mubr.msk.f32.gmra.mrb[18].mxu0 %vm17257_vm1, %v2271_v47  ;;  %v3550_v47 = vld [vmem:[%s13192_s21 + $0x76] sm:$0xff] }
 0x1ea   : > { %11836 = vmatprep.mubr.msk.f32.mxu0 %vm17257_vm1, %v2272_v48  ;;  %v3551_v48 = vld [vmem:[%s13192_s21 + $0x7e] sm:$0xff] }
 0x1ed   : > { %11837 = vmatmul.mubr.msk.f32.gmra.mrb[20].mxu0 %vm17257_vm1, %v2273_v49  ;;  %v3552_v49 = vld [vmem:[%s13192_s21 + $0x86] sm:$0xff] }
 0x1ee   : > { %11839 = vmatprep.mubr.msk.f32.mxu0 %vm17257_vm1, %v2274_v50  ;;  %v3553_v50 = vld [vmem:[%s13192_s21 + $0x8e] sm:$0xff] }
 0x1f1   : > { %11840 = vmatmul.mubr.msk.f32.gmra.mrb[22].mxu0 %vm17257_vm1, %v2275_v51  ;;  %v3554_v51 = vld [vmem:[%s13192_s21 + $0x96] sm:$0xff] }
 0x1f2   : > { %11842 = vmatprep.mubr.msk.f32.mxu0 %vm17257_vm1, %v2276_v52  ;;  %v3555_v52 = vld [vmem:[%s13192_s21 + $0x9e] sm:$0xff] }
 0x1f5   : > { %11843 = vmatmul.mubr.msk.f32.gmra.mrb[24].mxu0 %vm17257_vm1, %v2277_v53  ;;  %v3556_v53 = vld [vmem:[%s13192_s21 + $0xa6] sm:$0xff] }
 0x1f6   : > { %11845 = vmatprep.mubr.msk.f32.mxu0 %vm17257_vm1, %v2278_v54  ;;  %v3557_v54 = vld [vmem:[%s13192_s21 + $0xae] sm:$0xff] }
 0x1f9   : > { %11846 = vmatmul.mubr.msk.f32.gmra.mrb[26].mxu0 %vm17257_vm1, %v2279_v55  ;;  %v3558_v55 = vld [vmem:[%s13192_s21 + $0xb6] sm:$0xff] }
 0x1fa   : > { %11848 = vmatprep.mubr.msk.f32.mxu0 %vm17257_vm1, %v2280_v56  ;;  %v3559_v56 = vld [vmem:[%s13192_s21 + $0xbe] sm:$0xff] }
 0x1fd   : > { %11849 = vmatmul.mubr.msk.f32.gmra.mrb[28].mxu0 %vm17257_vm1, %v2281_v57  ;;  %v3560_v57 = vld [vmem:[%s13192_s21 + $0xc6] sm:$0xff] }
 0x1fe   : > { %11851 = vmatprep.mubr.msk.f32.mxu0 %vm17257_vm1, %v2282_v58  ;;  %v3561_v58 = vld [vmem:[%s13192_s21 + $0xce] sm:$0xff] }
 0x201   : > { %11852 = vmatmul.mubr.msk.f32.gmra.mrb[30].mxu0 %vm17257_vm1, %v2283_v59  ;;  %v3562_v59 = vld [vmem:[%s13192_s21 + $0xd6] sm:$0xff] }
 0x202   : > { %11854 = vmatprep.mubr.msk.f32.mxu0 %vm17257_vm1, %v2284_v60  ;;  %v3563_v60 = vld [vmem:[%s13192_s21 + $0xde] sm:$0xff] }
 0x205   : > { %11855 = vmatmul.mubr.msk.f32.gmra.mrb[32].mxu0 %vm17257_vm1, %v2285_v61  ;;  %v3564_v61 = vld [vmem:[%s13192_s21 + $0xe6] sm:$0xff] }
 0x206   : > { %11857 = vmatprep.mubr.msk.f32.mxu0 %vm17257_vm1, %v2714_v63  ;;  %v3566_v63 = vld [vmem:[%s13192_s21 + $0xf6] sm:$0xff] }
 0x209   : > { %11858 = vmatmul.mubr.msk.f32.gmra.mrb[34].mxu0 %vm17257_vm1, %v2715_v0  ;;  %v3567_v0 = vld [vmem:[%s13192_s21 + $0xfe] sm:$0xff] }
 0x20a   : > { %11862 = vmatprep.mubr.msk.f32.mxu0 %vm17257_vm1, %v3110_v1  ;;  %v3568_v1 = vld [vmem:[%s13192_s21 + $0x106] sm:$0xff] }
 0x20d   : > { %11863 = vmatmul.mubr.msk.f32.vlgmr.msra.gmra.mrb[0].mxu0 %vm17257_vm1, %v3111_v2  ;;  %v3569_v2 = vld [vmem:[%s13192_s21 + $0x10e] sm:$0xff] }
 0x20e   : > { %11917 = vmatpush3.msk.msra.mxu0 %vm17256_vm0, %v10421_v62  ;;  %11865 = vmatprep.mubr.msk.f32.mxu0 %vm17257_vm1, %v3112_v3  ;;  %v3565_v62 = vld [vmem:[%s13192_s21 + $0xee] sm:$0xff]  ;;  %v3570_v3 = vld [vmem:[%s13192_s21 + $0x116] sm:$0xff] }
 0x211   : > { %11866 = vmatmul.mubr.msk.f32.gmra.mrb[2].mxu0 %vm17257_vm1, %v3113_v4  ;;  %v3571_v4 = vld [vmem:[%s13192_s21 + $0x11e] sm:$0xff] }
 0x212   : > { %11868 = vmatprep.mubr.msk.f32.mxu0 %vm17257_vm1, %v3114_v5  ;;  %v3572_v5 = vld [vmem:[%s13192_s21 + $0x126] sm:$0xff] }
 0x215   : > { %11869 = vmatmul.mubr.msk.f32.gmra.mrb[4].mxu0 %vm17257_vm1, %v3115_v6  ;;  %v3573_v6 = vld [vmem:[%s13192_s21 + $0x12e] sm:$0xff] }
 0x216   : > { %11871 = vmatprep.mubr.msk.f32.mxu0 %vm17257_vm1, %v3116_v7  ;;  %v3574_v7 = vld [vmem:[%s13192_s21 + $0x136] sm:$0xff] }
 0x219   : > { %11872 = vmatmul.mubr.msk.f32.gmra.mrb[6].mxu0 %vm17257_vm1, %v3117_v8  ;;  %v3575_v8 = vld [vmem:[%s13192_s21 + $0x13e] sm:$0xff] }
 0x21a   : > { %11874 = vmatprep.mubr.msk.f32.mxu0 %vm17257_vm1, %v3118_v9  ;;  %v4006_v9 = vlaneseq }
 0x21d   : > { %11875 = vmatmul.mubr.msk.f32.gmra.mrb[8].mxu0 %vm17257_vm1, %v3119_v10  ;;  %v13902_v10 = vshrl.u32 %v4006_v9, 7 }
 0x21e   : > { %11877 = vmatprep.mubr.msk.f32.mxu0 %vm17257_vm1, %v3120_v11 }
 0x21f   : > { %v4008_v11 = vadd.s32 8, %v13902_v10 }
 0x221   : > { %11878 = vmatmul.mubr.msk.f32.gmra.mrb[10].mxu0 %vm17257_vm1, %v3121_v12 }
 0x222   : > { %11880 = vmatprep.mubr.msk.f32.mxu0 %vm17257_vm1, %v3122_v13  ;;  %v13905_v12 = vmul.u32.u64.low 3817748708, %v4008_v11  ;;  %v13906_v13 = vmul.u32.u64.high 3817748708, %v4008_v11, %v13905_v12 }
 0x223   : > { %v13994_v12 = vadd.s32 120, %v13902_v10 }
 0x225   : > { %11881 = vmatmul.mubr.msk.f32.gmra.mrb[12].mxu0 %vm17257_vm1, %v3123_v14 }
 0x226   : > { %11883 = vmatprep.mubr.msk.f32.mxu0 %vm17257_vm1, %v3124_v15  ;;  %v13909_v14 = vmul.u32.u64.low 3817748708, %v13902_v10  ;;  %v13910_v15 = vmul.u32.u64.high 3817748708, %v13902_v10, %v13909_v14 }
 0x229   : > { %11884 = vmatmul.mubr.msk.f32.gmra.mrb[14].mxu0 %vm17257_vm1, %v3125_v16  ;;  %v4010_v16 = vadd.s32 24, %v13902_v10 }
 0x22a   : > { %11886 = vmatprep.mubr.msk.f32.mxu0 %vm17257_vm1, %v3126_v17  ;;  %v4009_v17 = vadd.s32 16, %v13902_v10 }
 0x22d   : > { %11887 = vmatmul.mubr.msk.f32.gmra.mrb[16].mxu0 %vm17257_vm1, %v3127_v18  ;;  %v4012_v18 = vadd.s32 40, %v13902_v10 }
 0x22e   : > { %11889 = vmatprep.mubr.msk.f32.mxu0 %vm17257_vm1, %v3128_v19  ;;  %v4011_v19 = vadd.s32 32, %v13902_v10 }
 0x231   : > { %11890 = vmatmul.mubr.msk.f32.gmra.mrb[18].mxu0 %vm17257_vm1, %v3129_v20  ;;  %v4060_v20 = vshrl.u32 %v13906_v13, 4 }
 0x232   : > { %11892 = vmatprep.mubr.msk.f32.mxu0 %vm17257_vm1, %v3130_v21 }
 0x235   : > { %11893 = vmatmul.mubr.msk.f32.gmra.mrb[20].mxu0 %vm17257_vm1, %v3131_v22  ;;  %v13917_v21 = vmul.u32.u64.low 3817748708, %v4010_v16  ;;  %v13918_v22 = vmul.u32.u64.high 3817748708, %v4010_v16, %v13917_v21 }
 0x236   : > { %11895 = vmatprep.mubr.msk.f32.mxu0 %vm17257_vm1, %v3132_v23 }
 0x239   : > { %11896 = vmatmul.mubr.msk.f32.gmra.mrb[22].mxu0 %vm17257_vm1, %v3133_v24  ;;  %v13920_v23 = vmul.u32.u64.low 3817748708, %v4009_v17  ;;  %v13921_v24 = vmul.u32.u64.high 3817748708, %v4009_v17, %v13920_v23 }
 0x23a   : > { %11898 = vmatprep.mubr.msk.f32.mxu0 %vm17257_vm1, %v3134_v25 }
 0x23d   : > { %11899 = vmatmul.mubr.msk.f32.gmra.mrb[24].mxu0 %vm17257_vm1, %v3135_v26  ;;  %v13923_v25 = vmul.u32.u64.low 3817748708, %v4012_v18  ;;  %v13924_v26 = vmul.u32.u64.high 3817748708, %v4012_v18, %v13923_v25 }
 0x23e   : > { %11901 = vmatprep.mubr.msk.f32.mxu0 %vm17257_vm1, %v3136_v27  ;;  %v4014_v27 = vadd.s32 56, %v13902_v10 }
 0x241   : > { %11902 = vmatmul.mubr.msk.f32.gmra.mrb[26].mxu0 %vm17257_vm1, %v3137_v28  ;;  %v4049_v28 = vshrl.u32 %v13910_v15, 4 }
 0x242   : > { %11904 = vmatprep.mubr.msk.f32.mxu0 %vm17257_vm1, %v3138_v29 }
 0x245   : > { %11905 = vmatmul.mubr.msk.f32.gmra.mrb[28].mxu0 %vm17257_vm1, %v3139_v30  ;;  %v13928_v29 = vmul.u32.u64.low 3817748708, %v4011_v19  ;;  %v13929_v30 = vmul.u32.u64.high 3817748708, %v4011_v19, %v13928_v29 }
 0x246   : > { %11907 = vmatprep.mubr.msk.f32.mxu0 %vm17257_vm1, %v3140_v31  ;;  %v13932_v31 = vadd.s32 48, %v13902_v10 }
 0x249   : > { %11908 = vmatmul.mubr.msk.f32.gmra.mrb[30].mxu0 %vm17257_vm1, %v3141_v32  ;;  %v4061_v32 = vmul.u32 18, %v4060_v20 }
 0x24a   : > { %11910 = vmatprep.mubr.msk.f32.mxu0 %vm17257_vm1, %v3142_v33 }
 0x24d   : > { %11911 = vmatmul.mubr.msk.f32.gmra.mrb[32].mxu0 %vm17257_vm1, %v3143_v34  ;;  %v13934_v33 = vmul.u32.u64.low 3817748708, %v4014_v27  ;;  %v13935_v34 = vmul.u32.u64.high 3817748708, %v4014_v27, %v13934_v33 }
 0x24e   : > { %11913 = vmatprep.mubr.msk.f32.mxu0 %vm17257_vm1, %v3144_v35  ;;  %v4050_v35 = vmul.u32 18, %v4049_v28 }
 0x251   : > { %11914 = vmatmul.mubr.msk.f32.gmra.mrb[34].mxu0 %vm17257_vm1, %v3145_v36 }
 0x252   : > { %11918 = vmatprep.mubr.msk.f32.mxu0 %vm17257_vm1, %v3540_v37  ;;  %v13938_v36 = vmul.u32.u64.low 3817748708, %v13932_v31  ;;  %v13939_v37 = vmul.u32.u64.high 3817748708, %v13932_v31, %v13938_v36 }
 0x255   : > { %11919 = vmatmul.mubr.msk.f32.vlgmr.msra.gmra.mrb[0].mxu0 %vm17257_vm1, %v3541_v38  ;;  %v4062_v38 = vsub.s32 %v4008_v11, %v4061_v32 }
 0x256   : > { %11921 = vmatprep.mubr.msk.f32.mxu0 %vm17257_vm1, %v3542_v39  ;;  %v4082_v39 = vshrl.u32 %v13918_v22, 4  ;;  %v14018_v22 = vmul.u32.u64.low 3817748708, %v13994_v12  ;;  %v14019_v23 = vmul.u32.u64.high 3817748708, %v13994_v12, %v14018_v22 }
 0x257   : > { %vm4440_vm2 = vcmp.ne.s32.totalorder %v4062_v38, 0  ;;  %vm4476_vm3 = vcmp.lt.s32.totalorder %v4062_v38, 0  ;;  %v14160_v22 = vadd.s32 176, %v13902_v10 }
 0x258   : > { %vm4512_vm4 = vmand %vm4476_vm3, %vm4440_vm2 }
 0x259   : > { %11922 = vmatmul.mubr.msk.f32.gmra.mrb[2].mxu0 %vm17257_vm1, %v3543_v40  ;;  %v4071_v40 = vshrl.u32 %v13921_v24, 4 }
 0x25a   : > { %11924 = vmatprep.mubr.msk.f32.mxu0 %vm17257_vm1, %v3544_v41  ;;  %v13944_v41 = vadd.s32 72, %v13902_v10 }
 0x25d   : > { %11925 = vmatmul.mubr.msk.f32.gmra.mrb[4].mxu0 %vm17257_vm1, %v3545_v42  ;;  %v4104_v42 = vshrl.u32 %v13924_v26, 4 }
 0x25e   : > { %11927 = vmatprep.mubr.msk.f32.mxu0 %vm17257_vm1, %v3546_v43  ;;  %v13948_v43 = vadd.s32 64, %v13902_v10 }
 0x261   : > { %11928 = vmatmul.mubr.msk.f32.gmra.mrb[6].mxu0 %vm17257_vm1, %v3547_v44  ;;  %v13951_v44 = vsub.s32 %v13902_v10, %v4050_v35 }
 0x262   : > { %11930 = vmatprep.mubr.msk.f32.mxu0 %vm17257_vm1, %v3548_v45  ;;  %v4093_v45 = vshrl.u32 %v13929_v30, 4 }
 0x263   : > { %vm4439_vm5 = vcmp.ne.s32.totalorder %v13951_v44, 0  ;;  %vm4475_vm6 = vcmp.lt.s32.totalorder %v13951_v44, 0 }
 0x264   : > { %vm14006_vm11 = vmand %vm4475_vm6, %vm4439_vm5 }
 0x265   : > { %11931 = vmatmul.mubr.msk.f32.gmra.mrb[8].mxu0 %vm17257_vm1, %v3549_v46  ;;  %v4083_v46 = vmul.u32 18, %v4082_v39 }
 0x266   : > { %11933 = vmatprep.mubr.msk.f32.mxu0 %vm17257_vm1, %v3550_v47  ;;  %v13955_v47 = vadd.s32 88, %v13902_v10 }
 0x269   : > { %11934 = vmatmul.mubr.msk.f32.gmra.mrb[10].mxu0 %vm17257_vm1, %v3551_v48  ;;  %v4548_v48 = vadd.s32 18, %v4062_v38 }
 0x26a   : > { %11936 = vmatprep.mubr.msk.f32.mxu0 %vm17257_vm1, %v3552_v49  ;;  %v4072_v49 = vmul.u32 18, %v4071_v40 }
 0x26d   : > { %11937 = vmatmul.mubr.msk.f32.gmra.mrb[12].mxu0 %vm17257_vm1, %v3553_v50 }
 0x26e   : > { %11939 = vmatprep.mubr.msk.f32.mxu0 %vm17257_vm1, %v3554_v51  ;;  %v13958_v50 = vmul.u32.u64.low 3817748708, %v13944_v41  ;;  %v13959_v51 = vmul.u32.u64.high 3817748708, %v13944_v41, %v13958_v50 }
 0x270   : > { %v4148_v13 = vshrl.u32 %v13959_v51, 4 }
 0x271   : > { %11940 = vmatmul.mubr.msk.f32.gmra.mrb[14].mxu0 %vm17257_vm1, %v3555_v52  ;;  %v4105_v52 = vmul.u32 18, %v4104_v42 }
 0x272   : > { %11942 = vmatprep.mubr.msk.f32.mxu0 %vm17257_vm1, %v3556_v53  ;;  %v4126_v53 = vshrl.u32 %v13935_v34, 4  ;;  %v4149_v28 = vmul.u32 18, %v4148_v13  ;;  %v14040_v34 = vadd.s32 112, %v13902_v10  ;;  %v14127_v13 = vadd.s32 168, %v13902_v10 }
 0x275   : > { %11943 = vmatmul.mubr.msk.f32.gmra.mrb[16].mxu0 %vm17257_vm1, %v3557_v54 }
 0x276   : > { %11945 = vmatprep.mubr.msk.f32.mxu0 %vm17257_vm1, %v3558_v55  ;;  %v13963_v54 = vmul.u32.u64.low 3817748708, %v13948_v43  ;;  %v13964_v55 = vmul.u32.u64.high 3817748708, %v13948_v43, %v13963_v54 }
 0x278   : > { %v4137_v15 = vshrl.u32 %v13964_v55, 4 }
 0x279   : > { %11946 = vmatmul.mubr.msk.f32.gmra.mrb[18].mxu0 %vm17257_vm1, %v3559_v56  ;;  %v4094_v56 = vmul.u32 18, %v4093_v45  ;;  %v14059_v45 = vsub.s32 %v13944_v41, %v4149_v28  ;;  %v14076_v41 = vmul.u32.u64.low 3817748708, %v14040_v34  ;;  %v14077_v51 = vmul.u32.u64.high 3817748708, %v14040_v34, %v14076_v41 }
 0x27a   : > { %11948 = vmatprep.mubr.msk.f32.mxu0 %vm17257_vm1, %v3560_v57  ;;  %v4115_v57 = vshrl.u32 %v13939_v37, 4 }
 0x27d   : > { %11949 = vmatmul.mubr.msk.f32.gmra.mrb[20].mxu0 %vm17257_vm1, %v3561_v58  ;;  %v13968_v58 = vadd.s32 80, %v13902_v10 }
 0x27e   : > { %11951 = vmatprep.mubr.msk.f32.mxu0 %vm17257_vm1, %v3562_v59  ;;  %v4084_v59 = vsub.s32 %v4010_v16, %v4083_v46 }
 0x280   : > { %vm4442_vm7 = vcmp.ne.s32.totalorder %v4084_v59, 0  ;;  %vm4478_vm8 = vcmp.lt.s32.totalorder %v4084_v59, 0  ;;  %v4550_v24 = vadd.s32 18, %v4084_v59 }
 0x281   : > { %11952 = vmatmul.mubr.msk.f32.gmra.mrb[22].mxu0 %vm17257_vm1, %v3563_v60  ;;  %vm14012_vm15 = vmand %vm4478_vm8, %vm4442_vm7 }
 0x282   : > { %11954 = vmatprep.mubr.msk.f32.mxu0 %vm17257_vm1, %v3564_v61  ;;  %v13971_v60 = vmul.u32.u64.low 3817748708, %v13955_v47  ;;  %v13972_v61 = vmul.u32.u64.high 3817748708, %v13955_v47, %v13971_v60  ;;  %v14050_v39 = vsel %vm14012_vm15, %v4550_v24, %v4084_v59  ;;  %v4556_v59 = vadd.s32 18, %v14059_v45 }
 0x284   : > { %v4170_v21 = vshrl.u32 %v13972_v61, 4 }
 0x285   : > { %11955 = vmatmul.mubr.msk.f32.gmra.mrb[24].mxu0 %vm17257_vm1, %v3565_v62  ;;  %v13975_v62 = vadd.s32 104, %v13902_v10 }
 0x286   : > { %11957 = vmatprep.mubr.msk.f32.mxu0 %vm17257_vm1, %v3566_v63  ;;  %v4547_v63 = vadd.s32 18, %v13951_v44  ;;  %v4171_v37 = vmul.u32 18, %v4170_v21 }
 0x287   : > { %v13990_v9 = vmul.u32.u64.low 3817748708, %v13975_v62  ;;  %v13991_v11 = vmul.u32.u64.high 3817748708, %v13975_v62, %v13990_v9 }
 0x288   : > { %v14045_v35 = vsel %vm14006_vm11, %v4547_v63, %v13951_v44  ;;  %v14085_v54 = vsub.s32 %v13955_v47, %v4171_v37  ;;  %v14098_v47 = vadd.s32 152, %v13902_v10 }
 0x289   : > { %11958 = vmatmul.mubr.msk.f32.gmra.mrb[26].mxu0 %vm17257_vm1, %v3567_v0  ;;  %v4073_v0 = vsub.s32 %v4009_v17, %v4072_v49 }
 0x28a   : > { %11960 = vmatprep.mubr.msk.f32.mxu0 %vm17257_vm1, %v3568_v1  ;;  %v13980_v1 = vsel %vm4512_vm4, %v4548_v48, %v4062_v38  ;;  %v4192_v38 = vshrl.u32 %v13991_v11, 4  ;;  %v14123_v9 = vmul.u32.u64.low 3817748708, %v14098_v47  ;;  %v14124_v11 = vmul.u32.u64.high 3817748708, %v14098_v47, %v14123_v9 }
 0x28b   : > { %vm4441_vm9 = vcmp.ne.s32.totalorder %v4073_v0, 0  ;;  %vm4477_vm10 = vcmp.lt.s32.totalorder %v4073_v0, 0  ;;  %v4549_v26 = vadd.s32 18, %v4073_v0 }
 0x28c   : > { %vm14023_vm3 = vmand %vm4477_vm10, %vm4441_vm9  ;;  %v4193_v55 = vmul.u32 18, %v4192_v38 }
 0x28d   : > { %11961 = vmatmul.mubr.msk.f32.gmra.mrb[28].mxu0 %vm17257_vm1, %v3569_v2  ;;  %v4106_v2 = vsub.s32 %v4012_v18, %v4105_v52  ;;  %v14054_v40 = vsel %vm14023_vm3, %v4549_v26, %v4073_v0  ;;  %v14080_v52 = vadd.s32 136, %v13902_v10  ;;  %vm4486_vm3 = vcmp.lt.s32.totalorder %v14085_v54, 0 }
 0x28e   : > { %11963 = vmatprep.mubr.msk.f32.mxu0 %vm17257_vm1, %v3570_v3  ;;  %v4127_v3 = vmul.u32 18, %v4126_v53  ;;  %v14172_v26 = vadd.s32 200, %v13902_v10 }
 0x28f   : > { %vm4444_vm12 = vcmp.ne.s32.totalorder %v4106_v2, 0  ;;  %vm4480_vm13 = vcmp.lt.s32.totalorder %v4106_v2, 0  ;;  %v14105_v63 = vmul.u32.u64.low 3817748708, %v14080_v52  ;;  %v14106_v0 = vmul.u32.u64.high 3817748708, %v14080_v52, %v14105_v63 }
 0x290   : > { %v4128_v14 = vsub.s32 %v4014_v27, %v4127_v3  ;;  %v4552_v27 = vadd.s32 18, %v4106_v2  ;;  %vm14028_vm4 = vmand %vm4480_vm13, %vm4444_vm12  ;;  %vm4448_vm12 = vcmp.ne.s32.totalorder %v14059_v45, 0  ;;  %vm4484_vm13 = vcmp.lt.s32.totalorder %v14059_v45, 0 }
 0x291   : > { %11964 = vmatmul.mubr.msk.f32.gmra.mrb[30].mxu0 %vm17257_vm1, %v3571_v4  ;;  %v13983_v4 = vadd.s32 96, %v13902_v10  ;;  %v14111_v3 = vsub.s32 %v13975_v62, %v4193_v55  ;;  %v4558_v62 = vadd.s32 18, %v14085_v54  ;;  %v4236_v25 = vshrl.u32 %v14106_v0, 4 }
 0x292   : > { %11966 = vmatprep.mubr.msk.f32.mxu0 %vm17257_vm1, %v3572_v5  ;;  %v4095_v5 = vsub.s32 %v4011_v19, %v4094_v56  ;;  %vm4446_vm5 = vcmp.ne.s32.totalorder %v4128_v14, 0  ;;  %vm4482_vm6 = vcmp.lt.s32.totalorder %v4128_v14, 0  ;;  %v4554_v36 = vadd.s32 18, %v4128_v14 }
 0x293   : > { %v13999_v16 = vmul.u32.u64.low 3817748708, %v13983_v4  ;;  %v14000_v17 = vmul.u32.u64.high 3817748708, %v13983_v4, %v13999_v16  ;;  %vm4518_vm10 = vmand %vm4482_vm6, %vm4446_vm5  ;;  %v14063_v44 = vsel %vm14028_vm4, %v4552_v27, %v4106_v2  ;;  %v4214_v56 = vshrl.u32 %v14019_v23, 4 }
 0x294   : > { %vm4443_vm14 = vcmp.ne.s32.totalorder %v4095_v5, 0  ;;  %vm4479_vm2 = vcmp.lt.s32.totalorder %v4095_v5, 0  ;;  %v4551_v30 = vadd.s32 18, %v4095_v5  ;;  %v14082_v53 = vsel %vm4518_vm10, %v4554_v36, %v4128_v14 }
 0x295   : > { %11967 = vmatmul.mubr.msk.f32.gmra.mrb[32].mxu0 %vm17257_vm1, %v3573_v6  ;;  %v4116_v6 = vmul.u32 18, %v4115_v57  ;;  %vm14034_vm7 = vmand %vm4479_vm2, %vm4443_vm14  ;;  %v4181_v49 = vshrl.u32 %v14000_v17, 4  ;;  %v14093_v57 = vadd.s32 128, %v13902_v10  ;;  %vm4450_vm2 = vcmp.ne.s32.totalorder %v14085_v54, 0 }
 0x296   : > { %11969 = vmatprep.mubr.msk.f32.mxu0 %vm17257_vm1, %v3574_v7  ;;  %v14067_v46 = vsel %vm14034_vm7, %v4551_v30, %v4095_v5  ;;  %v4215_v5 = vmul.u32 18, %v4214_v56  ;;  %v4203_v14 = vshrl.u32 %v14077_v51, 4  ;;  %vm4452_vm6 = vcmp.ne.s32.totalorder %v14111_v3, 0 }
 0x297   : > { %v4117_v19 = vsub.s32 %v13932_v31, %v4116_v6  ;;  %v4138_v31 = vmul.u32 18, %v4137_v15  ;;  %v4182_v60 = vmul.u32 18, %v4181_v49  ;;  %v14137_v16 = vadd.s32 160, %v13902_v10 }
 0x298   : > { %vm4488_vm7 = vcmp.lt.s32.totalorder %v14111_v3, 0  ;;  %v4204_v24 = vmul.u32 18, %v4203_v14  ;;  %v14187_v30 = vadd.s32 192, %v13902_v10  ;;  %v4560_v38 = vadd.s32 18, %v14111_v3 }
 0x299   : > { %11970 = vmatmul.mubr.msk.f32.gmra.mrb[34].mxu0 %vm17257_vm1, %v3575_v8  ;;  %v13986_v7 = vmul.u32.u64.low 3817748708, %v13968_v58  ;;  %v13987_v8 = vmul.u32.u64.high 3817748708, %v13968_v58, %v13986_v7  ;;  %vm4445_vm8 = vcmp.ne.s32.totalorder %v4117_v19, 0  ;;  %vm4481_vm9 = vcmp.lt.s32.totalorder %v4117_v19, 0 }
 0x29a   : > { %v4553_v42 = vadd.s32 18, %v4117_v19  ;;  %vm4517_vm11 = vmand %vm4481_vm9, %vm4445_vm8  ;;  %v14072_v48 = vsub.s32 %v13948_v43, %v4138_v31  ;;  %v14115_v6 = vmul.u32.u64.low 3817748708, %v14093_v57  ;;  %v14116_v7 = vmul.u32.u64.high 3817748708, %v14093_v57, %v14115_v6 }
 0x29b   : > { %v4159_v33 = vshrl.u32 %v13987_v8, 4  ;;  %v4183_v8 = vsub.s32 %v13983_v4, %v4182_v60  ;;  %v4216_v4 = vsub.s32 %v13994_v12, %v4215_v5  ;;  %vm14151_vm8 = vmand %vm4484_vm13, %vm4448_vm12  ;;  %v14237_v5 = vsub.s32 %v14040_v34, %v4204_v24 }
 0x29c   : > { %v14088_v43 = vsel %vm4517_vm11, %v4553_v42, %v4117_v19  ;;  %vm4447_vm14 = vcmp.ne.s32.totalorder %v14072_v48, 0  ;;  %vm4483_vm15 = vcmp.lt.s32.totalorder %v14072_v48, 0  ;;  %v4555_v2 = vadd.s32 18, %v14072_v48  ;;  %vm14178_vm12 = vmand %vm4486_vm3, %vm4450_vm2 }
 0x29d   : > { %v4160_v50 = vmul.u32 18, %v4159_v33  ;;  %v14145_v19 = vadd.s32 184, %v13902_v10  ;;  %vm4451_vm9 = vcmp.ne.s32.totalorder %v4183_v8, 0  ;;  %vm14166_vm10 = vmand %vm4483_vm15, %vm4447_vm14  ;;  %vm4487_vm11 = vcmp.lt.s32.totalorder %v4183_v8, 0 }
 0x29e   : > { %v14156_v12 = vmul.u32.u64.low 3817748708, %v14127_v13  ;;  %v14157_v21 = vmul.u32.u64.high 3817748708, %v14127_v13, %v14156_v12  ;;  %vm4454_vm13 = vcmp.ne.s32.totalorder %v4216_v4, 0  ;;  %vm4490_vm15 = vcmp.lt.s32.totalorder %v4216_v4, 0  ;;  %vm14206_vm2 = vmand %vm4488_vm7, %vm4452_vm6 }
 0x29f   : > { %v14102_v61 = vsub.s32 %v13968_v58, %v4160_v50  ;;  %v14119_v58 = vadd.s32 144, %v13902_v10  ;;  %v14183_v28 = vmul.u32.u64.low 3817748708, %v14137_v16  ;;  %v14184_v29 = vmul.u32.u64.high 3817748708, %v14137_v16, %v14183_v28  ;;  %vm14218_vm3 = vmand %vm4487_vm11, %vm4451_vm9 }
 0x2a0   : > { %v4225_v32 = vshrl.u32 %v14116_v7, 4  ;;  %v14199_v33 = vmul.u32.u64.low 3817748708, %v14145_v19  ;;  %v14200_v36 = vmul.u32.u64.high 3817748708, %v14145_v19, %v14199_v33  ;;  %v4258_v42 = vshrl.u32 %v14124_v11, 4 }
 0x2a1   : > { %vm4449_vm4 = vcmp.ne.s32.totalorder %v14102_v61, 0  ;;  %vm4485_vm5 = vcmp.lt.s32.totalorder %v14102_v61, 0  ;;  %v4557_v15 = vadd.s32 18, %v14102_v61  ;;  %v4559_v51 = vadd.s32 18, %v4183_v8 }
 0x2a2   : > { %v14141_v17 = vmul.u32.u64.low 3817748708, %v14119_v58  ;;  %v14142_v18 = vmul.u32.u64.high 3817748708, %v14119_v58, %v14141_v17  ;;  %vm14193_vm14 = vmand %vm4485_vm5, %vm4449_vm4  ;;  %v14213_v49 = vmul.u32.u64.low 3817748708, %v14160_v22  ;;  %v14214_v50 = vmul.u32.u64.high 3817748708, %v14160_v22, %v14213_v49 }
 0x2a3   : > { %v4562_v55 = vadd.s32 18, %v4216_v4  ;;  %v14223_v56 = vmul.u32.u64.low 3817748708, %v14172_v26  ;;  %v14224_v60 = vmul.u32.u64.high 3817748708, %v14172_v26, %v14223_v56  ;;  %v14229_v63 = vsel %vm14151_vm8, %v4556_v59, %v14059_v45  ;;  %vm14232_vm4 = vmand %vm4490_vm15, %vm4454_vm13 }
 0x2a4   : > { %17440 = vst [vmem:[#allocation4_spill] sm:$0xff] %v14229_v63  ;;  %v14240_v6 = vmul.u32.u64.low 3817748708, %v14187_v30  ;;  %v14241_v7 = vmul.u32.u64.high 3817748708, %v14187_v30, %v14240_v6  ;;  %v14246_v9 = vsel %vm14166_vm10, %v4555_v2, %v14072_v48  ;;  %v14251_v45 = vsel %vm14178_vm12, %v4558_v62, %v14085_v54 }
 0x2a5   : > { %17443 = vst [vmem:[#allocation5_spill] sm:$0xff] %v14246_v9  ;;  %17444 = vst [vmem:[#allocation6_spill] sm:$0xff] %v14251_v45  ;;  %v4237_v59 = vmul.u32 18, %v4236_v25  ;;  %v4226_v11 = vmul.u32 18, %v4225_v32  ;;  %v14256_v34 = vsel %vm14193_vm14, %v4557_v15, %v14102_v61  ;;  %v4247_v17 = vshrl.u32 %v14142_v18, 4 }
 0x2a6   : > { %17445 = vst [vmem:[#allocation7_spill] sm:$0xff] %v14256_v34  ;;  %v4259_v14 = vmul.u32 18, %v4258_v42  ;;  %v4280_v20 = vshrl.u32 %v14157_v21, 4  ;;  %v14263_v48 = vsel %vm14206_vm2, %v4560_v38, %v14111_v3  ;;  %v14267_v54 = vsel %vm14218_vm3, %v4559_v51, %v4183_v8 }
 0x2a7   : > { %17446 = vst [vmem:[#allocation8_spill] sm:$0xff] %v14263_v48  ;;  %17447 = vst [vmem:[#allocation9_spill] sm:$0xff] %v14267_v54  ;;  %v14271_v2 = vsel %vm14232_vm4, %v4562_v55, %v4216_v4  ;;  %v14274_v61 = vadd.s32 216, %v13902_v10  ;;  %vm4453_vm5 = vcmp.ne.s32.totalorder %v14237_v5, 0  ;;  %vm4489_vm6 = vcmp.lt.s32.totalorder %v14237_v5, 0 }
 0x2a8   : > { %17448 = vst [vmem:[#allocation10_spill] sm:$0xff] %v14271_v2  ;;  %v4269_v62 = vshrl.u32 %v14184_v29, 4  ;;  %v14280_v3 = vadd.s32 208, %v13902_v10  ;;  %v14283_v15 = vadd.s32 18, %v14237_v5  ;;  %v14286_v8 = vsub.s32 %v14080_v52, %v4237_v59  ;;  %vm14337_vm12 = vmand %vm4489_vm6, %vm4453_vm5 }
 0x2a9   : > { %v14289_v4 = vsub.s32 %v14093_v57, %v4226_v11  ;;  %v4302_v18 = vshrl.u32 %v14200_v36, 4  ;;  %v14293_v12 = vsub.s32 %v14098_v47, %v4259_v14  ;;  %v4248_v21 = vmul.u32 18, %v4247_v17 }
 0x2aa   : > { %v4281_v23 = vmul.u32 18, %v4280_v20  ;;  %v4291_v24 = vshrl.u32 %v14214_v50, 4  ;;  %v4324_v25 = vshrl.u32 %v14224_v60, 4  ;;  %v14302_v52 = vadd.s32 232, %v13902_v10 }
 0x2ab   : > { %v14298_v27 = vmul.u32.u64.low 3817748708, %v14274_v61  ;;  %v14299_v28 = vmul.u32.u64.high 3817748708, %v14274_v61, %v14298_v27  ;;  %v4270_v57 = vmul.u32 18, %v4269_v62  ;;  %v4313_v29 = vshrl.u32 %v14241_v7, 4 }
 0x2ac   : > { %v14306_v31 = vmul.u32.u64.low 3817748708, %v14280_v3  ;;  %v14307_v47 = vmul.u32.u64.high 3817748708, %v14280_v3, %v14306_v31  ;;  %vm4456_vm7 = vcmp.ne.s32.totalorder %v14286_v8, 0  ;;  %vm4492_vm8 = vcmp.lt.s32.totalorder %v14286_v8, 0 }
 0x2ad   : > { %v14312_v32 = vadd.s32 18, %v14286_v8  ;;  %v4303_v33 = vmul.u32 18, %v4302_v18  ;;  %vm4455_vm9 = vcmp.ne.s32.totalorder %v14289_v4, 0  ;;  %vm4491_vm10 = vcmp.lt.s32.totalorder %v14289_v4, 0  ;;  %vm14353_vm14 = vmand %vm4492_vm8, %vm4456_vm7 }
 0x2ae   : > { %v14317_v36 = vsub.s32 %v14119_v58, %v4248_v21  ;;  %v4292_v37 = vmul.u32 18, %v4291_v24  ;;  %v14320_v38 = vsub.s32 %v14127_v13, %v4281_v23  ;;  %v4325_v42 = vmul.u32 18, %v4324_v25  ;;  %vm14369_vm5 = vmand %vm4491_vm10, %vm4455_vm9 }
 0x2af   : > { %v14323_v49 = vmul.u32.u64.low 3817748708, %v14302_v52  ;;  %v14324_v50 = vmul.u32.u64.high 3817748708, %v14302_v52, %v14323_v49  ;;  %v14327_v41 = vadd.s32 18, %v14289_v4  ;;  %vm4458_vm11 = vcmp.ne.s32.totalorder %v14293_v12, 0 }
 0x2b0   : > { %v14331_v51 = vsub.s32 %v14137_v16, %v4270_v57  ;;  %v4314_v55 = vmul.u32 18, %v4313_v29  ;;  %vm4494_vm13 = vcmp.lt.s32.totalorder %v14293_v12, 0  ;;  %v4566_v13 = vadd.s32 18, %v14293_v12 }
 0x2b1   : > { %v14344_v56 = vsub.s32 %v14145_v19, %v4303_v33  ;;  %v14347_v60 = vadd.s32 224, %v13902_v10  ;;  %vm4457_vm15 = vcmp.ne.s32.totalorder %v14317_v36, 0  ;;  %vm4493_vm2 = vcmp.lt.s32.totalorder %v14317_v36, 0  ;;  %vm14383_vm9 = vmand %vm4494_vm13, %vm4458_vm11 }
 0x2b2   : > { %v4565_v0 = vadd.s32 18, %v14317_v36  ;;  %v14361_v19 = vsub.s32 %v14160_v22, %v4292_v37  ;;  %vm4460_vm6 = vcmp.ne.s32.totalorder %v14320_v38, 0  ;;  %vm4496_vm7 = vcmp.lt.s32.totalorder %v14320_v38, 0  ;;  %vm14395_vm8 = vmand %vm4493_vm2, %vm4457_vm15 }
 0x2b3   : > { %v4326_v7 = vsub.s32 %v14172_v26, %v4325_v42  ;;  %v4346_v22 = vshrl.u32 %v14299_v28, 4  ;;  %vm4459_vm10 = vcmp.ne.s32.totalorder %v14331_v51, 0  ;;  %vm4495_vm1 = vcmp.lt.s32.totalorder %v14331_v51, 0  ;;  %vm14411_vm15 = vmand %vm4496_vm7, %vm4460_vm6 }
 0x2b4   : > { %v4315_v26 = vsub.s32 %v14187_v30, %v4314_v55  ;;  %v4335_v11 = vshrl.u32 %v14307_v47, 4  ;;  %vm4462_vm11 = vcmp.ne.s32.totalorder %v14344_v56, 0  ;;  %vm4498_vm13 = vcmp.lt.s32.totalorder %v14344_v56, 0  ;;  %vm14423_vm0 = vmand %vm4495_vm1, %vm4459_vm10 }
 0x2b5   : > { %v14402_v17 = vmul.u32.u64.low 3817748708, %v14347_v60  ;;  %v14403_v20 = vmul.u32.u64.high 3817748708, %v14347_v60, %v14402_v17  ;;  %v4568_v62 = vadd.s32 18, %v14320_v38  ;;  %v14419_v18 = vadd.s32 248, %v13902_v10  ;;  %vm14435_vm4 = vmand %vm4498_vm13, %vm4462_vm11 }
 0x2b6   : > { %vm4464_vm3 = vcmp.ne.s32.totalorder %v4326_v7, 0  ;;  %vm4500_vm6 = vcmp.lt.s32.totalorder %v4326_v7, 0  ;;  %v4347_v23 = vmul.u32 18, %v4346_v22  ;;  %v4368_v24 = vshrl.u32 %v14324_v50, 4 }
 0x2b7   : > { %v4567_v25 = vadd.s32 18, %v14331_v51  ;;  %vm4463_vm1 = vcmp.ne.s32.totalorder %v4315_v26, 0  ;;  %vm4499_vm10 = vcmp.lt.s32.totalorder %v4315_v26, 0  ;;  %v4336_v28 = vmul.u32 18, %v4335_v11 }
 0x2b8   : > { %v14443_v57 = vsel %vm14337_vm12, %v14283_v15, %v14237_v5  ;;  %v14449_v29 = vsel %vm14353_vm14, %v14312_v32, %v14286_v8  ;;  %v4570_v31 = vadd.s32 18, %v14344_v56  ;;  %vm17467_vm11 = vcmp.ne.s32.totalorder %v14361_v19, 0  ;;  %vm14465_vm14 = vmand %vm4500_vm6, %vm4464_vm3 }
 0x2b9   : > { %17465 = vst [vmem:[#allocation11_spill] sm:$0xff] %v14443_v57  ;;  %17466 = vst [vmem:[#allocation12_spill] sm:$0xff] %v14449_v29  ;;  %vm17468_vm13 = vcmp.lt.s32.totalorder %v14361_v19, 0  ;;  %v4569_v33 = vadd.s32 18, %v14361_v19  ;;  %v4572_v15 = vadd.s32 18, %v4326_v7  ;;  %v4571_v8 = vadd.s32 18, %v4315_v26 }
 0x2ba   : > { %vm14456_vm7 = vmand %vm17468_vm13, %vm17467_vm11  ;;  %v14470_v32 = vmul.u32.u64.low 3817748708, %v14419_v18  ;;  %v14471_v37 = vmul.u32.u64.high 3817748708, %v14419_v18, %v14470_v32  ;;  %v14477_v42 = vsel %vm14369_vm5, %v14327_v41, %v14289_v4  ;;  %v14482_v49 = vsel %vm14383_vm9, %v4566_v13, %v14293_v12 }
 0x2bb   : > { %17473 = vst [vmem:[#allocation13_spill] sm:$0xff] %v14477_v42  ;;  %17474 = vst [vmem:[#allocation14_spill] sm:$0xff] %v14482_v49  ;;  %v14487_v50 = vsub.s32 %v14274_v61, %v4347_v23  ;;  %v4369_v55 = vmul.u32 18, %v4368_v24  ;;  %v14494_v4 = vsel %vm14395_vm8, %v4565_v0, %v14317_v36  ;;  %v14499_v12 = vsel %vm14411_vm15, %v4568_v62, %v14320_v38 }
 0x2bc   : > { %vm4535_vm3 = vmand %vm4499_vm10, %vm4463_vm1  ;;  %17475 = vst [vmem:[#allocation15_spill] sm:$0xff] %v14494_v4  ;;  %v14504_v61 = vsel %vm14423_vm0, %v4567_v25, %v14331_v51  ;;  %v14507_v41 = vsub.s32 %v14280_v3, %v4336_v28  ;;  %v14512_v58 = vsel %vm14435_vm4, %v4570_v31, %v14344_v56  ;;  %v14517_v36 = vsel %vm14456_vm7, %v4569_v33, %v14361_v19 }
 0x2bd   : > { %17476 = vst [vmem:[#allocation16_spill] sm:$0xff] %v14499_v12  ;;  %17477 = vst [vmem:[#allocation17_spill] sm:$0xff] %v14504_v61  ;;  %v4357_v38 = vshrl.u32 %v14403_v20, 4  ;;  %v14521_v13 = vadd.s32 240, %v13902_v10  ;;  %vm17480_vm0 = vcmp.le.s32.totalorder %v13980_v1, 16  ;;  %vm17481_vm5 = vcmp.ge.s32.totalorder %v13980_v1, 1 }
 0x2be   : > { %17478 = vst [vmem:[#allocation18_spill] sm:$0xff] %v14512_v58  ;;  %17479 = vst [vmem:[#allocation19_spill] sm:$0xff] %v14517_v36  ;;  %v17482_v3 = vmov 0  ;;  %v14533_v51 = vsel %vm14465_vm14, %v4572_v15, %v4326_v7  ;;  %v14535_v56 = vsel %vm4535_vm3, %v4571_v8, %v4315_v26  ;;  %v14538_v16 = vadd.s32 264, %v13902_v10 }
 0x2bf   : > { %vm14527_vm8 = vmand %vm17481_vm5, %vm17480_vm0  ;;  %17485 = vst [vmem:[#allocation21_spill] sm:$0xff] %v14533_v51  ;;  %v14541_v0 = vadd.s32 256, %v13902_v10  ;;  %vm17487_vm4 = vcmp.le.s32.totalorder %v14045_v35, 16  ;;  %vm17488_vm9 = vcmp.ge.s32.totalorder %v14045_v35, 1  ;;  %v17489_v19 = vmov 0 }
 0x2c0   : > { %v17483_v3 = vsel %vm14527_vm8, 4294967295, %v17482_v3  ;;  %17486 = vst [vmem:[#allocation22_spill] sm:$0xff] %v14535_v56  ;;  %vm14547_vm15 = vmand %vm17488_vm9, %vm17487_vm4  ;;  %vm4466_vm10 = vcmp.ne.s32.totalorder %v14487_v50, 0  ;;  %vm4502_vm13 = vcmp.lt.s32.totalorder %v14487_v50, 0  ;;  %v4574_v6 = vadd.s32 18, %v14487_v50 }
 0x2c1   : > { %17484 = vst [vmem:[#allocation20_spill] sm:$0xff] %v17483_v3  ;;  %v17490_v19 = vsel %vm14547_vm15, 4294967295, %v17489_v19  ;;  %v14557_v7 = vsub.s32 %v14302_v52, %v4369_v55  ;;  %vm4465_vm0 = vcmp.ne.s32.totalorder %v14507_v41, 0  ;;  %vm4501_vm5 = vcmp.lt.s32.totalorder %v14507_v41, 0 }
 0x2c2   : > { %17491 = vst [vmem:[#allocation23_spill] sm:$0xff] %v17490_v19  ;;  %v4573_v59 = vadd.s32 18, %v14507_v41  ;;  %v14565_v26 = vadd.s32 280, %v13902_v10  ;;  %vm17492_vm4 = vcmask 31744   ;;  %vm17493_vm9 = vcmp.le.s32.totalorder %v14050_v39, 16 }
 0x2c3   : > { %vm17494_vm14 = vcmp.ge.s32.totalorder %v14050_v39, 1  ;;  %v17495_v14 = vmov 0  ;;  %v4358_v17 = vmul.u32 18, %v4357_v38  ;;  %vm17498_vm7 = vmmov %vm17492_vm4  ;;  %v4390_v25 = vshrl.u32 %v14471_v37, 4 }
 0x2c4   : > { %vm14574_vm3 = vmand %vm17494_vm14, %vm17493_vm9  ;;  %v14579_v20 = vmul.u32.u64.low 3817748708, %v14521_v13  ;;  %v14580_v30 = vmul.u32.u64.high 3817748708, %v14521_v13, %v14579_v20  ;;  %v17504_v31 = vmov 0  ;;  %vm4504_vm11 = vcmp.lt.s32.totalorder %v14557_v7, 0 }
 0x2c5   : > { %v17496_v14 = vsel %vm14574_vm3, 4294967295, %v17495_v14  ;;  %vm14590_vm14 = vmand %vm4502_vm13, %vm4466_vm10  ;;  %vm4664_vm10 = vcmp.le.s32.totalorder %v14229_v63, 16  ;;  %vm4468_vm13 = vcmp.ne.s32.totalorder %v14557_v7, 0  ;;  %vm17513_vm2 = vcmp.ge.s32.totalorder %v14063_v44, 1 }
 0x2c6   : > { %17497 = vst [vmem:[#allocation24_spill] sm:$0xff] %v17496_v14  ;;  %vm17501_vm9 = vmmov %vm17492_vm4  ;;  %v14620_v8 = vmul.u32.u64.low 3817748708, %v14538_v16  ;;  %v14621_v32 = vmul.u32.u64.high 3817748708, %v14538_v16, %v14620_v8 }
 0x2c7   : > { %vm17507_vm12 = vmmov %vm17501_vm9  ;;  %v4391_v8 = vmul.u32 18, %v4390_v25 }
 0x328   : > { %v11920_v22 = vpop.f32.mrb[0].mxu0 }
 0x329   : > { %3971 = vst.msk [vmem:[#allocation2 + $0x8] sm:$0xff] %vm17492_vm4, %v11920_v22  ;;  %v4872_v52 = vsel %vm14527_vm8, %v11920_v22, 0.0  ;;  %v3755_v11 = vpop.f32.mrb[1].mxu0  ;;  %v17514_v22 = vmov 0 }
 0x32a   : > { %v4908_v62 = vsel %vm17498_vm7, %v4872_v52, 0.0  ;;  %v4986_v21 = vmul.f32 %v4872_v52, %v4872_v52  ;;  %3970 = vst.msk [vmem:[#allocation2] sm:$0xff] %vm17492_vm4, %v3755_v11  ;;  %v4871_v23 = vsel %vm14547_vm15, %v3755_v11, 0.0  ;;  %vm17502_vm7 = vcmp.le.s32.totalorder %v14054_v40, 16 }
 0x32b   : > { %v4907_v27 = vsel %vm17501_vm9, %v4871_v23, 0.0  ;;  %v4985_v28 = vmul.f32 %v4871_v23, %v4871_v23  ;;  %vm17503_vm4 = vcmp.ge.s32.totalorder %v14054_v40, 1  ;;  %v14638_v52 = vsel %vm14590_vm14, %v4574_v6, %v14487_v50 }
 0x32c   : > { %vm14600_vm1 = vmand %vm17503_vm4, %vm17502_vm7  ;;  %v5022_v47 = vsel %vm17507_vm12, %v4986_v21, 0.0  ;;  %v4909_v33 = vadd.f32 %v4908_v62, %v4907_v27  ;;  %v11923_v5 = vpop.f32.mrb[2].mxu0  ;;  %17517 = vst [vmem:[#allocation27_spill] sm:$0xff] %v14638_v52  ;;  %v4576_v11 = vadd.s32 18, %v14557_v7  ;;  %v14653_v50 = vadd.s32 272, %v13902_v10 }
 0x32d   : > { %v17505_v31 = vsel %vm14600_vm1, 4294967295, %v17504_v31  ;;  %vm14615_vm7 = vmand %vm4501_vm5, %vm4465_vm0  ;;  %v4874_v55 = vsel %vm14574_vm3, %v11923_v5, 0.0  ;;  %v3765_v38 = vpop.f32.mrb[3].mxu0  ;;  %v17524_v27 = vmov 0  ;;  %v17536_v23 = vmov 0 }
 0x32e   : > { %17506 = vst [vmem:[#allocation25_spill] sm:$0xff] %v17505_v31  ;;  %vm17510_vm4 = vmmov %vm17501_vm9  ;;  %vm17512_vm9 = vcmp.le.s32.totalorder %v14063_v44, 16  ;;  %v4988_v62 = vmul.f32 %v4874_v55, %v4874_v55  ;;  %v4873_v21 = vsel %vm14600_vm1, %v3765_v38, 0.0  ;;  %v14669_v10 = vsel %vm14615_vm7, %v4573_v59, %v14507_v41 }
 0x32f   : > { %v5021_v37 = vsel %vm17510_vm4, %v4985_v28, 0.0  ;;  %vm17511_vm12 = vmmov %vm17510_vm4  ;;  %v4987_v24 = vmul.f32 %v4873_v21, %v4873_v21  ;;  %17527 = vst [vmem:[#allocation29_spill] sm:$0xff] %v14669_v10  ;;  %v14672_v28 = vsub.s32 %v14347_v60, %v4358_v17  ;;  %v4379_v17 = vshrl.u32 %v14580_v30, 4 }
 0x330   : > { %3973 = vst.msk [vmem:[#allocation2 + $0x18] sm:$0xff] %vm17511_vm12, %v11923_v5  ;;  %vm14631_vm0 = vmand %vm17513_vm2, %vm17512_vm9  ;;  %v5023_v20 = vadd.f32 %v5022_v47, %v5021_v37  ;;  %vm17522_vm9 = vcmp.le.s32.totalorder %v14067_v46, 16  ;;  %v11926_v5 = vpop.f32.mrb[4].mxu0 }
 0x331   : > { %v17515_v22 = vsel %vm14631_vm0, 4294967295, %v17514_v22  ;;  %vm17518_vm5 = vmmov %vm17510_vm4  ;;  %v4876_v60 = vsel %vm14631_vm0, %v11926_v5, 0.0  ;;  %v3775_v41 = vpop.f32.mrb[5].mxu0 }
 0x332   : > { %17516 = vst [vmem:[#allocation26_spill] sm:$0xff] %v17515_v22  ;;  %3972 = vst.msk [vmem:[#allocation2 + $0x10] sm:$0xff] %vm17518_vm5, %v3765_v38  ;;  %v14677_v37 = vmul.u32.u64.low 3817748708, %v14541_v0  ;;  %v14678_v38 = vmul.u32.u64.high 3817748708, %v14541_v0, %v14677_v37 }
 0x333   : > { %vm14648_vm2 = vmand %vm4504_vm11, %vm4468_vm13  ;;  %vm17541_vm11 = vcmp.ge.s32.totalorder %v14088_v43, 1 }
 0x334   : > { %vm17521_vm14 = vmmov %vm17510_vm4  ;;  %vm17523_vm4 = vcmp.ge.s32.totalorder %v14067_v46, 1  ;;  %v14688_v59 = vsel %vm14648_vm2, %v4576_v11, %v14557_v7  ;;  %v4990_v7 = vmul.f32 %v4876_v60, %v4876_v60 }
 0x335   : > { %v4910_v6 = vsel %vm17521_vm14, %v4873_v21, 0.0  ;;  %vm14660_vm12 = vmand %vm17523_vm4, %vm17522_vm9  ;;  %17530 = vst [vmem:[#allocation30_spill] sm:$0xff] %v14688_v59 }
 0x336   : > { %v17525_v27 = vsel %vm14660_vm12, 4294967295, %v17524_v27  ;;  %v4911_v47 = vadd.f32 %v4910_v6, %v4909_v33  ;;  %vm17528_vm9 = vmmov %vm17518_vm5  ;;  %v4875_v6 = vsel %vm14660_vm12, %v3775_v41, 0.0 }
 0x337   : > { %17526 = vst [vmem:[#allocation28_spill] sm:$0xff] %v17525_v27  ;;  %v5024_v21 = vsel %vm17528_vm9, %v4987_v24, 0.0  ;;  %vm17529_vm4 = vmmov %vm17518_vm5  ;;  %vm17534_vm9 = vcmp.le.s32.totalorder %v14082_v53, 16  ;;  %v4989_v11 = vmul.f32 %v4875_v6, %v4875_v6  ;;  %v11929_v24 = vpop.f32.mrb[6].mxu0 }
 0x338   : > { %3975 = vst.msk [vmem:[#allocation2 + $0x28] sm:$0xff] %vm17529_vm4, %v11926_v5  ;;  %vm17531_vm7 = vmmov %vm17529_vm4  ;;  %v5025_v15 = vadd.f32 %v5024_v21, %v5023_v20  ;;  %v17542_v20 = vmov 0 }
 0x339   : > { %v4912_v25 = vsel %vm17531_vm7, %v4874_v55, 0.0  ;;  %vm17532_vm13 = vmmov %vm17529_vm4 }
 0x33a   : > { %v5026_v33 = vsel %vm17532_vm13, %v4988_v62, 0.0  ;;  %vm17533_vm14 = vmmov %vm17529_vm4  ;;  %vm17535_vm4 = vcmp.ge.s32.totalorder %v14082_v53, 1  ;;  %v4913_v30 = vadd.f32 %v4912_v25, %v4911_v47  ;;  %v14720_v47 = vsub.s32 %v14419_v18, %v4391_v8 }
 0x33b   : > { %3974 = vst.msk [vmem:[#allocation2 + $0x20] sm:$0xff] %vm17533_vm14, %v3775_v41  ;;  %vm14700_vm5 = vmand %vm17535_vm4, %vm17534_vm9  ;;  %vm17540_vm14 = vcmp.le.s32.totalorder %v14088_v43, 16  ;;  %v5027_v62 = vadd.f32 %v5026_v33, %v5025_v15  ;;  %v3785_v41 = vpop.f32.mrb[7].mxu0  ;;  %v4575_v25 = vadd.s32 18, %v14672_v28  ;;  %v17550_v8 = vmov 0 }
 0x33c   : > { %v17537_v23 = vsel %vm14700_vm5, 4294967295, %v17536_v23  ;;  %vm17539_vm13 = vmmov %vm17531_vm7  ;;  %v4878_v21 = vsel %vm14700_vm5, %v11929_v24, 0.0 }
 0x33d   : > { %17538 = vst [vmem:[#allocation31_spill] sm:$0xff] %v17537_v23  ;;  %v4914_v55 = vsel %vm17539_vm13, %v4875_v6, 0.0  ;;  %vm14711_vm6 = vmand %vm17541_vm11, %vm17540_vm14  ;;  %v4992_v6 = vmul.f32 %v4878_v21, %v4878_v21 }
 0x33e   : > { %v17543_v20 = vsel %vm14711_vm6, 4294967295, %v17542_v20  ;;  %v4915_v5 = vadd.f32 %v4914_v55, %v4913_v30  ;;  %vm17545_vm13 = vmmov %vm17531_vm7  ;;  %v4877_v18 = vsel %vm14711_vm6, %v3785_v41, 0.0  ;;  %vm17562_vm6 = vcmp.ne.s32.totalorder %v14672_v28, 0 }
 0x33f   : > { %17544 = vst [vmem:[#allocation32_spill] sm:$0xff] %v17543_v20  ;;  %v5028_v37 = vsel %vm17545_vm13, %v4989_v11, 0.0  ;;  %vm17546_vm11 = vmmov %vm17531_vm7  ;;  %vm17549_vm13 = vcmp.ge.s32.totalorder %v14229_v63, 1  ;;  %v4991_v11 = vmul.f32 %v4877_v18, %v4877_v18 }
 0x340   : > { %3977 = vst.msk [vmem:[#allocation2 + $0x38] sm:$0xff] %vm17546_vm11, %v11929_v24  ;;  %vm17547_vm14 = vmmov %vm17531_vm7  ;;  %v5029_v15 = vadd.f32 %v5028_v37, %v5027_v62  ;;  %v17557_v62 = vmov 0  ;;  %v11932_v37 = vpop.f32.mrb[8].mxu0 }
 0x341   : > { %v4916_v33 = vsel %vm17547_vm14, %v4876_v60, 0.0  ;;  %vm17548_vm9 = vmmov %vm17531_vm7  ;;  %vm17555_vm14 = vcmp.le.s32.totalorder %v14246_v9, 16  ;;  %v3795_v20 = vpop.f32.mrb[9].mxu0 }
 0x342   : > { %3976 = vst.msk [vmem:[#allocation2 + $0x30] sm:$0xff] %vm17548_vm9, %v3785_v41  ;;  %vm14735_vm11 = vmand %vm17549_vm13, %vm4664_vm10  ;;  %v4917_v55 = vadd.f32 %v4916_v33, %v4915_v5  ;;  %vm17556_vm9 = vcmp.ge.s32.totalorder %v14246_v9, 1  ;;  %v4412_v5 = vshrl.u32 %v14621_v32, 4  ;;  %vm17589_vm13 = vcmp.lt.s32.totalorder %v14720_v47, 0 }
 0x343   : > { %v17551_v8 = vsel %vm14735_vm11, 4294967295, %v17550_v8  ;;  %vm17553_vm4 = vmmov %vm17531_vm7 }
 0x344   : > { %17552 = vst [vmem:[#allocation33_spill] sm:$0xff] %v17551_v8  ;;  %v5030_v30 = vsel %vm17553_vm4, %v4990_v7, 0.0  ;;  %vm17554_vm7 = vmmov %vm17553_vm4  ;;  %v4380_v7 = vmul.u32 18, %v4379_v17 }
 0x345   : > { %v4918_v60 = vsel %vm17554_vm7, %v4877_v18, 0.0  ;;  %vm14745_vm2 = vmand %vm17556_vm9, %vm17555_vm14  ;;  %v5031_v24 = vadd.f32 %v5030_v30, %v5029_v15  ;;  %v4880_v18 = vsel %vm14735_vm11, %v11932_v37, 0.0  ;;  %v4920_v32 = vsel %vm17554_vm7, %v4878_v21, 0.0 }
 0x346   : > { %v17558_v62 = vsel %vm14745_vm2, 4294967295, %v17557_v62  ;;  %v4919_v41 = vadd.f32 %v4918_v60, %v4917_v55  ;;  %vm17560_vm14 = vmmov %vm17553_vm4  ;;  %v4879_v55 = vsel %vm14745_vm2, %v3795_v20, 0.0  ;;  %vm17569_vm11 = vcmp.ge.s32.totalorder %v14251_v45, 1 }
 0x347   : > { %17559 = vst [vmem:[#allocation34_spill] sm:$0xff] %v17558_v62  ;;  %v5032_v33 = vsel %vm17560_vm14, %v4991_v11, 0.0  ;;  %vm17561_vm9 = vmmov %vm17553_vm4  ;;  %vm17563_vm4 = vcmp.lt.s32.totalorder %v14672_v28, 0  ;;  %v17570_v60 = vmov 0  ;;  %v4994_v11 = vmul.f32 %v4880_v18, %v4880_v18 }
 0x348   : > { %3979 = vst.msk [vmem:[#allocation2 + $0x48] sm:$0xff] %vm17561_vm9, %v11932_v37  ;;  %vm14763_vm10 = vmand %vm17563_vm4, %vm17562_vm6  ;;  %v5033_v30 = vadd.f32 %v5032_v33, %v5031_v24  ;;  %vm17568_vm9 = vcmp.le.s32.totalorder %v14251_v45, 16  ;;  %v4921_v37 = vadd.f32 %v4920_v32, %v4919_v41  ;;  %v4993_v8 = vmul.f32 %v4879_v55, %v4879_v55  ;;  %v11935_v24 = vpop.f32.mrb[10].mxu0 }
 0x349   : > { %vm17566_vm5 = vmmov %vm17554_vm7  ;;  %vm17575_vm7 = vcmp.ge.s32.totalorder %v14256_v34, 1  ;;  %v14797_v41 = vsel %vm14763_vm10, %v4575_v25, %v14672_v28  ;;  %v4578_v33 = vadd.s32 18, %v14720_v47  ;;  %v14801_v32 = vsub.s32 %v14521_v13, %v4380_v7 }
 0x34a   : > { %v5034_v17 = vsel %vm17566_vm5, %v4992_v6, 0.0  ;;  %vm17567_vm14 = vmmov %vm17566_vm5  ;;  %v17576_v6 = vmov 0  ;;  %17579 = vst [vmem:[#allocation37_spill] sm:$0xff] %v14797_v41  ;;  %v17583_v28 = vmov 0  ;;  %v4413_v25 = vmul.u32 18, %v4412_v5 }
 0x34b   : > { %3978 = vst.msk [vmem:[#allocation2 + $0x40] sm:$0xff] %vm17567_vm14, %v3795_v20  ;;  %vm14777_vm6 = vmand %vm17569_vm11, %vm17568_vm9  ;;  %v5035_v20 = vadd.f32 %v5034_v17, %v5033_v30  ;;  %v3805_v30 = vpop.f32.mrb[11].mxu0  ;;  %vm17582_vm9 = vcmp.ge.s32.totalorder %v14263_v48, 1 }
 0x34c   : > { %v17571_v60 = vsel %vm14777_vm6, 4294967295, %v17570_v60  ;;  %vm17573_vm4 = vmmov %vm17566_vm5  ;;  %vm17574_vm5 = vcmp.le.s32.totalorder %v14256_v34, 16  ;;  %v4882_v17 = vsel %vm14777_vm6, %v11935_v24, 0.0 }
 0x34d   : > { %17572 = vst [vmem:[#allocation35_spill] sm:$0xff] %v17571_v60  ;;  %v4922_v21 = vsel %vm17573_vm4, %v4879_v55, 0.0  ;;  %vm14786_vm14 = vmand %vm17575_vm7, %vm17574_vm5  ;;  %v5036_v62 = vsel %vm17573_vm4, %v4993_v8, 0.0  ;;  %vm17581_vm7 = vcmp.le.s32.totalorder %v14263_v48, 16  ;;  %v4996_v15 = vmul.f32 %v4882_v17, %v4882_v17 }
 0x34e   : > { %v17577_v6 = vsel %vm14786_vm14, 4294967295, %v17576_v6  ;;  %v4923_v55 = vadd.f32 %v4922_v21, %v4921_v37  ;;  %vm17580_vm5 = vmmov %vm17573_vm4  ;;  %v5037_v7 = vadd.f32 %v5036_v62, %v5035_v20  ;;  %v4881_v8 = vsel %vm14786_vm14, %v3805_v30, 0.0 }
 0x34f   : > { %17578 = vst [vmem:[#allocation36_spill] sm:$0xff] %v17577_v6  ;;  %3981 = vst.msk [vmem:[#allocation2 + $0x58] sm:$0xff] %vm17580_vm5, %v11935_v24  ;;  %vm17588_vm5 = vcmp.ne.s32.totalorder %v14720_v47, 0  ;;  %v4995_v62 = vmul.f32 %v4881_v8, %v4881_v8  ;;  %v17596_v20 = vmov 0 }
 0x350   : > { %vm14811_vm10 = vmand %vm17582_vm9, %vm17581_vm7 }
 0x351   : > { %v17584_v28 = vsel %vm14811_vm10, 4294967295, %v17583_v28  ;;  %vm17586_vm2 = vmmov %vm17573_vm4 }
 0x352   : > { %17585 = vst [vmem:[#allocation38_spill] sm:$0xff] %v17584_v28  ;;  %v4924_v13 = vsel %vm17586_vm2, %v4880_v18, 0.0  ;;  %vm17587_vm4 = vmmov %vm17586_vm2 }
 0x353   : > { %3980 = vst.msk [vmem:[#allocation2 + $0x50] sm:$0xff] %vm17587_vm4, %v3805_v30  ;;  %vm14823_vm11 = vmand %vm17589_vm13, %vm17588_vm5  ;;  %v4925_v5 = vadd.f32 %v4924_v13, %v4923_v55  ;;  %vm17595_vm4 = vcmp.ge.s32.totalorder %v14267_v54, 1  ;;  %v11938_v30 = vpop.f32.mrb[12].mxu0  ;;  %v14843_v55 = vmul.u32.u64.low 3817748708, %v14565_v26  ;;  %v14844_v13 = vmul.u32.u64.high 3817748708, %v14565_v26, %v14843_v55 }
 0x354   : > { %vm17592_vm9 = vmmov %vm17586_vm2  ;;  %v4884_v60 = vsel %vm14811_vm10, %v11938_v30, 0.0  ;;  %vm17611_vm13 = vcmp.ge.s32.totalorder %v14443_v57, 1  ;;  %v4577_v55 = vadd.s32 18, %v14801_v32 }
 0x355   : > { %v5038_v21 = vsel %vm17592_vm9, %v4994_v11, 0.0  ;;  %vm17593_vm7 = vmmov %vm17586_vm2  ;;  %vm17594_vm2 = vcmp.le.s32.totalorder %v14267_v54, 16 }
 0x356   : > { %v4926_v18 = vsel %vm17593_vm7, %v4881_v8, 0.0  ;;  %vm14833_vm6 = vmand %vm17595_vm4, %vm17594_vm2  ;;  %v5039_v24 = vadd.f32 %v5038_v21, %v5037_v7  ;;  %v5040_v6 = vsel %vm17593_vm7, %v4995_v62, 0.0  ;;  %v3815_v7 = vpop.f32.mrb[13].mxu0  ;;  %v14853_v21 = vsel %vm14823_vm11, %v4578_v33, %v14720_v47 }
 0x357   : > { %v17597_v20 = vsel %vm14833_vm6, 4294967295, %v17596_v20  ;;  %v4927_v8 = vadd.f32 %v4926_v18, %v4925_v5  ;;  %vm17599_vm2 = vmmov %vm17593_vm7  ;;  %17600 = vst [vmem:[#allocation40_spill] sm:$0xff] %v14853_v21  ;;  %v4883_v5 = vsel %vm14833_vm6, %v3815_v7, 0.0  ;;  %vm17604_vm7 = vcmp.le.s32.totalorder %v14271_v2, 16  ;;  %v11941_v62 = vpop.f32.mrb[14].mxu0 }
 0x358   : > { %17598 = vst [vmem:[#allocation39_spill] sm:$0xff] %v17597_v20  ;;  %3983 = vst.msk [vmem:[#allocation2 + $0x68] sm:$0xff] %vm17599_vm2, %v11938_v30  ;;  %v5041_v27 = vadd.f32 %v5040_v6, %v5039_v24  ;;  %v17606_v18 = vmov 0  ;;  %v4998_v47 = vmul.f32 %v4884_v60, %v4884_v60  ;;  %v14884_v24 = vsub.s32 %v14538_v16, %v4413_v25 }
 0x359   : > { %vm17601_vm4 = vmmov %vm17599_vm2  ;;  %v17621_v25 = vmov 0 }
 0x35a   : > { %v4928_v11 = vsel %vm17601_vm4, %v4882_v17, 0.0  ;;  %vm17602_vm5 = vmmov %vm17599_vm2  ;;  %v4997_v17 = vmul.f32 %v4883_v5, %v4883_v5 }
 0x35b   : > { %v5042_v23 = vsel %vm17602_vm5, %v4996_v15, 0.0  ;;  %vm17603_vm9 = vmmov %vm17599_vm2  ;;  %vm17605_vm2 = vcmp.ge.s32.totalorder %v14271_v2, 1  ;;  %v4929_v33 = vadd.f32 %v4928_v11, %v4927_v8  ;;  %v17612_v15 = vmov 0 }
 0x35c   : > { %3982 = vst.msk [vmem:[#allocation2 + $0x60] sm:$0xff] %vm17603_vm9, %v3815_v7  ;;  %vm14864_vm14 = vmand %vm17605_vm2, %vm17604_vm7  ;;  %vm17610_vm9 = vcmp.le.s32.totalorder %v14443_v57, 16  ;;  %v5043_v37 = vadd.f32 %v5042_v23, %v5041_v27  ;;  %v3825_v23 = vpop.f32.mrb[15].mxu0  ;;  %vm17619_vm2 = vcmp.le.s32.totalorder %v14449_v29, 16 }
 0x35d   : > { %v17607_v18 = vsel %vm14864_vm14, 4294967295, %v17606_v18  ;;  %vm17609_vm5 = vmmov %vm17601_vm4  ;;  %v4886_v27 = vsel %vm14864_vm14, %v11941_v62, 0.0 }
 0x35e   : > { %17608 = vst [vmem:[#allocation41_spill] sm:$0xff] %v17607_v18  ;;  %v4930_v6 = vsel %vm17609_vm5, %v4883_v5, 0.0  ;;  %vm14875_vm6 = vmand %vm17611_vm13, %vm17610_vm9  ;;  %v5000_v5 = vmul.f32 %v4886_v27, %v4886_v27 }
 0x35f   : > { %v17613_v15 = vsel %vm14875_vm6, 4294967295, %v17612_v15  ;;  %v4931_v30 = vadd.f32 %v4930_v6, %v4929_v33  ;;  %vm17615_vm5 = vmmov %vm17601_vm4  ;;  %v4885_v16 = vsel %vm14875_vm6, %v3825_v23, 0.0  ;;  %v5046_v33 = vsel %vm17601_vm4, %v4998_v47, 0.0 }
 0x360   : > { %17614 = vst [vmem:[#allocation42_spill] sm:$0xff] %v17613_v15  ;;  %v5044_v11 = vsel %vm17615_vm5, %v4997_v17, 0.0  ;;  %vm17616_vm13 = vmmov %vm17601_vm4  ;;  %vm17620_vm5 = vcmp.ge.s32.totalorder %v14449_v29, 1  ;;  %v4999_v17 = vmul.f32 %v4885_v16, %v4885_v16  ;;  %vm17632_vm6 = vcmp.ne.s32.totalorder %v14801_v32, 0 }
 0x361   : > { %3985 = vst.msk [vmem:[#allocation2 + $0x78] sm:$0xff] %vm17616_vm13, %v11941_v62  ;;  %vm17617_vm9 = vmmov %vm17601_vm4  ;;  %v5045_v7 = vadd.f32 %v5044_v11, %v5043_v37  ;;  %v17627_v37 = vmov 0  ;;  %v11944_v11 = vpop.f32.mrb[16].mxu0 }
 0x362   : > { %v4932_v8 = vsel %vm17617_vm9, %v4884_v60, 0.0  ;;  %vm17618_vm7 = vmmov %vm17601_vm4  ;;  %vm17625_vm9 = vcmp.le.s32.totalorder %v14477_v42, 16 }
 0x363   : > { %3984 = vst.msk [vmem:[#allocation2 + $0x70] sm:$0xff] %vm17618_vm7, %v3825_v23  ;;  %vm14899_vm13 = vmand %vm17620_vm5, %vm17619_vm2  ;;  %v4933_v6 = vadd.f32 %v4932_v8, %v4931_v30  ;;  %vm17626_vm7 = vcmp.ge.s32.totalorder %v14477_v42, 1  ;;  %v5047_v62 = vadd.f32 %v5046_v33, %v5045_v7  ;;  %v3835_v7 = vpop.f32.mrb[17].mxu0  ;;  %vm17660_vm2 = vcmp.lt.s32.totalorder %v14884_v24, 0 }
 0x364   : > { %v17622_v25 = vsel %vm14899_vm13, 4294967295, %v17621_v25  ;;  %vm17624_vm11 = vmmov %vm17601_vm4  ;;  %v14919_v47 = vmul.u32.u64.low 3817748708, %v14653_v50  ;;  %v14920_v30 = vmul.u32.u64.high 3817748708, %v14653_v50, %v14919_v47 }
 0x365   : > { %17623 = vst [vmem:[#allocation43_spill] sm:$0xff] %v17622_v25  ;;  %v4934_v60 = vsel %vm17624_vm11, %v4885_v16, 0.0  ;;  %vm14909_vm14 = vmand %vm17626_vm7, %vm17625_vm9  ;;  %v4888_v16 = vsel %vm14899_vm13, %v11944_v11, 0.0  ;;  %vm17640_vm13 = vcmp.ge.s32.totalorder %v14482_v49, 1  ;;  %v17641_v47 = vmov 0 }
 0x366   : > { %v17628_v37 = vsel %vm14909_vm14, 4294967295, %v17627_v37  ;;  %v4935_v23 = vadd.f32 %v4934_v60, %v4933_v6  ;;  %vm17630_vm9 = vmmov %vm17601_vm4  ;;  %v5002_v25 = vmul.f32 %v4888_v16, %v4888_v16 }
 0x367   : > { %17629 = vst [vmem:[#allocation44_spill] sm:$0xff] %v17628_v37  ;;  %v5048_v8 = vsel %vm17630_vm9, %v4999_v17, 0.0  ;;  %vm17631_vm7 = vmmov %vm17601_vm4  ;;  %vm17633_vm4 = vcmp.lt.s32.totalorder %v14801_v32, 0 }
 0x368   : > { %3987 = vst.msk [vmem:[#allocation2 + $0x88] sm:$0xff] %vm17631_vm7, %v11944_v11  ;;  %vm14930_vm5 = vmand %vm17633_vm4, %vm17632_vm6  ;;  %v5049_v17 = vadd.f32 %v5048_v8, %v5047_v62  ;;  %v4887_v11 = vsel %vm14909_vm14, %v3835_v7, 0.0  ;;  %v11947_v8 = vpop.f32.mrb[18].mxu0 }
 0x369   : > { %vm17636_vm11 = vmmov %vm17631_vm7  ;;  %v5001_v18 = vmul.f32 %v4887_v11, %v4887_v11 }
 0x36a   : > { %v4936_v6 = vsel %vm17636_vm11, %v4886_v27, 0.0  ;;  %vm17637_vm10 = vmmov %vm17631_vm7  ;;  %vm17646_vm11 = vcmp.ge.s32.totalorder %v14494_v4, 1  ;;  %v15347_v31 = vld [vmem:[#allocation2 + $0x70] sm:$0xff] }
 0x36b   : > { %v5050_v60 = vsel %vm17637_vm10, %v5000_v5, 0.0  ;;  %vm17638_vm9 = vmmov %vm17631_vm7  ;;  %vm17639_vm7 = vcmp.le.s32.totalorder %v14482_v49, 16  ;;  %v4937_v15 = vadd.f32 %v4936_v6, %v4935_v23  ;;  %vm17645_vm10 = vcmp.le.s32.totalorder %v14494_v4, 16 }
 0x36c   : > { %3986 = vst.msk [vmem:[#allocation2 + $0x80] sm:$0xff] %vm17638_vm9, %v3835_v7  ;;  %vm14944_vm6 = vmand %vm17640_vm13, %vm17639_vm7  ;;  %v17647_v5 = vmov 0  ;;  %v5051_v62 = vadd.f32 %v5050_v60, %v5049_v17  ;;  %v14964_v23 = vsel %vm14930_vm5, %v4577_v55, %v14801_v32  ;;  %v17651_v7 = vshrl.u32 %v14678_v38, 4  ;;  %v3845_v17 = vpop.f32.mrb[19].mxu0 }
 0x36d   : > { %v17642_v47 = vsel %vm14944_vm6, 4294967295, %v17641_v47  ;;  %vm17644_vm4 = vmmov %vm17638_vm9  ;;  %17650 = vst [vmem:[#allocation47_spill] sm:$0xff] %v14964_v23  ;;  %v4890_v60 = vsel %vm14944_vm6, %v11947_v8, 0.0  ;;  %vm17654_vm7 = vcmp.ge.s32.totalorder %v14499_v12, 1  ;;  %v17655_v32 = vmov 0 }
 0x36e   : > { %17643 = vst [vmem:[#allocation45_spill] sm:$0xff] %v17642_v47  ;;  %v4938_v27 = vsel %vm17644_vm4, %v4887_v11, 0.0  ;;  %vm14953_vm9 = vmand %vm17646_vm11, %vm17645_vm10  ;;  %v4402_v6 = vmul.u32 18, %v17651_v7  ;;  %v4434_v11 = vshrl.u32 %v14844_v13, 4  ;;  %v5052_v20 = vsel %vm17644_vm4, %v5001_v18, 0.0 }
 0x36f   : > { %v17648_v5 = vsel %vm14953_vm9, 4294967295, %v17647_v5  ;;  %v4939_v37 = vadd.f32 %v4938_v27, %v4937_v15  ;;  %vm17652_vm10 = vmmov %vm17644_vm4  ;;  %vm17653_vm11 = vcmp.le.s32.totalorder %v14499_v12, 16  ;;  %v4580_v38 = vadd.s32 18, %v14884_v24  ;;  %3988 = vst.msk [vmem:[#allocation2 + $0x90] sm:$0xff] %vm17644_vm4, %v3845_v17  ;;  %v15351_v14 = vld [vmem:[#allocation2 + $0x88] sm:$0xff] }
 0x370   : > { %17649 = vst [vmem:[#allocation46_spill] sm:$0xff] %v17648_v5  ;;  %3989 = vst.msk [vmem:[#allocation2 + $0x98] sm:$0xff] %vm17652_vm10, %v11947_v8  ;;  %v5053_v15 = vadd.f32 %v5052_v20, %v5051_v62  ;;  %v5004_v18 = vmul.f32 %v4890_v60, %v4890_v60  ;;  %v4889_v55 = vsel %vm14953_vm9, %v3845_v17, 0.0  ;;  %vm17659_vm10 = vcmp.ne.s32.totalorder %v14884_v24, 0  ;;  %v11950_v17 = vpop.f32.mrb[20].mxu0 }
 0x371   : > { %vm14977_vm5 = vmand %vm17654_vm7, %vm17653_vm11  ;;  %v5003_v20 = vmul.f32 %v4889_v55, %v4889_v55  ;;  %v17667_v62 = vmov 0 }
 0x372   : > { %v17656_v32 = vsel %vm14977_vm5, 4294967295, %v17655_v32  ;;  %vm17658_vm14 = vmmov %vm17644_vm4  ;;  %v4892_v47 = vsel %vm14977_vm5, %v11950_v17, 0.0 }
 0x373   : > { %17657 = vst [vmem:[#allocation48_spill] sm:$0xff] %v17656_v32  ;;  %v4940_v13 = vsel %vm17658_vm14, %v4888_v16, 0.0  ;;  %vm14990_vm13 = vmand %vm17660_vm2, %vm17659_vm10  ;;  %vm17665_vm14 = vcmp.le.s32.totalorder %v14504_v61, 16  ;;  %v15361_v3 = vld [vmem:[#allocation2 + $0x80] sm:$0xff] }
 0x374   : > { %vm17663_vm7 = vmmov %vm17644_vm4  ;;  %v4941_v8 = vadd.f32 %v4940_v13, %v4939_v37  ;;  %v4435_v37 = vmul.u32 18, %v4434_v11  ;;  %v4423_v13 = vshrl.u32 %v14920_v30, 4 }
 0x375   : > { %v5054_v27 = vsel %vm17663_vm7, %v5002_v25, 0.0  ;;  %vm17664_vm11 = vmmov %vm17644_vm4  ;;  %vm17666_vm4 = vcmp.ge.s32.totalorder %v14504_v61, 1  ;;  %v15009_v25 = vsub.s32 %v14541_v0, %v4402_v6 }
 0x376   : > { %v4942_v16 = vsel %vm17664_vm11, %v4889_v55, 0.0  ;;  %vm15000_vm6 = vmand %vm17666_vm4, %vm17665_vm14  ;;  %v5055_v7 = vadd.f32 %v5054_v27, %v5053_v15  ;;  %v3855_v15 = vpop.f32.mrb[21].mxu0  ;;  %v15019_v27 = vsel %vm14990_vm13, %v4580_v38, %v14884_v24  ;;  %v5006_v24 = vmul.f32 %v4892_v47, %v4892_v47 }
 0x377   : > { %v17668_v62 = vsel %vm15000_vm6, 4294967295, %v17667_v62  ;;  %v4943_v55 = vadd.f32 %v4942_v16, %v4941_v8  ;;  %vm17670_vm11 = vmmov %vm17663_vm7  ;;  %v4891_v30 = vsel %vm15000_vm6, %v3855_v15, 0.0  ;;  %v17677_v8 = vmov 0  ;;  %v11953_v16 = vpop.f32.mrb[22].mxu0 }
 0x378   : > { %17669 = vst [vmem:[#allocation49_spill] sm:$0xff] %v17668_v62  ;;  %v5056_v5 = vsel %vm17670_vm11, %v5003_v20, 0.0  ;;  %vm17671_vm14 = vmmov %vm17663_vm7  ;;  %vm17675_vm11 = vcmp.le.s32.totalorder %v14512_v58, 16  ;;  %v5005_v33 = vmul.f32 %v4891_v30, %v4891_v30  ;;  %v15049_v20 = vsub.s32 %v14565_v26, %v4435_v37 }
 0x379   : > { %3991 = vst.msk [vmem:[#allocation2 + $0xa8] sm:$0xff] %vm17671_vm14, %v11950_v17  ;;  %vm17672_vm4 = vmmov %vm17663_vm7  ;;  %v5057_v11 = vadd.f32 %v5056_v5, %v5055_v7  ;;  %vm17676_vm14 = vcmp.ge.s32.totalorder %v14512_v58, 1  ;;  %v17683_v5 = vmov 0  ;;  %v4424_v7 = vmul.u32 18, %v4423_v13 }
 0x37a   : > { %v4944_v0 = vsel %vm17672_vm4, %v4890_v60, 0.0  ;;  %vm17673_vm10 = vmmov %vm17672_vm4  ;;  %v17692_v37 = vmov 0 }
 0x37b   : > { %v5058_v6 = vsel %vm17673_vm10, %v5004_v18, 0.0  ;;  %vm17674_vm7 = vmmov %vm17672_vm4  ;;  %v4945_v38 = vadd.f32 %v4944_v0, %v4943_v55  ;;  %vm17681_vm10 = vcmp.le.s32.totalorder %v14517_v36, 16  ;;  %v3865_v0 = vpop.f32.mrb[23].mxu0 }
 0x37c   : > { %3990 = vst.msk [vmem:[#allocation2 + $0xa0] sm:$0xff] %vm17674_vm7, %v3855_v15  ;;  %vm15030_vm9 = vmand %vm17676_vm14, %vm17675_vm11  ;;  %vm17682_vm7 = vcmp.ge.s32.totalorder %v14517_v36, 1  ;;  %v5059_v18 = vadd.f32 %v5058_v6, %v5057_v11  ;;  %vm17690_vm11 = vcmp.le.s32.totalorder %v14533_v51, 16 }
 0x37d   : > { %v17678_v8 = vsel %vm15030_vm9, 4294967295, %v17677_v8  ;;  %vm17680_vm13 = vmmov %vm17672_vm4  ;;  %v4894_v15 = vsel %vm15030_vm9, %v11953_v16, 0.0 }
 0x37e   : > { %17679 = vst [vmem:[#allocation50_spill] sm:$0xff] %v17678_v8  ;;  %v4946_v60 = vsel %vm17680_vm13, %v4891_v30, 0.0  ;;  %vm15039_vm4 = vmand %vm17682_vm7, %vm17681_vm10  ;;  %v5008_v30 = vmul.f32 %v4894_v15, %v4894_v15 }
 0x37f   : > { %v17684_v5 = vsel %vm15039_vm4, 4294967295, %v17683_v5  ;;  %v4947_v17 = vadd.f32 %v4946_v60, %v4945_v38  ;;  %vm17686_vm10 = vmmov %vm17680_vm13  ;;  %v4893_v26 = vsel %vm15039_vm4, %v3865_v0, 0.0  ;;  %vm17698_vm4 = vcmp.ge.s32.totalorder %v14535_v56, 1 }
 0x380   : > { %17685 = vst [vmem:[#allocation51_spill] sm:$0xff] %v17684_v5  ;;  %v5060_v55 = vsel %vm17686_vm10, %v5005_v33, 0.0  ;;  %vm17687_vm7 = vmmov %vm17686_vm10  ;;  %vm17691_vm10 = vcmp.ge.s32.totalorder %v14533_v51, 1  ;;  %v5007_v60 = vmul.f32 %v4893_v26, %v4893_v26  ;;  %v17699_v33 = vmov 0 }
 0x381   : > { %3993 = vst.msk [vmem:[#allocation2 + $0xb8] sm:$0xff] %vm17687_vm7, %v11953_v16  ;;  %vm17688_vm14 = vmmov %vm17687_vm7  ;;  %v5061_v11 = vadd.f32 %v5060_v55, %v5059_v18  ;;  %v11956_v16 = vpop.f32.mrb[24].mxu0 }
 0x382   : > { %v4948_v6 = vsel %vm17688_vm14, %v4892_v47, 0.0  ;;  %vm17689_vm6 = vmmov %vm17687_vm7 }
 0x383   : > { %3992 = vst.msk [vmem:[#allocation2 + $0xb0] sm:$0xff] %vm17689_vm6, %v3865_v0  ;;  %vm15064_vm7 = vmand %vm17691_vm10, %vm17690_vm11  ;;  %v4949_v13 = vadd.f32 %v4948_v6, %v4947_v17  ;;  %v15085_v17 = vsub.s32 %v14653_v50, %v4424_v7  ;;  %vm17704_vm11 = vcmp.lt.s32.totalorder %v15009_v25, 0 }
 0x384   : > { %v17693_v37 = vsel %vm15064_vm7, 4294967295, %v17692_v37  ;;  %vm17695_vm14 = vmmov %vm17689_vm6  ;;  %v4896_v6 = vsel %vm15064_vm7, %v11956_v16, 0.0  ;;  %vm17711_vm7 = vcmp.ge.s32.totalorder %v14638_v52, 1 }
 0x385   : > { %17694 = vst [vmem:[#allocation52_spill] sm:$0xff] %v17693_v37  ;;  %v5062_v47 = vsel %vm17695_vm14, %v5006_v24, 0.0  ;;  %vm17696_vm9 = vmmov %vm17689_vm6  ;;  %vm17697_vm6 = vcmp.le.s32.totalorder %v14535_v56, 16  ;;  %v4579_v24 = vadd.s32 18, %v15009_v25 }
 0x386   : > { %v4950_v38 = vsel %vm17696_vm9, %v4893_v26, 0.0  ;;  %vm15076_vm5 = vmand %vm17698_vm4, %vm17697_vm6  ;;  %v5063_v18 = vadd.f32 %v5062_v47, %v5061_v11  ;;  %v5064_v0 = vsel %vm17696_vm9, %v5007_v60, 0.0  ;;  %v3875_v11 = vpop.f32.mrb[25].mxu0  ;;  %vm17703_vm6 = vcmp.ne.s32.totalorder %v15009_v25, 0 }
 0x387   : > { %v17700_v33 = vsel %vm15076_vm5, 4294967295, %v17699_v33  ;;  %v4951_v55 = vadd.f32 %v4950_v38, %v4949_v13  ;;  %vm17702_vm4 = vmmov %vm17696_vm9  ;;  %v4895_v13 = vsel %vm15076_vm5, %v3875_v11, 0.0  ;;  %v17712_v38 = vmov 0 }
 0x388   : > { %17701 = vst [vmem:[#allocation53_spill] sm:$0xff] %v17700_v33  ;;  %3995 = vst.msk [vmem:[#allocation2 + $0xc8] sm:$0xff] %vm17702_vm4, %v11956_v16  ;;  %v5065_v47 = vadd.f32 %v5064_v0, %v5063_v18  ;;  %v5010_v60 = vmul.f32 %v4896_v6, %v4896_v6  ;;  %v5009_v37 = vmul.f32 %v4895_v13, %v4895_v13  ;;  %v11959_v0 = vpop.f32.mrb[26].mxu0 }
 0x389   : > { %vm15095_vm10 = vmand %vm17704_vm11, %vm17703_vm6  ;;  %v3885_v5 = vpop.f32.mrb[27].mxu0 }
 0x38a   : > { %vm17707_vm2 = vmmov %vm17702_vm4  ;;  %vm17710_vm4 = vcmp.le.s32.totalorder %v14638_v52, 16 }
 0x38b   : > { %v4952_v50 = vsel %vm17707_vm2, %v4894_v15, 0.0  ;;  %vm17708_vm14 = vmmov %vm17707_vm2 }
 0x38c   : > { %v5066_v7 = vsel %vm17708_vm14, %v5008_v30, 0.0  ;;  %vm17709_vm9 = vmmov %vm17707_vm2  ;;  %v4953_v16 = vadd.f32 %v4952_v50, %v4951_v55  ;;  %vm17717_vm14 = vcmp.ge.s32.totalorder %v14669_v10, 1  ;;  %v17718_v30 = vmov 0 }
 0x38d   : > { %3994 = vst.msk [vmem:[#allocation2 + $0xc0] sm:$0xff] %vm17709_vm9, %v3875_v11  ;;  %vm15109_vm11 = vmand %vm17711_vm7, %vm17710_vm4  ;;  %v5067_v18 = vadd.f32 %v5066_v7, %v5065_v47  ;;  %v15126_v11 = vsel %vm15095_vm10, %v4579_v24, %v15009_v25  ;;  %v4582_v55 = vadd.s32 18, %v15049_v20  ;;  %v17731_v47 = vmov 0 }
 0x38e   : > { %v17713_v38 = vsel %vm15109_vm11, 4294967295, %v17712_v38  ;;  %vm17715_vm6 = vmmov %vm17707_vm2  ;;  %vm17716_vm2 = vcmp.le.s32.totalorder %v14669_v10, 16  ;;  %17721 = vst [vmem:[#allocation56_spill] sm:$0xff] %v15126_v11  ;;  %v4898_v33 = vsel %vm15109_vm11, %v11959_v0, 0.0  ;;  %vm17730_vm11 = vcmp.ge.s32.totalorder %v14688_v59, 1 }
 0x38f   : > { %17714 = vst [vmem:[#allocation54_spill] sm:$0xff] %v17713_v38  ;;  %v4954_v15 = vsel %vm17715_vm6, %v4895_v13, 0.0  ;;  %vm15118_vm9 = vmand %vm17717_vm14, %vm17716_vm2  ;;  %vm17724_vm2 = vcmp.ne.s32.totalorder %v15049_v20, 0  ;;  %vm17725_vm14 = vcmp.lt.s32.totalorder %v15049_v20, 0  ;;  %v15393_v52 = vld [vmem:[#allocation2 + $0xc8] sm:$0xff] }
 0x390   : > { %v17719_v30 = vsel %vm15118_vm9, 4294967295, %v17718_v30  ;;  %v4955_v50 = vadd.f32 %v4954_v15, %v4953_v16  ;;  %vm17722_vm4 = vmmov %vm17715_vm6  ;;  %v4897_v7 = vsel %vm15118_vm9, %v3885_v5, 0.0  ;;  %v10459_v16 = vld [vmem:[%s17254_s2 + $0x4] sm:$0xf] }
 0x391   : > { %17720 = vst [vmem:[#allocation55_spill] sm:$0xff] %v17719_v30  ;;  %v5068_v13 = vsel %vm17722_vm4, %v5009_v37, 0.0  ;;  %vm17723_vm6 = vmmov %vm17722_vm4  ;;  %v5012_v37 = vmul.f32 %v4898_v33, %v4898_v33  ;;  %v11962_v30 = vpop.f32.mrb[28].mxu0 }
 0x392   : > { %3997 = vst.msk [vmem:[#allocation2 + $0xd8] sm:$0xff] %vm17723_vm6, %v11959_v0  ;;  %vm15138_vm13 = vmand %vm17725_vm14, %vm17724_vm2  ;;  %v5069_v26 = vadd.f32 %v5068_v13, %v5067_v18  ;;  %vm17729_vm6 = vcmp.le.s32.totalorder %v14688_v59, 16  ;;  %v5011_v0 = vmul.f32 %v4897_v7, %v4897_v7  ;;  %vm17736_vm14 = vcmp.le.s32.totalorder %v14797_v41, 16 }
 0x393   : > { %vm17728_vm7 = vmmov %vm17722_vm4  ;;  %3996 = vst.msk [vmem:[#allocation2 + $0xd0] sm:$0xff] %vm17722_vm4, %v3885_v5  ;;  %v17738_v5 = vmov 0 }
 0x394   : > { %v4956_v24 = vsel %vm17728_vm7, %v4896_v6, 0.0  ;;  %vm15151_vm5 = vmand %vm17730_vm11, %vm17729_vm6  ;;  %vm17741_vm11 = vcmask 1043456   ;;  %v15391_v10 = vld [vmem:[#allocation2 + $0xc0] sm:$0xff] }
 0x395   : > { %v17732_v47 = vsel %vm15151_vm5, 4294967295, %v17731_v47  ;;  %vm17734_vm7 = vmmov %vm17722_vm4  ;;  %v4957_v15 = vadd.f32 %v4956_v24, %v4955_v50  ;;  %11972 = vmatprep.subr.msk.mxu1 %vm17741_vm11, %v10459_v16 }
 0x396   : > { %17733 = vst [vmem:[#allocation57_spill] sm:$0xff] %v17732_v47  ;;  %v5070_v6 = vsel %vm17734_vm7, %v5010_v60, 0.0  ;;  %vm17735_vm2 = vmmov %vm17722_vm4  ;;  %vm17737_vm4 = vcmp.ge.s32.totalorder %v14797_v41, 1  ;;  %v15174_v60 = vsel %vm15138_vm13, %v4582_v55, %v15049_v20  ;;  %v4581_v20 = vadd.s32 18, %v15085_v17  ;;  %v15379_v41 = vld [vmem:[#allocation2 + $0xb8] sm:$0xff] }
 0x397   : > { %v4958_v18 = vsel %vm17735_vm2, %v4897_v7, 0.0  ;;  %vm15164_vm10 = vmand %vm17737_vm4, %vm17736_vm14  ;;  %v5071_v13 = vadd.f32 %v5070_v6, %v5069_v26  ;;  %v4900_v26 = vsel %vm15151_vm5, %v11962_v30, 0.0  ;;  %v3895_v7 = vpop.f32.mrb[29].mxu0  ;;  %v17747_v6 = vmov 0 }
 0x398   : > { %v17739_v5 = vsel %vm15164_vm10, 4294967295, %v17738_v5  ;;  %vm17742_vm2 = vmmov %vm17741_vm11  ;;  %v4959_v50 = vadd.f32 %v4958_v18, %v4957_v15  ;;  %vm17745_vm11 = vcmp.le.s32.totalorder %v14853_v21, 16  ;;  %vm17754_vm5 = vcmp.lt.s32.totalorder %v15085_v17, 0 }
 0x399   : > { %17740 = vst [vmem:[#allocation58_spill] sm:$0xff] %v17739_v5  ;;  %11973 = vmatpush3.msk.msra.mxu1 %vm17742_vm2, %v10459_v16  ;;  %vm17743_vm14 = vmmov %vm17734_vm7  ;;  %v5014_v18 = vmul.f32 %v4900_v26, %v4900_v26  ;;  %v15405_v51 = vld [vmem:[#allocation2 + $0xd8] sm:$0xff] }
 0x39a   : > { %v5072_v24 = vsel %vm17743_vm14, %v5011_v0, 0.0  ;;  %vm17744_vm4 = vmmov %vm17734_vm7  ;;  %vm17746_vm7 = vcmp.ge.s32.totalorder %v14853_v21, 1  ;;  %v15377_v21 = vld [vmem:[#allocation2 + $0xa8] sm:$0xff] }
 0x39b   : > { %3999 = vst.msk [vmem:[#allocation2 + $0xe8] sm:$0xff] %vm17744_vm4, %v11962_v30  ;;  %vm15185_vm6 = vmand %vm17746_vm7, %vm17745_vm11  ;;  %v5073_v16 = vadd.f32 %v5072_v24, %v5071_v13  ;;  %v4899_v30 = vsel %vm15164_vm10, %v3895_v7, 0.0  ;;  %v11965_v24 = vpop.f32.mrb[30].mxu0 }
 0x39c   : > { %v17748_v6 = vsel %vm15185_vm6, 4294967295, %v17747_v6  ;;  %vm17750_vm13 = vmmov %vm17744_vm4  ;;  %v5013_v47 = vmul.f32 %v4899_v30, %v4899_v30 }
 0x39d   : > { %17749 = vst [vmem:[#allocation59_spill] sm:$0xff] %v17748_v6  ;;  %v4960_v55 = vsel %vm17750_vm13, %v4898_v33, 0.0  ;;  %vm17751_vm2 = vmmov %vm17744_vm4  ;;  %vm17753_vm4 = vcmp.ne.s32.totalorder %v15085_v17, 0  ;;  %vm17758_vm13 = vcmp.le.s32.totalorder %v14964_v23, 16 }
 0x39e   : > { %v5074_v25 = vsel %vm17751_vm2, %v5012_v37, 0.0  ;;  %vm17752_vm14 = vmmov %vm17751_vm2  ;;  %v4961_v0 = vadd.f32 %v4960_v55, %v4959_v50  ;;  %v17760_v37 = vmov 0  ;;  %v4902_v55 = vsel %vm15185_vm6, %v11965_v24, 0.0 }
 0x39f   : > { %3998 = vst.msk [vmem:[#allocation2 + $0xe0] sm:$0xff] %vm17752_vm14, %v3895_v7  ;;  %vm15199_vm7 = vmand %vm17754_vm5, %vm17753_vm4  ;;  %v5075_v13 = vadd.f32 %v5074_v25, %v5073_v16  ;;  %vm4687_vm5 = vcmp.le.s32.totalorder %v15126_v11, 16  ;;  %v5016_v38 = vmul.f32 %v4902_v55, %v4902_v55 }
 0x3a0   : > { %vm17757_vm11 = vmmov %vm17751_vm2  ;;  %vm17759_vm2 = vcmp.ge.s32.totalorder %v14964_v23, 1  ;;  %v15222_v25 = vsel %vm15199_vm7, %v4581_v20, %v15085_v17 }
 0x3a1   : > { %v4962_v33 = vsel %vm17757_vm11, %v4899_v30, 0.0  ;;  %vm15208_vm14 = vmand %vm17759_vm2, %vm17758_vm13  ;;  %v3905_v30 = vpop.f32.mrb[31].mxu0 }
 0x3a2   : > { %v17761_v37 = vsel %vm15208_vm14, 4294967295, %v17760_v37  ;;  %v4963_v50 = vadd.f32 %v4962_v33, %v4961_v0  ;;  %vm17763_vm9 = vmmov %vm17757_vm11  ;;  %v17769_v0 = vmov 0  ;;  %v17775_v33 = vmov 0  ;;  %v15407_v36 = vld [vmem:[#allocation2 + $0xe8] sm:$0xff] }
 0x3a3   : > { %17762 = vst [vmem:[#allocation60_spill] sm:$0xff] %v17761_v37  ;;  %v5076_v7 = vsel %vm17763_vm9, %v5013_v47, 0.0  ;;  %vm17764_vm11 = vmmov %vm17763_vm9  ;;  %v4901_v47 = vsel %vm15208_vm14, %v3905_v30, 0.0 }
 0x3a4   : > { %4001 = vst.msk [vmem:[#allocation2 + $0xf8] sm:$0xff] %vm17764_vm11, %v11965_v24  ;;  %vm17765_vm13 = vmmov %vm17763_vm9  ;;  %v5077_v5 = vadd.f32 %v5076_v7, %v5075_v13  ;;  %vm17768_vm11 = vcmp.ge.s32.totalorder %v15019_v27, 1  ;;  %v5015_v15 = vmul.f32 %v4901_v47, %v4901_v47  ;;  %v5808_v13 = vld [vmem:[%s17254_s2] sm:$0xf]  ;;  %v11968_v7 = vpop.f32.mrb[32].mxu0 }
 0x3a5   : > { %v4964_v16 = vsel %vm17765_vm13, %v4900_v26, 0.0  ;;  %vm17766_vm2 = vmmov %vm17763_vm9  ;;  %vm17767_vm9 = vcmp.le.s32.totalorder %v15019_v27, 16  ;;  %vm17774_vm13 = vcmp.ge.s32.totalorder %v15126_v11, 1  ;;  %v15365_v11 = vld [vmem:[#allocation2 + $0x98] sm:$0xff] }
 0x3a6   : > { %4000 = vst.msk [vmem:[#allocation2 + $0xf0] sm:$0xff] %vm17766_vm2, %v3905_v30  ;;  %vm15232_vm4 = vmand %vm17768_vm11, %vm17767_vm9  ;;  %v4965_v20 = vadd.f32 %v4964_v16, %v4963_v50  ;;  %vm4689_vm9 = vcmp.le.s32.totalorder %v15222_v25, 16  ;;  %vm17778_vm11 = vcmask 1043456   ;;  %v15420_v58 = vld [vmem:[#allocation2 + $0xe0] sm:$0xff] }
 0x3a7   : > { %v17770_v0 = vsel %vm15232_vm4, 4294967295, %v17769_v0  ;;  %vm17772_vm10 = vmmov %vm17766_vm2  ;;  %12028 = vmatprep.subr.msk.mxu1 %vm17778_vm11, %v5808_v13  ;;  %v4904_v16 = vsel %vm15232_vm4, %v11968_v7, 0.0  ;;  %vm17783_vm11 = vcmp.le.s32.totalorder %v15174_v60, 16 }
 0x3a8   : > { %17771 = vst [vmem:[#allocation61_spill] sm:$0xff] %v17770_v0  ;;  %v5078_v17 = vsel %vm17772_vm10, %v5014_v18, 0.0  ;;  %vm17773_vm7 = vmmov %vm17766_vm2  ;;  %v5018_v37 = vmul.f32 %v4904_v16, %v4904_v16 }
 0x3a9   : > { %v4966_v26 = vsel %vm17773_vm7, %v4901_v47, 0.0  ;;  %vm15242_vm2 = vmand %vm17774_vm13, %vm4687_vm5  ;;  %v5079_v24 = vadd.f32 %v5078_v17, %v5077_v5  ;;  %v4968_v18 = vsel %vm17773_vm7, %v4902_v55, 0.0  ;;  %v3915_v47 = vpop.f32.mrb[33].mxu0  ;;  %v17785_v55 = vmov 0 }
 0x3aa   : > { %v17776_v33 = vsel %vm15242_vm2, 4294967295, %v17775_v33  ;;  %v4967_v50 = vadd.f32 %v4966_v26, %v4965_v20  ;;  %vm17779_vm14 = vmmov %vm17773_vm7  ;;  %v4903_v13 = vsel %vm15242_vm2, %v3915_v47, 0.0  ;;  %vm5756_vm2 = vcmask 24576  }
 0x3ab   : > { %17777 = vst [vmem:[#allocation62_spill] sm:$0xff] %v17776_v33  ;;  %v5080_v30 = vsel %vm17779_vm14, %v5015_v15, 0.0  ;;  %vm17780_vm5 = vmmov %vm17773_vm7  ;;  %vm17784_vm7 = vcmp.ge.s32.totalorder %v15174_v60, 1  ;;  %v5017_v15 = vmul.f32 %v4903_v13, %v4903_v13  ;;  %v15424_v12 = vld [vmem:[#allocation2 + $0xf8] sm:$0xff] }
 0x3ac   : > { %4003 = vst.msk [vmem:[#allocation2 + $0x108] sm:$0xff] %vm17780_vm5, %v11968_v7  ;;  %vm17781_vm13 = vmmov %vm17780_vm5  ;;  %v5081_v17 = vadd.f32 %v5080_v30, %v5079_v24  ;;  %v4969_v20 = vadd.f32 %v4968_v18, %v4967_v50  ;;  %v4970_v26 = vsel %vm17780_vm5, %v4903_v13, 0.0  ;;  %v11971_v7 = vpop.f32.mrb[34].mxu0  ;;  %v13148_v13 = vmov 0.0  }
 0x3ad   : > { %v5082_v5 = vsel %vm17781_vm13, %v5016_v38, 0.0  ;;  %vm17782_vm10 = vmmov %vm17780_vm5  ;;  %vm17788_vm13 = vcmp.ge.s32.totalorder %v15222_v25, 1  ;;  %v17789_v38 = vmov 0  ;;  %v3925_v50 = vpop.f32.mrb[35].mxu0  ;;  %5757 = vst.msk [vmem:[#allocation3] sm:$0x1] %vm5756_vm2, %v13148_v13 }
 0x3ae   : > { %4002 = vst.msk [vmem:[#allocation2 + $0x100] sm:$0xff] %vm17782_vm10, %v3915_v47  ;;  %vm15265_vm14 = vmand %vm17784_vm7, %vm17783_vm11  ;;  %v5083_v24 = vadd.f32 %v5082_v5, %v5081_v17  ;;  %v4971_v30 = vadd.f32 %v4970_v26, %v4969_v20  ;;  %v4972_v33 = vsel %vm17780_vm5, %v4904_v16, 0.0  ;;  %v15422_v61 = vld [vmem:[#allocation2 + $0xf0] sm:$0xff] }
 0x3af   : > { %v17786_v55 = vsel %vm15265_vm14, 4294967295, %v17785_v55  ;;  %vm15274_vm10 = vmand %vm17788_vm13, %vm4689_vm9  ;;  %v4906_v18 = vsel %vm15265_vm14, %v11971_v7, 0.0  ;;  %5758 = vst.msk [vmem:[#allocation3 + $0x145] sm:$0x1] %vm5756_vm2, %v13148_v13 }
 0x3b0   : > { %17787 = vst [vmem:[#allocation63_spill] sm:$0xff] %v17786_v55  ;;  %v17790_v38 = vsel %vm15274_vm10, 4294967295, %v17789_v38  ;;  %vm17792_vm11 = vmmov %vm17780_vm5  ;;  %v4905_v5 = vsel %vm15274_vm10, %v3925_v50, 0.0  ;;  %v5020_v17 = vmul.f32 %v4906_v18, %v4906_v18  ;;  %v4973_v20 = vadd.f32 %v4972_v33, %v4971_v30 }
 0x3b1   : > { %17791 = vst [vmem:[#allocation64_spill] sm:$0xff] %v17790_v38  ;;  %v5084_v47 = vsel %vm17792_vm11, %v5017_v15, 0.0  ;;  %vm17793_vm7 = vmmov %vm17780_vm5  ;;  %v5019_v15 = vmul.f32 %v4905_v5, %v4905_v5 }
 0x3b2   : > { %4005 = vst.msk [vmem:[#allocation2 + $0x118] sm:$0xff] %vm17793_vm7, %v11971_v7  ;;  %vm17794_vm9 = vmmov %vm17780_vm5  ;;  %v5085_v6 = vadd.f32 %v5084_v47, %v5083_v24 }
 0x3b3   : > { %v5086_v0 = vsel %vm17794_vm9, %v5018_v37, 0.0  ;;  %vm17795_vm13 = vmmov %vm17780_vm5  ;;  %vm17371_vm9 = vcmask 1045504  }
 0x3b4   : > { %4004 = vst.msk [vmem:[#allocation2 + $0x110] sm:$0xff] %vm17795_vm13, %v3925_v50  ;;  %vm17796_vm11 = vmmov %vm17780_vm5  ;;  %v5087_v7 = vadd.f32 %v5086_v0, %v5085_v6  ;;  %vm17372_vm13 = vcmask 1041408  }
 0x3b5   : > { %v4974_v26 = vsel %vm17796_vm11, %v4905_v5, 0.0  ;;  %vm17797_vm7 = vmmov %vm17780_vm5  ;;  %vm4796_vm11 = vcmp.eq.s32.totalorder %v15019_v27, 17 }
 0x3b6   : > { %v4975_v55 = vadd.f32 %v4974_v26, %v4973_v20  ;;  %v5088_v8 = vsel %vm17797_vm7, %v5019_v15, 0.0  ;;  %vm17798_vm2 = vmmov %vm17780_vm5  ;;  %vm17815_vm7 = vcmp.eq.s32.totalorder %v15174_v60, 17 }
 0x3b7   : > { %v4976_v13 = vsel %vm17798_vm2, %v4906_v18, 0.0  ;;  %v5089_v16 = vadd.f32 %v5088_v8, %v5087_v7  ;;  %vm17799_vm5 = vmmov %vm17798_vm2  ;;  %v15295_v7 = vld [vmem:[#allocation2] sm:$0xff]  ;;  %vm4761_vm2 = vcmp.eq.s32.totalorder %v15222_v25, 0 }
 0x3b8   : > { %v5090_v37 = vsel %vm17799_vm5, %v5020_v17, 0.0  ;;  %v4977_v24 = vadd.f32 %v4976_v13, %v4975_v55  ;;  %v15307_v13 = vld [vmem:[#allocation2 + $0x28] sm:$0xff]  ;;  %vm4760_vm5 = vcmp.eq.s32.totalorder %v15019_v27, 0 }
 0x3b9   : > { %v5091_v47 = vadd.f32 %v5090_v37, %v5089_v16  ;;  %v15309_v16 = vld [vmem:[#allocation2 + $0x30] sm:$0xff]  ;;  %v15311_v37 = vld [vmem:[#allocation2 + $0x38] sm:$0xff] }
 0x3ba   : > { %v4978_v62 = vrot.slane %v4977_v24, 4 }
 0x3bb   : > { %v5092_v32 = vrot.slane %v5091_v47, 4 }
 0x3bc   : > { %v4979_v38 = vadd.f32 %v4978_v62, %v4977_v24  ;;  %v15299_v62 = vld [vmem:[#allocation2 + $0x10] sm:$0xff]  ;;  %v15313_v24 = vld [vmem:[#allocation2 + $0x100] sm:$0xff] }
 0x3bd   : > { %v5093_v50 = vadd.f32 %v5092_v32, %v5091_v47  ;;  %v15297_v32 = vld [vmem:[#allocation2 + $0x8] sm:$0xff]  ;;  %v15315_v47 = vld [vmem:[#allocation2 + $0x110] sm:$0xff] }
 0x3be   : > { %v4980_v28 = vrot.slane %v4979_v38, 2 }
 0x3bf   : > { %v5094_v33 = vrot.slane %v5093_v50, 2 }
 0x3c0   : > { %v4981_v30 = vadd.f32 %v4980_v28, %v4979_v38  ;;  %v15301_v28 = vld [vmem:[#allocation2 + $0x18] sm:$0xff]  ;;  %v15303_v38 = vld [vmem:[#allocation2 + $0x108] sm:$0xff] }
 0x3c1   : > { %v5095_v22 = vadd.f32 %v5094_v33, %v5093_v50  ;;  %v15317_v50 = vld [vmem:[#allocation2 + $0x118] sm:$0xff]  ;;  %v15319_v33 = vld [vmem:[#allocation2 + $0x40] sm:$0xff] }
 0x3c2   : > { %v4982_v5 = vrot.slane %v4981_v30, 1 }
 0x3c3   : > { %v5096_v6 = vrot.slane %v5095_v22, 1 }
 0x3c4   : > { %v4983_v0 = vadd.f32 %v4982_v5, %v4981_v30  ;;  %v15321_v30 = vld [vmem:[#allocation2 + $0x48] sm:$0xff]  ;;  %v15323_v5 = vld [vmem:[#allocation2 + $0x58] sm:$0xff] }
 0x3c5   : > { %v5097_v20 = vadd.f32 %v5096_v6, %v5095_v22  ;;  %v15305_v22 = vld [vmem:[#allocation2 + $0x20] sm:$0xff]  ;;  %v15389_v6 = vld [vmem:[#allocation2 + $0xb0] sm:$0xff] }
 0x3c6   : > { %v15291_v26 = vmul.f32 0.00390625, %v4983_v0  ;;  %v15375_v0 = vld [vmem:[#allocation2 + $0xa0] sm:$0xff] }
 0x3c7   : > { %v5100_v18 = vmul.f32 0.00390625, %v5097_v20  ;;  %v15363_v20 = vld [vmem:[#allocation2 + $0x90] sm:$0xff] }
 0x3c8   : > { %v5101_v8 = vmul.f32 %v15291_v26, %v15291_v26  ;;  %v17800_v56 = vsub.f32 %v15313_v24, %v15291_v26  ;;  %v17801_v59 = vsub.f32 %v15303_v38, %v15291_v26  ;;  %v17802_v49 = vsub.f32 %v15315_v47, %v15291_v26 }
 0x3c9   : > { %v17803_v23 = vsub.f32 %v15317_v50, %v15291_v26  ;;  %v17804_v24 = vsub.f32 %v15295_v7, %v15291_v26  ;;  %v17805_v38 = vsub.f32 %v15297_v32, %v15291_v26  ;;  %v17806_v47 = vsub.f32 %v15299_v62, %v15291_v26 }
 0x3ca   : > { %v5102_v55 = vsub.f32 %v5100_v18, %v5101_v8  ;;  %v15333_v8 = vld [vmem:[#allocation2 + $0x50] sm:$0xff]  ;;  %v15349_v18 = vld [vmem:[#allocation2 + $0x78] sm:$0xff]  ;;  %v17807_v50 = vsub.f32 %v15301_v28, %v15291_v26  ;;  %v17808_v32 = vsub.f32 %v15305_v22, %v15291_v26  ;;  %v17809_v62 = vsub.f32 %v15307_v13, %v15291_v26 }
 0x3cb   : > { %v17810_v28 = vsub.f32 %v15309_v16, %v15291_v26 }
 0x3cc   : > { %v5103_v17 = vmax.f32 %v5102_v55, 0.0  ;;  %v15335_v55 = vld [vmem:[#allocation2 + $0x60] sm:$0xff] }
 0x3ce   : > { %v5104_v15 = vadd.f32 1e-05, %v5103_v17  ;;  %v15337_v17 = vld [vmem:[#allocation2 + $0x68] sm:$0xff] }
 0x3cf   : > { %v17823_v27 = vsub.f32 %v15337_v17, %v15291_v26  ;;  %v17827_v17 = vsub.f32 %v15351_v14, %v15291_v26  ;;  %v17831_v14 = vsub.f32 %v15377_v21, %v15291_v26  ;;  %v17835_v21 = vsub.f32 %v15393_v52, %v15291_v26 }
 0x3d0   : > { %13135 = vrsqrt.f32 %v5104_v15  ;;  %v15403_v15 = vld [vmem:[#allocation2 + $0xd0] sm:$0xff]  ;;  %v17839_v52 = vsub.f32 %v15407_v36, %v15291_v26 }
 0x3da   : > { %v15437_v4 = vpop.eup %13135 }
 0x3db   : > { %v5210_v29 = vmul.f32 %v15437_v4, %v17800_v56  ;;  %v5211_v57 = vmul.f32 %v15437_v4, %v17801_v59  ;;  %v5212_v42 = vmul.f32 %v15437_v4, %v17802_v49  ;;  %v5213_v19 = vmul.f32 %v15437_v4, %v17803_v23 }
 0x3dc   : > { %v5178_v56 = vmul.f32 %v15437_v4, %v17804_v24  ;;  %v5179_v59 = vmul.f32 %v15437_v4, %v17805_v38  ;;  %v5180_v49 = vmul.f32 %v15437_v4, %v17806_v47  ;;  %v5181_v23 = vmul.f32 %v15437_v4, %v17807_v50 }
 0x3dd   : > { %v15479_v2 = vmax.f32 %v5210_v29, 0.0  ;;  %v15481_v7 = vmax.f32 %v5211_v57, 0.0  ;;  %v5248_v24 = vmax.f32 %v5212_v42, 0.0  ;;  %v5249_v54 = vmax.f32 %v5213_v19, 0.0 }
 0x3de   : > { %v5182_v38 = vmul.f32 %v15437_v4, %v17808_v32  ;;  %v5183_v47 = vmul.f32 %v15437_v4, %v17809_v62  ;;  %v5184_v29 = vmul.f32 %v15437_v4, %v17810_v28  ;;  %v17811_v57 = vsub.f32 %v15311_v37, %v15291_v26 }
 0x3df   : > { %v17370_v19 = vrot.slane %v15481_v7, 2  ;;  %v5354_v22 = vrot.slane %v5248_v24, 2  ;;  %v5356_v50 = vrot.slane %v5249_v54, 2  ;;  %v17375_v32 = vrot.slane %v15479_v2, 6 }
 0x3e0   : > { %v5185_v42 = vmul.f32 %v15437_v4, %v17811_v57  ;;  %v5461_v13 = vrot.slane %v15481_v7, 6  ;;  %v5463_v48 = vrot.slane %v5248_v24, 6  ;;  %v5465_v62 = vrot.slane %v5249_v54, 6 }
 0x3e1   : > { %v5355_v16 = vsel %vm17371_vm9, %v17370_v19, %v5354_v22  ;;  %v5357_v37 = vsel %vm17371_vm9, %v5354_v22, %v5356_v50  ;;  %v5394_v28 = vsel %vm17371_vm9, %v5356_v50, 0.0  ;;  %v17812_v57 = vsub.f32 %v15319_v33, %v15291_v26 }
 0x3e2   : > { %v5462_v9 = vsel %vm17372_vm13, %v17375_v32, %v5461_v13  ;;  %v5464_v63 = vsel %vm17372_vm13, %v5461_v13, %v5463_v48  ;;  %v5466_v34 = vsel %vm17372_vm13, %v5463_v48, %v5465_v62  ;;  %v17813_v19 = vsub.f32 %v15321_v30, %v15291_v26 }
 0x3e3   : > { %v5186_v45 = vmul.f32 %v15437_v4, %v17812_v57  ;;  %v5609_v50 = vsel %vm4796_vm11, %v5462_v9, %v15481_v7  ;;  %vm17814_vm9 = vcmp.eq.s32.totalorder %v15222_v25, 17  ;;  %v5611_v57 = vsel %vm17815_vm7, %v5466_v34, %v5249_v54 }
 0x3e4   : > { %v5187_v22 = vmul.f32 %v15437_v4, %v17813_v19  ;;  %v5610_v33 = vsel %vm17814_vm9, %v5464_v63, %v5248_v24  ;;  %v17816_v13 = vsub.f32 %v15333_v8, %v15291_v26  ;;  %v5717_v30 = vsel %vm4760_vm5, %v5355_v16, %v5609_v50 }
 0x3e5   : > { %v5718_v19 = vsel %vm4761_vm2, %v5357_v37, %v5610_v33  ;;  %vm17817_vm13 = vcmp.eq.s32.totalorder %v15174_v60, 0  ;;  %v17818_v63 = vsub.f32 %v15323_v5, %v15291_v26  ;;  %vm17819_vm9 = vcmask 31744  }
 0x3e6   : > { %v5188_v48 = vmul.f32 %v15437_v4, %v17816_v13  ;;  %v5719_v9 = vsel %vm17817_vm13, %v5394_v28, %v5611_v57  ;;  %5753 = vst.msk [vmem:[#allocation3 + $0x11b] sm:$0xff] %vm17819_vm9, %v5717_v30  ;;  %vm17820_vm11 = vmmov %vm17819_vm9  ;;  %v17822_v34 = vsub.f32 %v15335_v55, %v15291_v26  ;;  %v5191_v60 = vmul.f32 %v15437_v4, %v17823_v27 }
 0x3e7   : > { %v5189_v24 = vmul.f32 %v15437_v4, %v17818_v63  ;;  %5754 = vst.msk [vmem:[#allocation3 + $0x123] sm:$0xff] %vm17820_vm11, %v5718_v19  ;;  %vm17821_vm7 = vmmov %vm17819_vm9  ;;  %v17824_v25 = vsub.f32 %v15347_v31, %v15291_v26  ;;  %v17825_v8 = vsub.f32 %v15349_v18, %v15291_v26  ;;  %v17826_v55 = vsub.f32 %v15361_v3, %v15291_v26 }
 0x3e8   : > { %5755 = vst.msk [vmem:[#allocation3 + $0x12b] sm:$0xff] %vm17821_vm7, %v5719_v9  ;;  %v5190_v54 = vmul.f32 %v15437_v4, %v17822_v34  ;;  %v5195_v37 = vmul.f32 %v15437_v4, %v17827_v17  ;;  %v17828_v31 = vsub.f32 %v15363_v20, %v15291_v26  ;;  %v17829_v18 = vsub.f32 %v15365_v11, %v15291_v26 }
 0x3e9   : > { %v5192_v5 = vmul.f32 %v15437_v4, %v17824_v25  ;;  %v5193_v62 = vmul.f32 %v15437_v4, %v17825_v8  ;;  %v5194_v16 = vmul.f32 %v15437_v4, %v17826_v55  ;;  %vm17373_vm13 = vcmask 25600  }
 0x3ea   : > { %v5196_v28 = vmul.f32 %v15437_v4, %v17828_v31  ;;  %v5197_v50 = vmul.f32 %v15437_v4, %v17829_v18  ;;  %v17830_v3 = vsub.f32 %v15375_v0, %v15291_v26  ;;  %v5199_v57 = vmul.f32 %v15437_v4, %v17831_v14 }
 0x3eb   : > { %v17832_v20 = vsub.f32 %v15389_v6, %v15291_v26  ;;  %v17833_v11 = vsub.f32 %v15379_v41, %v15291_v26  ;;  %v17834_v0 = vsub.f32 %v15391_v10, %v15291_v26  ;;  %v5203_v9 = vmul.f32 %v15437_v4, %v17835_v21 }
 0x3ec   : > { %v5198_v33 = vmul.f32 %v15437_v4, %v17830_v3  ;;  %v17836_v6 = vsub.f32 %v15403_v15, %v15291_v26  ;;  %v17837_v41 = vsub.f32 %v15405_v51, %v15291_v26  ;;  %v17838_v10 = vsub.f32 %v15420_v58, %v15291_v26 }
 0x3ed   : > { %v5200_v13 = vmul.f32 %v15437_v4, %v17832_v20  ;;  %v5201_v30 = vmul.f32 %v15437_v4, %v17833_v11  ;;  %v5202_v19 = vmul.f32 %v15437_v4, %v17834_v0  ;;  %v5207_v25 = vmul.f32 %v15437_v4, %v17839_v52 }
 0x3ee   : > { %v5204_v63 = vmul.f32 %v15437_v4, %v17836_v6  ;;  %v5205_v34 = vmul.f32 %v15437_v4, %v17837_v41  ;;  %v5206_v27 = vmul.f32 %v15437_v4, %v17838_v10  ;;  %v17840_v15 = vsub.f32 %v15422_v61, %v15291_v26 }
 0x3ef   : > { %v17841_v51 = vsub.f32 %v15424_v12, %v15291_v26  ;;  %v15625_v17 = vmax.f32 %v5178_v56, 0.0  ;;  %v15627_v58 = vmax.f32 %v5179_v59, 0.0  ;;  %v15629_v31 = vmax.f32 %v5180_v49, 0.0 }
 0x3f0   : > { %v5208_v8 = vmul.f32 %v15437_v4, %v17840_v15  ;;  %v15631_v18 = vmax.f32 %v5181_v23, 0.0  ;;  %v15633_v36 = vmax.f32 %v5182_v38, 0.0  ;;  %v15635_v3 = vmax.f32 %v5183_v47, 0.0 }
 0x3f1   : > { %v5209_v55 = vmul.f32 %v15437_v4, %v17841_v51  ;;  %v15637_v61 = vmax.f32 %v5184_v29, 0.0  ;;  %v15639_v14 = vmax.f32 %v5185_v42, 0.0  ;;  %v15641_v20 = vmax.f32 %v5186_v45, 0.0 }
 0x3f2   : > { %v15643_v12 = vmax.f32 %v5187_v22, 0.0  ;;  %v15645_v4 = vmax.f32 %v5188_v48, 0.0  ;;  %v15647_v26 = vmax.f32 %v5189_v24, 0.0  ;;  %v15649_v56 = vmax.f32 %v5190_v54, 0.0 }
 0x3f3   : > { %v15651_v59 = vmax.f32 %v5191_v60, 0.0  ;;  %v15653_v49 = vmax.f32 %v5192_v5, 0.0  ;;  %v15655_v23 = vmax.f32 %v5193_v62, 0.0  ;;  %v15657_v38 = vmax.f32 %v5194_v16, 0.0  ;;  %v5768_v16 = vld [vmem:[#allocation3 + $0x11f] sm:$0x3] }
 0x3f4   : > { %17842 = vst [vmem:[#allocation65_spill] sm:$0xff] %v15643_v12  ;;  %17843 = vst [vmem:[#allocation66_spill] sm:$0xff] %v15645_v4  ;;  %v15659_v47 = vmax.f32 %v5195_v37, 0.0  ;;  %v15661_v45 = vmax.f32 %v5196_v28, 0.0  ;;  %v15663_v29 = vmax.f32 %v5197_v50, 0.0  ;;  %v15665_v42 = vmax.f32 %v5198_v33, 0.0 }
 0x3f5   : > { %17844 = vst [vmem:[#allocation67_spill] sm:$0xff] %v15647_v26  ;;  %17845 = vst [vmem:[#allocation68_spill] sm:$0xff] %v15649_v56  ;;  %v15667_v22 = vmax.f32 %v5199_v57, 0.0  ;;  %v15669_v48 = vmax.f32 %v5200_v13, 0.0  ;;  %v15671_v24 = vmax.f32 %v5201_v30, 0.0  ;;  %v15673_v54 = vmax.f32 %v5202_v19, 0.0 }
 0x3f6   : > { %17846 = vst [vmem:[#allocation69_spill] sm:$0xff] %v15651_v59  ;;  %17847 = vst [vmem:[#allocation70_spill] sm:$0xff] %v15653_v49  ;;  %v15675_v60 = vmax.f32 %v5203_v9, 0.0  ;;  %v15677_v5 = vmax.f32 %v5204_v63, 0.0  ;;  %v15679_v62 = vmax.f32 %v5205_v34, 0.0  ;;  %v15681_v37 = vmax.f32 %v5206_v27, 0.0 }
 0x3f7   : > { %17848 = vst [vmem:[#allocation71_spill] sm:$0xff] %v15655_v23  ;;  %17849 = vst [vmem:[#allocation72_spill] sm:$0xff] %v15657_v38  ;;  %v15683_v28 = vmax.f32 %v5207_v25, 0.0  ;;  %v15685_v50 = vmax.f32 %v5208_v8, 0.0  ;;  %v15687_v33 = vmax.f32 %v5209_v55, 0.0  ;;  %v5287_v57 = vrot.slane %v15625_v17, 2 }
 0x3f8   : > { %17850 = vst [vmem:[#allocation73_spill] sm:$0xff] %v15659_v47  ;;  %17851 = vst [vmem:[#allocation74_spill] sm:$0xff] %v15661_v45  ;;  %v5288_v13 = vrot.slane %v15627_v58, 2  ;;  %v5290_v11 = vrot.slane %v15629_v31, 2  ;;  %v5292_v30 = vrot.slane %v15631_v18, 2  ;;  %v5294_v0 = vrot.slane %v15633_v36, 2 }
 0x3f9   : > { %17852 = vst [vmem:[#allocation75_spill] sm:$0xff] %v15663_v29  ;;  %17853 = vst [vmem:[#allocation76_spill] sm:$0xff] %v15665_v42  ;;  %v5296_v19 = vrot.slane %v15635_v3, 2  ;;  %v5298_v21 = vrot.slane %v15637_v61, 2  ;;  %v5300_v9 = vrot.slane %v15639_v14, 2  ;;  %vm17865_vm2 = vcmask 1045504  }
 0x3fa   : > { %17854 = vst [vmem:[#allocation77_spill] sm:$0xff] %v15667_v22  ;;  %17855 = vst [vmem:[#allocation78_spill] sm:$0xff] %v15669_v48  ;;  %v15699_v6 = vsel %vm17865_vm2, %v5287_v57, %v5288_v13  ;;  %v5302_v34 = vrot.slane %v15641_v20, 2  ;;  %v5304_v8 = vrot.slane %v15643_v12, 2  ;;  %v5306_v51 = vrot.slane %v15645_v4, 2 }
 0x3fb   : > { %17856 = vst [vmem:[#allocation79_spill] sm:$0xff] %v15671_v24  ;;  %17857 = vst [vmem:[#allocation80_spill] sm:$0xff] %v15673_v54  ;;  %v5308_v55 = vrot.slane %v15647_v26, 2  ;;  %v5312_v57 = vrot.slane %v15651_v59, 2 }
 0x3fc   : > { %17858 = vst [vmem:[#allocation81_spill] sm:$0xff] %v15675_v60  ;;  %17859 = vst [vmem:[#allocation82_spill] sm:$0xff] %v15677_v5  ;;  %v15721_v15 = vsel %vm17865_vm2, %v5300_v9, %v5302_v34 }
 0x3fd   : > { %17860 = vst [vmem:[#allocation83_spill] sm:$0xff] %v15679_v62  ;;  %17861 = vst [vmem:[#allocation84_spill] sm:$0xff] %v15681_v37 }
 0x3fe   : > { %17862 = vst [vmem:[#allocation85_spill] sm:$0xff] %v15683_v28  ;;  %17863 = vst [vmem:[#allocation86_spill] sm:$0xff] %v15685_v50 }
 0x3ff   : > { %17864 = vst [vmem:[#allocation87_spill] sm:$0xff] %v15687_v33  ;;  %5771 = vst.msk [vmem:[#allocation3 + $0x143] sm:$0x3] %vm17373_vm13, %v5768_v16  ;;  %v5310_v16 = vrot.slane %v15649_v56, 2 }
 0x400   : > { %17866 = vst [vmem:[#allocation88_spill] sm:$0xff] %v15699_v6  ;;  %vm17867_vm5 = vmmov %vm17865_vm2 }
 0x401   : > { %v15702_v63 = vsel %vm17867_vm5, %v5288_v13, %v5290_v11  ;;  %vm17869_vm9 = vmmov %vm17865_vm2  ;;  %17879 = vst [vmem:[#allocation95_spill] sm:$0xff] %v15721_v15  ;;  %v5314_v13 = vrot.slane %v15653_v49, 2 }
 0x402   : > { %17868 = vst [vmem:[#allocation89_spill] sm:$0xff] %v15702_v63  ;;  %v15705_v41 = vsel %vm17869_vm9, %v5290_v11, %v5292_v30  ;;  %vm17871_vm11 = vmmov %vm17865_vm2  ;;  %v5316_v11 = vrot.slane %v15655_v23, 2 }
 0x403   : > { %17870 = vst [vmem:[#allocation90_spill] sm:$0xff] %v15705_v41  ;;  %v15709_v10 = vsel %vm17871_vm11, %v5292_v30, %v5294_v0  ;;  %vm17873_vm7 = vmmov %vm17865_vm2  ;;  %v17943_v41 = vld [vmem:[#allocation5_spill] sm:$0xff] }
 0x404   : > { %17872 = vst [vmem:[#allocation91_spill] sm:$0xff] %v15709_v10  ;;  %v15712_v27 = vsel %vm17873_vm7, %v5294_v0, %v5296_v19  ;;  %vm17875_vm13 = vmmov %vm17865_vm2  ;;  %v17942_v10 = vld [vmem:[#allocation4_spill] sm:$0xff] }
 0x405   : > { %17874 = vst [vmem:[#allocation92_spill] sm:$0xff] %v15712_v27  ;;  %v15715_v52 = vsel %vm17875_vm13, %v5296_v19, %v5298_v21  ;;  %vm17877_vm10 = vmmov %vm17865_vm2  ;;  %v5427_v27 = vrot.slane %v15657_v38, 6  ;;  %vm4736_vm6 = vcmp.eq.s32.totalorder %v17942_v10, 0 }
 0x406   : > { %17876 = vst [vmem:[#allocation93_spill] sm:$0xff] %v15715_v52  ;;  %v15718_v25 = vsel %vm17877_vm10, %v5298_v21, %v5300_v9  ;;  %vm17880_vm13 = vmmov %vm17865_vm2  ;;  %v5318_v21 = vrot.slane %v15657_v38, 2  ;;  %v5425_v52 = vrot.slane %v15655_v23, 6  ;;  %v17952_v38 = vld [vmem:[#allocation6_spill] sm:$0xff]  ;;  %v17953_v23 = vld [vmem:[#allocation7_spill] sm:$0xff] }
 0x407   : > { %17878 = vst [vmem:[#allocation94_spill] sm:$0xff] %v15718_v25  ;;  %v15731_v30 = vsel %vm17880_vm13, %v5302_v34, %v5304_v8  ;;  %vm17882_vm10 = vmmov %vm17865_vm2  ;;  %v15750_v34 = vsel %vm17865_vm2, %v5314_v13, %v5316_v11 }
 0x408   : > { %17881 = vst [vmem:[#allocation96_spill] sm:$0xff] %v15731_v30  ;;  %v15734_v0 = vsel %vm17882_vm10, %v5304_v8, %v5306_v51  ;;  %vm17884_vm5 = vmmov %vm17865_vm2 }
 0x409   : > { %17883 = vst [vmem:[#allocation97_spill] sm:$0xff] %v15734_v0  ;;  %v15737_v19 = vsel %vm17884_vm5, %v5306_v51, %v5308_v55  ;;  %vm17886_vm9 = vmmov %vm17865_vm2  ;;  %v5320_v51 = vrot.slane %v15659_v47, 2  ;;  %v5324_v0 = vrot.slane %v15663_v29, 2 }
 0x40a   : > { %17885 = vst [vmem:[#allocation98_spill] sm:$0xff] %v15737_v19  ;;  %v15741_v9 = vsel %vm17886_vm9, %v5308_v55, %v5310_v16  ;;  %vm17888_vm11 = vmmov %vm17865_vm2  ;;  %v5322_v19 = vrot.slane %v15661_v45, 2  ;;  %v5326_v55 = vrot.slane %v15665_v42, 2 }
 0x40b   : > { %17887 = vst [vmem:[#allocation99_spill] sm:$0xff] %v15741_v9  ;;  %v15744_v32 = vsel %vm17888_vm11, %v5310_v16, %v5312_v57  ;;  %vm17890_vm7 = vmmov %vm17865_vm2  ;;  %v5328_v16 = vrot.slane %v15667_v22, 2 }
 0x40c   : > { %17889 = vst [vmem:[#allocation100_spill] sm:$0xff] %v15744_v32  ;;  %v15747_v15 = vsel %vm17890_vm7, %v5312_v57, %v5314_v13  ;;  %17892 = vst [vmem:[#allocation102_spill] sm:$0xff] %v15750_v34  ;;  %v5330_v32 = vrot.slane %v15669_v48, 2  ;;  %v5332_v57 = vrot.slane %v15671_v24, 2  ;;  %v5334_v34 = vrot.slane %v15673_v54, 2 }
 0x40d   : > { %17891 = vst [vmem:[#allocation101_spill] sm:$0xff] %v15747_v15  ;;  %vm17893_vm13 = vmmov %vm17865_vm2 }
 0x40e   : > { %v15753_v8 = vsel %vm17893_vm13, %v5316_v11, %v5318_v21  ;;  %vm17895_vm10 = vmmov %vm17865_vm2  ;;  %v15779_v30 = vsel %vm17865_vm2, %v5328_v16, %v5330_v32 }
 0x40f   : > { %17894 = vst [vmem:[#allocation103_spill] sm:$0xff] %v15753_v8  ;;  %v15763_v13 = vsel %vm17895_vm10, %v5318_v21, %v5320_v51  ;;  %vm17897_vm5 = vmmov %vm17865_vm2 }
 0x410   : > { %17896 = vst [vmem:[#allocation104_spill] sm:$0xff] %v15763_v13  ;;  %v15766_v11 = vsel %vm17897_vm5, %v5320_v51, %v5322_v19  ;;  %vm17899_vm9 = vmmov %vm17865_vm2 }
 0x411   : > { %17898 = vst [vmem:[#allocation105_spill] sm:$0xff] %v15766_v11  ;;  %v15769_v8 = vsel %vm17899_vm9, %v5322_v19, %v5324_v0  ;;  %vm17901_vm11 = vmmov %vm17865_vm2  ;;  %v5336_v19 = vrot.slane %v15675_v60, 2  ;;  %v5340_v11 = vrot.slane %v15679_v62, 2 }
 0x412   : > { %17900 = vst [vmem:[#allocation106_spill] sm:$0xff] %v15769_v8  ;;  %v15773_v15 = vsel %vm17901_vm11, %v5324_v0, %v5326_v55  ;;  %vm17903_vm7 = vmmov %vm17865_vm2  ;;  %v5338_v8 = vrot.slane %v15677_v5, 2  ;;  %v5342_v0 = vrot.slane %v15681_v37, 2 }
 0x413   : > { %17902 = vst [vmem:[#allocation107_spill] sm:$0xff] %v15773_v15  ;;  %v15776_v9 = vsel %vm17903_vm7, %v5326_v55, %v5328_v16  ;;  %17905 = vst [vmem:[#allocation109_spill] sm:$0xff] %v15779_v30  ;;  %v5344_v55 = vrot.slane %v15683_v28, 2  ;;  %v5348_v16 = vrot.slane %v15687_v33, 2  ;;  %v17917_v30 = vrot.slane %v15479_v2, 2 }
 0x414   : > { %17904 = vst [vmem:[#allocation108_spill] sm:$0xff] %v15776_v9  ;;  %vm17906_vm13 = vmmov %vm17865_vm2  ;;  %v5346_v9 = vrot.slane %v15685_v50, 2  ;;  %v15811_v13 = vsel %vm17865_vm2, %v5340_v11, %v5342_v0 }
 0x415   : > { %v15782_v21 = vsel %vm17906_vm13, %v5330_v32, %v5332_v57  ;;  %vm17908_vm10 = vmmov %vm17865_vm2  ;;  %17920 = vst [vmem:[#allocation116_spill] sm:$0xff] %v15811_v13 }
 0x416   : > { %17907 = vst [vmem:[#allocation110_spill] sm:$0xff] %v15782_v21  ;;  %v15785_v51 = vsel %vm17908_vm10, %v5332_v57, %v5334_v34  ;;  %vm17910_vm5 = vmmov %vm17865_vm2  ;;  %v17916_v21 = vrot.slane %v15481_v7, 2 }
 0x417   : > { %17909 = vst [vmem:[#allocation111_spill] sm:$0xff] %v15785_v51  ;;  %v15795_v32 = vsel %vm17910_vm5, %v5334_v34, %v5336_v19  ;;  %vm17912_vm9 = vmmov %vm17865_vm2 }
 0x418   : > { %17911 = vst [vmem:[#allocation112_spill] sm:$0xff] %v15795_v32  ;;  %v15798_v57 = vsel %vm17912_vm9, %v5336_v19, %v5338_v8  ;;  %vm17914_vm11 = vmmov %vm17865_vm2 }
 0x419   : > { %17913 = vst [vmem:[#allocation113_spill] sm:$0xff] %v15798_v57  ;;  %v15801_v51 = vsel %vm17914_vm11, %v5338_v8, %v5340_v11  ;;  %vm17918_vm7 = vmmov %vm17865_vm2  ;;  %v17927_v8 = vmov %v17917_v30  ;;  %v5399_v11 = vrot.slane %v15629_v31, 6  ;;  %vm17930_vm11 = vcmask 1041408  }
 0x41a   : > { %17915 = vst [vmem:[#allocation114_spill] sm:$0xff] %v15801_v51  ;;  %v15808_v15 = vsel %vm17918_vm7, %v17917_v30, %v17916_v21  ;;  %vm17921_vm13 = vmmov %vm17865_vm2  ;;  %v17376_v30 = vrot.slane %v15625_v17, 6  ;;  %v5397_v21 = vrot.slane %v15627_v58, 6  ;;  %v5413_v57 = vrot.slane %v15643_v12, 6  ;;  %v17975_v12 = vld [vmem:[#allocation22_spill] sm:$0xff] }
 0x41b   : > { %17919 = vst [vmem:[#allocation115_spill] sm:$0xff] %v15808_v15  ;;  %v15814_v25 = vsel %vm17921_vm13, %v5342_v0, %v5344_v55  ;;  %vm17923_vm10 = vmmov %vm17865_vm2  ;;  %v5401_v0 = vrot.slane %v15631_v18, 6  ;;  %v5403_v15 = vrot.slane %v15633_v36, 6 }
 0x41c   : > { %17922 = vst [vmem:[#allocation117_spill] sm:$0xff] %v15814_v25  ;;  %v15817_v34 = vsel %vm17923_vm10, %v5344_v55, %v5346_v9  ;;  %vm17925_vm5 = vmmov %vm17865_vm2  ;;  %v5405_v55 = vrot.slane %v15635_v3, 6 }
 0x41d   : > { %17924 = vst [vmem:[#allocation118_spill] sm:$0xff] %v15817_v34  ;;  %v15820_v19 = vsel %vm17925_vm5, %v5346_v9, %v5348_v16  ;;  %vm17928_vm9 = vmmov %vm17865_vm2  ;;  %v5407_v9 = vrot.slane %v15637_v61, 6 }
 0x41e   : > { %17926 = vst [vmem:[#allocation119_spill] sm:$0xff] %v15820_v19  ;;  %v15825_v7 = vsel %vm17928_vm9, %v5348_v16, %v17927_v8  ;;  %v15837_v19 = vsel %vm17930_vm11, %v17376_v30, %v5397_v21  ;;  %vm17931_vm7 = vmmov %vm17930_vm11  ;;  %v5409_v8 = vrot.slane %v15639_v14, 6 }
 0x41f   : > { %17929 = vst [vmem:[#allocation120_spill] sm:$0xff] %v15825_v7  ;;  %v15840_v16 = vsel %vm17931_vm7, %v5397_v21, %v5399_v11  ;;  %v5411_v7 = vrot.slane %v15641_v20, 6  ;;  %vm17932_vm2 = vmmov %vm17931_vm7 }
 0x420   : > { %v15845_v34 = vsel %vm17932_vm2, %v5399_v11, %v5401_v0  ;;  %vm17933_vm13 = vmmov %vm17932_vm2  ;;  %v5415_v11 = vrot.slane %v15645_v4, 6 }
 0x421   : > { %v15848_v25 = vsel %vm17933_vm13, %v5401_v0, %v5403_v15  ;;  %vm17934_vm10 = vmmov %vm17932_vm2  ;;  %v5419_v0 = vrot.slane %v15649_v56, 6  ;;  %v17963_v56 = vld [vmem:[#allocation13_spill] sm:$0xff] }
 0x422   : > { %v15851_v13 = vsel %vm17934_vm10, %v5403_v15, %v5405_v55  ;;  %vm17935_vm5 = vmmov %vm17932_vm2  ;;  %v5417_v15 = vrot.slane %v15647_v26, 6  ;;  %v17967_v26 = vld [vmem:[#allocation17_spill] sm:$0xff] }
 0x423   : > { %v15854_v51 = vsel %vm17935_vm5, %v5405_v55, %v5407_v9  ;;  %vm17936_vm9 = vmmov %vm17932_vm2  ;;  %v5421_v55 = vrot.slane %v15651_v59, 6  ;;  %v17955_v59 = vld [vmem:[#allocation9_spill] sm:$0xff] }
 0x424   : > { %v15857_v30 = vsel %vm17936_vm9, %v5407_v9, %v5409_v8  ;;  %vm17937_vm11 = vmmov %vm17932_vm2  ;;  %v5423_v9 = vrot.slane %v15653_v49, 6  ;;  %v17954_v49 = vld [vmem:[#allocation8_spill] sm:$0xff] }
 0x425   : > { %v15860_v21 = vsel %vm17937_vm11, %v5409_v8, %v5411_v7  ;;  %vm17938_vm11 = vmmov %vm17932_vm2 }
 0x426   : > { %v15875_v8 = vsel %vm17938_vm11, %v5411_v7, %v5413_v57  ;;  %vm17940_vm7 = vmmov %vm17932_vm2 }
 0x427   : > { %17939 = vst [vmem:[#allocation121_spill] sm:$0xff] %v15875_v8  ;;  %v15878_v32 = vsel %vm17940_vm7, %v5413_v57, %v5415_v11  ;;  %vm17944_vm14 = vmmov %vm17932_vm2  ;;  %v17986_v8 = vld [vmem:[#allocation37_spill] sm:$0xff] }
 0x428   : > { %17941 = vst [vmem:[#allocation122_spill] sm:$0xff] %v15878_v32  ;;  %v15887_v63 = vsel %vm17944_vm14, %v5415_v11, %v5417_v15  ;;  %vm17946_vm11 = vmmov %vm17932_vm2 }
 0x429   : > { %17945 = vst [vmem:[#allocation123_spill] sm:$0xff] %v15887_v63  ;;  %v15890_v7 = vsel %vm17946_vm11, %v5417_v15, %v5419_v0  ;;  %vm17948_vm7 = vmmov %vm17932_vm2  ;;  %v5433_v63 = vrot.slane %v15663_v29, 6  ;;  %v17972_v29 = vld [vmem:[#allocation18_spill] sm:$0xff] }
 0x42a   : > { %17947 = vst [vmem:[#allocation124_spill] sm:$0xff] %v15890_v7  ;;  %v15893_v57 = vsel %vm17948_vm7, %v5419_v0, %v5421_v55  ;;  %vm17950_vm9 = vmmov %vm17932_vm2  ;;  %v5429_v0 = vrot.slane %v15659_v47, 6  ;;  %v17962_v7 = vld [vmem:[#allocation12_spill] sm:$0xff]  ;;  %v17965_v47 = vld [vmem:[#allocation15_spill] sm:$0xff] }
 0x42b   : > { %17949 = vst [vmem:[#allocation125_spill] sm:$0xff] %v15893_v57  ;;  %v15896_v6 = vsel %vm17950_vm9, %v5421_v55, %v5423_v9  ;;  %vm17956_vm4 = vmmov %vm17932_vm2  ;;  %v5431_v57 = vrot.slane %v15661_v45, 6  ;;  %v17960_v55 = vld [vmem:[#allocation10_spill] sm:$0xff] }
 0x42c   : > { %17951 = vst [vmem:[#allocation126_spill] sm:$0xff] %v15896_v6  ;;  %v15903_v11 = vsel %vm17956_vm4, %v5423_v9, %v5425_v52  ;;  %vm17958_vm14 = vmmov %vm17932_vm2  ;;  %v17961_v6 = vld [vmem:[#allocation11_spill] sm:$0xff]  ;;  %v5435_v9 = vrot.slane %v15665_v42, 6  ;;  %v5441_v42 = vrot.slane %v15671_v24, 6 }
 0x42d   : > { %17957 = vst [vmem:[#allocation127_spill] sm:$0xff] %v15903_v11  ;;  %v15906_v15 = vsel %vm17958_vm14, %v5425_v52, %v5427_v27  ;;  %v5437_v11 = vrot.slane %v15667_v22, 6  ;;  %v5439_v52 = vrot.slane %v15669_v48, 6  ;;  %vm17968_vm5 = vmmov %vm17932_vm2  ;;  %v5443_v22 = vrot.slane %v15673_v54, 6  ;;  %v17973_v48 = vld [vmem:[#allocation19_spill] sm:$0xff] }
 0x42e   : > { %17959 = vst [vmem:[#allocation128_spill] sm:$0xff] %v15906_v15  ;;  %v17964_v15 = vld [vmem:[#allocation14_spill] sm:$0xff]  ;;  %v15923_v32 = vsel %vm17968_vm5, %v5427_v27, %v5429_v0  ;;  %vm17970_vm7 = vmmov %vm17932_vm2  ;;  %v15935_v45 = vsel %vm17932_vm2, %v5431_v57, %v5433_v63  ;;  %v17983_v54 = vld [vmem:[#allocation27_spill] sm:$0xff] }
 0x42f   : > { %17969 = vst [vmem:[#allocation14_spill] sm:$0xff] %v15923_v32  ;;  %v15926_v4 = vsel %vm17970_vm7, %v5429_v0, %v5431_v57  ;;  %17976 = vst [vmem:[#allocation19_spill] sm:$0xff] %v15935_v45  ;;  %v17985_v32 = vld [vmem:[#allocation30_spill] sm:$0xff]  ;;  %v5449_v45 = vrot.slane %v15679_v62, 6 }
 0x430   : > { %17971 = vst [vmem:[#allocation17_spill] sm:$0xff] %v15926_v4  ;;  %vm17977_vm5 = vmmov %vm17932_vm2  ;;  %v17984_v4 = vld [vmem:[#allocation29_spill] sm:$0xff] }
 0x431   : > { %v15938_v27 = vsel %vm17977_vm5, %v5433_v63, %v5435_v9  ;;  %vm17979_vm7 = vmmov %vm17932_vm2  ;;  %v15954_v63 = vsel %vm17932_vm2, %v5441_v42, %v5443_v22 }
 0x432   : > { %17978 = vst [vmem:[#allocation129_spill] sm:$0xff] %v15938_v27  ;;  %v15941_v0 = vsel %vm17979_vm7, %v5435_v9, %v5437_v11  ;;  %vm17981_vm11 = vmmov %vm17932_vm2  ;;  %v5445_v9 = vrot.slane %v15675_v60, 6  ;;  %v17991_v27 = vld [vmem:[#allocation56_spill] sm:$0xff] }
 0x433   : > { %17980 = vst [vmem:[#allocation130_spill] sm:$0xff] %v15941_v0  ;;  %v15944_v24 = vsel %vm17981_vm11, %v5437_v11, %v5439_v52  ;;  %vm17987_vm13 = vmmov %vm17932_vm2  ;;  %v5447_v0 = vrot.slane %v15677_v5, 6  ;;  %v17989_v11 = vld [vmem:[#allocation40_spill] sm:$0xff]  ;;  %vm4733_vm11 = vcmp.eq.s32.totalorder %v14088_v43, 0 }
 0x434   : > { %17982 = vst [vmem:[#allocation131_spill] sm:$0xff] %v15944_v24  ;;  %v15951_v57 = vsel %vm17987_vm13, %v5439_v52, %v5441_v42  ;;  %v17990_v24 = vld [vmem:[#allocation47_spill] sm:$0xff]  ;;  %v5451_v52 = vrot.slane %v15681_v37, 6  ;;  %v5455_v42 = vrot.slane %v15685_v50, 6  ;;  %vm17992_vm9 = vmmov %vm17932_vm2  ;;  %v5457_v37 = vrot.slane %v15687_v33, 6 }
 0x435   : > { %17988 = vst [vmem:[#allocation27_spill] sm:$0xff] %v15951_v57  ;;  %v5453_v57 = vrot.slane %v15683_v28, 6  ;;  %v15971_v5 = vsel %vm17992_vm9, %v5443_v22, %v5445_v9  ;;  %vm17993_vm14 = vmmov %vm17932_vm2  ;;  %v17995_v28 = vrot.slane %v15625_v17, 6  ;;  %vm4737_vm13 = vcmp.eq.s32.totalorder %v17953_v23, 0 }
 0x436   : > { %v15974_v60 = vsel %vm17993_vm14, %v5445_v9, %v5447_v0  ;;  %vm17996_vm7 = vmmov %vm17932_vm2 }
 0x437   : > { %17994 = vst [vmem:[#allocation29_spill] sm:$0xff] %v15974_v60  ;;  %v5503_v50 = vsel %vm17996_vm7, 0.0, %v17995_v28  ;;  %vm17997_vm10 = vmmov %vm17932_vm2  ;;  %vm4738_vm7 = vcmp.eq.s32.totalorder %v17952_v38, 0  ;;  %v18002_v60 = vrot.slane %v15479_v2, 6 }
 0x438   : > { %v5450_v22 = vsel %vm17997_vm10, %v5447_v0, %v5449_v45  ;;  %vm17998_vm9 = vmmov %vm17932_vm2  ;;  %vm18004_vm10 = vcmp.eq.s32.totalorder %v14045_v35, 17 }
 0x439   : > { %v5452_v62 = vsel %vm17998_vm9, %v5449_v45, %v5451_v52  ;;  %vm17999_vm14 = vmmov %vm17932_vm2  ;;  %v5576_v45 = vsel %vm18004_vm10, %v5503_v50, %v15625_v17  ;;  %vm18007_vm10 = vcmp.eq.s32.totalorder %v14050_v39, 17  ;;  %v18014_v50 = vld [vmem:[#allocation121_spill] sm:$0xff] }
 0x43a   : > { %v5454_v9 = vsel %vm17999_vm14, %v5451_v52, %v5453_v57  ;;  %vm18000_vm4 = vmmov %vm17932_vm2  ;;  %v5579_v17 = vsel %vm18007_vm10, %v15845_v34, %v15631_v18  ;;  %vm18009_vm14 = vcmp.eq.s32.totalorder %v14063_v44, 17  ;;  %vm18010_vm10 = vcmp.eq.s32.totalorder %v14088_v43, 17  ;;  %v18020_v34 = vld [vmem:[#allocation67_spill] sm:$0xff]  ;;  %v18026_v52 = vld [vmem:[#allocation69_spill] sm:$0xff] }
 0x43b   : > { %v5456_v33 = vsel %vm18000_vm4, %v5453_v57, %v5455_v42  ;;  %vm18001_vm12 = vmmov %vm17932_vm2  ;;  %vm18005_vm4 = vcmp.eq.s32.totalorder %v13980_v1, 17 }
 0x43c   : > { %v5458_v28 = vsel %vm18001_vm12, %v5455_v42, %v5457_v37  ;;  %vm18003_vm5 = vmmov %vm17932_vm2  ;;  %v5577_v57 = vsel %vm18005_vm4, %v15837_v19, %v15627_v58  ;;  %vm18008_vm4 = vcmp.eq.s32.totalorder %v14067_v46, 17  ;;  %vm18015_vm2 = vcmp.eq.s32.totalorder %v17942_v10, 17  ;;  %v18027_v42 = vld [vmem:[#allocation125_spill] sm:$0xff]  ;;  %v18054_v10 = vld [vmem:[#allocation78_spill] sm:$0xff] }
 0x43d   : > { %v5460_v0 = vsel %vm18003_vm5, %v5457_v37, %v18002_v60  ;;  %vm18006_vm5 = vcmp.eq.s32.totalorder %v14054_v40, 17  ;;  %v5580_v58 = vsel %vm18008_vm4, %v15848_v25, %v15633_v36  ;;  %v5581_v37 = vsel %vm18009_vm14, %v15851_v13, %v15635_v3  ;;  %v18013_v3 = vld [vmem:[#allocation65_spill] sm:$0xff]  ;;  %v18016_v13 = vld [vmem:[#allocation16_spill] sm:$0xff] }
 0x43e   : > { %v5578_v60 = vsel %vm18006_vm5, %v15840_v16, %v15629_v31  ;;  %v5582_v31 = vsel %vm18010_vm10, %v15854_v51, %v15637_v61  ;;  %vm18011_vm4 = vcmp.eq.s32.totalorder %v14082_v53, 17  ;;  %vm18012_vm14 = vcmp.eq.s32.totalorder %v17943_v41, 17  ;;  %v18017_v61 = vld [vmem:[#allocation66_spill] sm:$0xff]  ;;  %v18024_v16 = vld [vmem:[#allocation124_spill] sm:$0xff]  ;;  %v18055_v41 = vld [vmem:[#allocation131_spill] sm:$0xff] }
 0x43f   : > { %v5583_v18 = vsel %vm18011_vm4, %v15857_v30, %v15639_v14  ;;  %v5584_v36 = vsel %vm18012_vm14, %v15860_v21, %v15641_v20  ;;  %v5585_v25 = vsel %vm18015_vm2, %v18014_v50, %v18013_v3  ;;  %v18018_v14 = vld [vmem:[#allocation122_spill] sm:$0xff]  ;;  %vm18019_vm4 = vcmp.eq.s32.totalorder %v17953_v23, 17  ;;  %v18021_v20 = vld [vmem:[#allocation123_spill] sm:$0xff]  ;;  %v18023_v30 = vld [vmem:[#allocation68_spill] sm:$0xff] }
 0x440   : > { %v5586_v51 = vsel %vm18019_vm4, %v18018_v14, %v18017_v61  ;;  %vm18022_vm14 = vcmp.eq.s32.totalorder %v17952_v38, 17  ;;  %vm18025_vm2 = vcmp.eq.s32.totalorder %v17955_v59, 17  ;;  %vm18028_vm5 = vcmp.eq.s32.totalorder %v17954_v49, 17  ;;  %v18029_v50 = vld [vmem:[#allocation21_spill] sm:$0xff]  ;;  %v18030_v61 = vld [vmem:[#allocation70_spill] sm:$0xff]  ;;  %v18036_v49 = vld [vmem:[#allocation72_spill] sm:$0xff] }
 0x441   : > { %v5587_v19 = vsel %vm18022_vm14, %v18021_v20, %v18020_v34  ;;  %v5588_v21 = vsel %vm18025_vm2, %v18024_v16, %v18023_v30  ;;  %v5589_v3 = vsel %vm18028_vm5, %v18027_v42, %v18026_v52  ;;  %v18031_v14 = vld [vmem:[#allocation126_spill] sm:$0xff]  ;;  %vm18032_vm14 = vcmp.eq.s32.totalorder %v17961_v6, 17  ;;  %v18033_v20 = vld [vmem:[#allocation71_spill] sm:$0xff]  ;;  %v18037_v52 = vld [vmem:[#allocation128_spill] sm:$0xff] }
 0x442   : > { %v5590_v34 = vsel %vm18032_vm14, %v18031_v14, %v18030_v61  ;;  %v18034_v30 = vld [vmem:[#allocation127_spill] sm:$0xff]  ;;  %vm18035_vm2 = vcmp.eq.s32.totalorder %v17960_v55, 17  ;;  %vm18038_vm5 = vcmp.eq.s32.totalorder %v17963_v56, 17  ;;  %v18039_v59 = vld [vmem:[#allocation73_spill] sm:$0xff]  ;;  %v18040_v38 = vld [vmem:[#allocation14_spill] sm:$0xff]  ;;  %vm18041_vm10 = vcmp.eq.s32.totalorder %v17962_v7, 17 }
 0x443   : > { %v5591_v16 = vsel %vm18035_vm2, %v18034_v30, %v18033_v20  ;;  %v5592_v42 = vsel %vm18038_vm5, %v18037_v52, %v18036_v49  ;;  %v5593_v23 = vsel %vm18041_vm10, %v18040_v38, %v18039_v59  ;;  %v18042_v61 = vld [vmem:[#allocation74_spill] sm:$0xff]  ;;  %v18043_v14 = vld [vmem:[#allocation17_spill] sm:$0xff]  ;;  %vm18044_vm2 = vcmp.eq.s32.totalorder %v17965_v47, 17  ;;  %v18045_v30 = vld [vmem:[#allocation75_spill] sm:$0xff] }
 0x444   : > { %v5594_v20 = vsel %vm18044_vm2, %v18043_v14, %v18042_v61  ;;  %v18046_v49 = vld [vmem:[#allocation19_spill] sm:$0xff]  ;;  %vm18047_vm5 = vcmp.eq.s32.totalorder %v17964_v15, 17  ;;  %v18048_v7 = vld [vmem:[#allocation76_spill] sm:$0xff]  ;;  %v18049_v59 = vld [vmem:[#allocation129_spill] sm:$0xff]  ;;  %vm18050_vm10 = vcmp.eq.s32.totalorder %v17967_v26, 17  ;;  %vm18053_vm4 = vcmp.eq.s32.totalorder %v18016_v13, 17 }
 0x445   : > { %v5595_v52 = vsel %vm18047_vm5, %v18046_v49, %v18045_v30  ;;  %v5596_v38 = vsel %vm18050_vm10, %v18049_v59, %v18048_v7  ;;  %v18051_v56 = vld [vmem:[#allocation77_spill] sm:$0xff]  ;;  %v18052_v55 = vld [vmem:[#allocation130_spill] sm:$0xff]  ;;  %vm18056_vm12 = vcmp.eq.s32.totalorder %v17973_v48, 17  ;;  %v18057_v14 = vld [vmem:[#allocation79_spill] sm:$0xff]  ;;  %vm18059_vm2 = vcmp.eq.s32.totalorder %v17972_v29, 17 }
 0x446   : > { %v5597_v6 = vsel %vm18053_vm4, %v18052_v55, %v18051_v56  ;;  %v5598_v61 = vsel %vm18056_vm12, %v18055_v41, %v18054_v10  ;;  %v18058_v47 = vld [vmem:[#allocation27_spill] sm:$0xff]  ;;  %v18060_v49 = vld [vmem:[#allocation80_spill] sm:$0xff]  ;;  %vm18061_vm5 = vcmp.eq.s32.totalorder %v17975_v12, 17  ;;  %v18062_v59 = vld [vmem:[#allocation81_spill] sm:$0xff]  ;;  %vm18063_vm10 = vcmp.eq.s32.totalorder %v18029_v50, 17 }
 0x447   : > { %v5599_v30 = vsel %vm18059_vm2, %v18058_v47, %v18057_v14  ;;  %v5600_v7 = vsel %vm18061_vm5, %v15954_v63, %v18060_v49  ;;  %v5601_v56 = vsel %vm18063_vm10, %v15971_v5, %v18062_v59  ;;  %v18064_v55 = vld [vmem:[#allocation82_spill] sm:$0xff]  ;;  %v18065_v13 = vld [vmem:[#allocation29_spill] sm:$0xff]  ;;  %vm18066_vm4 = vcmp.eq.s32.totalorder %v17984_v4, 17  ;;  %v18067_v10 = vld [vmem:[#allocation83_spill] sm:$0xff] }
 0x448   : > { %v5602_v41 = vsel %vm18066_vm4, %v18065_v13, %v18064_v55  ;;  %vm18068_vm12 = vcmp.eq.s32.totalorder %v17983_v54, 17  ;;  %v18069_v47 = vld [vmem:[#allocation84_spill] sm:$0xff]  ;;  %vm18070_vm2 = vcmp.eq.s32.totalorder %v17986_v8, 17  ;;  %v18071_v12 = vld [vmem:[#allocation85_spill] sm:$0xff]  ;;  %vm18072_vm5 = vcmp.eq.s32.totalorder %v17985_v32, 17  ;;  %v18073_v49 = vld [vmem:[#allocation86_spill] sm:$0xff] }
 0x449   : > { %v5603_v29 = vsel %vm18068_vm12, %v5450_v22, %v18067_v10  ;;  %v5604_v14 = vsel %vm18070_vm2, %v5452_v62, %v18069_v47  ;;  %v5605_v63 = vsel %vm18072_vm5, %v5454_v9, %v18071_v12  ;;  %vm18074_vm10 = vcmp.eq.s32.totalorder %v17990_v24, 17  ;;  %v18075_v59 = vld [vmem:[#allocation87_spill] sm:$0xff]  ;;  %v18078_v55 = vld [vmem:[#allocation88_spill] sm:$0xff]  ;;  %v18080_v10 = vld [vmem:[#allocation89_spill] sm:$0xff] }
 0x44a   : > { %v5606_v5 = vsel %vm18074_vm10, %v5456_v33, %v18073_v49  ;;  %vm18076_vm14 = vcmp.eq.s32.totalorder %v17989_v11, 17  ;;  %vm18077_vm4 = vcmp.eq.s32.totalorder %v17991_v27, 17  ;;  %vm18079_vm12 = vcmp.eq.s32.totalorder %v14045_v35, 0  ;;  %v18082_v9 = vld [vmem:[#allocation90_spill] sm:$0xff]  ;;  %v18084_v47 = vld [vmem:[#allocation91_spill] sm:$0xff]  ;;  %v18086_v49 = vld [vmem:[#allocation92_spill] sm:$0xff] }
 0x44b   : > { %v5607_v13 = vsel %vm18076_vm14, %v5458_v28, %v18075_v59  ;;  %v5608_v22 = vsel %vm18077_vm4, %v5460_v0, %v15479_v2  ;;  %v5684_v62 = vsel %vm18079_vm12, %v18078_v55, %v5576_v45  ;;  %vm18081_vm2 = vcmp.eq.s32.totalorder %v13980_v1, 0  ;;  %v18089_v35 = vld [vmem:[#allocation93_spill] sm:$0xff]  ;;  %v18091_v1 = vld [vmem:[#allocation94_spill] sm:$0xff]  ;;  %v18106_v59 = vld [vmem:[#allocation100_spill] sm:$0xff] }
 0x44c   : > { %v5685_v12 = vsel %vm18081_vm2, %v18080_v10, %v5577_v57  ;;  %vm18083_vm5 = vcmp.eq.s32.totalorder %v14054_v40, 0  ;;  %vm18085_vm10 = vcmp.eq.s32.totalorder %v14050_v39, 0  ;;  %vm18087_vm14 = vcmp.eq.s32.totalorder %v14067_v46, 0  ;;  %v18092_v40 = vld [vmem:[#allocation95_spill] sm:$0xff]  ;;  %v18094_v39 = vld [vmem:[#allocation96_spill] sm:$0xff]  ;;  %v18107_v55 = vld [vmem:[#allocation9_spill] sm:$0xff] }
 0x44d   : > { %v5686_v33 = vsel %vm18083_vm5, %v18082_v9, %v5578_v60  ;;  %v5687_v28 = vsel %vm18085_vm10, %v18084_v47, %v5579_v17  ;;  %v5688_v2 = vsel %vm18087_vm14, %v18086_v49, %v5580_v58  ;;  %vm18088_vm4 = vcmask 31744   ;;  %v18095_v60 = vld [vmem:[#allocation5_spill] sm:$0xff]  ;;  %v18102_v58 = vld [vmem:[#allocation98_spill] sm:$0xff]  ;;  %v18114_v10 = vld [vmem:[#allocation8_spill] sm:$0xff] }
 0x44e   : > { %5720 = vst.msk [vmem:[#allocation3 + $0x13] sm:$0xff] %vm18088_vm4, %v5684_v62  ;;  %vm18090_vm12 = vcmp.eq.s32.totalorder %v14063_v44, 0  ;;  %v5690_v45 = vsel %vm4733_vm11, %v18091_v1, %v5582_v31  ;;  %vm18093_vm2 = vcmp.eq.s32.totalorder %v14082_v53, 0  ;;  %vm18096_vm5 = vcmp.eq.s32.totalorder %v18095_v60, 0  ;;  %vm18097_vm10 = vmmov %vm18088_vm4  ;;  %v18100_v44 = vld [vmem:[#allocation97_spill] sm:$0xff]  ;;  %v18104_v31 = vld [vmem:[#allocation99_spill] sm:$0xff] }
 0x44f   : > { %v5689_v0 = vsel %vm18090_vm12, %v18089_v35, %v5581_v37  ;;  %v5691_v57 = vsel %vm18093_vm2, %v18092_v40, %v5583_v18  ;;  %v5692_v17 = vsel %vm18096_vm5, %v18094_v39, %v5584_v36  ;;  %5721 = vst.msk [vmem:[#allocation3 + $0x1b] sm:$0xff] %vm18097_vm10, %v5685_v12  ;;  %vm18098_vm14 = vmmov %vm18088_vm4  ;;  %v5693_v43 = vsel %vm4736_vm6, %v18100_v44, %v5585_v25  ;;  %v18113_v25 = vld [vmem:[#allocation101_spill] sm:$0xff]  ;;  %v18116_v12 = vld [vmem:[#allocation102_spill] sm:$0xff] }
 0x450   : > { %5722 = vst.msk [vmem:[#allocation3 + $0x23] sm:$0xff] %vm18098_vm14, %v5686_v33  ;;  %vm18099_vm9 = vmmov %vm18088_vm4  ;;  %v5694_v53 = vsel %vm4737_vm13, %v18102_v58, %v5586_v51  ;;  %v5695_v36 = vsel %vm4738_vm7, %v18104_v31, %v5587_v19  ;;  %vm18108_vm11 = vcmp.eq.s32.totalorder %v18107_v55, 0  ;;  %vm18115_vm6 = vcmp.eq.s32.totalorder %v18114_v10, 0  ;;  %v18117_v9 = vld [vmem:[#allocation11_spill] sm:$0xff]  ;;  %v18120_v47 = vld [vmem:[#allocation10_spill] sm:$0xff] }
 0x451   : > { %5723 = vst.msk [vmem:[#allocation3 + $0x2b] sm:$0xff] %vm18088_vm4, %v5687_v28  ;;  %v5696_v62 = vsel %vm18108_vm11, %v18106_v59, %v5588_v21  ;;  %vm18109_vm12 = vmmov %vm18088_vm4  ;;  %v5697_v51 = vsel %vm18115_vm6, %v18113_v25, %v5589_v3  ;;  %vm18118_vm13 = vcmp.eq.s32.totalorder %v18117_v9, 0  ;;  %v18119_v33 = vld [vmem:[#allocation103_spill] sm:$0xff]  ;;  %vm18121_vm7 = vcmp.eq.s32.totalorder %v18120_v47, 0  ;;  %v18122_v28 = vld [vmem:[#allocation104_spill] sm:$0xff] }
 0x452   : > { %5724 = vst.msk [vmem:[#allocation3 + $0x33] sm:$0xff] %vm18099_vm9, %v5688_v2  ;;  %vm18110_vm2 = vmmov %vm18088_vm4  ;;  %v5698_v19 = vsel %vm18118_vm13, %v18116_v12, %v5590_v34  ;;  %v5699_v21 = vsel %vm18121_vm7, %v18119_v33, %v5591_v16  ;;  %v18123_v49 = vld [vmem:[#allocation13_spill] sm:$0xff]  ;;  %v18130_v35 = vld [vmem:[#allocation12_spill] sm:$0xff]  ;;  %vm18138_vm6 = vcmp.eq.s32.totalorder %v17967_v26, 0 }
 0x453   : > { %5725 = vst.msk [vmem:[#allocation3 + $0x3b] sm:$0xff] %vm18109_vm12, %v5689_v0  ;;  %vm18111_vm9 = vmmov %vm18110_vm2  ;;  %vm18124_vm10 = vcmp.eq.s32.totalorder %v18123_v49, 0  ;;  %v18129_v3 = vld [vmem:[#allocation105_spill] sm:$0xff]  ;;  %v18132_v0 = vld [vmem:[#allocation106_spill] sm:$0xff] }
 0x454   : > { %5726 = vst.msk [vmem:[#allocation3 + $0x43] sm:$0xff] %vm18110_vm2, %v5690_v45  ;;  %vm18112_vm5 = vmmov %vm18110_vm2  ;;  %v5700_v2 = vsel %vm18124_vm10, %v18122_v28, %v5592_v42  ;;  %v18133_v1 = vld [vmem:[#allocation15_spill] sm:$0xff]  ;;  %v18137_v40 = vld [vmem:[#allocation108_spill] sm:$0xff] }
 0x455   : > { %5727 = vst.msk [vmem:[#allocation3 + $0x4b] sm:$0xff] %vm18111_vm9, %v5691_v57  ;;  %vm18125_vm14 = vmmov %vm18110_vm2  ;;  %vm18134_vm9 = vcmp.eq.s32.totalorder %v18133_v1, 0  ;;  %v18135_v45 = vld [vmem:[#allocation107_spill] sm:$0xff]  ;;  %v5704_v57 = vsel %vm18138_vm6, %v18137_v40, %v5596_v38  ;;  %v18144_v39 = vld [vmem:[#allocation16_spill] sm:$0xff] }
 0x456   : > { %5728 = vst.msk [vmem:[#allocation3 + $0x53] sm:$0xff] %vm18112_vm5, %v5692_v17  ;;  %vm18126_vm4 = vmmov %vm18110_vm2  ;;  %v5702_v16 = vsel %vm18134_vm9, %v18132_v0, %v5594_v20  ;;  %vm18136_vm5 = vcmp.eq.s32.totalorder %v17964_v15, 0  ;;  %v18146_v60 = vld [vmem:[#allocation110_spill] sm:$0xff]  ;;  %v18151_v38 = vld [vmem:[#allocation112_spill] sm:$0xff] }
 0x457   : > { %5729 = vst.msk [vmem:[#allocation3 + $0x5b] sm:$0xff] %vm18125_vm14, %v5693_v43  ;;  %vm18127_vm11 = vmmov %vm18110_vm2  ;;  %v5703_v42 = vsel %vm18136_vm5, %v18135_v45, %v5595_v52  ;;  %v18148_v52 = vld [vmem:[#allocation111_spill] sm:$0xff]  ;;  %v18149_v17 = vld [vmem:[#allocation18_spill] sm:$0xff] }
 0x458   : > { %5730 = vst.msk [vmem:[#allocation3 + $0x63] sm:$0xff] %vm18126_vm4, %v5694_v53  ;;  %vm18128_vm12 = vmmov %vm18110_vm2  ;;  %vm18131_vm2 = vcmp.eq.s32.totalorder %v18130_v35, 0  ;;  %v18152_v44 = vld [vmem:[#allocation22_spill] sm:$0xff]  ;;  %v18162_v43 = vld [vmem:[#allocation116_spill] sm:$0xff] }
 0x459   : > { %5731 = vst.msk [vmem:[#allocation3 + $0x6b] sm:$0xff] %vm18127_vm11, %v5695_v36  ;;  %v5701_v34 = vsel %vm18131_vm2, %v18129_v3, %v5593_v23  ;;  %vm18139_vm13 = vmmov %vm18126_vm4  ;;  %v18143_v23 = vld [vmem:[#allocation109_spill] sm:$0xff]  ;;  %vm18147_vm11 = vcmp.eq.s32.totalorder %v17973_v48, 0  ;;  %vm18153_vm2 = vcmp.eq.s32.totalorder %v18152_v44, 0  ;;  %v5812_v53 = vld [vmem:[#allocation3 + $0x19] sm:$0xff] }
 0x45a   : > { %5732 = vst.msk [vmem:[#allocation3 + $0x73] sm:$0xff] %vm18128_vm12, %v5696_v62  ;;  %vm18140_vm7 = vmmov %vm18126_vm4  ;;  %v5706_v15 = vsel %vm18147_vm11, %v18146_v60, %v5598_v61  ;;  %vm18150_vm12 = vcmp.eq.s32.totalorder %v18149_v17, 0  ;;  %v5708_v46 = vsel %vm18153_vm2, %v18151_v38, %v5600_v7  ;;  %v18160_v61 = vld [vmem:[#allocation114_spill] sm:$0xff]  ;;  %v18164_v58 = vld [vmem:[#allocation117_spill] sm:$0xff] }
 0x45b   : > { %5733 = vst.msk [vmem:[#allocation3 + $0x7b] sm:$0xff] %vm18139_vm13, %v5697_v51  ;;  %vm18141_vm10 = vmmov %vm18126_vm4  ;;  %v5707_v26 = vsel %vm18150_vm12, %v18148_v52, %v5599_v30  ;;  %v5813_v31 = vld [vmem:[#allocation3 + $0x21] sm:$0xff]  ;;  %v5814_v18 = vld [vmem:[#allocation3 + $0x29] sm:$0xff] }
 0x45c   : > { %5734 = vst.msk [vmem:[#allocation3 + $0x83] sm:$0xff] %vm18140_vm7, %v5698_v19  ;;  %vm18142_vm14 = vmmov %vm18126_vm4  ;;  %vm18145_vm4 = vcmp.eq.s32.totalorder %v18144_v39, 0  ;;  %v5815_v36 = vld [vmem:[#allocation3 + $0x31] sm:$0xff]  ;;  %v5816_v59 = vld [vmem:[#allocation3 + $0x39] sm:$0xff] }
 0x45d   : > { %5735 = vst.msk [vmem:[#allocation3 + $0x8b] sm:$0xff] %vm18141_vm10, %v5699_v21  ;;  %v5705_v20 = vsel %vm18145_vm4, %v18143_v23, %v5597_v6  ;;  %vm18154_vm9 = vmmov %vm18140_vm7  ;;  %v18158_v6 = vld [vmem:[#allocation113_spill] sm:$0xff]  ;;  %vm18161_vm10 = vcmp.eq.s32.totalorder %v17984_v4, 0  ;;  %vm18165_vm4 = vcmp.eq.s32.totalorder %v17986_v8, 0  ;;  %v5817_v55 = vld [vmem:[#allocation3 + $0x41] sm:$0xff] }
 0x45e   : > { %5736 = vst.msk [vmem:[#allocation3 + $0x93] sm:$0xff] %vm18142_vm14, %v5700_v2  ;;  %vm18155_vm5 = vmmov %vm18140_vm7  ;;  %vm18159_vm7 = vcmp.eq.s32.totalorder %v18029_v50, 0  ;;  %v5710_v30 = vsel %vm18161_vm10, %v18160_v61, %v5602_v41  ;;  %vm18163_vm14 = vcmp.eq.s32.totalorder %v17983_v54, 0  ;;  %v5712_v37 = vsel %vm18165_vm4, %v18164_v58, %v5604_v14  ;;  %v18170_v50 = vld [vmem:[#allocation118_spill] sm:$0xff]  ;;  %v18174_v54 = vld [vmem:[#allocation120_spill] sm:$0xff] }
 0x45f   : > { %5737 = vst.msk [vmem:[#allocation3 + $0x9b] sm:$0xff] %vm18154_vm9, %v5701_v34  ;;  %vm18156_vm6 = vmmov %vm18155_vm5  ;;  %v5709_v48 = vsel %vm18159_vm7, %v18158_v6, %v5601_v56  ;;  %v5711_v7 = vsel %vm18163_vm14, %v18162_v43, %v5603_v29  ;;  %v18172_v56 = vld [vmem:[#allocation119_spill] sm:$0xff]  ;;  %vm18177_vm7 = vcmp.eq.s32.totalorder %v17991_v27, 0  ;;  %v5761_v27 = vld [vmem:[#allocation3 + $0x35] sm:$0x3] }
 0x460   : > { %5738 = vst.msk [vmem:[#allocation3 + $0xa3] sm:$0xff] %vm18155_vm5, %v5702_v16  ;;  %vm18157_vm13 = vmmov %vm18155_vm5  ;;  %v18176_v41 = vld [vmem:[#allocation115_spill] sm:$0xff]  ;;  %v5818_v62 = vld [vmem:[#allocation3 + $0x49] sm:$0xff] }
 0x461   : > { %5739 = vst.msk [vmem:[#allocation3 + $0xab] sm:$0xff] %vm18156_vm6, %v5703_v42  ;;  %vm18166_vm11 = vmmov %vm18155_vm5  ;;  %vm18173_vm6 = vcmp.eq.s32.totalorder %v17990_v24, 0  ;;  %v5716_v14 = vsel %vm18177_vm7, %v18176_v41, %v5608_v22  ;;  %v5759_v24 = vld [vmem:[#allocation3 + $0x25] sm:$0xff]  ;;  %vm18187_vm7 = vcmask 25600   ;;  %v13139_v22 = vld [vmem:[%s17254_s2] sm:$0xf] }
 0x462   : > { %5740 = vst.msk [vmem:[#allocation3 + $0xb3] sm:$0xff] %vm18157_vm13, %v5704_v57  ;;  %vm18167_vm12 = vmmov %vm18155_vm5  ;;  %v5714_v29 = vsel %vm18173_vm6, %v18172_v56, %v5606_v5  ;;  %vm18175_vm13 = vcmp.eq.s32.totalorder %v17989_v11, 0  ;;  %v16280_v5 = vld [vmem:[%s17254_s2 + $0x8] sm:$0xf]  ;;  %v5819_v25 = vld [vmem:[#allocation3 + $0x51] sm:$0xff] }
 0x463   : > { %5741 = vst.msk [vmem:[#allocation3 + $0xbb] sm:$0xff] %vm18166_vm11, %v5705_v20  ;;  %vm18168_vm2 = vmmov %vm18155_vm5  ;;  %vm18171_vm5 = vcmp.eq.s32.totalorder %v17985_v32, 0  ;;  %v5715_v8 = vsel %vm18175_vm13, %v18174_v54, %v5607_v13  ;;  %v5760_v32 = vld [vmem:[#allocation3 + $0x2d] sm:$0xff]  ;;  %v5820_v10 = vld [vmem:[#allocation3 + $0x59] sm:$0xff] }
 0x464   : > { %5742 = vst.msk [vmem:[#allocation3 + $0xc3] sm:$0xff] %vm18167_vm12, %v5706_v15  ;;  %vm18169_vm9 = vmmov %vm18168_vm2  ;;  %v5713_v4 = vsel %vm18171_vm5, %v18170_v50, %v5605_v63  ;;  %v5821_v51 = vld [vmem:[#allocation3 + $0x61] sm:$0xff]  ;;  %v5822_v12 = vld [vmem:[#allocation3 + $0x69] sm:$0xff] }
 0x465   : > { %5743 = vst.msk [vmem:[#allocation3 + $0xcb] sm:$0xff] %vm18168_vm2, %v5707_v26  ;;  %vm18178_vm10 = vmmov %vm18168_vm2  ;;  %v5823_v9 = vld [vmem:[#allocation3 + $0x71] sm:$0xff]  ;;  %v5824_v19 = vld [vmem:[#allocation3 + $0x79] sm:$0xff] }
 0x466   : > { %5744 = vst.msk [vmem:[#allocation3 + $0xd3] sm:$0xff] %vm18169_vm9, %v5708_v46  ;;  %vm18179_vm14 = vmmov %vm18168_vm2  ;;  %v5825_v33 = vld [vmem:[#allocation3 + $0x81] sm:$0xff]  ;;  %v5826_v47 = vld [vmem:[#allocation3 + $0x89] sm:$0xff] }
 0x467   : > { %5745 = vst.msk [vmem:[#allocation3 + $0xdb] sm:$0xff] %vm18178_vm10, %v5709_v48  ;;  %vm18180_vm4 = vmmov %vm18168_vm2  ;;  %v5827_v21 = vld [vmem:[#allocation3 + $0x91] sm:$0xff]  ;;  %v5828_v28 = vld [vmem:[#allocation3 + $0x99] sm:$0xff] }
 0x468   : > { %5746 = vst.msk [vmem:[#allocation3 + $0xe3] sm:$0xff] %vm18179_vm14, %v5710_v30  ;;  %vm18181_vm11 = vmmov %vm18168_vm2  ;;  %v5829_v49 = vld [vmem:[#allocation3 + $0xa1] sm:$0xff]  ;;  %v5830_v2 = vld [vmem:[#allocation3 + $0xa9] sm:$0xff] }
 0x469   : > { %5747 = vst.msk [vmem:[#allocation3 + $0xeb] sm:$0xff] %vm18180_vm4, %v5711_v7  ;;  %vm18182_vm12 = vmmov %vm18168_vm2  ;;  %vm18190_vm4 = vcmask 1043456   ;;  %v5831_v3 = vld [vmem:[#allocation3 + $0xb1] sm:$0xff]  ;;  %v16329_v38 = vld [vmem:[%s17254_s2 + $0xc] sm:$0xf] }
 0x46a   : > { %5748 = vst.msk [vmem:[#allocation3 + $0xf3] sm:$0xff] %vm18181_vm11, %v5712_v37  ;;  %vm18183_vm9 = vmmov %vm18168_vm2  ;;  %v5832_v35 = vld [vmem:[#allocation3 + $0xb9] sm:$0xff]  ;;  %v5777_v48 = vld [vmem:[#allocation3 + $0x28] sm:$0xff] }
 0x46b   : > { %5749 = vst.msk [vmem:[#allocation3 + $0xfb] sm:$0xff] %vm18182_vm12, %v5713_v4  ;;  %vm18184_vm5 = vmmov %vm18168_vm2  ;;  %v5833_v34 = vld [vmem:[#allocation3 + $0xc1] sm:$0xff]  ;;  %v5775_v46 = vld [vmem:[#allocation3 + $0x18] sm:$0xff] }
 0x46c   : > { %5750 = vst.msk [vmem:[#allocation3 + $0x103] sm:$0xff] %vm18168_vm2, %v5714_v29  ;;  %vm18185_vm6 = vmmov %vm18168_vm2  ;;  %v5834_v0 = vld [vmem:[#allocation3 + $0xc9] sm:$0xff]  ;;  %v5776_v6 = vld [vmem:[#allocation3 + $0x20] sm:$0xff] }
 0x46d   : > { %5751 = vst.msk [vmem:[#allocation3 + $0x10b] sm:$0xff] %vm18183_vm9, %v5715_v8  ;;  %vm18186_vm13 = vmmov %vm18168_vm2  ;;  %v5835_v1 = vld [vmem:[#allocation3 + $0xd1] sm:$0xff]  ;;  %v5780_v43 = vld [vmem:[#allocation3 + $0x40] sm:$0xff] }
 0x46e   : > { %5752 = vst.msk [vmem:[#allocation3 + $0x113] sm:$0xff] %vm18184_vm5, %v5716_v14  ;;  %vm18188_vm10 = vmmov %vm18168_vm2  ;;  %v5836_v42 = vld [vmem:[#allocation3 + $0xd9] sm:$0xff]  ;;  %v5778_v61 = vld [vmem:[#allocation3 + $0x30] sm:$0xff] }
 0x46f   : > { %5762 = vst.msk [vmem:[#allocation3 + $0x1] sm:$0xff] %vm18185_vm6, %v5759_v24  ;;  %vm18189_vm14 = vmmov %vm18168_vm2  ;;  %v5837_v40 = vld [vmem:[#allocation3 + $0xe1] sm:$0xff]  ;;  %v5779_v30 = vld [vmem:[#allocation3 + $0x38] sm:$0xff] }
 0x470   : > { %5763 = vst.msk [vmem:[#allocation3 + $0x9] sm:$0xff] %vm18186_vm13, %v5760_v32  ;;  %vm18191_vm11 = vmmov %vm18168_vm2  ;;  %v5838_v57 = vld [vmem:[#allocation3 + $0xe9] sm:$0xff]  ;;  %v5783_v37 = vld [vmem:[#allocation3 + $0x58] sm:$0xff] }
 0x471   : > { %5765 = vst.msk [vmem:[#allocation3 + $0x11] sm:$0x3] %vm18187_vm7, %v5761_v27  ;;  %vm18192_vm12 = vmmov %vm18190_vm4  ;;  %v5839_v23 = vld [vmem:[#allocation3 + $0xf1] sm:$0xff]  ;;  %v5781_v7 = vld [vmem:[#allocation3 + $0x48] sm:$0xff] }
 0x472   : > { %vm18193_vm9 = vmmov %vm18168_vm2  ;;  %v5840_v39 = vld [vmem:[#allocation3 + $0xf9] sm:$0xff]  ;;  %v5782_v58 = vld [vmem:[#allocation3 + $0x50] sm:$0xff] }
 0x473   : > { %vm18194_vm5 = vmmov %vm18168_vm2  ;;  %v5841_v20 = vld [vmem:[#allocation3 + $0x101] sm:$0xff]  ;;  %v5786_v56 = vld [vmem:[#allocation3 + $0x70] sm:$0xff] }
 0x474   : > { %vm18195_vm6 = vmmov %vm18168_vm2  ;;  %v5842_v60 = vld [vmem:[#allocation3 + $0x109] sm:$0xff]  ;;  %v5784_v50 = vld [vmem:[#allocation3 + $0x60] sm:$0xff] }
 0x475   : > { %vm18196_vm13 = vmmov %vm18168_vm2  ;;  %v5766_v16 = vld [vmem:[#allocation3 + $0x10f] sm:$0xff]  ;;  %v5767_v45 = vld [vmem:[#allocation3 + $0x117] sm:$0xff] }
 0x476   : > { %v5809_v11 = vld [vmem:[#allocation3 + $0x1] sm:$0xff]  ;;  %vm18197_vm7 = vmmov %vm18168_vm2  ;;  %v5843_v15 = vld [vmem:[#allocation3 + $0x111] sm:$0xff] }
 0x477   : > { %v5810_v63 = vld [vmem:[#allocation3 + $0x9] sm:$0xff]  ;;  %11974 = vmatprep.mubr.msk.f32.mxu1 %vm18188_vm10, %v5809_v11  ;;  %vm18198_vm10 = vmmov %vm18168_vm2  ;;  %v5844_v52 = vld [vmem:[#allocation3 + $0x119] sm:$0xff] }
 0x478   : > { %11975 = vmatmul.mubr.msk.f32.vlgmr.msra.gmra.mrb[0].mxu1 %vm18189_vm14, %v5810_v63  ;;  %v5811_v13 = vld [vmem:[#allocation3 + $0x11] sm:$0xff]  ;;  %vm18199_vm14 = vmmov %vm18168_vm2  ;;  %v5772_v17 = vld [vmem:[#allocation3] sm:$0xff] }
 0x479   : > { %12029 = vmatpush3.msk.msra.mxu1 %vm18190_vm4, %v13139_v22  ;;  %11977 = vmatprep.mubr.msk.f32.mxu1 %vm18191_vm11, %v5811_v13  ;;  %vm18200_vm4 = vmmov %vm18168_vm2  ;;  %v5773_v26 = vld [vmem:[#allocation3 + $0x8] sm:$0xff]  ;;  %v5774_v44 = vld [vmem:[#allocation3 + $0x10] sm:$0xff] }
 0x47a   : > { %12084 = vmatprep.subr.msk.mxu1 %vm18192_vm12, %v16280_v5  ;;  %vm18201_vm11 = vmmov %vm18168_vm2  ;;  %v5785_v4 = vld [vmem:[#allocation3 + $0x68] sm:$0xff]  ;;  %v5787_v29 = vld [vmem:[#allocation3 + $0x78] sm:$0xff] }
 0x47b   : > { %vm18202_vm12 = vmmov %vm18168_vm2  ;;  %v5788_v54 = vld [vmem:[#allocation3 + $0x80] sm:$0xff]  ;;  %v5789_v8 = vld [vmem:[#allocation3 + $0x88] sm:$0xff] }
 0x47c   : > { %11978 = vmatmul.mubr.msk.f32.gmra.mrb[2].mxu1 %vm18168_vm2, %v5812_v53  ;;  %v5790_v41 = vld [vmem:[#allocation3 + $0x90] sm:$0xff]  ;;  %v5791_v14 = vld [vmem:[#allocation3 + $0x98] sm:$0xff]  ;;  %v5792_v24 = vld [vmem:[#allocation3 + $0xa0] sm:$0xff] }
 0x47d   : > { %11980 = vmatprep.mubr.msk.f32.mxu1 %vm18193_vm9, %v5813_v31  ;;  %vm18203_vm9 = vmmov %vm18168_vm2  ;;  %v5793_v32 = vld [vmem:[#allocation3 + $0xa8] sm:$0xff]  ;;  %v5794_v27 = vld [vmem:[#allocation3 + $0xb0] sm:$0xff] }
 0x47e   : > { %v5795_v11 = vld [vmem:[#allocation3 + $0xb8] sm:$0xff]  ;;  %v5796_v63 = vld [vmem:[#allocation3 + $0xc0] sm:$0xff]  ;;  %v5798_v13 = vld [vmem:[#allocation3 + $0xd0] sm:$0xff] }
 0x47f   : > { %v5799_v22 = vld [vmem:[#allocation3 + $0xd8] sm:$0xff]  ;;  %v5800_v53 = vld [vmem:[#allocation3 + $0xe0] sm:$0xff]  ;;  %v5801_v31 = vld [vmem:[#allocation3 + $0xe8] sm:$0xff] }
 0x480   : > { %11981 = vmatmul.mubr.msk.f32.gmra.mrb[4].mxu1 %vm18194_vm5, %v5814_v18  ;;  %vm18204_vm5 = vmmov %vm18168_vm2  ;;  %v5802_v18 = vld [vmem:[#allocation3 + $0xf0] sm:$0xff] }
 0x481   : > { %11983 = vmatprep.mubr.msk.f32.mxu1 %vm18195_vm6, %v5815_v36  ;;  %vm18205_vm6 = vmmov %vm18168_vm2  ;;  %v5803_v36 = vld [vmem:[#allocation3 + $0xf8] sm:$0xff] }
 0x484   : > { %11984 = vmatmul.mubr.msk.f32.gmra.mrb[6].mxu1 %vm18196_vm13, %v5816_v59  ;;  %vm18206_vm13 = vmmov %vm18168_vm2  ;;  %v5804_v59 = vld [vmem:[#allocation3 + $0x100] sm:$0xff] }
 0x485   : > { %11986 = vmatprep.mubr.msk.f32.mxu1 %vm18197_vm7, %v5817_v55  ;;  %vm18207_vm7 = vmmov %vm18168_vm2  ;;  %v5805_v55 = vld [vmem:[#allocation3 + $0x108] sm:$0xff] }
 0x488   : > { %11987 = vmatmul.mubr.msk.f32.gmra.mrb[8].mxu1 %vm18198_vm10, %v5818_v62  ;;  %vm18208_vm10 = vmmov %vm18168_vm2  ;;  %v5806_v62 = vld [vmem:[#allocation3 + $0x110] sm:$0xff] }
 0x489   : > { %11989 = vmatprep.mubr.msk.f32.mxu1 %vm18199_vm14, %v5819_v25  ;;  %vm18209_vm14 = vmmov %vm18168_vm2  ;;  %v5807_v25 = vld [vmem:[#allocation3 + $0x118] sm:$0xff] }
 0x48c   : > { %11990 = vmatmul.mubr.msk.f32.gmra.mrb[10].mxu1 %vm18200_vm4, %v5820_v10  ;;  %vm18210_vm4 = vmmov %vm18168_vm2  ;;  %v6559_v10 = vld [vmem:[#allocation3 + $0x2] sm:$0xff] }
 0x48d   : > { %11992 = vmatprep.mubr.msk.f32.mxu1 %vm18201_vm11, %v5821_v51  ;;  %vm18211_vm11 = vmmov %vm18168_vm2  ;;  %v6560_v51 = vld [vmem:[#allocation3 + $0xa] sm:$0xff] }
 0x490   : > { %11993 = vmatmul.mubr.msk.f32.gmra.mrb[12].mxu1 %vm18202_vm12, %v5822_v12  ;;  %vm18212_vm12 = vmmov %vm18168_vm2  ;;  %v16374_v12 = vld [vmem:[%s17254_s2 + $0x10] sm:$0xf] }
 0x491   : > { %11995 = vmatprep.mubr.msk.f32.mxu1 %vm18168_vm2, %v5823_v9  ;;  %v16377_v9 = vld [vmem:[#allocation3 + $0x12] sm:$0xff] }
 0x494   : > { %11996 = vmatmul.mubr.msk.f32.gmra.mrb[14].mxu1 %vm18203_vm9, %v5824_v19  ;;  %vm18213_vm9 = vmmov %vm18168_vm2  ;;  %v16385_v19 = vld [vmem:[#allocation3 + $0x1a] sm:$0xff] }
 0x495   : > { %11998 = vmatprep.mubr.msk.f32.mxu1 %vm18204_vm5, %v5825_v33  ;;  %vm18214_vm5 = vmmov %vm18168_vm2  ;;  %v16389_v33 = vld [vmem:[#allocation3 + $0x22] sm:$0xff] }
 0x496   : > { %5769 = vst.msk [vmem:[#allocation3 + $0x133] sm:$0xff] %vm18214_vm5, %v5766_v16  ;;  %vm18224_vm5 = vmmov %vm18168_vm2  ;;  %v6574_v16 = vld [vmem:[#allocation3 + $0x7a] sm:$0xff] }
 0x498   : > { %11999 = vmatmul.mubr.msk.f32.gmra.mrb[16].mxu1 %vm18205_vm6, %v5826_v47  ;;  %vm18215_vm6 = vmmov %vm18168_vm2  ;;  %v16393_v47 = vld [vmem:[#allocation3 + $0x2a] sm:$0xff] }
 0x499   : > { %12001 = vmatprep.mubr.msk.f32.mxu1 %vm18206_vm13, %v5827_v21  ;;  %5770 = vst.msk [vmem:[#allocation3 + $0x13b] sm:$0xff] %vm18215_vm6, %v5767_v45  ;;  %vm18216_vm13 = vmmov %vm18168_vm2  ;;  %v16397_v21 = vld [vmem:[#allocation3 + $0x32] sm:$0xff]  ;;  %v6575_v45 = vld [vmem:[#allocation3 + $0x82] sm:$0xff] }
 0x49a   : > { %vm18225_vm6 = vmmov %vm18168_vm2 }
 0x49c   : > { %12002 = vmatmul.mubr.msk.f32.gmra.mrb[18].mxu1 %vm18207_vm7, %v5828_v28  ;;  %vm18217_vm7 = vmmov %vm18168_vm2  ;;  %v16401_v28 = vld [vmem:[#allocation3 + $0x3a] sm:$0xff] }
 0x49d   : > { %12004 = vmatprep.mubr.msk.f32.mxu1 %vm18208_vm10, %v5829_v49  ;;  %vm18218_vm10 = vmmov %vm18168_vm2  ;;  %v16405_v49 = vld [vmem:[#allocation3 + $0x42] sm:$0xff] }
 0x4a0   : > { %12005 = vmatmul.mubr.msk.f32.gmra.mrb[20].mxu1 %vm18209_vm14, %v5830_v2  ;;  %vm18219_vm14 = vmmov %vm18168_vm2  ;;  %v16409_v2 = vld [vmem:[#allocation3 + $0x4a] sm:$0xff] }
 0x4a1   : > { %12007 = vmatprep.mubr.msk.f32.mxu1 %vm18210_vm4, %v5831_v3  ;;  %vm18220_vm4 = vmmov %vm18168_vm2  ;;  %v16413_v3 = vld [vmem:[#allocation3 + $0x52] sm:$0xff] }
 0x4a4   : > { %12008 = vmatmul.mubr.msk.f32.gmra.mrb[22].mxu1 %vm18211_vm11, %v5832_v35  ;;  %vm18221_vm11 = vmmov %vm18168_vm2  ;;  %v6570_v35 = vld [vmem:[#allocation3 + $0x5a] sm:$0xff] }
 0x4a5   : > { %12010 = vmatprep.mubr.msk.f32.mxu1 %vm18212_vm12, %v5833_v34  ;;  %vm18222_vm12 = vmmov %vm18168_vm2  ;;  %v6571_v34 = vld [vmem:[#allocation3 + $0x62] sm:$0xff] }
 0x4a8   : > { %12011 = vmatmul.mubr.msk.f32.gmra.mrb[24].mxu1 %vm18168_vm2, %v5834_v0  ;;  %v6572_v0 = vld [vmem:[#allocation3 + $0x6a] sm:$0xff] }
 0x4a9   : > { %12013 = vmatprep.mubr.msk.f32.mxu1 %vm18213_vm9, %v5835_v1  ;;  %vm18223_vm9 = vmmov %vm18168_vm2  ;;  %v6573_v1 = vld [vmem:[#allocation3 + $0x72] sm:$0xff] }
 0x4ac   : > { %12014 = vmatmul.mubr.msk.f32.gmra.mrb[26].mxu1 %vm18216_vm13, %v5836_v42  ;;  %vm18226_vm13 = vcmask 1043456   ;;  %v6576_v42 = vld [vmem:[#allocation3 + $0x8a] sm:$0xff] }
 0x4ad   : > { %12016 = vmatprep.mubr.msk.f32.mxu1 %vm18217_vm7, %v5837_v40  ;;  %vm18227_vm7 = vmmov %vm18168_vm2  ;;  %v6577_v40 = vld [vmem:[#allocation3 + $0x92] sm:$0xff] }
 0x4b0   : > { %12017 = vmatmul.mubr.msk.f32.gmra.mrb[28].mxu1 %vm18218_vm10, %v5838_v57  ;;  %vm18228_vm10 = vmmov %vm18226_vm13  ;;  %v6578_v57 = vld [vmem:[#allocation3 + $0x9a] sm:$0xff] }
 0x4b1   : > { %12019 = vmatprep.mubr.msk.f32.mxu1 %vm18219_vm14, %v5839_v23  ;;  %vm18229_vm14 = vmmov %vm18168_vm2  ;;  %v6579_v23 = vld [vmem:[#allocation3 + $0xa2] sm:$0xff] }
 0x4b4   : > { %12020 = vmatmul.mubr.msk.f32.gmra.mrb[30].mxu1 %vm18220_vm4, %v5840_v39  ;;  %vm18230_vm4 = vmmov %vm18168_vm2  ;;  %v6580_v39 = vld [vmem:[#allocation3 + $0xaa] sm:$0xff] }
 0x4b5   : > { %12022 = vmatprep.mubr.msk.f32.mxu1 %vm18221_vm11, %v5841_v20  ;;  %vm18231_vm11 = vmmov %vm18168_vm2  ;;  %v6581_v20 = vld [vmem:[#allocation3 + $0xb2] sm:$0xff] }
 0x4b8   : > { %12023 = vmatmul.mubr.msk.f32.gmra.mrb[32].mxu1 %vm18222_vm12, %v5842_v60  ;;  %vm18232_vm12 = vmmov %vm18168_vm2  ;;  %v6582_v60 = vld [vmem:[#allocation3 + $0xba] sm:$0xff] }
 0x4b9   : > { %12025 = vmatprep.mubr.msk.f32.mxu1 %vm18168_vm2, %v5843_v15  ;;  %v6583_v15 = vld [vmem:[#allocation3 + $0xc2] sm:$0xff] }
 0x4bc   : > { %12026 = vmatmul.mubr.msk.f32.gmra.mrb[34].mxu1 %vm18223_vm9, %v5844_v52  ;;  %vm18233_vm9 = vmmov %vm18168_vm2  ;;  %v6584_v52 = vld [vmem:[#allocation3 + $0xca] sm:$0xff] }
 0x4bd   : > { %12030 = vmatprep.mubr.msk.f32.mxu1 %vm18224_vm5, %v5772_v17  ;;  %vm18234_vm5 = vmmov %vm18168_vm2  ;;  %v6585_v17 = vld [vmem:[#allocation3 + $0xd2] sm:$0xff] }
 0x4c0   : > { %12031 = vmatmul.mubr.msk.f32.vlgmr.msra.gmra.mrb[0].mxu1 %vm18225_vm6, %v5773_v26  ;;  %vm18235_vm6 = vmmov %vm18168_vm2  ;;  %v6586_v26 = vld [vmem:[#allocation3 + $0xda] sm:$0xff] }
 0x4c1   : > { %12085 = vmatpush3.msk.msra.mxu1 %vm18226_vm13, %v16280_v5  ;;  %12033 = vmatprep.mubr.msk.f32.mxu1 %vm18227_vm7, %v5774_v44  ;;  %vm18236_vm13 = vmmov %vm18168_vm2  ;;  %v5797_v5 = vld [vmem:[#allocation3 + $0xc8] sm:$0xff] }
 0x4c2   : > { %12140 = vmatprep.subr.msk.mxu1 %vm18228_vm10, %v16329_v38  ;;  %vm18237_vm7 = vmmov %vm18168_vm2  ;;  %v6588_v44 = vld [vmem:[#allocation3 + $0xea] sm:$0xff] }
 0x4c3   : > { %vm18238_vm10 = vmmov %vm18168_vm2 }
 0x4c4   : > { %12034 = vmatmul.mubr.msk.f32.gmra.mrb[2].mxu1 %vm18229_vm14, %v5775_v46  ;;  %vm18239_vm14 = vmmov %vm18168_vm2  ;;  %v6589_v46 = vld [vmem:[#allocation3 + $0xf2] sm:$0xff] }
 0x4c5   : > { %12036 = vmatprep.mubr.msk.f32.mxu1 %vm18230_vm4, %v5776_v6  ;;  %vm18240_vm4 = vmmov %vm18168_vm2  ;;  %v6590_v6 = vld [vmem:[#allocation3 + $0xfa] sm:$0xff] }
 0x4c8   : > { %12037 = vmatmul.mubr.msk.f32.gmra.mrb[4].mxu1 %vm18231_vm11, %v5777_v48  ;;  %vm18241_vm11 = vmmov %vm18168_vm2  ;;  %v6591_v48 = vld [vmem:[#allocation3 + $0x102] sm:$0xff] }
 0x4c9   : > { %12039 = vmatprep.mubr.msk.f32.mxu1 %vm18232_vm12, %v5778_v61  ;;  %vm18242_vm12 = vmmov %vm18168_vm2  ;;  %v6592_v61 = vld [vmem:[#allocation3 + $0x10a] sm:$0xff] }
 0x4cc   : > { %12040 = vmatmul.mubr.msk.f32.gmra.mrb[6].mxu1 %vm18168_vm2, %v5779_v30  ;;  %v6593_v30 = vld [vmem:[#allocation3 + $0x112] sm:$0xff] }
 0x4cd   : > { %12042 = vmatprep.mubr.msk.f32.mxu1 %vm18233_vm9, %v5780_v43  ;;  %vm18243_vm9 = vmmov %vm18168_vm2  ;;  %v6594_v43 = vld [vmem:[#allocation3 + $0x11a] sm:$0xff] }
 0x4d0   : > { %12043 = vmatmul.mubr.msk.f32.gmra.mrb[8].mxu1 %vm18234_vm5, %v5781_v7  ;;  %vm18244_vm5 = vmmov %vm18168_vm2  ;;  %v10648_v7 = vld [vmem:[%s17254_s2 + $0x14] sm:$0xf] }
 0x4d1   : > { %12045 = vmatprep.mubr.msk.f32.mxu1 %vm18235_vm6, %v5782_v58  ;;  %vm18245_vm6 = vmmov %vm18168_vm2  ;;  %v7023_v58 = vld [vmem:[#allocation3 + $0x122] sm:$0xff] }
 0x4d4   : > { %12046 = vmatmul.mubr.msk.f32.gmra.mrb[10].mxu1 %vm18236_vm13, %v5783_v37  ;;  %vm18246_vm13 = vmmov %vm18168_vm2  ;;  %v7024_v37 = vld [vmem:[#allocation3 + $0x12a] sm:$0xff] }
 0x4d5   : > { %12048 = vmatprep.mubr.msk.f32.mxu1 %vm18237_vm7, %v5784_v50  ;;  %vm18247_vm7 = vmmov %vm18168_vm2  ;;  %v7419_v50 = vld [vmem:[#allocation3 + $0x13] sm:$0xff] }
 0x4d8   : > { %12049 = vmatmul.mubr.msk.f32.gmra.mrb[12].mxu1 %vm18238_vm10, %v5785_v4  ;;  %vm18248_vm10 = vmmov %vm18168_vm2  ;;  %v7420_v4 = vld [vmem:[#allocation3 + $0x1b] sm:$0xff] }
 0x4d9   : > { %12051 = vmatprep.mubr.msk.f32.mxu1 %vm18239_vm14, %v5786_v56  ;;  %vm18249_vm14 = vmmov %vm18168_vm2  ;;  %v16497_v56 = vld [vmem:[%s17254_s2 + $0x18] sm:$0xf] }
 0x4dc   : > { %12052 = vmatmul.mubr.msk.f32.gmra.mrb[14].mxu1 %vm18240_vm4, %v5787_v29  ;;  %vm18250_vm4 = vmmov %vm18168_vm2  ;;  %v7421_v29 = vld [vmem:[#allocation3 + $0x23] sm:$0xff] }
 0x4dd   : > { %12054 = vmatprep.mubr.msk.f32.mxu1 %vm18241_vm11, %v5788_v54  ;;  %vm18251_vm11 = vmmov %vm18168_vm2  ;;  %v7422_v54 = vld [vmem:[#allocation3 + $0x2b] sm:$0xff] }
 0x4e0   : > { %12055 = vmatmul.mubr.msk.f32.gmra.mrb[16].mxu1 %vm18242_vm12, %v5789_v8  ;;  %vm18252_vm12 = vmmov %vm18168_vm2  ;;  %v7423_v8 = vld [vmem:[#allocation3 + $0x33] sm:$0xff] }
 0x4e1   : > { %12057 = vmatprep.mubr.msk.f32.mxu1 %vm18168_vm2, %v5790_v41  ;;  %v7424_v41 = vld [vmem:[#allocation3 + $0x3b] sm:$0xff] }
 0x4e4   : > { %12058 = vmatmul.mubr.msk.f32.gmra.mrb[18].mxu1 %vm18243_vm9, %v5791_v14  ;;  %vm18253_vm9 = vmmov %vm18168_vm2  ;;  %v7425_v14 = vld [vmem:[#allocation3 + $0x43] sm:$0xff] }
 0x4e5   : > { %12060 = vmatprep.mubr.msk.f32.mxu1 %vm18244_vm5, %v5792_v24  ;;  %vm18254_vm5 = vmmov %vm18168_vm2  ;;  %v7426_v24 = vld [vmem:[#allocation3 + $0x4b] sm:$0xff] }
 0x4e8   : > { %12061 = vmatmul.mubr.msk.f32.gmra.mrb[20].mxu1 %vm18245_vm6, %v5793_v32  ;;  %vm18255_vm6 = vmmov %vm18168_vm2  ;;  %v7427_v32 = vld [vmem:[#allocation3 + $0x53] sm:$0xff] }
 0x4e9   : > { %12063 = vmatprep.mubr.msk.f32.mxu1 %vm18246_vm13, %v5794_v27  ;;  %vm18256_vm13 = vmmov %vm18168_vm2  ;;  %v7428_v27 = vld [vmem:[#allocation3 + $0x5b] sm:$0xff] }
 0x4ec   : > { %12064 = vmatmul.mubr.msk.f32.gmra.mrb[22].mxu1 %vm18247_vm7, %v5795_v11  ;;  %vm18257_vm7 = vmmov %vm18168_vm2  ;;  %v7429_v11 = vld [vmem:[#allocation3 + $0x63] sm:$0xff] }
 0x4ed   : > { %12066 = vmatprep.mubr.msk.f32.mxu1 %vm18248_vm10, %v5796_v63  ;;  %vm18258_vm10 = vmmov %vm18168_vm2  ;;  %v7430_v63 = vld [vmem:[#allocation3 + $0x6b] sm:$0xff] }
 0x4f0   : > { %12067 = vmatmul.mubr.msk.f32.gmra.mrb[24].mxu1 %vm18249_vm14, %v5797_v5  ;;  %vm18259_vm14 = vmmov %vm18168_vm2  ;;  %v7431_v5 = vld [vmem:[#allocation3 + $0x73] sm:$0xff] }
 0x4f1   : > { %12069 = vmatprep.mubr.msk.f32.mxu1 %vm18250_vm4, %v5798_v13  ;;  %vm18260_vm4 = vmmov %vm18168_vm2  ;;  %v7432_v13 = vld [vmem:[#allocation3 + $0x7b] sm:$0xff] }
 0x4f4   : > { %12070 = vmatmul.mubr.msk.f32.gmra.mrb[26].mxu1 %vm18251_vm11, %v5799_v22  ;;  %vm18261_vm11 = vcmask 1043456   ;;  %v7433_v22 = vld [vmem:[#allocation3 + $0x83] sm:$0xff] }
 0x4f5   : > { %12072 = vmatprep.mubr.msk.f32.mxu1 %vm18252_vm12, %v5800_v53  ;;  %vm18262_vm12 = vmmov %vm18168_vm2  ;;  %v7434_v53 = vld [vmem:[#allocation3 + $0x8b] sm:$0xff] }
 0x4f8   : > { %12073 = vmatmul.mubr.msk.f32.gmra.mrb[28].mxu1 %vm18168_vm2, %v5801_v31  ;;  %vm18263_vm2 = vmmov %vm18261_vm11  ;;  %v7435_v31 = vld [vmem:[#allocation3 + $0x93] sm:$0xff] }
 0x4f9   : > { %12075 = vmatprep.mubr.msk.f32.mxu1 %vm18253_vm9, %v5802_v18  ;;  %vm18264_vm9 = vmmov %vm18260_vm4  ;;  %v7436_v18 = vld [vmem:[#allocation3 + $0x9b] sm:$0xff] }
 0x4fc   : > { %12076 = vmatmul.mubr.msk.f32.gmra.mrb[30].mxu1 %vm18254_vm5, %v5803_v36  ;;  %vm18265_vm5 = vmmov %vm18260_vm4  ;;  %v7437_v36 = vld [vmem:[#allocation3 + $0xa3] sm:$0xff] }
 0x4fd   : > { %12078 = vmatprep.mubr.msk.f32.mxu1 %vm18255_vm6, %v5804_v59  ;;  %vm18266_vm6 = vmmov %vm18260_vm4  ;;  %v7438_v59 = vld [vmem:[#allocation3 + $0xab] sm:$0xff] }
 0x500   : > { %12079 = vmatmul.mubr.msk.f32.gmra.mrb[32].mxu1 %vm18256_vm13, %v5805_v55  ;;  %vm18267_vm13 = vmmov %vm18260_vm4  ;;  %v7439_v55 = vld [vmem:[#allocation3 + $0xb3] sm:$0xff] }
 0x501   : > { %12081 = vmatprep.mubr.msk.f32.mxu1 %vm18257_vm7, %v5806_v62  ;;  %vm18268_vm7 = vmmov %vm18260_vm4  ;;  %v7440_v62 = vld [vmem:[#allocation3 + $0xbb] sm:$0xff] }
 0x504   : > { %12082 = vmatmul.mubr.msk.f32.gmra.mrb[34].mxu1 %vm18258_vm10, %v5807_v25  ;;  %vm18269_vm10 = vmmov %vm18260_vm4  ;;  %v7441_v25 = vld [vmem:[#allocation3 + $0xc3] sm:$0xff] }
 0x505   : > { %12086 = vmatprep.mubr.msk.f32.mxu1 %vm18259_vm14, %v6559_v10  ;;  %vm18270_vm14 = vmmov %vm18260_vm4  ;;  %v7442_v10 = vld [vmem:[#allocation3 + $0xcb] sm:$0xff] }
 0x508   : > { %12087 = vmatmul.mubr.msk.f32.vlgmr.msra.gmra.mrb[0].mxu1 %vm18260_vm4, %v6560_v51  ;;  %v7443_v51 = vld [vmem:[#allocation3 + $0xd3] sm:$0xff] }
 0x509   : > { %12141 = vmatpush3.msk.msra.mxu1 %vm18261_vm11, %v16329_v38  ;;  %12089 = vmatprep.mubr.msk.f32.mxu1 %vm18262_vm12, %v16377_v9  ;;  %vm18271_vm11 = vmmov %vm18260_vm4  ;;  %v6587_v38 = vld [vmem:[#allocation3 + $0xe2] sm:$0xff] }
 0x50a   : > { %12196 = vmatprep.subr.msk.mxu1 %vm18263_vm2, %v16374_v12  ;;  %vm18272_vm12 = vmmov %vm18260_vm4 }
 0x50b   : > { %vm18273_vm2 = vmmov %vm18260_vm4 }
 0x50c   : > { %12090 = vmatmul.mubr.msk.f32.gmra.mrb[2].mxu1 %vm18264_vm9, %v16385_v19  ;;  %vm18274_vm9 = vmmov %vm18273_vm2 }
 0x50d   : > { %12092 = vmatprep.mubr.msk.f32.mxu1 %vm18265_vm5, %v16389_v33  ;;  %vm18275_vm5 = vmmov %vm18273_vm2 }
 0x510   : > { %12093 = vmatmul.mubr.msk.f32.gmra.mrb[4].mxu1 %vm18266_vm6, %v16393_v47  ;;  %vm18276_vm6 = vmmov %vm18273_vm2 }
 0x511   : > { %12095 = vmatprep.mubr.msk.f32.mxu1 %vm18267_vm13, %v16397_v21  ;;  %vm18277_vm13 = vmmov %vm18273_vm2 }
 0x514   : > { %12096 = vmatmul.mubr.msk.f32.gmra.mrb[6].mxu1 %vm18268_vm7, %v16401_v28  ;;  %vm18278_vm7 = vmmov %vm18273_vm2 }
 0x515   : > { %12098 = vmatprep.mubr.msk.f32.mxu1 %vm18269_vm10, %v16405_v49  ;;  %vm18279_vm10 = vmmov %vm18273_vm2 }
 0x518   : > { %12099 = vmatmul.mubr.msk.f32.gmra.mrb[8].mxu1 %vm18270_vm14, %v16409_v2  ;;  %vm18280_vm14 = vmmov %vm18273_vm2 }
 0x519   : > { %12101 = vmatprep.mubr.msk.f32.mxu1 %vm18260_vm4, %v16413_v3  ;;  %vm18281_vm4 = vmmov %vm18273_vm2 }
 0x51c   : > { %12102 = vmatmul.mubr.msk.f32.gmra.mrb[10].mxu1 %vm18271_vm11, %v6570_v35  ;;  %vm18282_vm11 = vmmov %vm18273_vm2 }
 0x51d   : > { %12104 = vmatprep.mubr.msk.f32.mxu1 %vm18272_vm12, %v6571_v34  ;;  %vm18283_vm12 = vmmov %vm18273_vm2 }
 0x520   : > { %12105 = vmatmul.mubr.msk.f32.gmra.mrb[12].mxu1 %vm18273_vm2, %v6572_v0 }
 0x521   : > { %12107 = vmatprep.mubr.msk.f32.mxu1 %vm18274_vm9, %v6573_v1  ;;  %vm18284_vm9 = vmmov %vm18273_vm2 }
 0x524   : > { %12108 = vmatmul.mubr.msk.f32.gmra.mrb[14].mxu1 %vm18275_vm5, %v6574_v16  ;;  %vm18285_vm5 = vmmov %vm18273_vm2 }
 0x525   : > { %12110 = vmatprep.mubr.msk.f32.mxu1 %vm18276_vm6, %v6575_v45  ;;  %vm18286_vm6 = vmmov %vm18273_vm2 }
 0x528   : > { %12111 = vmatmul.mubr.msk.f32.gmra.mrb[16].mxu1 %vm18277_vm13, %v6576_v42  ;;  %vm18287_vm13 = vmmov %vm18273_vm2 }
 0x529   : > { %12113 = vmatprep.mubr.msk.f32.mxu1 %vm18278_vm7, %v6577_v40  ;;  %vm18288_vm7 = vmmov %vm18273_vm2 }
 0x52c   : > { %12114 = vmatmul.mubr.msk.f32.gmra.mrb[18].mxu1 %vm18279_vm10, %v6578_v57  ;;  %vm18289_vm10 = vmmov %vm18273_vm2 }
 0x52d   : > { %12116 = vmatprep.mubr.msk.f32.mxu1 %vm18280_vm14, %v6579_v23  ;;  %vm18290_vm14 = vmmov %vm18273_vm2 }
 0x530   : > { %12117 = vmatmul.mubr.msk.f32.gmra.mrb[20].mxu1 %vm18281_vm4, %v6580_v39  ;;  %vm18291_vm4 = vmmov %vm18273_vm2 }
 0x531   : > { %12119 = vmatprep.mubr.msk.f32.mxu1 %vm18282_vm11, %v6581_v20  ;;  %vm18292_vm11 = vmmov %vm18273_vm2 }
 0x534   : > { %12120 = vmatmul.mubr.msk.f32.gmra.mrb[22].mxu1 %vm18283_vm12, %v6582_v60  ;;  %vm18293_vm12 = vmmov %vm18273_vm2 }
 0x535   : > { %12122 = vmatprep.mubr.msk.f32.mxu1 %vm18273_vm2, %v6583_v15 }
 0x538   : > { %12123 = vmatmul.mubr.msk.f32.gmra.mrb[24].mxu1 %vm18284_vm9, %v6584_v52  ;;  %vm18294_vm9 = vmmov %vm18273_vm2 }
 0x539   : > { %12125 = vmatprep.mubr.msk.f32.mxu1 %vm18285_vm5, %v6585_v17  ;;  %vm18295_vm5 = vmmov %vm18273_vm2 }
 0x53c   : > { %12126 = vmatmul.mubr.msk.f32.gmra.mrb[26].mxu1 %vm18286_vm6, %v6586_v26  ;;  %vm18296_vm6 = vcmask 1043456  }
 0x53d   : > { %12128 = vmatprep.mubr.msk.f32.mxu1 %vm18287_vm13, %v6587_v38  ;;  %vm18297_vm13 = vmmov %vm18273_vm2 }
 0x540   : > { %12129 = vmatmul.mubr.msk.f32.gmra.mrb[28].mxu1 %vm18288_vm7, %v6588_v44  ;;  %vm18298_vm7 = vmmov %vm18296_vm6 }
 0x541   : > { %12131 = vmatprep.mubr.msk.f32.mxu1 %vm18289_vm10, %v6589_v46  ;;  %vm18299_vm10 = vmmov %vm18273_vm2 }
 0x544   : > { %12132 = vmatmul.mubr.msk.f32.gmra.mrb[30].mxu1 %vm18290_vm14, %v6590_v6  ;;  %vm18300_vm14 = vmmov %vm18273_vm2 }
 0x545   : > { %12134 = vmatprep.mubr.msk.f32.mxu1 %vm18291_vm4, %v6591_v48  ;;  %vm18301_vm4 = vmmov %vm18273_vm2 }
 0x548   : > { %12135 = vmatmul.mubr.msk.f32.gmra.mrb[32].mxu1 %vm18292_vm11, %v6592_v61  ;;  %vm18302_vm11 = vmmov %vm18273_vm2 }
 0x549   : > { %12137 = vmatprep.mubr.msk.f32.mxu1 %vm18293_vm12, %v6593_v30  ;;  %vm18303_vm12 = vmmov %vm18273_vm2 }
 0x54c   : > { %12138 = vmatmul.mubr.msk.f32.gmra.mrb[34].mxu1 %vm18273_vm2, %v6594_v43 }
 0x54d   : > { %12142 = vmatprep.mubr.msk.f32.mxu1 %vm18294_vm9, %v16377_v9  ;;  %vm18304_vm9 = vmmov %vm18273_vm2  ;;  %v7445_v9 = vld [vmem:[#allocation3 + $0xe3] sm:$0xff] }
 0x550   : > { %12143 = vmatmul.mubr.msk.f32.vlgmr.msra.gmra.mrb[0].mxu1 %vm18295_vm5, %v16385_v19  ;;  %vm18305_vm5 = vmmov %vm18273_vm2  ;;  %v7446_v19 = vld [vmem:[#allocation3 + $0xeb] sm:$0xff] }
 0x551   : > { %12197 = vmatpush3.msk.msra.mxu1 %vm18296_vm6, %v16374_v12  ;;  %12145 = vmatprep.mubr.msk.f32.mxu1 %vm18297_vm13, %v16389_v33  ;;  %vm18306_vm6 = vmmov %vm18273_vm2  ;;  %v7444_v12 = vld [vmem:[#allocation3 + $0xdb] sm:$0xff]  ;;  %v7447_v33 = vld [vmem:[#allocation3 + $0xf3] sm:$0xff] }
 0x552   : > { %12252 = vmatprep.subr.msk.mxu1 %vm18298_vm7, %v10648_v7  ;;  %vm18307_vm13 = vmmov %vm18273_vm2 }
 0x553   : > { %vm18308_vm7 = vmmov %vm18273_vm2 }
 0x554   : > { %12146 = vmatmul.mubr.msk.f32.gmra.mrb[2].mxu1 %vm18299_vm10, %v16393_v47  ;;  %vm18309_vm10 = vmmov %vm18273_vm2  ;;  %v7448_v47 = vld [vmem:[#allocation3 + $0xfb] sm:$0xff] }
 0x555   : > { %12148 = vmatprep.mubr.msk.f32.mxu1 %vm18300_vm14, %v16397_v21  ;;  %vm18310_vm14 = vmmov %vm18273_vm2  ;;  %v7449_v21 = vld [vmem:[#allocation3 + $0x103] sm:$0xff] }
 0x558   : > { %12149 = vmatmul.mubr.msk.f32.gmra.mrb[4].mxu1 %vm18301_vm4, %v16401_v28  ;;  %vm18311_vm4 = vmmov %vm18273_vm2  ;;  %v7450_v28 = vld [vmem:[#allocation3 + $0x10b] sm:$0xff] }
 0x559   : > { %12151 = vmatprep.mubr.msk.f32.mxu1 %vm18302_vm11, %v16405_v49  ;;  %vm18312_vm11 = vmmov %vm18273_vm2  ;;  %v7451_v49 = vld [vmem:[#allocation3 + $0x113] sm:$0xff] }
 0x55c   : > { %12152 = vmatmul.mubr.msk.f32.gmra.mrb[6].mxu1 %vm18303_vm12, %v16409_v2  ;;  %vm18313_vm12 = vmmov %vm18273_vm2  ;;  %v7452_v2 = vld [vmem:[#allocation3 + $0x11b] sm:$0xff] }
 0x55d   : > { %12154 = vmatprep.mubr.msk.f32.mxu1 %vm18273_vm2, %v16413_v3  ;;  %v7453_v3 = vld [vmem:[#allocation3 + $0x123] sm:$0xff] }
 0x560   : > { %12155 = vmatmul.mubr.msk.f32.gmra.mrb[8].mxu1 %vm18304_vm9, %v6570_v35  ;;  %vm18314_vm9 = vmmov %vm18273_vm2  ;;  %v7454_v35 = vld [vmem:[#allocation3 + $0x12b] sm:$0xff] }
 0x561   : > { %12157 = vmatprep.mubr.msk.f32.mxu1 %vm18305_vm5, %v6571_v34  ;;  %vm18315_vm5 = vmmov %vm18273_vm2  ;;  %v7849_v34 = vld [vmem:[#allocation3 + $0x14] sm:$0xff] }
 0x564   : > { %12158 = vmatmul.mubr.msk.f32.gmra.mrb[10].mxu1 %vm18306_vm6, %v6572_v0  ;;  %vm18316_vm6 = vmmov %vm18273_vm2  ;;  %v7850_v0 = vld [vmem:[#allocation3 + $0x1c] sm:$0xff] }
 0x565   : > { %12160 = vmatprep.mubr.msk.f32.mxu1 %vm18307_vm13, %v6573_v1  ;;  %vm18317_vm13 = vmmov %vm18273_vm2  ;;  %v16541_v1 = vld [vmem:[%s17254_s2 + $0x1c] sm:$0xf] }
 0x568   : > { %12161 = vmatmul.mubr.msk.f32.gmra.mrb[12].mxu1 %vm18308_vm7, %v6574_v16  ;;  %vm18318_vm7 = vmmov %vm18273_vm2  ;;  %v16544_v16 = vld [vmem:[#allocation3 + $0x24] sm:$0xff] }
 0x569   : > { %12163 = vmatprep.mubr.msk.f32.mxu1 %vm18309_vm10, %v6575_v45  ;;  %vm18319_vm10 = vmmov %vm18273_vm2  ;;  %v16552_v45 = vld [vmem:[#allocation3 + $0x2c] sm:$0xff] }
 0x56c   : > { %12164 = vmatmul.mubr.msk.f32.gmra.mrb[14].mxu1 %vm18310_vm14, %v6576_v42  ;;  %vm18320_vm14 = vmmov %vm18273_vm2  ;;  %v16556_v42 = vld [vmem:[#allocation3 + $0x34] sm:$0xff] }
 0x56d   : > { %12166 = vmatprep.mubr.msk.f32.mxu1 %vm18311_vm4, %v6577_v40  ;;  %vm18321_vm4 = vmmov %vm18273_vm2  ;;  %v16560_v40 = vld [vmem:[#allocation3 + $0x3c] sm:$0xff] }
 0x570   : > { %12167 = vmatmul.mubr.msk.f32.gmra.mrb[16].mxu1 %vm18312_vm11, %v6578_v57  ;;  %vm18322_vm11 = vmmov %vm18273_vm2  ;;  %v16564_v57 = vld [vmem:[#allocation3 + $0x44] sm:$0xff] }
 0x571   : > { %12169 = vmatprep.mubr.msk.f32.mxu1 %vm18313_vm12, %v6579_v23  ;;  %vm18323_vm12 = vmmov %vm18273_vm2  ;;  %v16568_v23 = vld [vmem:[#allocation3 + $0x4c] sm:$0xff] }
 0x574   : > { %12170 = vmatmul.mubr.msk.f32.gmra.mrb[18].mxu1 %vm18273_vm2, %v6580_v39  ;;  %v16572_v39 = vld [vmem:[#allocation3 + $0x54] sm:$0xff] }
 0x575   : > { %12172 = vmatprep.mubr.msk.f32.mxu1 %vm18314_vm9, %v6581_v20  ;;  %vm18324_vm9 = vmmov %vm18273_vm2  ;;  %v16576_v20 = vld [vmem:[#allocation3 + $0x5c] sm:$0xff] }
 0x578   : > { %12173 = vmatmul.mubr.msk.f32.gmra.mrb[20].mxu1 %vm18315_vm5, %v6582_v60  ;;  %vm18325_vm5 = vmmov %vm18273_vm2  ;;  %v16580_v60 = vld [vmem:[#allocation3 + $0x64] sm:$0xff] }
 0x579   : > { %12175 = vmatprep.mubr.msk.f32.mxu1 %vm18316_vm6, %v6583_v15  ;;  %vm18326_vm6 = vmmov %vm18273_vm2  ;;  %v7860_v15 = vld [vmem:[#allocation3 + $0x6c] sm:$0xff] }
 0x57c   : > { %12176 = vmatmul.mubr.msk.f32.gmra.mrb[22].mxu1 %vm18317_vm13, %v6584_v52  ;;  %vm18327_vm13 = vmmov %vm18273_vm2  ;;  %v7861_v52 = vld [vmem:[#allocation3 + $0x74] sm:$0xff] }
 0x57d   : > { %12178 = vmatprep.mubr.msk.f32.mxu1 %vm18318_vm7, %v6585_v17  ;;  %vm18328_vm7 = vmmov %vm18273_vm2  ;;  %v7862_v17 = vld [vmem:[#allocation3 + $0x7c] sm:$0xff] }
 0x580   : > { %12179 = vmatmul.mubr.msk.f32.gmra.mrb[24].mxu1 %vm18319_vm10, %v6586_v26  ;;  %vm18329_vm10 = vmmov %vm18273_vm2  ;;  %v7863_v26 = vld [vmem:[#allocation3 + $0x84] sm:$0xff] }
 0x581   : > { %12181 = vmatprep.mubr.msk.f32.mxu1 %vm18320_vm14, %v6587_v38  ;;  %vm18330_vm14 = vmmov %vm18273_vm2  ;;  %v7864_v38 = vld [vmem:[#allocation3 + $0x8c] sm:$0xff] }
 0x584   : > { %12182 = vmatmul.mubr.msk.f32.gmra.mrb[26].mxu1 %vm18321_vm4, %v6588_v44  ;;  %vm18331_vm4 = vcmask 1043456   ;;  %v7865_v44 = vld [vmem:[#allocation3 + $0x94] sm:$0xff] }
 0x585   : > { %12184 = vmatprep.mubr.msk.f32.mxu1 %vm18322_vm11, %v6589_v46  ;;  %vm18332_vm11 = vmmov %vm18273_vm2  ;;  %v7866_v46 = vld [vmem:[#allocation3 + $0x9c] sm:$0xff] }
 0x588   : > { %12185 = vmatmul.mubr.msk.f32.gmra.mrb[28].mxu1 %vm18323_vm12, %v6590_v6  ;;  %vm18333_vm12 = vmmov %vm18331_vm4  ;;  %v7867_v6 = vld [vmem:[#allocation3 + $0xa4] sm:$0xff] }
 0x589   : > { %12187 = vmatprep.mubr.msk.f32.mxu1 %vm18273_vm2, %v6591_v48  ;;  %v7868_v48 = vld [vmem:[#allocation3 + $0xac] sm:$0xff] }
 0x58c   : > { %12188 = vmatmul.mubr.msk.f32.gmra.mrb[30].mxu1 %vm18324_vm9, %v6592_v61  ;;  %vm18334_vm9 = vmmov %vm18273_vm2  ;;  %v7869_v61 = vld [vmem:[#allocation3 + $0xb4] sm:$0xff] }
 0x58d   : > { %12190 = vmatprep.mubr.msk.f32.mxu1 %vm18325_vm5, %v6593_v30  ;;  %vm18335_vm5 = vmmov %vm18273_vm2  ;;  %v7870_v30 = vld [vmem:[#allocation3 + $0xbc] sm:$0xff] }
 0x590   : > { %12191 = vmatmul.mubr.msk.f32.gmra.mrb[32].mxu1 %vm18326_vm6, %v6594_v43  ;;  %vm18336_vm6 = vmmov %vm18273_vm2  ;;  %v7871_v43 = vld [vmem:[#allocation3 + $0xc4] sm:$0xff] }
 0x591   : > { %12193 = vmatprep.mubr.msk.f32.mxu1 %vm18327_vm13, %v7023_v58  ;;  %vm18337_vm13 = vmmov %vm18273_vm2  ;;  %v7873_v58 = vld [vmem:[#allocation3 + $0xd4] sm:$0xff] }
 0x594   : > { %12194 = vmatmul.mubr.msk.f32.gmra.mrb[34].mxu1 %vm18328_vm7, %v7024_v37  ;;  %vm18338_vm7 = vmmov %vm18273_vm2  ;;  %v7874_v37 = vld [vmem:[#allocation3 + $0xdc] sm:$0xff] }
 0x595   : > { %12198 = vmatprep.mubr.msk.f32.mxu1 %vm18329_vm10, %v7419_v50  ;;  %vm18339_vm10 = vmmov %vm18273_vm2  ;;  %v7875_v50 = vld [vmem:[#allocation3 + $0xe4] sm:$0xff] }
 0x598   : > { %12199 = vmatmul.mubr.msk.f32.vlgmr.msra.gmra.mrb[0].mxu1 %vm18330_vm14, %v7420_v4  ;;  %vm18340_vm14 = vmmov %vm18273_vm2  ;;  %v7876_v4 = vld [vmem:[#allocation3 + $0xec] sm:$0xff] }
 0x599   : > { %12253 = vmatpush3.msk.msra.mxu1 %vm18331_vm4, %v10648_v7  ;;  %12201 = vmatprep.mubr.msk.f32.mxu1 %vm18332_vm11, %v7421_v29  ;;  %vm18341_vm4 = vmmov %vm18273_vm2  ;;  %v7872_v7 = vld [vmem:[#allocation3 + $0xcc] sm:$0xff]  ;;  %v7878_v29 = vld [vmem:[#allocation3 + $0xfc] sm:$0xff] }
 0x59a   : > { %12308 = vmatprep.subr.msk.mxu1 %vm18333_vm12, %v16497_v56  ;;  %vm18342_vm11 = vmmov %vm18273_vm2 }
 0x59b   : > { %vm18343_vm12 = vmmov %vm18273_vm2 }
 0x59c   : > { %12202 = vmatmul.mubr.msk.f32.gmra.mrb[2].mxu1 %vm18273_vm2, %v7422_v54  ;;  %v7879_v54 = vld [vmem:[#allocation3 + $0x104] sm:$0xff] }
 0x59d   : > { %12204 = vmatprep.mubr.msk.f32.mxu1 %vm18334_vm9, %v7423_v8  ;;  %vm18344_vm9 = vmmov %vm18273_vm2  ;;  %v7880_v8 = vld [vmem:[#allocation3 + $0x10c] sm:$0xff] }
 0x5a0   : > { %12205 = vmatmul.mubr.msk.f32.gmra.mrb[4].mxu1 %vm18335_vm5, %v7424_v41  ;;  %vm18345_vm5 = vmmov %vm18273_vm2  ;;  %v7881_v41 = vld [vmem:[#allocation3 + $0x114] sm:$0xff] }
 0x5a1   : > { %12207 = vmatprep.mubr.msk.f32.mxu1 %vm18336_vm6, %v7425_v14  ;;  %vm18346_vm6 = vmmov %vm18273_vm2  ;;  %v7882_v14 = vld [vmem:[#allocation3 + $0x11c] sm:$0xff] }
 0x5a4   : > { %12208 = vmatmul.mubr.msk.f32.gmra.mrb[6].mxu1 %vm18337_vm13, %v7426_v24  ;;  %vm18347_vm13 = vmmov %vm18273_vm2  ;;  %v7883_v24 = vld [vmem:[#allocation3 + $0x124] sm:$0xff] }
 0x5a5   : > { %12210 = vmatprep.mubr.msk.f32.mxu1 %vm18338_vm7, %v7427_v32  ;;  %vm18348_vm7 = vmmov %vm18273_vm2  ;;  %v7884_v32 = vld [vmem:[#allocation3 + $0x12c] sm:$0xff] }
 0x5a8   : > { %12211 = vmatmul.mubr.msk.f32.gmra.mrb[8].mxu1 %vm18339_vm10, %v7428_v27  ;;  %vm18349_vm10 = vmmov %vm18273_vm2  ;;  %v10762_v27 = vld [vmem:[%s17254_s2 + $0x20] sm:$0xf] }
 0x5a9   : > { %12213 = vmatprep.mubr.msk.f32.mxu1 %vm18340_vm14, %v7429_v11  ;;  %vm18350_vm14 = vmmov %vm18273_vm2  ;;  %v8313_v11 = vld [vmem:[#allocation3 + $0x134] sm:$0xff] }
 0x5ac   : > { %12214 = vmatmul.mubr.msk.f32.gmra.mrb[10].mxu1 %vm18341_vm4, %v7430_v63  ;;  %vm18351_vm4 = vmmov %vm18273_vm2  ;;  %v8314_v63 = vld [vmem:[#allocation3 + $0x13c] sm:$0xff] }
 0x5ad   : > { %12216 = vmatprep.mubr.msk.f32.mxu1 %vm18342_vm11, %v7431_v5  ;;  %vm18352_vm11 = vmmov %vm18273_vm2  ;;  %v8709_v5 = vld [vmem:[#allocation3 + $0x25] sm:$0xff] }
 0x5b0   : > { %12217 = vmatmul.mubr.msk.f32.gmra.mrb[12].mxu1 %vm18343_vm12, %v7432_v13  ;;  %vm18353_vm12 = vmmov %vm18273_vm2  ;;  %v8710_v13 = vld [vmem:[#allocation3 + $0x2d] sm:$0xff] }
 0x5b1   : > { %12219 = vmatprep.mubr.msk.f32.mxu1 %vm18273_vm2, %v7433_v22  ;;  %v8711_v22 = vld [vmem:[#allocation3 + $0x35] sm:$0xff] }
 0x5b4   : > { %12220 = vmatmul.mubr.msk.f32.gmra.mrb[14].mxu1 %vm18344_vm9, %v7434_v53  ;;  %vm18354_vm9 = vmmov %vm18273_vm2  ;;  %v8712_v53 = vld [vmem:[#allocation3 + $0x3d] sm:$0xff] }
 0x5b5   : > { %12222 = vmatprep.mubr.msk.f32.mxu1 %vm18345_vm5, %v7435_v31  ;;  %vm18355_vm5 = vmmov %vm18273_vm2  ;;  %v8713_v31 = vld [vmem:[#allocation3 + $0x45] sm:$0xff] }
 0x5b8   : > { %12223 = vmatmul.mubr.msk.f32.gmra.mrb[16].mxu1 %vm18346_vm6, %v7436_v18  ;;  %vm18356_vm6 = vmmov %vm18273_vm2  ;;  %v8714_v18 = vld [vmem:[#allocation3 + $0x4d] sm:$0xff] }
 0x5b9   : > { %12225 = vmatprep.mubr.msk.f32.mxu1 %vm18347_vm13, %v7437_v36  ;;  %vm18357_vm13 = vmmov %vm18273_vm2  ;;  %v8715_v36 = vld [vmem:[#allocation3 + $0x55] sm:$0xff] }
 0x5bc   : > { %12226 = vmatmul.mubr.msk.f32.gmra.mrb[18].mxu1 %vm18348_vm7, %v7438_v59  ;;  %vm18358_vm7 = vmmov %vm18273_vm2  ;;  %v8716_v59 = vld [vmem:[#allocation3 + $0x5d] sm:$0xff] }
 0x5bd   : > { %12228 = vmatprep.mubr.msk.f32.mxu1 %vm18349_vm10, %v7439_v55  ;;  %vm18359_vm10 = vmmov %vm18273_vm2  ;;  %v8717_v55 = vld [vmem:[#allocation3 + $0x65] sm:$0xff] }
 0x5c0   : > { %12229 = vmatmul.mubr.msk.f32.gmra.mrb[20].mxu1 %vm18350_vm14, %v7440_v62  ;;  %vm18360_vm14 = vmmov %vm18273_vm2  ;;  %v8718_v62 = vld [vmem:[#allocation3 + $0x6d] sm:$0xff] }
 0x5c1   : > { %12231 = vmatprep.mubr.msk.f32.mxu1 %vm18351_vm4, %v7441_v25  ;;  %vm18361_vm4 = vmmov %vm18273_vm2  ;;  %v8719_v25 = vld [vmem:[#allocation3 + $0x75] sm:$0xff] }
 0x5c4   : > { %12232 = vmatmul.mubr.msk.f32.gmra.mrb[22].mxu1 %vm18352_vm11, %v7442_v10  ;;  %vm18362_vm11 = vmmov %vm18273_vm2  ;;  %v8720_v10 = vld [vmem:[#allocation3 + $0x7d] sm:$0xff] }
 0x5c5   : > { %12234 = vmatprep.mubr.msk.f32.mxu1 %vm18353_vm12, %v7443_v51  ;;  %vm18363_vm12 = vmmov %vm18273_vm2  ;;  %v8721_v51 = vld [vmem:[#allocation3 + $0x85] sm:$0xff] }
 0x5c8   : > { %12235 = vmatmul.mubr.msk.f32.gmra.mrb[24].mxu1 %vm18273_vm2, %v7444_v12  ;;  %v8722_v12 = vld [vmem:[#allocation3 + $0x8d] sm:$0xff] }
 0x5c9   : > { %12237 = vmatprep.mubr.msk.f32.mxu1 %vm18354_vm9, %v7445_v9  ;;  %vm18364_vm9 = vmmov %vm18273_vm2  ;;  %v8723_v9 = vld [vmem:[#allocation3 + $0x95] sm:$0xff] }
 0x5cc   : > { %12238 = vmatmul.mubr.msk.f32.gmra.mrb[26].mxu1 %vm18355_vm5, %v7446_v19  ;;  %vm18365_vm5 = vcmask 1043456   ;;  %v8724_v19 = vld [vmem:[#allocation3 + $0x9d] sm:$0xff] }
 0x5cd   : > { %12240 = vmatprep.mubr.msk.f32.mxu1 %vm18356_vm6, %v7447_v33  ;;  %vm18366_vm6 = vmmov %vm18273_vm2  ;;  %v8725_v33 = vld [vmem:[#allocation3 + $0xa5] sm:$0xff] }
 0x5d0   : > { %12241 = vmatmul.mubr.msk.f32.gmra.mrb[28].mxu1 %vm18357_vm13, %v7448_v47  ;;  %vm18367_vm13 = vmmov %vm18365_vm5  ;;  %v8726_v47 = vld [vmem:[#allocation3 + $0xad] sm:$0xff] }
 0x5d1   : > { %12243 = vmatprep.mubr.msk.f32.mxu1 %vm18358_vm7, %v7449_v21  ;;  %vm18368_vm7 = vmmov %vm18273_vm2  ;;  %v8727_v21 = vld [vmem:[#allocation3 + $0xb5] sm:$0xff] }
 0x5d4   : > { %12244 = vmatmul.mubr.msk.f32.gmra.mrb[30].mxu1 %vm18359_vm10, %v7450_v28  ;;  %vm18369_vm10 = vmmov %vm18273_vm2  ;;  %v8728_v28 = vld [vmem:[#allocation3 + $0xbd] sm:$0xff] }
 0x5d5   : > { %12246 = vmatprep.mubr.msk.f32.mxu1 %vm18360_vm14, %v7451_v49  ;;  %vm18370_vm14 = vmmov %vm18273_vm2  ;;  %v8729_v49 = vld [vmem:[#allocation3 + $0xc5] sm:$0xff] }
 0x5d8   : > { %12247 = vmatmul.mubr.msk.f32.gmra.mrb[32].mxu1 %vm18361_vm4, %v7452_v2  ;;  %vm18371_vm4 = vmmov %vm18273_vm2  ;;  %v8730_v2 = vld [vmem:[#allocation3 + $0xcd] sm:$0xff] }
 0x5d9   : > { %12249 = vmatprep.mubr.msk.f32.mxu1 %vm18362_vm11, %v7453_v3  ;;  %vm18372_vm11 = vmmov %vm18273_vm2  ;;  %v8731_v3 = vld [vmem:[#allocation3 + $0xd5] sm:$0xff] }
 0x5dc   : > { %12250 = vmatmul.mubr.msk.f32.gmra.mrb[34].mxu1 %vm18363_vm12, %v7454_v35  ;;  %vm18373_vm12 = vmmov %vm18273_vm2  ;;  %v8732_v35 = vld [vmem:[#allocation3 + $0xdd] sm:$0xff] }
 0x5dd   : > { %12254 = vmatprep.mubr.msk.f32.mxu1 %vm18273_vm2, %v7849_v34  ;;  %v8733_v34 = vld [vmem:[#allocation3 + $0xe5] sm:$0xff] }
 0x5e0   : > { %12255 = vmatmul.mubr.msk.f32.vlgmr.msra.gmra.mrb[0].mxu1 %vm18364_vm9, %v7850_v0  ;;  %vm18374_vm9 = vmmov %vm18273_vm2  ;;  %v8734_v0 = vld [vmem:[#allocation3 + $0xed] sm:$0xff] }
 0x5e1   : > { %12309 = vmatpush3.msk.msra.mxu1 %vm18365_vm5, %v16497_v56  ;;  %12257 = vmatprep.mubr.msk.f32.mxu1 %vm18366_vm6, %v16544_v16  ;;  %vm18375_vm5 = vmmov %vm18273_vm2  ;;  %v7877_v56 = vld [vmem:[#allocation3 + $0xf4] sm:$0xff] }
 0x5e2   : > { %12364 = vmatprep.subr.msk.mxu1 %vm18367_vm13, %v16541_v1  ;;  %vm18376_vm6 = vmmov %vm18273_vm2 }
 0x5e3   : > { %vm18377_vm13 = vmmov %vm18273_vm2 }
 0x5e4   : > { %12258 = vmatmul.mubr.msk.f32.gmra.mrb[2].mxu1 %vm18368_vm7, %v16552_v45  ;;  %vm18378_vm7 = vmmov %vm18273_vm2 }
 0x5e5   : > { %12260 = vmatprep.mubr.msk.f32.mxu1 %vm18369_vm10, %v16556_v42  ;;  %vm18379_vm10 = vmmov %vm18273_vm2 }
 0x5e8   : > { %12261 = vmatmul.mubr.msk.f32.gmra.mrb[4].mxu1 %vm18370_vm14, %v16560_v40  ;;  %vm18380_vm14 = vmmov %vm18273_vm2 }
 0x5e9   : > { %12263 = vmatprep.mubr.msk.f32.mxu1 %vm18371_vm4, %v16564_v57  ;;  %vm18381_vm4 = vmmov %vm18273_vm2 }
 0x5ec   : > { %12264 = vmatmul.mubr.msk.f32.gmra.mrb[6].mxu1 %vm18372_vm11, %v16568_v23  ;;  %vm18382_vm11 = vmmov %vm18273_vm2 }
 0x5ed   : > { %12266 = vmatprep.mubr.msk.f32.mxu1 %vm18373_vm12, %v16572_v39  ;;  %vm18383_vm12 = vmmov %vm18273_vm2 }
 0x5f0   : > { %12267 = vmatmul.mubr.msk.f32.gmra.mrb[8].mxu1 %vm18273_vm2, %v16576_v20 }
 0x5f1   : > { %12269 = vmatprep.mubr.msk.f32.mxu1 %vm18374_vm9, %v16580_v60  ;;  %vm18384_vm9 = vmmov %vm18273_vm2 }
 0x5f4   : > { %12270 = vmatmul.mubr.msk.f32.gmra.mrb[10].mxu1 %vm18375_vm5, %v7860_v15  ;;  %vm18385_vm5 = vmmov %vm18273_vm2 }
 0x5f5   : > { %12272 = vmatprep.mubr.msk.f32.mxu1 %vm18376_vm6, %v7861_v52  ;;  %vm18386_vm6 = vmmov %vm18273_vm2 }
 0x5f8   : > { %12273 = vmatmul.mubr.msk.f32.gmra.mrb[12].mxu1 %vm18377_vm13, %v7862_v17  ;;  %vm18387_vm13 = vmmov %vm18273_vm2 }
 0x5f9   : > { %12275 = vmatprep.mubr.msk.f32.mxu1 %vm18378_vm7, %v7863_v26  ;;  %vm18388_vm7 = vmmov %vm18273_vm2 }
 0x5fc   : > { %12276 = vmatmul.mubr.msk.f32.gmra.mrb[14].mxu1 %vm18379_vm10, %v7864_v38  ;;  %vm18389_vm10 = vmmov %vm18273_vm2 }
 0x5fd   : > { %12278 = vmatprep.mubr.msk.f32.mxu1 %vm18380_vm14, %v7865_v44  ;;  %vm18390_vm14 = vmmov %vm18273_vm2 }
 0x600   : > { %12279 = vmatmul.mubr.msk.f32.gmra.mrb[16].mxu1 %vm18381_vm4, %v7866_v46  ;;  %vm18391_vm4 = vmmov %vm18273_vm2 }
 0x601   : > { %12281 = vmatprep.mubr.msk.f32.mxu1 %vm18382_vm11, %v7867_v6  ;;  %vm18392_vm11 = vmmov %vm18273_vm2 }
 0x604   : > { %12282 = vmatmul.mubr.msk.f32.gmra.mrb[18].mxu1 %vm18383_vm12, %v7868_v48  ;;  %vm18393_vm12 = vmmov %vm18273_vm2 }
 0x605   : > { %12284 = vmatprep.mubr.msk.f32.mxu1 %vm18273_vm2, %v7869_v61 }
 0x608   : > { %12285 = vmatmul.mubr.msk.f32.gmra.mrb[20].mxu1 %vm18384_vm9, %v7870_v30  ;;  %vm18394_vm9 = vmmov %vm18273_vm2 }
 0x609   : > { %12287 = vmatprep.mubr.msk.f32.mxu1 %vm18385_vm5, %v7871_v43  ;;  %vm18395_vm5 = vmmov %vm18273_vm2 }
 0x60c   : > { %12288 = vmatmul.mubr.msk.f32.gmra.mrb[22].mxu1 %vm18386_vm6, %v7872_v7  ;;  %vm18396_vm6 = vmmov %vm18273_vm2 }
 0x60d   : > { %12290 = vmatprep.mubr.msk.f32.mxu1 %vm18387_vm13, %v7873_v58  ;;  %vm18397_vm13 = vmmov %vm18273_vm2 }
 0x610   : > { %12291 = vmatmul.mubr.msk.f32.gmra.mrb[24].mxu1 %vm18388_vm7, %v7874_v37  ;;  %vm18398_vm7 = vmmov %vm18273_vm2 }
 0x611   : > { %12293 = vmatprep.mubr.msk.f32.mxu1 %vm18389_vm10, %v7875_v50  ;;  %vm18399_vm10 = vmmov %vm18273_vm2 }
 0x614   : > { %12294 = vmatmul.mubr.msk.f32.gmra.mrb[26].mxu1 %vm18390_vm14, %v7876_v4  ;;  %vm18400_vm14 = vcmask 1043456  }
 0x615   : > { %12296 = vmatprep.mubr.msk.f32.mxu1 %vm18391_vm4, %v7877_v56  ;;  %vm18401_vm4 = vmmov %vm18273_vm2 }
 0x618   : > { %12297 = vmatmul.mubr.msk.f32.gmra.mrb[28].mxu1 %vm18392_vm11, %v7878_v29  ;;  %vm18402_vm11 = vmmov %vm18400_vm14 }
 0x619   : > { %12299 = vmatprep.mubr.msk.f32.mxu1 %vm18393_vm12, %v7879_v54  ;;  %vm18403_vm12 = vmmov %vm18273_vm2 }
 0x61c   : > { %12300 = vmatmul.mubr.msk.f32.gmra.mrb[30].mxu1 %vm18273_vm2, %v7880_v8 }
 0x61d   : > { %12302 = vmatprep.mubr.msk.f32.mxu1 %vm18394_vm9, %v7881_v41  ;;  %vm18404_vm9 = vmmov %vm18273_vm2 }
 0x620   : > { %12303 = vmatmul.mubr.msk.f32.gmra.mrb[32].mxu1 %vm18395_vm5, %v7882_v14  ;;  %vm18405_vm5 = vmmov %vm18273_vm2 }
 0x621   : > { %12305 = vmatprep.mubr.msk.f32.mxu1 %vm18396_vm6, %v7883_v24  ;;  %vm18406_vm6 = vmmov %vm18273_vm2 }
 0x624   : > { %12306 = vmatmul.mubr.msk.f32.gmra.mrb[34].mxu1 %vm18397_vm13, %v7884_v32  ;;  %vm18407_vm13 = vmmov %vm18273_vm2 }
 0x625   : > { %12310 = vmatprep.mubr.msk.f32.mxu1 %vm18398_vm7, %v16544_v16  ;;  %vm18408_vm7 = vmmov %vm18273_vm2  ;;  %v8736_v16 = vld [vmem:[#allocation3 + $0xfd] sm:$0xff] }
 0x628   : > { %12311 = vmatmul.mubr.msk.f32.vlgmr.msra.gmra.mrb[0].mxu1 %vm18399_vm10, %v16552_v45  ;;  %vm18409_vm10 = vmmov %vm18273_vm2  ;;  %v8737_v45 = vld [vmem:[#allocation3 + $0x105] sm:$0xff] }
 0x629   : > { %12365 = vmatpush3.msk.msra.mxu1 %vm18400_vm14, %v16541_v1  ;;  %12313 = vmatprep.mubr.msk.f32.mxu1 %vm18401_vm4, %v16556_v42  ;;  %vm18410_vm14 = vmmov %vm18273_vm2  ;;  %v8735_v1 = vld [vmem:[#allocation3 + $0xf5] sm:$0xff]  ;;  %v8738_v42 = vld [vmem:[#allocation3 + $0x10d] sm:$0xff] }
 0x62a   : > { %12420 = vmatprep.subr.msk.mxu1 %vm18402_vm11, %v10762_v27  ;;  %vm18411_vm4 = vmmov %vm18273_vm2 }
 0x62b   : > { %vm18412_vm11 = vmmov %vm18273_vm2 }
 0x62c   : > { %12314 = vmatmul.mubr.msk.f32.gmra.mrb[2].mxu1 %vm18403_vm12, %v16560_v40  ;;  %vm18413_vm12 = vmmov %vm18273_vm2  ;;  %v8739_v40 = vld [vmem:[#allocation3 + $0x115] sm:$0xff] }
 0x62d   : > { %12316 = vmatprep.mubr.msk.f32.mxu1 %vm18273_vm2, %v16564_v57  ;;  %v8740_v57 = vld [vmem:[#allocation3 + $0x11d] sm:$0xff] }
 0x630   : > { %12317 = vmatmul.mubr.msk.f32.gmra.mrb[4].mxu1 %vm18404_vm9, %v16568_v23  ;;  %vm18414_vm9 = vmmov %vm18273_vm2  ;;  %v8741_v23 = vld [vmem:[#allocation3 + $0x125] sm:$0xff] }
 0x631   : > { %12319 = vmatprep.mubr.msk.f32.mxu1 %vm18405_vm5, %v16572_v39  ;;  %vm18415_vm5 = vmmov %vm18273_vm2  ;;  %v8742_v39 = vld [vmem:[#allocation3 + $0x12d] sm:$0xff] }
 0x634   : > { %12320 = vmatmul.mubr.msk.f32.gmra.mrb[6].mxu1 %vm18406_vm6, %v16576_v20  ;;  %vm18416_vm6 = vmmov %vm18273_vm2  ;;  %v8743_v20 = vld [vmem:[#allocation3 + $0x135] sm:$0xff] }
 0x635   : > { %12322 = vmatprep.mubr.msk.f32.mxu1 %vm18407_vm13, %v16580_v60  ;;  %vm18417_vm13 = vmmov %vm18273_vm2  ;;  %v8744_v60 = vld [vmem:[#allocation3 + $0x13d] sm:$0xff] }
 0x638   : > { %12323 = vmatmul.mubr.msk.f32.gmra.mrb[8].mxu1 %vm18408_vm7, %v7860_v15  ;;  %vm18418_vm7 = vmmov %vm18273_vm2  ;;  %v9139_v15 = vld [vmem:[#allocation3 + $0x26] sm:$0xff] }
 0x639   : > { %12325 = vmatprep.mubr.msk.f32.mxu1 %vm18409_vm10, %v7861_v52  ;;  %vm18419_vm10 = vmmov %vm18273_vm2  ;;  %v9140_v52 = vld [vmem:[#allocation3 + $0x2e] sm:$0xff] }
 0x63c   : > { %12326 = vmatmul.mubr.msk.f32.gmra.mrb[10].mxu1 %vm18410_vm14, %v7862_v17  ;;  %vm18420_vm14 = vmmov %vm18273_vm2  ;;  %v9141_v17 = vld [vmem:[#allocation3 + $0x36] sm:$0xff] }
 0x63d   : > { %12328 = vmatprep.mubr.msk.f32.mxu1 %vm18411_vm4, %v7863_v26  ;;  %vm18421_vm4 = vmmov %vm18273_vm2  ;;  %v9142_v26 = vld [vmem:[#allocation3 + $0x3e] sm:$0xff] }
 0x640   : > { %12329 = vmatmul.mubr.msk.f32.gmra.mrb[12].mxu1 %vm18412_vm11, %v7864_v38  ;;  %vm18422_vm11 = vmmov %vm18273_vm2  ;;  %v9143_v38 = vld [vmem:[#allocation3 + $0x46] sm:$0xff] }
 0x641   : > { %12331 = vmatprep.mubr.msk.f32.mxu1 %vm18413_vm12, %v7865_v44  ;;  %vm18423_vm12 = vmmov %vm18273_vm2  ;;  %v9144_v44 = vld [vmem:[#allocation3 + $0x4e] sm:$0xff] }
 0x644   : > { %12332 = vmatmul.mubr.msk.f32.gmra.mrb[14].mxu1 %vm18273_vm2, %v7866_v46  ;;  %v9145_v46 = vld [vmem:[#allocation3 + $0x56] sm:$0xff] }
 0x645   : > { %12334 = vmatprep.mubr.msk.f32.mxu1 %vm18414_vm9, %v7867_v6  ;;  %vm18424_vm9 = vmmov %vm18273_vm2  ;;  %v9146_v6 = vld [vmem:[#allocation3 + $0x5e] sm:$0xff] }
 0x648   : > { %12335 = vmatmul.mubr.msk.f32.gmra.mrb[16].mxu1 %vm18415_vm5, %v7868_v48  ;;  %vm18425_vm5 = vmmov %vm18273_vm2  ;;  %v9147_v48 = vld [vmem:[#allocation3 + $0x66] sm:$0xff] }
 0x649   : > { %12337 = vmatprep.mubr.msk.f32.mxu1 %vm18416_vm6, %v7869_v61  ;;  %vm18426_vm6 = vmmov %vm18273_vm2  ;;  %v9148_v61 = vld [vmem:[#allocation3 + $0x6e] sm:$0xff] }
 0x64c   : > { %12338 = vmatmul.mubr.msk.f32.gmra.mrb[18].mxu1 %vm18417_vm13, %v7870_v30  ;;  %vm18427_vm13 = vmmov %vm18273_vm2  ;;  %v9149_v30 = vld [vmem:[#allocation3 + $0x76] sm:$0xff] }
 0x64d   : > { %12340 = vmatprep.mubr.msk.f32.mxu1 %vm18418_vm7, %v7871_v43  ;;  %vm18428_vm7 = vmmov %vm18273_vm2  ;;  %v9150_v43 = vld [vmem:[#allocation3 + $0x7e] sm:$0xff] }
 0x650   : > { %12341 = vmatmul.mubr.msk.f32.gmra.mrb[20].mxu1 %vm18419_vm10, %v7872_v7  ;;  %vm18429_vm10 = vmmov %vm18273_vm2  ;;  %v9151_v7 = vld [vmem:[#allocation3 + $0x86] sm:$0xff] }
 0x651   : > { %12343 = vmatprep.mubr.msk.f32.mxu1 %vm18420_vm14, %v7873_v58  ;;  %vm18430_vm14 = vmmov %vm18273_vm2  ;;  %v9152_v58 = vld [vmem:[#allocation3 + $0x8e] sm:$0xff] }
 0x654   : > { %12344 = vmatmul.mubr.msk.f32.gmra.mrb[22].mxu1 %vm18421_vm4, %v7874_v37  ;;  %vm18431_vm4 = vmmov %vm18273_vm2  ;;  %v9153_v37 = vld [vmem:[#allocation3 + $0x96] sm:$0xff] }
 0x655   : > { %12346 = vmatprep.mubr.msk.f32.mxu1 %vm18422_vm11, %v7875_v50  ;;  %vm18432_vm11 = vmmov %vm18273_vm2  ;;  %v9154_v50 = vld [vmem:[#allocation3 + $0x9e] sm:$0xff] }
 0x658   : > { %12347 = vmatmul.mubr.msk.f32.gmra.mrb[24].mxu1 %vm18423_vm12, %v7876_v4  ;;  %vm18433_vm12 = vmmov %vm18273_vm2  ;;  %v9155_v4 = vld [vmem:[#allocation3 + $0xa6] sm:$0xff] }
 0x659   : > { %12349 = vmatprep.mubr.msk.f32.mxu1 %vm18273_vm2, %v7877_v56  ;;  %v9156_v56 = vld [vmem:[#allocation3 + $0xae] sm:$0xff] }
 0x65c   : > { %12350 = vmatmul.mubr.msk.f32.gmra.mrb[26].mxu1 %vm18424_vm9, %v7878_v29  ;;  %vm18434_vm9 = vcmask 1043456   ;;  %v9157_v29 = vld [vmem:[#allocation3 + $0xb6] sm:$0xff] }
 0x65d   : > { %12352 = vmatprep.mubr.msk.f32.mxu1 %vm18425_vm5, %v7879_v54  ;;  %vm18435_vm5 = vmmov %vm18273_vm2  ;;  %v9158_v54 = vld [vmem:[#allocation3 + $0xbe] sm:$0xff] }
 0x660   : > { %12353 = vmatmul.mubr.msk.f32.gmra.mrb[28].mxu1 %vm18426_vm6, %v7880_v8  ;;  %vm18436_vm6 = vmmov %vm18273_vm2  ;;  %v9159_v8 = vld [vmem:[#allocation3 + $0xc6] sm:$0xff] }
 0x661   : > { %12355 = vmatprep.mubr.msk.f32.mxu1 %vm18427_vm13, %v7881_v41  ;;  %vm18437_vm13 = vmmov %vm18273_vm2  ;;  %v9160_v41 = vld [vmem:[#allocation3 + $0xce] sm:$0xff] }
 0x664   : > { %12356 = vmatmul.mubr.msk.f32.gmra.mrb[30].mxu1 %vm18428_vm7, %v7882_v14  ;;  %vm18438_vm7 = vmmov %vm18273_vm2  ;;  %v9161_v14 = vld [vmem:[#allocation3 + $0xd6] sm:$0xff] }
 0x665   : > { %12358 = vmatprep.mubr.msk.f32.mxu1 %vm18429_vm10, %v7883_v24  ;;  %vm18439_vm10 = vmmov %vm18273_vm2  ;;  %v9162_v24 = vld [vmem:[#allocation3 + $0xde] sm:$0xff] }
 0x668   : > { %12359 = vmatmul.mubr.msk.f32.gmra.mrb[32].mxu1 %vm18430_vm14, %v7884_v32  ;;  %vm18440_vm14 = vmmov %vm18273_vm2  ;;  %v9163_v32 = vld [vmem:[#allocation3 + $0xe6] sm:$0xff] }
 0x669   : > { %12361 = vmatprep.mubr.msk.f32.mxu1 %vm18431_vm4, %v8313_v11  ;;  %vm18441_vm4 = vmmov %vm18273_vm2  ;;  %v9165_v11 = vld [vmem:[#allocation3 + $0xf6] sm:$0xff] }
 0x66c   : > { %12362 = vmatmul.mubr.msk.f32.gmra.mrb[34].mxu1 %vm18432_vm11, %v8314_v63  ;;  %vm18442_vm11 = vmmov %vm18273_vm2  ;;  %v9166_v63 = vld [vmem:[#allocation3 + $0xfe] sm:$0xff] }
 0x66d   : > { %12366 = vmatprep.mubr.msk.f32.mxu1 %vm18433_vm12, %v8709_v5  ;;  %vm18443_vm12 = vmmov %vm18273_vm2  ;;  %v9167_v5 = vld [vmem:[#allocation3 + $0x106] sm:$0xff] }
 0x670   : > { %12367 = vmatmul.mubr.msk.f32.vlgmr.msra.gmra.mrb[0].mxu1 %vm18273_vm2, %v8710_v13  ;;  %v9168_v13 = vld [vmem:[#allocation3 + $0x10e] sm:$0xff] }
 0x671   : > { %12421 = vmatpush3.msk.msra.mxu1 %vm18434_vm9, %v10762_v27  ;;  %12369 = vmatprep.mubr.msk.f32.mxu1 %vm18435_vm5, %v8711_v22  ;;  %vm18444_vm9 = vmmov %vm18273_vm2  ;;  %v9164_v27 = vld [vmem:[#allocation3 + $0xee] sm:$0xff]  ;;  %v9169_v22 = vld [vmem:[#allocation3 + $0x116] sm:$0xff] }
 0x672   : > { %vm18445_vm5 = vmmov %vm18273_vm2 }
 0x674   : > { %12370 = vmatmul.mubr.msk.f32.gmra.mrb[2].mxu1 %vm18436_vm6, %v8712_v53  ;;  %vm18446_vm6 = vmmov %vm18273_vm2  ;;  %v9170_v53 = vld [vmem:[#allocation3 + $0x11e] sm:$0xff] }
 0x675   : > { %12372 = vmatprep.mubr.msk.f32.mxu1 %vm18437_vm13, %v8713_v31  ;;  %vm18447_vm13 = vmmov %vm18273_vm2  ;;  %v9171_v31 = vld [vmem:[#allocation3 + $0x126] sm:$0xff] }
 0x678   : > { %12373 = vmatmul.mubr.msk.f32.gmra.mrb[4].mxu1 %vm18438_vm7, %v8714_v18  ;;  %vm18448_vm7 = vmmov %vm18273_vm2  ;;  %v9172_v18 = vld [vmem:[#allocation3 + $0x12e] sm:$0xff] }
 0x679   : > { %12375 = vmatprep.mubr.msk.f32.mxu1 %vm18439_vm10, %v8715_v36  ;;  %vm18449_vm10 = vmmov %vm18273_vm2  ;;  %v9173_v36 = vld [vmem:[#allocation3 + $0x136] sm:$0xff] }
 0x67c   : > { %12376 = vmatmul.mubr.msk.f32.gmra.mrb[6].mxu1 %vm18440_vm14, %v8716_v59  ;;  %vm18450_vm14 = vmmov %vm18273_vm2  ;;  %v9174_v59 = vld [vmem:[#allocation3 + $0x13e] sm:$0xff] }
 0x67d   : > { %12378 = vmatprep.mubr.msk.f32.mxu1 %vm18441_vm4, %v8717_v55  ;;  %vm18451_vm4 = vmmov %vm18273_vm2 }
 0x680   : > { %12379 = vmatmul.mubr.msk.f32.gmra.mrb[8].mxu1 %vm18442_vm11, %v8718_v62  ;;  %vm18452_vm11 = vmmov %vm18273_vm2 }
 0x681   : > { %12381 = vmatprep.mubr.msk.f32.mxu1 %vm18443_vm12, %v8719_v25  ;;  %vm18453_vm12 = vmmov %vm18273_vm2 }
 0x684   : > { %12382 = vmatmul.mubr.msk.f32.gmra.mrb[10].mxu1 %vm18273_vm2, %v8720_v10 }
 0x685   : > { %12384 = vmatprep.mubr.msk.f32.mxu1 %vm18444_vm9, %v8721_v51  ;;  %vm18454_vm9 = vmmov %vm18273_vm2 }
 0x688   : > { %12385 = vmatmul.mubr.msk.f32.gmra.mrb[12].mxu1 %vm18445_vm5, %v8722_v12  ;;  %vm18455_vm5 = vmmov %vm18273_vm2 }
 0x689   : > { %12387 = vmatprep.mubr.msk.f32.mxu1 %vm18446_vm6, %v8723_v9  ;;  %vm18456_vm6 = vmmov %vm18273_vm2 }
 0x68c   : > { %12388 = vmatmul.mubr.msk.f32.gmra.mrb[14].mxu1 %vm18447_vm13, %v8724_v19  ;;  %vm18457_vm13 = vmmov %vm18273_vm2 }
 0x68d   : > { %12390 = vmatprep.mubr.msk.f32.mxu1 %vm18448_vm7, %v8725_v33  ;;  %vm18458_vm7 = vmmov %vm18273_vm2 }
 0x690   : > { %12391 = vmatmul.mubr.msk.f32.gmra.mrb[16].mxu1 %vm18449_vm10, %v8726_v47  ;;  %vm18459_vm10 = vmmov %vm18273_vm2 }
 0x691   : > { %12393 = vmatprep.mubr.msk.f32.mxu1 %vm18450_vm14, %v8727_v21  ;;  %vm18460_vm14 = vmmov %vm18273_vm2 }
 0x694   : > { %12394 = vmatmul.mubr.msk.f32.gmra.mrb[18].mxu1 %vm18451_vm4, %v8728_v28  ;;  %vm18461_vm4 = vmmov %vm18273_vm2 }
 0x695   : > { %12396 = vmatprep.mubr.msk.f32.mxu1 %vm18452_vm11, %v8729_v49  ;;  %vm18462_vm11 = vmmov %vm18273_vm2 }
 0x698   : > { %12397 = vmatmul.mubr.msk.f32.gmra.mrb[20].mxu1 %vm18453_vm12, %v8730_v2  ;;  %vm18463_vm12 = vmmov %vm18273_vm2 }
 0x699   : > { %12399 = vmatprep.mubr.msk.f32.mxu1 %vm18273_vm2, %v8731_v3 }
 0x69c   : > { %12400 = vmatmul.mubr.msk.f32.gmra.mrb[22].mxu1 %vm18454_vm9, %v8732_v35  ;;  %vm18464_vm9 = vmmov %vm18273_vm2 }
 0x69d   : > { %12402 = vmatprep.mubr.msk.f32.mxu1 %vm18455_vm5, %v8733_v34  ;;  %vm18465_vm5 = vmmov %vm18273_vm2 }
 0x6a0   : > { %12403 = vmatmul.mubr.msk.f32.gmra.mrb[24].mxu1 %vm18456_vm6, %v8734_v0  ;;  %vm18466_vm6 = vmmov %vm18273_vm2 }
 0x6a1   : > { %12405 = vmatprep.mubr.msk.f32.mxu1 %vm18457_vm13, %v8735_v1  ;;  %vm18467_vm13 = vmmov %vm18273_vm2 }
 0x6a4   : > { %12406 = vmatmul.mubr.msk.f32.gmra.mrb[26].mxu1 %vm18458_vm7, %v8736_v16  ;;  %vm18468_vm7 = vmmov %vm18273_vm2 }
 0x6a5   : > { %12408 = vmatprep.mubr.msk.f32.mxu1 %vm18459_vm10, %v8737_v45  ;;  %vm18469_vm10 = vmmov %vm18273_vm2 }
 0x6a8   : > { %12409 = vmatmul.mubr.msk.f32.gmra.mrb[28].mxu1 %vm18460_vm14, %v8738_v42  ;;  %vm18470_vm14 = vmmov %vm18273_vm2 }
 0x6a9   : > { %12411 = vmatprep.mubr.msk.f32.mxu1 %vm18461_vm4, %v8739_v40  ;;  %vm18471_vm4 = vmmov %vm18273_vm2 }
 0x6ac   : > { %12412 = vmatmul.mubr.msk.f32.gmra.mrb[30].mxu1 %vm18462_vm11, %v8740_v57  ;;  %vm18472_vm11 = vmmov %vm18273_vm2 }
 0x6ad   : > { %12414 = vmatprep.mubr.msk.f32.mxu1 %vm18463_vm12, %v8741_v23  ;;  %vm18473_vm12 = vmmov %vm18273_vm2 }
 0x6b0   : > { %12415 = vmatmul.mubr.msk.f32.gmra.mrb[32].mxu1 %vm18273_vm2, %v8742_v39 }
 0x6b1   : > { %12417 = vmatprep.mubr.msk.f32.mxu1 %vm18464_vm9, %v8743_v20  ;;  %vm18474_vm9 = vmmov %vm18273_vm2  ;;  %v18551_v20 = vld [vmem:[#allocation38_spill] sm:$0xff] }
 0x6b4   : > { %12418 = vmatmul.mubr.msk.f32.gmra.mrb[34].mxu1 %vm18465_vm5, %v8744_v60  ;;  %vm18475_vm5 = vmmov %vm18273_vm2 }
 0x6b5   : > { %12422 = vmatprep.mubr.msk.f32.mxu1 %vm18466_vm6, %v9139_v15  ;;  %vm18476_vm6 = vmmov %vm18273_vm2 }
 0x6b8   : > { %12423 = vmatmul.mubr.msk.f32.vlgmr.msra.gmra.mrb[0].mxu1 %vm18467_vm13, %v9140_v52  ;;  %vm18477_vm13 = vmmov %vm18273_vm2 }
 0x6b9   : > { %12425 = vmatprep.mubr.msk.f32.mxu1 %vm18468_vm7, %v9141_v17  ;;  %vm18478_vm7 = vmmov %vm18273_vm2 }
 0x6bc   : > { %12426 = vmatmul.mubr.msk.f32.gmra.mrb[2].mxu1 %vm18469_vm10, %v9142_v26  ;;  %vm18479_vm10 = vmmov %vm18273_vm2 }
 0x6bd   : > { %12428 = vmatprep.mubr.msk.f32.mxu1 %vm18470_vm14, %v9143_v38  ;;  %vm18480_vm14 = vmmov %vm18273_vm2  ;;  %v18516_v38 = vld [vmem:[#allocation28_spill] sm:$0xff] }
 0x6c0   : > { %12429 = vmatmul.mubr.msk.f32.gmra.mrb[4].mxu1 %vm18471_vm4, %v9144_v44  ;;  %vm18481_vm4 = vmmov %vm18273_vm2 }
 0x6c1   : > { %12431 = vmatprep.mubr.msk.f32.mxu1 %vm18472_vm11, %v9145_v46  ;;  %vm18482_vm11 = vmmov %vm18273_vm2 }
 0x6c4   : > { %12432 = vmatmul.mubr.msk.f32.gmra.mrb[6].mxu1 %vm18473_vm12, %v9146_v6  ;;  %vm18483_vm12 = vmmov %vm18273_vm2 }
 0x6c5   : > { %12434 = vmatprep.mubr.msk.f32.mxu1 %vm18273_vm2, %v9147_v48 }
 0x6c8   : > { %12435 = vmatmul.mubr.msk.f32.gmra.mrb[8].mxu1 %vm18474_vm9, %v9148_v61  ;;  %vm18484_vm9 = vmmov %vm18273_vm2 }
 0x6c9   : > { %12437 = vmatprep.mubr.msk.f32.mxu1 %vm18475_vm5, %v9149_v30  ;;  %vm18485_vm5 = vmmov %vm18273_vm2 }
 0x6cc   : > { %12438 = vmatmul.mubr.msk.f32.gmra.mrb[10].mxu1 %vm18476_vm6, %v9150_v43  ;;  %vm18486_vm6 = vmmov %vm18273_vm2 }
 0x6cd   : > { %12440 = vmatprep.mubr.msk.f32.mxu1 %vm18477_vm13, %v9151_v7  ;;  %vm18487_vm13 = vmmov %vm18273_vm2 }
 0x6d0   : > { %12441 = vmatmul.mubr.msk.f32.gmra.mrb[12].mxu1 %vm18478_vm7, %v9152_v58  ;;  %vm18488_vm7 = vmmov %vm18273_vm2 }
 0x6d1   : > { %12443 = vmatprep.mubr.msk.f32.mxu1 %vm18479_vm10, %v9153_v37  ;;  %vm18489_vm10 = vmmov %vm18273_vm2  ;;  %v18522_v37 = vld [vmem:[#allocation31_spill] sm:$0xff] }
 0x6d4   : > { %12444 = vmatmul.mubr.msk.f32.gmra.mrb[14].mxu1 %vm18480_vm14, %v9154_v50  ;;  %vm18490_vm14 = vmmov %vm18273_vm2 }
 0x6d5   : > { %12446 = vmatprep.mubr.msk.f32.mxu1 %vm18481_vm4, %v9155_v4  ;;  %vm18491_vm4 = vmmov %vm18273_vm2 }
 0x6d8   : > { %12447 = vmatmul.mubr.msk.f32.gmra.mrb[16].mxu1 %vm18482_vm11, %v9156_v56  ;;  %vm18492_vm11 = vmmov %vm18273_vm2 }
 0x6d9   : > { %12449 = vmatprep.mubr.msk.f32.mxu1 %vm18483_vm12, %v9157_v29  ;;  %vm18493_vm12 = vmmov %vm18273_vm2 }
 0x6dc   : > { %12450 = vmatmul.mubr.msk.f32.gmra.mrb[18].mxu1 %vm18273_vm2, %v9158_v54 }
 0x6dd   : > { %12452 = vmatprep.mubr.msk.f32.mxu1 %vm18484_vm9, %v9159_v8  ;;  %vm18494_vm9 = vmmov %vm18273_vm2  ;;  %v18527_v8 = vld [vmem:[#allocation32_spill] sm:$0xff] }
 0x6e0   : > { %12453 = vmatmul.mubr.msk.f32.gmra.mrb[20].mxu1 %vm18485_vm5, %v9160_v41  ;;  %vm18495_vm5 = vmmov %vm18273_vm2 }
 0x6e1   : > { %12455 = vmatprep.mubr.msk.f32.mxu1 %vm18486_vm6, %v9161_v14  ;;  %vm18496_vm6 = vmmov %vm18273_vm2 }
 0x6e4   : > { %12456 = vmatmul.mubr.msk.f32.gmra.mrb[22].mxu1 %vm18487_vm13, %v9162_v24  ;;  %vm18497_vm13 = vmmov %vm18273_vm2 }
 0x6e5   : > { %12458 = vmatprep.mubr.msk.f32.mxu1 %vm18488_vm7, %v9163_v32  ;;  %vm18498_vm7 = vmmov %vm18273_vm2 }
 0x6e8   : > { %12459 = vmatmul.mubr.msk.f32.gmra.mrb[24].mxu1 %vm18489_vm10, %v9164_v27  ;;  %vm18499_vm10 = vmmov %vm18273_vm2 }
 0x6e9   : > { %12461 = vmatprep.mubr.msk.f32.mxu1 %vm18490_vm14, %v9165_v11  ;;  %vm18501_vm14 = vmmov %vm18273_vm2 }
 0x6ec   : > { %12462 = vmatmul.mubr.msk.f32.gmra.mrb[26].mxu1 %vm18491_vm4, %v9166_v63  ;;  %vm18502_vm4 = vmmov %vm18273_vm2 }
 0x6ed   : > { %12464 = vmatprep.mubr.msk.f32.mxu1 %vm18492_vm11, %v9167_v5  ;;  %vm18504_vm11 = vmmov %vm18273_vm2 }
 0x6f0   : > { %12465 = vmatmul.mubr.msk.f32.gmra.mrb[28].mxu1 %vm18493_vm12, %v9168_v13  ;;  %vm18505_vm12 = vmmov %vm18273_vm2 }
 0x6f1   : > { %12467 = vmatprep.mubr.msk.f32.mxu1 %vm18273_vm2, %v9169_v22  ;;  %v18532_v22 = vld [vmem:[#allocation33_spill] sm:$0xff] }
 0x6f4   : > { %12468 = vmatmul.mubr.msk.f32.gmra.mrb[30].mxu1 %vm18494_vm9, %v9170_v53  ;;  %vm18506_vm9 = vmmov %vm18273_vm2 }
 0x6f5   : > { %12470 = vmatprep.mubr.msk.f32.mxu1 %vm18495_vm5, %v9171_v31  ;;  %vm18511_vm5 = vmmov %vm18273_vm2 }
 0x6f8   : > { %12471 = vmatmul.mubr.msk.f32.gmra.mrb[32].mxu1 %vm18496_vm6, %v9172_v18  ;;  %vm18512_vm6 = vmmov %vm18273_vm2 }
 0x6f9   : > { %12473 = vmatprep.mubr.msk.f32.mxu1 %vm18497_vm13, %v9173_v36  ;;  %vm18515_vm13 = vmmov %vm18273_vm2 }
 0x6fc   : > { %12474 = vmatmul.mubr.msk.f32.gmra.mrb[34].mxu1 %vm18498_vm7, %v9174_v59  ;;  %vm18518_vm7 = vmmov %vm18273_vm2 }
 0x78b   : > { %v12424_v55 = vpop.f32.mrb[0].mxu1 }
 0x78c   : > { %9570 = vst.msk [vmem:[#allocation2 + $0x8] sm:$0xff] %vm18499_vm10, %v12424_v55  ;;  %v9606_v25 = vsel %vm14527_vm8, %v12424_v55, 0.0  ;;  %v9354_v10 = vpop.f32.mrb[1].mxu1  ;;  %vm18508_vm8 = vmmov %vm18273_vm2  ;;  %v18536_v55 = vld [vmem:[#allocation34_spill] sm:$0xff] }
 0x78d   : > { %v9642_v51 = vsel %vm18501_vm14, %v9606_v25, 0.0  ;;  %v9720_v12 = vmul.f32 %v9606_v25, %v9606_v25  ;;  %9569 = vst.msk [vmem:[#allocation2] sm:$0xff] %vm18502_vm4, %v9354_v10  ;;  %v9605_v19 = vsel %vm14547_vm15, %v9354_v10, 0.0  ;;  %vm18510_vm15 = vmmov %vm18273_vm2  ;;  %vm18523_vm4 = vnez %v18522_v37  ;;  %v18560_v37 = vld [vmem:[#allocation41_spill] sm:$0xff] }
 0x78e   : > { %v9641_v33 = vsel %vm18504_vm11, %v9605_v19, 0.0  ;;  %v9719_v47 = vmul.f32 %v9605_v19, %v9605_v19  ;;  %vm18519_vm10 = vmmov %vm18273_vm2 }
 0x78f   : > { %v9756_v21 = vsel %vm18505_vm12, %v9720_v12, 0.0  ;;  %v9643_v28 = vadd.f32 %v9642_v51, %v9641_v33  ;;  %v12427_v49 = vpop.f32.mrb[2].mxu1 }
 0x790   : > { %v9755_v2 = vsel %vm18273_vm2, %v9719_v47, 0.0  ;;  %9572 = vst.msk [vmem:[#allocation2 + $0x18] sm:$0xff] %vm18506_vm9, %v12427_v49  ;;  %v9608_v35 = vsel %vm14574_vm3, %v12427_v49, 0.0  ;;  %v9364_v34 = vpop.f32.mrb[3].mxu1  ;;  %vm18514_vm3 = vmmov %vm18273_vm2  ;;  %vm18528_vm9 = vnez %v18527_v8  ;;  %v18565_v8 = vld [vmem:[#allocation42_spill] sm:$0xff] }
 0x791   : > { %v9757_v0 = vadd.f32 %v9756_v21, %v9755_v2  ;;  %9571 = vst.msk [vmem:[#allocation2 + $0x10] sm:$0xff] %vm18508_vm8, %v9364_v34  ;;  %v9607_v16 = vsel %vm14600_vm1, %v9364_v34, 0.0  ;;  %v9722_v45 = vmul.f32 %v9608_v35, %v9608_v35  ;;  %v9646_v52 = vsel %vm18514_vm3, %v9608_v35, 0.0  ;;  %v18541_v21 = vld [vmem:[#allocation35_spill] sm:$0xff]  ;;  %v18546_v34 = vld [vmem:[#allocation36_spill] sm:$0xff] }
 0x792   : > { %v9644_v42 = vsel %vm18510_vm15, %v9607_v16, 0.0  ;;  %v9721_v40 = vmul.f32 %v9607_v16, %v9607_v16  ;;  %vm18517_vm1 = vnez %v18516_v38  ;;  %v18555_v38 = vld [vmem:[#allocation39_spill] sm:$0xff] }
 0x793   : > { %v9645_v57 = vadd.f32 %v9644_v42, %v9643_v28  ;;  %v12430_v23 = vpop.f32.mrb[4].mxu1  ;;  %v9760_v46 = vsel %vm18518_vm7, %v9722_v45, 0.0 }
 0x794   : > { %v9758_v39 = vsel %vm18511_vm5, %v9721_v40, 0.0  ;;  %9574 = vst.msk [vmem:[#allocation2 + $0x28] sm:$0xff] %vm18512_vm6, %v12430_v23  ;;  %v9610_v60 = vsel %vm14631_vm0, %v12430_v23, 0.0  ;;  %v9374_v15 = vpop.f32.mrb[5].mxu1  ;;  %vm18520_vm0 = vmmov %vm18273_vm2  ;;  %vm18533_vm6 = vnez %v18532_v22  ;;  %v18570_v22 = vld [vmem:[#allocation43_spill] sm:$0xff] }
 0x795   : > { %v9759_v17 = vadd.f32 %v9758_v39, %v9757_v0  ;;  %v9724_v26 = vmul.f32 %v9610_v60, %v9610_v60  ;;  %9573 = vst.msk [vmem:[#allocation2 + $0x20] sm:$0xff] %vm18515_vm13, %v9374_v15  ;;  %v9609_v44 = vsel %vm18517_vm1, %v9374_v15, 0.0  ;;  %v9647_v6 = vadd.f32 %v9646_v52, %v9645_v57  ;;  %vm18521_vm14 = vmmov %vm18520_vm0 }
 0x796   : > { %v9648_v48 = vsel %vm18519_vm10, %v9609_v44, 0.0  ;;  %v9723_v61 = vmul.f32 %v9609_v44, %v9609_v44  ;;  %vm18524_vm11 = vmmov %vm18520_vm0  ;;  %vm18537_vm1 = vnez %v18536_v55  ;;  %v18574_v55 = vld [vmem:[#allocation44_spill] sm:$0xff] }
 0x797   : > { %v9761_v30 = vadd.f32 %v9760_v46, %v9759_v17  ;;  %v12433_v43 = vpop.f32.mrb[6].mxu1  ;;  %v9649_v7 = vadd.f32 %v9648_v48, %v9647_v6  ;;  %v9650_v56 = vsel %vm18524_vm11, %v9610_v60, 0.0  ;;  %vm18525_vm12 = vmmov %vm18520_vm0 }
 0x798   : > { %v9762_v58 = vsel %vm18520_vm0, %v9723_v61, 0.0  ;;  %9576 = vst.msk [vmem:[#allocation2 + $0x38] sm:$0xff] %vm18521_vm14, %v12433_v43  ;;  %v9612_v50 = vsel %vm18523_vm4, %v12433_v43, 0.0  ;;  %v9384_v4 = vpop.f32.mrb[7].mxu1  ;;  %v9764_v29 = vsel %vm18525_vm12, %v9724_v26, 0.0  ;;  %vm18526_vm2 = vmmov %vm18520_vm0  ;;  %vm18542_vm4 = vnez %v18541_v21  ;;  %v18579_v21 = vld [vmem:[#allocation45_spill] sm:$0xff] }
 0x799   : > { %v9763_v54 = vadd.f32 %v9762_v58, %v9761_v30  ;;  %9575 = vst.msk [vmem:[#allocation2 + $0x30] sm:$0xff] %vm18526_vm2, %v9384_v4  ;;  %v9611_v41 = vsel %vm18528_vm9, %v9384_v4, 0.0  ;;  %v9726_v14 = vmul.f32 %v9612_v50, %v9612_v50  ;;  %v9651_v24 = vadd.f32 %v9650_v56, %v9649_v7  ;;  %vm18529_vm8 = vmmov %vm18520_vm0 }
 0x79a   : > { %v9652_v32 = vsel %vm18529_vm8, %v9611_v41, 0.0  ;;  %v9725_v27 = vmul.f32 %v9611_v41, %v9611_v41  ;;  %vm18530_vm15 = vmmov %vm18520_vm0  ;;  %vm18547_vm9 = vnez %v18546_v34  ;;  %v18584_v34 = vld [vmem:[#allocation46_spill] sm:$0xff] }
 0x79b   : > { %v9765_v11 = vadd.f32 %v9764_v29, %v9763_v54  ;;  %v12436_v63 = vpop.f32.mrb[8].mxu1  ;;  %v9653_v5 = vadd.f32 %v9652_v32, %v9651_v24  ;;  %vm18531_vm5 = vmmov %vm18520_vm0 }
 0x79c   : > { %v9766_v13 = vsel %vm18530_vm15, %v9725_v27, 0.0  ;;  %9578 = vst.msk [vmem:[#allocation2 + $0x48] sm:$0xff] %vm18531_vm5, %v12436_v63  ;;  %v9614_v53 = vsel %vm18533_vm6, %v12436_v63, 0.0  ;;  %v9394_v31 = vpop.f32.mrb[9].mxu1  ;;  %vm18534_vm3 = vmmov %vm18520_vm0  ;;  %vm18552_vm6 = vnez %v18551_v20  ;;  %v18589_v20 = vld [vmem:[#allocation48_spill] sm:$0xff] }
 0x79d   : > { %v9654_v18 = vsel %vm18534_vm3, %v9612_v50, 0.0  ;;  %v9767_v36 = vadd.f32 %v9766_v13, %v9765_v11  ;;  %v9728_v59 = vmul.f32 %v9614_v53, %v9614_v53  ;;  %vm18535_vm13 = vmmov %vm18520_vm0  ;;  %v9613_v62 = vsel %vm18537_vm1, %v9394_v31, 0.0 }
 0x79e   : > { %9577 = vst.msk [vmem:[#allocation2 + $0x40] sm:$0xff] %vm18535_vm13, %v9394_v31  ;;  %vm18538_vm7 = vmmov %vm18520_vm0  ;;  %v9655_v10 = vadd.f32 %v9654_v18, %v9653_v5  ;;  %v9727_v12 = vmul.f32 %v9613_v62, %v9613_v62  ;;  %vm18556_vm1 = vnez %v18555_v38  ;;  %v18593_v38 = vld [vmem:[#allocation49_spill] sm:$0xff] }
 0x79f   : > { %v9768_v25 = vsel %vm18538_vm7, %v9726_v14, 0.0  ;;  %vm18539_vm10 = vmmov %vm18520_vm0  ;;  %v12439_v19 = vpop.f32.mrb[10].mxu1 }
 0x7a0   : > { %v9656_v51 = vsel %vm18539_vm10, %v9613_v62, 0.0  ;;  %v9769_v9 = vadd.f32 %v9768_v25, %v9767_v36  ;;  %v9770_v47 = vsel %vm18520_vm0, %v9727_v12, 0.0  ;;  %vm18540_vm14 = vmmov %vm18520_vm0  ;;  %v9616_v28 = vsel %vm18542_vm4, %v12439_v19, 0.0  ;;  %v9404_v49 = vpop.f32.mrb[11].mxu1 }
 0x7a1   : > { %v9657_v33 = vadd.f32 %v9656_v51, %v9655_v10  ;;  %9580 = vst.msk [vmem:[#allocation2 + $0x58] sm:$0xff] %vm18540_vm14, %v12439_v19  ;;  %vm18543_vm11 = vmmov %vm18520_vm0  ;;  %v9615_v0 = vsel %vm18547_vm9, %v9404_v49, 0.0  ;;  %v9730_v1 = vmul.f32 %v9616_v28, %v9616_v28  ;;  %vm18561_vm4 = vnez %v18560_v37  ;;  %v18598_v37 = vld [vmem:[#allocation50_spill] sm:$0xff] }
 0x7a2   : > { %v9658_v2 = vsel %vm18543_vm11, %v9614_v53, 0.0  ;;  %vm18544_vm12 = vmmov %vm18520_vm0  ;;  %v9771_v35 = vadd.f32 %v9770_v47, %v9769_v9  ;;  %v9729_v42 = vmul.f32 %v9615_v0, %v9615_v0  ;;  %vm18566_vm9 = vnez %v18565_v8  ;;  %v18603_v8 = vld [vmem:[#allocation51_spill] sm:$0xff] }
 0x7a3   : > { %v9772_v3 = vsel %vm18544_vm12, %v9728_v59, 0.0  ;;  %vm18545_vm2 = vmmov %vm18520_vm0  ;;  %v9659_v16 = vadd.f32 %v9658_v2, %v9657_v33  ;;  %v12442_v57 = vpop.f32.mrb[12].mxu1 }
 0x7a4   : > { %9579 = vst.msk [vmem:[#allocation2 + $0x50] sm:$0xff] %vm18545_vm2, %v9404_v49  ;;  %vm18548_vm8 = vmmov %vm18520_vm0  ;;  %v9773_v40 = vadd.f32 %v9772_v3, %v9771_v35  ;;  %v9618_v60 = vsel %vm18552_vm6, %v12442_v57, 0.0  ;;  %v9414_v15 = vpop.f32.mrb[13].mxu1  ;;  %vm18571_vm6 = vnez %v18570_v22  ;;  %v18608_v22 = vld [vmem:[#allocation52_spill] sm:$0xff] }
 0x7a5   : > { %v9660_v45 = vsel %vm18548_vm8, %v9615_v0, 0.0  ;;  %vm18549_vm15 = vmmov %vm18520_vm0  ;;  %v9732_v26 = vmul.f32 %v9618_v60, %v9618_v60  ;;  %v9617_v44 = vsel %vm18556_vm1, %v9414_v15, 0.0  ;;  %vm18575_vm1 = vnez %v18574_v55  ;;  %v18612_v55 = vld [vmem:[#allocation53_spill] sm:$0xff] }
 0x7a6   : > { %v9661_v23 = vadd.f32 %v9660_v45, %v9659_v16  ;;  %v9774_v39 = vsel %vm18549_vm15, %v9729_v42, 0.0  ;;  %vm18550_vm5 = vmmov %vm18520_vm0  ;;  %v9731_v61 = vmul.f32 %v9617_v44, %v9617_v44 }
 0x7a7   : > { %9582 = vst.msk [vmem:[#allocation2 + $0x68] sm:$0xff] %vm18550_vm5, %v12442_v57  ;;  %vm18553_vm3 = vmmov %vm18520_vm0  ;;  %v9775_v17 = vadd.f32 %v9774_v39, %v9773_v40  ;;  %v12445_v43 = vpop.f32.mrb[14].mxu1 }
 0x7a8   : > { %v9662_v52 = vsel %vm18553_vm3, %v9616_v28, 0.0  ;;  %vm18554_vm13 = vmmov %vm18520_vm0  ;;  %v9778_v58 = vsel %vm18520_vm0, %v9731_v61, 0.0  ;;  %v9620_v50 = vsel %vm18561_vm4, %v12445_v43, 0.0  ;;  %v9424_v4 = vpop.f32.mrb[15].mxu1  ;;  %vm18580_vm4 = vnez %v18579_v21  ;;  %v18617_v21 = vld [vmem:[#allocation54_spill] sm:$0xff] }
 0x7a9   : > { %9581 = vst.msk [vmem:[#allocation2 + $0x60] sm:$0xff] %vm18554_vm13, %v9414_v15  ;;  %vm18557_vm7 = vmmov %vm18520_vm0  ;;  %v9663_v6 = vadd.f32 %v9662_v52, %v9661_v23  ;;  %v9619_v41 = vsel %vm18566_vm9, %v9424_v4, 0.0  ;;  %v9734_v14 = vmul.f32 %v9620_v50, %v9620_v50  ;;  %vm18585_vm9 = vnez %v18584_v34  ;;  %v18622_v34 = vld [vmem:[#allocation55_spill] sm:$0xff] }
 0x7aa   : > { %v9776_v46 = vsel %vm18557_vm7, %v9730_v1, 0.0  ;;  %vm18558_vm10 = vmmov %vm18520_vm0  ;;  %v9733_v27 = vmul.f32 %v9619_v41, %v9619_v41 }
 0x7ab   : > { %v9664_v48 = vsel %vm18558_vm10, %v9617_v44, 0.0  ;;  %v9777_v30 = vadd.f32 %v9776_v46, %v9775_v17  ;;  %vm18559_vm14 = vmmov %vm18520_vm0  ;;  %v12448_v63 = vpop.f32.mrb[16].mxu1 }
 0x7ac   : > { %v9665_v7 = vadd.f32 %v9664_v48, %v9663_v6  ;;  %9584 = vst.msk [vmem:[#allocation2 + $0x78] sm:$0xff] %vm18559_vm14, %v12445_v43  ;;  %vm18562_vm11 = vmmov %vm18520_vm0  ;;  %v9622_v53 = vsel %vm18571_vm6, %v12448_v63, 0.0  ;;  %v9434_v31 = vpop.f32.mrb[17].mxu1  ;;  %vm18590_vm6 = vnez %v18589_v20  ;;  %v18627_v20 = vld [vmem:[#allocation57_spill] sm:$0xff] }
 0x7ad   : > { %v9666_v56 = vsel %vm18562_vm11, %v9618_v60, 0.0  ;;  %vm18563_vm12 = vmmov %vm18520_vm0  ;;  %v9779_v54 = vadd.f32 %v9778_v58, %v9777_v30  ;;  %v9736_v59 = vmul.f32 %v9622_v53, %v9622_v53  ;;  %v9621_v62 = vsel %vm18575_vm1, %v9434_v31, 0.0 }
 0x7ae   : > { %v9780_v29 = vsel %vm18563_vm12, %v9732_v26, 0.0  ;;  %vm18564_vm2 = vmmov %vm18520_vm0  ;;  %v9667_v24 = vadd.f32 %v9666_v56, %v9665_v7  ;;  %v9735_v12 = vmul.f32 %v9621_v62, %v9621_v62  ;;  %vm18594_vm1 = vnez %v18593_v38  ;;  %v18631_v38 = vld [vmem:[#allocation58_spill] sm:$0xff] }
 0x7af   : > { %9583 = vst.msk [vmem:[#allocation2 + $0x70] sm:$0xff] %vm18564_vm2, %v9424_v4  ;;  %vm18567_vm8 = vmmov %vm18520_vm0  ;;  %v9781_v11 = vadd.f32 %v9780_v29, %v9779_v54  ;;  %v12451_v19 = vpop.f32.mrb[18].mxu1 }
 0x7b0   : > { %v9668_v32 = vsel %vm18567_vm8, %v9619_v41, 0.0  ;;  %vm18568_vm15 = vmmov %vm18520_vm0  ;;  %v9786_v47 = vsel %vm18520_vm0, %v9735_v12, 0.0  ;;  %v9624_v28 = vsel %vm18580_vm4, %v12451_v19, 0.0  ;;  %v9444_v49 = vpop.f32.mrb[19].mxu1  ;;  %vm18599_vm4 = vnez %v18598_v37  ;;  %v18636_v37 = vld [vmem:[#allocation59_spill] sm:$0xff] }
 0x7b1   : > { %v9669_v5 = vadd.f32 %v9668_v32, %v9667_v24  ;;  %v9782_v13 = vsel %vm18568_vm15, %v9733_v27, 0.0  ;;  %vm18569_vm5 = vmmov %vm18520_vm0  ;;  %v9623_v0 = vsel %vm18585_vm9, %v9444_v49, 0.0  ;;  %v9738_v1 = vmul.f32 %v9624_v28, %v9624_v28 }
 0x7b2   : > { %9586 = vst.msk [vmem:[#allocation2 + $0x88] sm:$0xff] %vm18569_vm5, %v12448_v63  ;;  %vm18572_vm3 = vmmov %vm18520_vm0  ;;  %v9783_v36 = vadd.f32 %v9782_v13, %v9781_v11  ;;  %v9737_v42 = vmul.f32 %v9623_v0, %v9623_v0  ;;  %vm18604_vm9 = vnez %v18603_v8  ;;  %v18641_v8 = vld [vmem:[#allocation60_spill] sm:$0xff] }
 0x7b3   : > { %v9670_v18 = vsel %vm18572_vm3, %v9620_v50, 0.0  ;;  %vm18573_vm13 = vmmov %vm18520_vm0  ;;  %v12454_v57 = vpop.f32.mrb[20].mxu1 }
 0x7b4   : > { %9585 = vst.msk [vmem:[#allocation2 + $0x80] sm:$0xff] %vm18573_vm13, %v9434_v31  ;;  %vm18576_vm7 = vmmov %vm18520_vm0  ;;  %v9671_v10 = vadd.f32 %v9670_v18, %v9669_v5  ;;  %v9626_v60 = vsel %vm18590_vm6, %v12454_v57, 0.0  ;;  %v9454_v15 = vpop.f32.mrb[21].mxu1  ;;  %vm18609_vm6 = vnez %v18608_v22  ;;  %v18646_v22 = vld [vmem:[#allocation61_spill] sm:$0xff] }
 0x7b5   : > { %v9784_v25 = vsel %vm18576_vm7, %v9734_v14, 0.0  ;;  %vm18577_vm10 = vmmov %vm18520_vm0  ;;  %v9740_v26 = vmul.f32 %v9626_v60, %v9626_v60  ;;  %v9625_v44 = vsel %vm18594_vm1, %v9454_v15, 0.0  ;;  %vm18613_vm1 = vnez %v18612_v55  ;;  %v18650_v55 = vld [vmem:[#allocation62_spill] sm:$0xff] }
 0x7b6   : > { %v9672_v51 = vsel %vm18577_vm10, %v9621_v62, 0.0  ;;  %v9785_v9 = vadd.f32 %v9784_v25, %v9783_v36  ;;  %vm18578_vm14 = vmmov %vm18520_vm0  ;;  %v9739_v61 = vmul.f32 %v9625_v44, %v9625_v44 }
 0x7b7   : > { %v9673_v33 = vadd.f32 %v9672_v51, %v9671_v10  ;;  %9588 = vst.msk [vmem:[#allocation2 + $0x98] sm:$0xff] %vm18578_vm14, %v12451_v19  ;;  %vm18581_vm11 = vmmov %vm18520_vm0  ;;  %v12457_v43 = vpop.f32.mrb[22].mxu1 }
 0x7b8   : > { %v9674_v2 = vsel %vm18581_vm11, %v9622_v53, 0.0  ;;  %vm18582_vm12 = vmmov %vm18520_vm0  ;;  %v9787_v35 = vadd.f32 %v9786_v47, %v9785_v9  ;;  %v9794_v58 = vsel %vm18520_vm0, %v9739_v61, 0.0  ;;  %v9628_v50 = vsel %vm18599_vm4, %v12457_v43, 0.0  ;;  %v9464_v4 = vpop.f32.mrb[23].mxu1 }
 0x7b9   : > { %v9788_v3 = vsel %vm18582_vm12, %v9736_v59, 0.0  ;;  %vm18583_vm2 = vmmov %vm18520_vm0  ;;  %v9675_v16 = vadd.f32 %v9674_v2, %v9673_v33  ;;  %v9627_v41 = vsel %vm18604_vm9, %v9464_v4, 0.0  ;;  %v9742_v14 = vmul.f32 %v9628_v50, %v9628_v50 }
 0x7ba   : > { %9587 = vst.msk [vmem:[#allocation2 + $0x90] sm:$0xff] %vm18583_vm2, %v9444_v49  ;;  %vm18586_vm8 = vmmov %vm18520_vm0  ;;  %v9789_v40 = vadd.f32 %v9788_v3, %v9787_v35  ;;  %v9741_v27 = vmul.f32 %v9627_v41, %v9627_v41  ;;  %vm18618_vm4 = vnez %v18617_v21  ;;  %vm18623_vm9 = vnez %v18622_v34  ;;  %v18655_v21 = vld [vmem:[#allocation63_spill] sm:$0xff]  ;;  %v18660_v34 = vld [vmem:[#allocation64_spill] sm:$0xff] }
 0x7bb   : > { %v9676_v45 = vsel %vm18586_vm8, %v9623_v0, 0.0  ;;  %vm18587_vm15 = vmmov %vm18520_vm0  ;;  %v12460_v63 = vpop.f32.mrb[24].mxu1 }
 0x7bc   : > { %v9677_v23 = vadd.f32 %v9676_v45, %v9675_v16  ;;  %v9790_v39 = vsel %vm18587_vm15, %v9737_v42, 0.0  ;;  %vm18588_vm5 = vmmov %vm18520_vm0  ;;  %v9630_v53 = vsel %vm18609_vm6, %v12460_v63, 0.0  ;;  %v9474_v31 = vpop.f32.mrb[25].mxu1  ;;  %vm18628_vm6 = vnez %v18627_v20 }
 0x7bd   : > { %9590 = vst.msk [vmem:[#allocation2 + $0xa8] sm:$0xff] %vm18588_vm5, %v12454_v57  ;;  %vm18591_vm3 = vmmov %vm18520_vm0  ;;  %v9791_v17 = vadd.f32 %v9790_v39, %v9789_v40  ;;  %v9744_v59 = vmul.f32 %v9630_v53, %v9630_v53  ;;  %v9629_v62 = vsel %vm18613_vm1, %v9474_v31, 0.0  ;;  %vm18632_vm1 = vnez %v18631_v38 }
 0x7be   : > { %v9678_v52 = vsel %vm18591_vm3, %v9624_v28, 0.0  ;;  %vm18592_vm13 = vmmov %vm18520_vm0  ;;  %v9743_v12 = vmul.f32 %v9629_v62, %v9629_v62 }
 0x7bf   : > { %9589 = vst.msk [vmem:[#allocation2 + $0xa0] sm:$0xff] %vm18592_vm13, %v9454_v15  ;;  %vm18595_vm7 = vmmov %vm18520_vm0  ;;  %v9679_v6 = vadd.f32 %v9678_v52, %v9677_v23  ;;  %v12463_v19 = vpop.f32.mrb[26].mxu1 }
 0x7c0   : > { %v9792_v46 = vsel %vm18595_vm7, %v9738_v1, 0.0  ;;  %vm18596_vm10 = vmmov %vm18520_vm0  ;;  %v9802_v47 = vsel %vm18520_vm0, %v9743_v12, 0.0  ;;  %v9632_v28 = vsel %vm18618_vm4, %v12463_v19, 0.0  ;;  %v9484_v49 = vpop.f32.mrb[27].mxu1  ;;  %vm18637_vm4 = vnez %v18636_v37 }
 0x7c1   : > { %v9680_v48 = vsel %vm18596_vm10, %v9625_v44, 0.0  ;;  %v9793_v30 = vadd.f32 %v9792_v46, %v9791_v17  ;;  %vm18597_vm14 = vmmov %vm18520_vm0  ;;  %v9631_v0 = vsel %vm18623_vm9, %v9484_v49, 0.0  ;;  %v9746_v1 = vmul.f32 %v9632_v28, %v9632_v28 }
 0x7c2   : > { %v9681_v7 = vadd.f32 %v9680_v48, %v9679_v6  ;;  %9592 = vst.msk [vmem:[#allocation2 + $0xb8] sm:$0xff] %vm18597_vm14, %v12457_v43  ;;  %vm18600_vm11 = vmmov %vm18520_vm0  ;;  %v9745_v42 = vmul.f32 %v9631_v0, %v9631_v0  ;;  %vm18642_vm9 = vnez %v18641_v8  ;;  %v16917_v8 = vld [vmem:[#allocation2 + $0x8] sm:$0xff] }
 0x7c3   : > { %v9682_v56 = vsel %vm18600_vm11, %v9626_v60, 0.0  ;;  %vm18601_vm12 = vmmov %vm18520_vm0  ;;  %v9795_v54 = vadd.f32 %v9794_v58, %v9793_v30  ;;  %v12466_v57 = vpop.f32.mrb[28].mxu1 }
 0x7c4   : > { %v9796_v29 = vsel %vm18601_vm12, %v9740_v26, 0.0  ;;  %vm18602_vm2 = vmmov %vm18520_vm0  ;;  %v9683_v24 = vadd.f32 %v9682_v56, %v9681_v7  ;;  %v9634_v60 = vsel %vm18628_vm6, %v12466_v57, 0.0  ;;  %v9494_v15 = vpop.f32.mrb[29].mxu1  ;;  %vm18647_vm6 = vnez %v18646_v22  ;;  %v16937_v22 = vld [vmem:[#allocation2 + $0x58] sm:$0xff] }
 0x7c5   : > { %9591 = vst.msk [vmem:[#allocation2 + $0xb0] sm:$0xff] %vm18602_vm2, %v9464_v4  ;;  %vm18605_vm8 = vmmov %vm18520_vm0  ;;  %v9797_v11 = vadd.f32 %v9796_v29, %v9795_v54  ;;  %v9748_v26 = vmul.f32 %v9634_v60, %v9634_v60  ;;  %v9633_v44 = vsel %vm18632_vm1, %v9494_v15, 0.0  ;;  %vm18651_vm1 = vnez %v18650_v55 }
 0x7c6   : > { %v9684_v32 = vsel %vm18605_vm8, %v9627_v41, 0.0  ;;  %vm18606_vm15 = vmmov %vm18520_vm0  ;;  %v9747_v61 = vmul.f32 %v9633_v44, %v9633_v44 }
 0x7c7   : > { %v9685_v5 = vadd.f32 %v9684_v32, %v9683_v24  ;;  %v9798_v13 = vsel %vm18606_vm15, %v9741_v27, 0.0  ;;  %vm18607_vm5 = vmmov %vm18520_vm0  ;;  %v12469_v43 = vpop.f32.mrb[30].mxu1 }
 0x7c8   : > { %9594 = vst.msk [vmem:[#allocation2 + $0xc8] sm:$0xff] %vm18607_vm5, %v12460_v63  ;;  %vm18610_vm3 = vmmov %vm18520_vm0  ;;  %v9799_v36 = vadd.f32 %v9798_v13, %v9797_v11  ;;  %v9810_v58 = vsel %vm18520_vm0, %v9747_v61, 0.0  ;;  %v9504_v4 = vpop.f32.mrb[31].mxu1 }
 0x7c9   : > { %v9686_v18 = vsel %vm18610_vm3, %v9628_v50, 0.0  ;;  %vm18611_vm13 = vmmov %vm18520_vm0  ;;  %v9636_v50 = vsel %vm18637_vm4, %v12469_v43, 0.0  ;;  %v9635_v41 = vsel %vm18642_vm9, %v9504_v4, 0.0  ;;  %vm18656_vm4 = vnez %v18655_v21  ;;  %v16969_v21 = vld [vmem:[#allocation2 + $0x98] sm:$0xff] }
 0x7ca   : > { %9593 = vst.msk [vmem:[#allocation2 + $0xc0] sm:$0xff] %vm18611_vm13, %v9474_v31  ;;  %vm18614_vm7 = vmmov %vm18520_vm0  ;;  %v9687_v10 = vadd.f32 %v9686_v18, %v9685_v5  ;;  %v9749_v27 = vmul.f32 %v9635_v41, %v9635_v41  ;;  %vm18661_vm9 = vnez %v18660_v34 }
 0x7cb   : > { %v9800_v25 = vsel %vm18614_vm7, %v9742_v14, 0.0  ;;  %vm18615_vm10 = vmmov %vm18520_vm0  ;;  %v9750_v14 = vmul.f32 %v9636_v50, %v9636_v50  ;;  %v12472_v63 = vpop.f32.mrb[32].mxu1 }
 0x7cc   : > { %v9688_v51 = vsel %vm18615_vm10, %v9629_v62, 0.0  ;;  %v9801_v9 = vadd.f32 %v9800_v25, %v9799_v36  ;;  %vm18616_vm14 = vmmov %vm18520_vm0  ;;  %v9514_v31 = vpop.f32.mrb[33].mxu1 }
 0x7cd   : > { %v9689_v33 = vadd.f32 %v9688_v51, %v9687_v10  ;;  %9596 = vst.msk [vmem:[#allocation2 + $0xd8] sm:$0xff] %vm18616_vm14, %v12463_v19  ;;  %vm18619_vm11 = vmmov %vm18520_vm0  ;;  %v9637_v62 = vsel %vm18651_vm1, %v9514_v31, 0.0 }
 0x7ce   : > { %v9690_v2 = vsel %vm18619_vm11, %v9630_v53, 0.0  ;;  %vm18620_vm12 = vmmov %vm18520_vm0  ;;  %v9803_v35 = vadd.f32 %v9802_v47, %v9801_v9  ;;  %v9638_v53 = vsel %vm18647_vm6, %v12472_v63, 0.0  ;;  %v9751_v12 = vmul.f32 %v9637_v62, %v9637_v62 }
 0x7cf   : > { %v9804_v3 = vsel %vm18620_vm12, %v9744_v59, 0.0  ;;  %vm18621_vm2 = vmmov %vm18520_vm0  ;;  %v9691_v16 = vadd.f32 %v9690_v2, %v9689_v33  ;;  %v9752_v59 = vmul.f32 %v9638_v53, %v9638_v53  ;;  %v12475_v19 = vpop.f32.mrb[34].mxu1 }
 0x7d0   : > { %9595 = vst.msk [vmem:[#allocation2 + $0xd0] sm:$0xff] %vm18621_vm2, %v9484_v49  ;;  %vm18624_vm8 = vmmov %vm18520_vm0  ;;  %v9805_v40 = vadd.f32 %v9804_v3, %v9803_v35  ;;  %v9818_v47 = vsel %vm18520_vm0, %v9751_v12, 0.0  ;;  %v9524_v49 = vpop.f32.mrb[35].mxu1  ;;  %v16959_v12 = vld [vmem:[#allocation2 + $0x80] sm:$0xff] }
 0x7d1   : > { %v9692_v45 = vsel %vm18624_vm8, %v9631_v0, 0.0  ;;  %vm18625_vm15 = vmmov %vm18520_vm0  ;;  %v9639_v0 = vsel %vm18661_vm9, %v9524_v49, 0.0 }
 0x7d2   : > { %v9693_v23 = vadd.f32 %v9692_v45, %v9691_v16  ;;  %v9806_v39 = vsel %vm18625_vm15, %v9745_v42, 0.0  ;;  %vm18626_vm5 = vmmov %vm18520_vm0  ;;  %v9753_v42 = vmul.f32 %v9639_v0, %v9639_v0 }
 0x7d3   : > { %9598 = vst.msk [vmem:[#allocation2 + $0xe8] sm:$0xff] %vm18626_vm5, %v12466_v57  ;;  %vm18629_vm3 = vmmov %vm18520_vm0  ;;  %v9807_v17 = vadd.f32 %v9806_v39, %v9805_v40 }
 0x7d4   : > { %v9694_v52 = vsel %vm18629_vm3, %v9632_v28, 0.0  ;;  %vm18630_vm13 = vmmov %vm18520_vm0  ;;  %v9640_v28 = vsel %vm18656_vm4, %v12475_v19, 0.0 }
 0x7d5   : > { %9597 = vst.msk [vmem:[#allocation2 + $0xe0] sm:$0xff] %vm18630_vm13, %v9494_v15  ;;  %vm18633_vm7 = vmmov %vm18520_vm0  ;;  %v9695_v6 = vadd.f32 %v9694_v52, %v9693_v23 }
 0x7d6   : > { %v9808_v46 = vsel %vm18633_vm7, %v9746_v1, 0.0  ;;  %vm18634_vm10 = vmmov %vm18520_vm0  ;;  %v9754_v1 = vmul.f32 %v9640_v28, %v9640_v28 }
 0x7d7   : > { %v9696_v48 = vsel %vm18634_vm10, %v9633_v44, 0.0  ;;  %v9809_v30 = vadd.f32 %v9808_v46, %v9807_v17  ;;  %vm18635_vm14 = vmmov %vm18520_vm0 }
 0x7d8   : > { %v9697_v7 = vadd.f32 %v9696_v48, %v9695_v6  ;;  %9600 = vst.msk [vmem:[#allocation2 + $0xf8] sm:$0xff] %vm18635_vm14, %v12469_v43  ;;  %vm18638_vm11 = vmmov %vm18520_vm0 }
 0x7d9   : > { %v9698_v56 = vsel %vm18638_vm11, %v9634_v60, 0.0  ;;  %vm18639_vm12 = vmmov %vm18520_vm0  ;;  %v9811_v54 = vadd.f32 %v9810_v58, %v9809_v30 }
 0x7da   : > { %v9812_v29 = vsel %vm18639_vm12, %v9748_v26, 0.0  ;;  %vm18640_vm2 = vmmov %vm18520_vm0  ;;  %v9699_v24 = vadd.f32 %v9698_v56, %v9697_v7 }
 0x7db   : > { %9599 = vst.msk [vmem:[#allocation2 + $0xf0] sm:$0xff] %vm18640_vm2, %v9504_v4  ;;  %vm18643_vm8 = vmmov %vm18520_vm0  ;;  %v9813_v11 = vadd.f32 %v9812_v29, %v9811_v54 }
 0x7dc   : > { %v9700_v32 = vsel %vm18643_vm8, %v9635_v41, 0.0  ;;  %vm18644_vm15 = vmmov %vm18520_vm0  ;;  %v16919_v41 = vld [vmem:[#allocation2] sm:$0xff] }
 0x7dd   : > { %v9701_v5 = vadd.f32 %v9700_v32, %v9699_v24  ;;  %v9814_v13 = vsel %vm18644_vm15, %v9749_v27, 0.0  ;;  %vm18645_vm5 = vmmov %vm18520_vm0  ;;  %v16923_v24 = vld [vmem:[#allocation2 + $0x10] sm:$0xff]  ;;  %v16925_v32 = vld [vmem:[#allocation2 + $0x28] sm:$0xff] }
 0x7de   : > { %9602 = vst.msk [vmem:[#allocation2 + $0x108] sm:$0xff] %vm18645_vm5, %v12472_v63  ;;  %vm18648_vm3 = vmmov %vm18520_vm0  ;;  %v9815_v36 = vadd.f32 %v9814_v13, %v9813_v11  ;;  %v16927_v27 = vld [vmem:[#allocation2 + $0x20] sm:$0xff]  ;;  %v16929_v11 = vld [vmem:[#allocation2 + $0x38] sm:$0xff] }
 0x7df   : > { %v9702_v18 = vsel %vm18648_vm3, %v9636_v50, 0.0  ;;  %vm18649_vm13 = vmmov %vm18520_vm0  ;;  %v16931_v63 = vld [vmem:[#allocation2 + $0x30] sm:$0xff]  ;;  %v16935_v13 = vld [vmem:[#allocation2 + $0x40] sm:$0xff] }
 0x7e0   : > { %9601 = vst.msk [vmem:[#allocation2 + $0x100] sm:$0xff] %vm18649_vm13, %v9514_v31  ;;  %vm18652_vm7 = vmmov %vm18520_vm0  ;;  %v9703_v10 = vadd.f32 %v9702_v18, %v9701_v5  ;;  %v16933_v5 = vld [vmem:[#allocation2 + $0x48] sm:$0xff]  ;;  %v16943_v18 = vld [vmem:[#allocation2 + $0x60] sm:$0xff] }
 0x7e1   : > { %v9816_v25 = vsel %vm18652_vm7, %v9750_v14, 0.0  ;;  %vm18653_vm10 = vmmov %vm18520_vm0  ;;  %v16921_v14 = vld [vmem:[#allocation2 + $0x18] sm:$0xff]  ;;  %v16941_v31 = vld [vmem:[#allocation2 + $0x68] sm:$0xff] }
 0x7e2   : > { %v9704_v51 = vsel %vm18653_vm10, %v9637_v62, 0.0  ;;  %v9817_v9 = vadd.f32 %v9816_v25, %v9815_v36  ;;  %vm18654_vm14 = vmmov %vm18520_vm0  ;;  %v16945_v36 = vld [vmem:[#allocation2 + $0x78] sm:$0xff] }
 0x7e3   : > { %v9705_v33 = vadd.f32 %v9704_v51, %v9703_v10  ;;  %9604 = vst.msk [vmem:[#allocation2 + $0x118] sm:$0xff] %vm18654_vm14, %v12475_v19  ;;  %vm18657_vm11 = vmmov %vm18520_vm0  ;;  %v16955_v10 = vld [vmem:[#allocation2 + $0x70] sm:$0xff]  ;;  %v16957_v51 = vld [vmem:[#allocation2 + $0x88] sm:$0xff] }
 0x7e4   : > { %v9706_v2 = vsel %vm18657_vm11, %v9638_v53, 0.0  ;;  %vm18658_vm12 = vmmov %vm18520_vm0  ;;  %v9819_v35 = vadd.f32 %v9818_v47, %v9817_v9  ;;  %v16939_v53 = vld [vmem:[#allocation2 + $0x50] sm:$0xff] }
 0x7e5   : > { %v9820_v3 = vsel %vm18658_vm12, %v9752_v59, 0.0  ;;  %vm18659_vm2 = vmmov %vm18520_vm0  ;;  %v9707_v16 = vadd.f32 %v9706_v2, %v9705_v33 }
 0x7e6   : > { %9603 = vst.msk [vmem:[#allocation2 + $0x110] sm:$0xff] %vm18659_vm2, %v9524_v49  ;;  %vm18662_vm8 = vmmov %vm18520_vm0  ;;  %v9821_v40 = vadd.f32 %v9820_v3, %v9819_v35  ;;  %v16973_v49 = vld [vmem:[#allocation2 + $0xa8] sm:$0xff] }
 0x7e7   : > { %v9708_v45 = vsel %vm18662_vm8, %v9639_v0, 0.0  ;;  %vm18663_vm15 = vmmov %vm18520_vm0  ;;  %v16983_v0 = vld [vmem:[#allocation2 + $0xa0] sm:$0xff] }
 0x7e8   : > { %v9709_v57 = vadd.f32 %v9708_v45, %v9707_v16  ;;  %v9822_v23 = vsel %vm18663_vm15, %v9753_v42, 0.0  ;;  %vm18664_vm5 = vmmov %vm18520_vm0  ;;  %v16987_v16 = vld [vmem:[#allocation2 + $0xb0] sm:$0xff] }
 0x7e9   : > { %v9710_v39 = vsel %vm18664_vm5, %v9640_v28, 0.0  ;;  %v9823_v20 = vadd.f32 %v9822_v23, %v9821_v40  ;;  %vm18665_vm6 = vmmov %vm18520_vm0  ;;  %v16971_v28 = vld [vmem:[#allocation2 + $0x90] sm:$0xff]  ;;  %v16997_v23 = vld [vmem:[#allocation2 + $0xc8] sm:$0xff] }
 0x7ea   : > { %v9824_v60 = vsel %vm18665_vm6, %v9754_v1, 0.0  ;;  %v9711_v15 = vadd.f32 %v9710_v39, %v9709_v57  ;;  %v16985_v1 = vld [vmem:[#allocation2 + $0xb8] sm:$0xff]  ;;  %v16999_v39 = vld [vmem:[#allocation2 + $0xc0] sm:$0xff]  ;;  %vm18672_vm3 = vmmov %vm18520_vm0 }
 0x7eb   : > { %v9825_v52 = vadd.f32 %v9824_v60, %v9823_v20  ;;  %v17001_v20 = vld [vmem:[#allocation2 + $0xd8] sm:$0xff]  ;;  %vm18673_vm13 = vmmov %vm18520_vm0 }
 0x7ec   : > { %v9712_v17 = vrot.slane %v9711_v15, 4  ;;  %vm18674_vm1 = vmmov %vm18520_vm0 }
 0x7ed   : > { %v9826_v26 = vrot.slane %v9825_v52, 4  ;;  %vm18675_vm7 = vmmov %vm18520_vm0 }
 0x7ee   : > { %v9713_v38 = vadd.f32 %v9712_v17, %v9711_v15  ;;  %vm18676_vm10 = vmmov %vm18520_vm0 }
 0x7ef   : > { %v9827_v44 = vadd.f32 %v9826_v26, %v9825_v52  ;;  %v9866_v26 = vld [vmem:[#allocation2 + $0xd0] sm:$0xff]  ;;  %vm18677_vm14 = vmmov %vm18520_vm0 }
 0x7f0   : > { %v9714_v46 = vrot.slane %v9713_v38, 2  ;;  %vm18678_vm4 = vmmov %vm18520_vm0 }
 0x7f1   : > { %v9828_v6 = vrot.slane %v9827_v44, 2  ;;  %vm18679_vm11 = vmmov %vm18520_vm0 }
 0x7f2   : > { %v9715_v48 = vadd.f32 %v9714_v46, %v9713_v38  ;;  %v17011_v38 = vld [vmem:[#allocation2 + $0xe8] sm:$0xff]  ;;  %vm18680_vm12 = vmmov %vm18520_vm0 }
 0x7f3   : > { %v9829_v61 = vadd.f32 %v9828_v6, %v9827_v44  ;;  %v17013_v44 = vld [vmem:[#allocation2 + $0xe0] sm:$0xff]  ;;  %vm18681_vm2 = vmmov %vm18520_vm0 }
 0x7f4   : > { %v9716_v30 = vrot.slane %v9715_v48, 1  ;;  %vm18682_vm9 = vmmov %vm18520_vm0 }
 0x7f5   : > { %v9830_v43 = vrot.slane %v9829_v61, 1  ;;  %vm18683_vm8 = vmmov %vm18520_vm0 }
 0x7f6   : > { %v9717_v7 = vadd.f32 %v9716_v30, %v9715_v48  ;;  %v17023_v30 = vld [vmem:[#allocation2 + $0xf8] sm:$0xff]  ;;  %vm18684_vm15 = vmmov %vm18520_vm0 }
 0x7f7   : > { %v9831_v58 = vadd.f32 %v9830_v43, %v9829_v61  ;;  %v9870_v43 = vld [vmem:[#allocation2 + $0xf0] sm:$0xff]  ;;  %vm18685_vm5 = vmmov %vm18520_vm0 }
 0x7f8   : > { %v16913_v37 = vmul.f32 0.00390625, %v9717_v7  ;;  %v17025_v7 = vld [vmem:[#allocation2 + $0x108] sm:$0xff]  ;;  %vm18686_vm6 = vmmov %vm18520_vm0 }
 0x7f9   : > { %v9834_v50 = vmul.f32 0.00390625, %v9831_v58 }
 0x7fa   : > { %v9835_v4 = vmul.f32 %v16913_v37, %v16913_v37  ;;  %v9876_v59 = vsub.f32 %v16919_v41, %v16913_v37  ;;  %v9877_v55 = vsub.f32 %v16917_v8, %v16913_v37  ;;  %v9878_v62 = vsub.f32 %v16923_v24, %v16913_v37  ;;  %v9874_v8 = vld [vmem:[#allocation2 + $0x110] sm:$0xff] }
 0x7fb   : > { %v9879_v25 = vsub.f32 %v16921_v14, %v16913_v37  ;;  %v9880_v9 = vsub.f32 %v16927_v27, %v16913_v37  ;;  %v9881_v19 = vsub.f32 %v16925_v32, %v16913_v37  ;;  %v9882_v33 = vsub.f32 %v16931_v63, %v16913_v37 }
 0x7fc   : > { %v9836_v56 = vsub.f32 %v9834_v50, %v9835_v4  ;;  %v9883_v47 = vsub.f32 %v16929_v11, %v16913_v37  ;;  %v9884_v2 = vsub.f32 %v16935_v13, %v16913_v37  ;;  %v9885_v3 = vsub.f32 %v16933_v5, %v16913_v37 }
 0x7fd   : > { %v9886_v35 = vsub.f32 %v16939_v53, %v16913_v37  ;;  %v9887_v34 = vsub.f32 %v16937_v22, %v16913_v37  ;;  %v9888_v45 = vsub.f32 %v16943_v18, %v16913_v37  ;;  %v9889_v42 = vsub.f32 %v16941_v31, %v16913_v37 }
 0x7fe   : > { %v9837_v29 = vmax.f32 %v9836_v56, 0.0  ;;  %v9890_v40 = vsub.f32 %v16955_v10, %v16913_v37  ;;  %v9891_v57 = vsub.f32 %v16945_v36, %v16913_v37  ;;  %v9892_v60 = vsub.f32 %v16959_v12, %v16913_v37 }
 0x7ff   : > { %v9893_v15 = vsub.f32 %v16957_v51, %v16913_v37  ;;  %v9894_v52 = vsub.f32 %v16971_v28, %v16913_v37  ;;  %v9895_v17 = vsub.f32 %v16969_v21, %v16913_v37  ;;  %v9896_v46 = vsub.f32 %v16983_v0, %v16913_v37 }
 0x800   : > { %v9838_v54 = vadd.f32 1e-05, %v9837_v29  ;;  %v9897_v6 = vsub.f32 %v16973_v49, %v16913_v37  ;;  %v9898_v48 = vsub.f32 %v16987_v16, %v16913_v37  ;;  %v9899_v61 = vsub.f32 %v16985_v1, %v16913_v37  ;;  %v9872_v29 = vld [vmem:[#allocation2 + $0x100] sm:$0xff] }
 0x801   : > { %v9900_v58 = vsub.f32 %v16999_v39, %v16913_v37  ;;  %v9901_v50 = vsub.f32 %v16997_v23, %v16913_v37  ;;  %v9902_v4 = vsub.f32 %v9866_v26, %v16913_v37  ;;  %v9903_v56 = vsub.f32 %v17001_v20, %v16913_v37  ;;  %v9955_v23 = vld [vmem:[%s13192_s21 + $0x4b] sm:$0xff]  ;;  %v9958_v26 = vld [vmem:[%s13192_s21 + $0x63] sm:$0xff] }
 0x802   : > { %13137 = vrsqrt.f32 %v9838_v54  ;;  %v17034_v54 = vld [vmem:[#allocation2 + $0x118] sm:$0xff]  ;;  %v9904_v41 = vsub.f32 %v17013_v44, %v16913_v37  ;;  %v9905_v14 = vsub.f32 %v17011_v38, %v16913_v37  ;;  %v9906_v24 = vsub.f32 %v9870_v43, %v16913_v37  ;;  %v9959_v38 = vld [vmem:[%s13192_s21 + $0x6b] sm:$0xff]  ;;  %v9962_v43 = vld [vmem:[%s13192_s21 + $0x83] sm:$0xff] }
 0x803   : > { %v9907_v32 = vsub.f32 %v17023_v30, %v16913_v37  ;;  %v9908_v11 = vsub.f32 %v9872_v29, %v16913_v37  ;;  %v9909_v63 = vsub.f32 %v17025_v7, %v16913_v37  ;;  %v9910_v5 = vsub.f32 %v9874_v8, %v16913_v37  ;;  %v9961_v30 = vld [vmem:[%s13192_s21 + $0x7b] sm:$0xff]  ;;  %v9964_v29 = vld [vmem:[%s13192_s21 + $0x93] sm:$0xff]  ;;  %v9966_v8 = vld [vmem:[%s13192_s21 + $0xa3] sm:$0xff] }
 0x804   : > { %v9911_v13 = vsub.f32 %v17034_v54, %v16913_v37  ;;  %v9965_v54 = vld [vmem:[%s13192_s21 + $0x9b] sm:$0xff] }
 0x80c   : > { %v13138_v27 = vpop.eup %13137 }
 0x80d   : > { %v9912_v22 = vmul.f32 %v13138_v27, %v9876_v59  ;;  %v9913_v53 = vmul.f32 %v13138_v27, %v9877_v55  ;;  %v9914_v31 = vmul.f32 %v13138_v27, %v9878_v62  ;;  %v9915_v18 = vmul.f32 %v13138_v27, %v9879_v25 }
 0x80e   : > { %v9916_v36 = vmul.f32 %v13138_v27, %v9880_v9  ;;  %v9917_v10 = vmul.f32 %v13138_v27, %v9881_v19  ;;  %v9918_v51 = vmul.f32 %v13138_v27, %v9882_v33  ;;  %v9919_v12 = vmul.f32 %v13138_v27, %v9883_v47 }
 0x80f   : > { %v17049_v21 = vmul.f32 %v13138_v27, %v9884_v2  ;;  %v17051_v28 = vmul.f32 %v13138_v27, %v9885_v3  ;;  %v17053_v49 = vmul.f32 %v13138_v27, %v9886_v35  ;;  %v17055_v37 = vmul.f32 %v13138_v27, %v9887_v34  ;;  %v9948_v2 = vld [vmem:[%s13192_s21 + $0x13] sm:$0xff]  ;;  %v9949_v3 = vld [vmem:[%s13192_s21 + $0x1b] sm:$0xff]  ;;  %v9950_v35 = vld [vmem:[%s13192_s21 + $0x23] sm:$0xff] }
 0x810   : > { %v17057_v59 = vmul.f32 %v13138_v27, %v9888_v45  ;;  %v17059_v55 = vmul.f32 %v13138_v27, %v9889_v42  ;;  %v17061_v62 = vmul.f32 %v13138_v27, %v9890_v40  ;;  %v17063_v25 = vmul.f32 %v13138_v27, %v9891_v57  ;;  %v9951_v34 = vld [vmem:[%s13192_s21 + $0x2b] sm:$0xff]  ;;  %v9952_v42 = vld [vmem:[%s13192_s21 + $0x33] sm:$0xff]  ;;  %v9953_v40 = vld [vmem:[%s13192_s21 + $0x3b] sm:$0xff] }
 0x811   : > { %v17066_v9 = vmul.f32 %v13138_v27, %v9892_v60  ;;  %v17068_v19 = vmul.f32 %v13138_v27, %v9893_v15  ;;  %v17070_v33 = vmul.f32 %v13138_v27, %v9894_v52  ;;  %v17072_v47 = vmul.f32 %v13138_v27, %v9895_v17  ;;  %v9954_v57 = vld [vmem:[%s13192_s21 + $0x43] sm:$0xff]  ;;  %v9956_v52 = vld [vmem:[%s13192_s21 + $0x53] sm:$0xff]  ;;  %v9957_v17 = vld [vmem:[%s13192_s21 + $0x5b] sm:$0xff] }
 0x812   : > { %v17078_v0 = vmul.f32 %v13138_v27, %v9896_v46  ;;  %v17080_v1 = vmul.f32 %v13138_v27, %v9897_v6  ;;  %v17082_v16 = vmul.f32 %v13138_v27, %v9898_v48  ;;  %v17084_v45 = vmul.f32 %v13138_v27, %v9899_v61  ;;  %v9960_v61 = vld [vmem:[%s13192_s21 + $0x73] sm:$0xff] }
 0x813   : > { %v17090_v39 = vmul.f32 %v13138_v27, %v9900_v58  ;;  %v17092_v20 = vmul.f32 %v13138_v27, %v9901_v50  ;;  %v17094_v60 = vmul.f32 %v13138_v27, %v9902_v4  ;;  %v17096_v15 = vmul.f32 %v13138_v27, %v9903_v56  ;;  %v9963_v56 = vld [vmem:[%s13192_s21 + $0x8b] sm:$0xff] }
 0x814   : > { %v17102_v44 = vmul.f32 %v13138_v27, %v9904_v41  ;;  %v17104_v46 = vmul.f32 %v13138_v27, %v9905_v14  ;;  %v17106_v6 = vmul.f32 %v13138_v27, %v9906_v24  ;;  %v17108_v48 = vmul.f32 %v13138_v27, %v9907_v32  ;;  %v9967_v41 = vld [vmem:[%s13192_s21 + $0xab] sm:$0xff]  ;;  %v9968_v14 = vld [vmem:[%s13192_s21 + $0xb3] sm:$0xff] }
 0x815   : > { %v17120_v7 = vmul.f32 %v13138_v27, %v9908_v11  ;;  %v17122_v58 = vmul.f32 %v13138_v27, %v9909_v63  ;;  %v17124_v50 = vmul.f32 %v13138_v27, %v9910_v5  ;;  %v17126_v4 = vmul.f32 %v13138_v27, %v9911_v13  ;;  %v9969_v63 = vld [vmem:[%s13192_s21 + $0xbb] sm:$0xff]  ;;  %v9970_v5 = vld [vmem:[%s13192_s21 + $0xc3] sm:$0xff]  ;;  %v9971_v27 = vld [vmem:[%s13192_s21 + $0xcb] sm:$0xff] }
 0x816   : > { %18666 = vst [vmem:[#allocation30_spill] sm:$0xff] %v17106_v6  ;;  %18667 = vst [vmem:[#allocation37_spill] sm:$0xff] %v17108_v48  ;;  %v9984_v24 = vadd.f32 %v9948_v2, %v9912_v22  ;;  %v9985_v32 = vadd.f32 %v9949_v3, %v9913_v53  ;;  %v9986_v11 = vadd.f32 %v9950_v35, %v9914_v31  ;;  %v9972_v48 = vld [vmem:[%s13192_s21 + $0xd3] sm:$0xff]  ;;  %v9973_v6 = vld [vmem:[%s13192_s21 + $0xdb] sm:$0xff] }
 0x817   : > { %18668 = vst [vmem:[#allocation40_spill] sm:$0xff] %v17120_v7  ;;  %18669 = vst [vmem:[#allocation47_spill] sm:$0xff] %v17122_v58  ;;  %v9987_v7 = vadd.f32 %v9951_v34, %v9915_v18  ;;  %v9988_v13 = vadd.f32 %v9952_v42, %v9916_v36  ;;  %v9991_v58 = vadd.f32 %v9955_v23, %v9919_v12  ;;  %v9974_v22 = vld [vmem:[%s13192_s21 + $0xe3] sm:$0xff]  ;;  %v9977_v12 = vld [vmem:[%s13192_s21 + $0xfb] sm:$0xff] }
 0x818   : > { %18670 = vst [vmem:[#allocation56_spill] sm:$0xff] %v17124_v50  ;;  %18671 = vst [vmem:[#allocation65_spill] sm:$0xff] %v17126_v4  ;;  %v9989_v4 = vadd.f32 %v9953_v40, %v9917_v10  ;;  %v9990_v50 = vadd.f32 %v9954_v57, %v9918_v51  ;;  %v9992_v53 = vadd.f32 %v9956_v52, %v17049_v21  ;;  %v9975_v10 = vld [vmem:[%s13192_s21 + $0xeb] sm:$0xff]  ;;  %v9976_v51 = vld [vmem:[%s13192_s21 + $0xf3] sm:$0xff] }
 0x819   : > { %v9993_v31 = vadd.f32 %v9957_v17, %v17051_v28  ;;  %v9994_v18 = vadd.f32 %v9958_v26, %v17053_v49  ;;  %v9995_v36 = vadd.f32 %v9959_v38, %v17055_v37  ;;  %10020 = vst.msk [vmem:[%s17118_s8] sm:$0xff] %vm18672_vm3, %v9984_v24  ;;  %v9996_v21 = vadd.f32 %v9960_v61, %v17057_v59  ;;  %v9978_v59 = vld [vmem:[%s13192_s21 + $0x103] sm:$0xff]  ;;  %v9979_v2 = vld [vmem:[%s13192_s21 + $0x10b] sm:$0xff]  ;;  %v9981_v34 = vld [vmem:[%s13192_s21 + $0x11b] sm:$0xff] }
 0x81a   : > { %10021 = vst.msk [vmem:[%s17118_s8 + $0x8] sm:$0xff] %vm18673_vm13, %v9985_v32  ;;  %v9997_v28 = vadd.f32 %v9961_v30, %v17059_v55  ;;  %v9998_v49 = vadd.f32 %v9962_v43, %v17061_v62  ;;  %v9999_v37 = vadd.f32 %v9963_v56, %v17063_v25  ;;  %v9980_v55 = vld [vmem:[%s13192_s21 + $0x113] sm:$0xff]  ;;  %v10000_v62 = vadd.f32 %v9964_v29, %v17066_v9  ;;  %v9982_v9 = vld [vmem:[%s13192_s21 + $0x123] sm:$0xff]  ;;  %vm18687_vm3 = vmmov %vm18520_vm0 }
 0x81b   : > { %10022 = vst.msk [vmem:[%s17118_s8 + $0x10] sm:$0xff] %vm18674_vm1, %v9986_v11  ;;  %v10001_v25 = vadd.f32 %v9965_v54, %v17068_v19  ;;  %v10002_v3 = vadd.f32 %v9966_v8, %v17070_v33  ;;  %v10003_v35 = vadd.f32 %v9967_v41, %v17072_v47  ;;  %v9983_v19 = vld [vmem:[%s13192_s21 + $0x12b] sm:$0xff]  ;;  %v10004_v33 = vadd.f32 %v9968_v14, %v17078_v0  ;;  %vm18688_vm13 = vmmov %vm18520_vm0 }
 0x81c   : > { %10023 = vst.msk [vmem:[%s17118_s8 + $0x18] sm:$0xff] %vm18675_vm7, %v9987_v7  ;;  %v10005_v42 = vadd.f32 %v9969_v63, %v17080_v1  ;;  %v10006_v47 = vadd.f32 %v9970_v5, %v17082_v16  ;;  %v10007_v40 = vadd.f32 %v9971_v27, %v17084_v45  ;;  %v10008_v0 = vadd.f32 %v9972_v48, %v17090_v39  ;;  %vm18689_vm1 = vmmov %vm18520_vm0 }
 0x81d   : > { %10024 = vst.msk [vmem:[%s17118_s8 + $0x20] sm:$0xff] %vm18676_vm10, %v9988_v13  ;;  %v10009_v1 = vadd.f32 %v9973_v6, %v17092_v20  ;;  %v10010_v16 = vadd.f32 %v9974_v22, %v17094_v60  ;;  %v10011_v45 = vadd.f32 %v9975_v10, %v17096_v15  ;;  %vm18690_vm7 = vmmov %vm18520_vm0  ;;  %v10012_v57 = vadd.f32 %v9976_v51, %v17102_v44  ;;  %v18691_v39 = vld [vmem:[#allocation30_spill] sm:$0xff]  ;;  %v18692_v60 = vld [vmem:[#allocation37_spill] sm:$0xff] }
 0x81e   : > { %10025 = vst.msk [vmem:[%s17118_s8 + $0x28] sm:$0xff] %vm18520_vm0, %v9989_v4  ;;  %v10013_v23 = vadd.f32 %v9977_v12, %v17104_v46  ;;  %v10014_v20 = vadd.f32 %v9978_v59, %v18691_v39  ;;  %v10015_v15 = vadd.f32 %v9979_v2, %v18692_v60  ;;  %vm18693_vm10 = vmmov %vm18520_vm0  ;;  %v18696_v52 = vld [vmem:[#allocation40_spill] sm:$0xff]  ;;  %v18697_v26 = vld [vmem:[#allocation47_spill] sm:$0xff] }
 0x81f   : > { %10026 = vst.msk [vmem:[%s17118_s8 + $0x30] sm:$0xff] %vm18677_vm14, %v9990_v50  ;;  %vm18694_vm14 = vmmov %vm18520_vm0  ;;  %v10016_v17 = vadd.f32 %v9980_v55, %v18696_v52  ;;  %v10017_v38 = vadd.f32 %v9981_v34, %v18697_v26  ;;  %v18698_v44 = vld [vmem:[#allocation56_spill] sm:$0xff]  ;;  %v18699_v6 = vld [vmem:[#allocation65_spill] sm:$0xff] }
 0x820   : > { %10027 = vst.msk [vmem:[%s17118_s8 + $0x38] sm:$0xff] %vm18678_vm4, %v9991_v58  ;;  %vm18695_vm4 = vmmov %vm18520_vm0  ;;  %v10018_v46 = vadd.f32 %v9982_v9, %v18698_v44  ;;  %v10019_v48 = vadd.f32 %v9983_v19, %v18699_v6 }
 0x821   : > { %10028 = vst.msk [vmem:[%s17118_s8 + $0x40] sm:$0xff] %vm18679_vm11, %v9992_v53  ;;  %vm18700_vm11 = vmmov %vm18520_vm0 }
 0x822   : > { %10029 = vst.msk [vmem:[%s17118_s8 + $0x48] sm:$0xff] %vm18680_vm12, %v9993_v31  ;;  %vm18701_vm12 = vmmov %vm18520_vm0 }
 0x823   : > { %10030 = vst.msk [vmem:[%s17118_s8 + $0x50] sm:$0xff] %vm18681_vm2, %v9994_v18  ;;  %vm18702_vm2 = vmmov %vm18520_vm0 }
 0x824   : > { %10031 = vst.msk [vmem:[%s17118_s8 + $0x58] sm:$0xff] %vm18682_vm9, %v9995_v36  ;;  %vm18703_vm9 = vmmov %vm18520_vm0 }
 0x825   : > { %10032 = vst.msk [vmem:[%s17118_s8 + $0x60] sm:$0xff] %vm18683_vm8, %v9996_v21  ;;  %vm18704_vm8 = vmmov %vm18520_vm0 }
 0x826   : > { %10033 = vst.msk [vmem:[%s17118_s8 + $0x68] sm:$0xff] %vm18684_vm15, %v9997_v28  ;;  %vm18705_vm15 = vmmov %vm18520_vm0 }
 0x827   : > { %10034 = vst.msk [vmem:[%s17118_s8 + $0x70] sm:$0xff] %vm18685_vm5, %v9998_v49  ;;  %vm18706_vm5 = vmmov %vm18520_vm0 }
 0x828   : > { %10035 = vst.msk [vmem:[%s17118_s8 + $0x78] sm:$0xff] %vm18686_vm6, %v9999_v37  ;;  %vm18707_vm6 = vmmov %vm18520_vm0 }
 0x829   : > { %10036 = vst.msk [vmem:[%s17118_s8 + $0x80] sm:$0xff] %vm18687_vm3, %v10000_v62  ;;  %vm18708_vm3 = vmmov %vm18520_vm0 }
 0x82a   : > { %10037 = vst.msk [vmem:[%s17118_s8 + $0x88] sm:$0xff] %vm18688_vm13, %v10001_v25  ;;  %vm18709_vm13 = vmmov %vm18520_vm0 }
 0x82b   : > { %10038 = vst.msk [vmem:[%s17118_s8 + $0x90] sm:$0xff] %vm18689_vm1, %v10002_v3  ;;  %vm18710_vm1 = vmmov %vm18520_vm0 }
 0x82c   : > { %10039 = vst.msk [vmem:[%s17118_s8 + $0x98] sm:$0xff] %vm18690_vm7, %v10003_v35  ;;  %vm18711_vm7 = vmmov %vm18520_vm0 }
 0x82d   : > { %10040 = vst.msk [vmem:[%s17118_s8 + $0xa0] sm:$0xff] %vm18693_vm10, %v10004_v33 }
 0x82e   : > { %10041 = vst.msk [vmem:[%s17118_s8 + $0xa8] sm:$0xff] %vm18520_vm0, %v10005_v42 }
 0x82f   : > { %10042 = vst.msk [vmem:[%s17118_s8 + $0xb0] sm:$0xff] %vm18694_vm14, %v10006_v47 }
 0x830   : > { %10043 = vst.msk [vmem:[%s17118_s8 + $0xb8] sm:$0xff] %vm18695_vm4, %v10007_v40 }
 0x831   : > { %10044 = vst.msk [vmem:[%s17118_s8 + $0xc0] sm:$0xff] %vm18700_vm11, %v10008_v0 }
 0x832   : > { %10045 = vst.msk [vmem:[%s17118_s8 + $0xc8] sm:$0xff] %vm18701_vm12, %v10009_v1 }
 0x833   : > { %10046 = vst.msk [vmem:[%s17118_s8 + $0xd0] sm:$0xff] %vm18702_vm2, %v10010_v16 }
 0x834   : > { %10047 = vst.msk [vmem:[%s17118_s8 + $0xd8] sm:$0xff] %vm18703_vm9, %v10011_v45 }
 0x835   : > { %10048 = vst.msk [vmem:[%s17118_s8 + $0xe0] sm:$0xff] %vm18704_vm8, %v10012_v57 }
 0x836   : > { %10049 = vst.msk [vmem:[%s17118_s8 + $0xe8] sm:$0xff] %vm18705_vm15, %v10013_v23 }
 0x837   : > { %10050 = vst.msk [vmem:[%s17118_s8 + $0xf0] sm:$0xff] %vm18706_vm5, %v10014_v20 }
 0x838   : > { %10051 = vst.msk [vmem:[%s17118_s8 + $0xf8] sm:$0xff] %vm18707_vm6, %v10015_v15 }
 0x839   : > { %10052 = vst.msk [vmem:[%s17118_s8 + $0x100] sm:$0xff] %vm18708_vm3, %v10016_v17 }
 0x83a   : > { %10053 = vst.msk [vmem:[%s17118_s8 + $0x108] sm:$0xff] %vm18709_vm13, %v10017_v38 }
 0x83b   : > { %10054 = vst.msk [vmem:[%s17118_s8 + $0x110] sm:$0xff] %vm18710_vm1, %v10018_v46 }
 0x83c   : > { %10055 = vst.msk [vmem:[%s17118_s8 + $0x118] sm:$0xff] %vm18711_vm7, %v10019_v48 }
 0x83d PF: > { %s13_s12 = sadd.s32 1, %s13146_s12  }
 0x83e   : > { %p10_p4 = scmp.ge.s32.totalorder %s13_s12, 4  }
 0x840   :  { %12 = sbr.rel (!%p10_p4) target bundleno = 1 (0x1), region = 78 }

</bundles_post_ra>
